<compile_context>
chip_gen: v6e
topology: v6e:2x2x1
jax: 0.10.0
libtpu: 0.0.40
codegen_flags: <defaults>
</compile_context>

<pallas_src>
import functools

import jax
import jax.numpy as jnp
from jax.experimental import pallas as pl
from jax.experimental.pallas import tpu as pltpu

MFCC_LENGTH = 20   # opt.mfcc_length
MFCC_WIDTH = 13    # opt.mfcc_width
BN_EPS = 1e-5
LRELU_SLOPE = 0.2
MAX_GROUP = 256    # samples per grid step (matmul M); 256 targets v6e/v7x


def _choose_group(n):
    """Samples per grid step: multiple of 16 (bf16 sublane tile), >= 16,
    <= MAX_GROUP, and (when the batch allows it) small enough that the grid has
    >= 2 steps so the 'parallel' axis can shard across v7x's two TensorCores."""
    if n <= 16:
        return 16
    if n >= 2 * MAX_GROUP:
        return MAX_GROUP
    g = -(-n // 2)                      # ceil(n / 2): keep >= 2 grid steps
    g = ((g + 15) // 16) * 16
    return min(g, MAX_GROUP)


# ----------------------------------------------------------------------------
# Fused Pallas kernel: model1 + model2 + concat + fc, all VMEM-resident
# ----------------------------------------------------------------------------
def _mfcc_fused_kernel(group,
                       p1_ref, p2_ref,
                       w11_ref, s11_ref, w12_ref, s12_ref, w13_ref, s13_ref, w14_ref,
                       w21_ref, s21_ref, w22_ref, s22_ref, w23_ref,
                       wfc_ref, bfc_ref,
                       o_ref,
                       a1_ref, b1_ref):
    bf16 = jnp.bfloat16
    f32 = jnp.float32

    def lrelu(y):
        return jnp.where(y >= 0.0, y, LRELU_SLOPE * y)

    def cat(blocks, axis):
        return blocks[0] if len(blocks) == 1 else jnp.concatenate(blocks, axis=axis)

    def rows(y, idx):
        # (group, C) row block `idx` of a value whose rows are ordered (h, w, n).
        return y[idx * group:(idx + 1) * group, :]

    # ---- zero ONLY the padding border of the two padded scratch buffers ----
    # (done every iteration so it stays correct when the parallel grid axis is
    #  sharded across TensorCores; interior is fully overwritten below)
    zrow = jnp.zeros((9, group, 64), bf16)
    zblk = jnp.zeros((group, 64), bf16)
    a1_ref[0, :, :, :] = zrow            # top zero-pad row
    a1_ref[8, :, :, :] = zrow            # bottom zero-pad row
    for h in range(1, 8):
        a1_ref[h, 0, :, :] = zblk        # left zero-pad column
    b1_ref[0, 0, :, :] = zblk            # top zero-pad row of the alter branch

    # ---------------- model1: mfcc_encoder ----------------
    # conv1 (1->64, k3x3, s(3,2), p(1,2)) from precomputed im2col patches,
    # + BN (scale folded into weights) + LeakyReLU   -> spatial (7, 8)
    y1 = jnp.dot(p1_ref[0, :, :], w11_ref[...], preferred_element_type=f32)
    y1 = lrelu(y1 + s11_ref[...]).astype(bf16)                   # (7*8*group, 64)
    for h in range(7):                                           # one store per row
        a1_ref[1 + h, 1:9, :, :] = (
            y1[h * 8 * group:(h + 1) * 8 * group, :].reshape(8, group, 64))

    # conv2 (64->128, k3x3, s2, p1) + BN + LReLU: one im2col matmul, K = 576
    xb = []
    for ho in range(4):
        for wo in range(4):
            taps = [a1_ref[i + 2 * ho, j + 2 * wo, :, :]
                    for i in range(3) for j in range(3)]
            xb.append(cat(taps, axis=1))                         # (group, 576)
    x2 = cat(xb, axis=0)                                         # (16*group, 576)
    y2 = lrelu(jnp.dot(x2, w12_ref[...], preferred_element_type=f32)
               + s12_ref[...]).astype(bf16)                      # rows (ho, wo, n)

    # conv3 (128->256, k3x3, s1, p0) + BN + LReLU: no padding, gather straight
    # from the y2 value (group-aligned row blocks), K = 1152
    xb = []
    for ho in range(2):
        for wo in range(2):
            taps = [rows(y2, (i + ho) * 4 + (j + wo))
                    for i in range(3) for j in range(3)]
            xb.append(cat(taps, axis=1))                         # (group, 1152)
    x3 = cat(xb, axis=0)                                         # (4*group, 1152)
    y3 = lrelu(jnp.dot(x3, w13_ref[...], preferred_element_type=f32)
               + s13_ref[...]).astype(bf16)                      # rows (ho, wo, n)

    # conv4 (256->512, k2x2, s1, p0): single output position, K = 1024
    # (bn5 / tanh exist in __init__ but are not applied in forward)
    x4 = cat([rows(y3, i * 2 + j) for i in range(2) for j in range(2)], axis=1)
    net1 = jnp.dot(x4, w14_ref[...], preferred_element_type=f32)   # (group, 512)

    # ---------------- model2: mfcc_encoder_alter ----------------
    # conv1 (1->64, k(3,12)) evaluated only at positions kept by MaxPool2d(1, 3),
    # + channel-wise eval-mode "BatchNorm1d" + LReLU
    yb = jnp.dot(p2_ref[0, :, :], w21_ref[...], preferred_element_type=f32)
    yb = lrelu(yb + s21_ref[...]).astype(bf16)                   # (6*group, 64)
    b1_ref[1:7, 0, :, :] = yb.reshape(6, group, 64)

    # conv2 (64->256, k(3,1), p(1,0)) evaluated only at rows kept by MaxPool2d(1,2),
    # + BN + LReLU: one im2col matmul, K = 192
    xb = []
    for ho in range(3):
        xb.append(cat([b1_ref[i + 2 * ho, 0, :, :] for i in range(3)], axis=1))
    xm = cat(xb, axis=0)                                         # (3*group, 192)
    ym = lrelu(jnp.dot(xm, w22_ref[...], preferred_element_type=f32)
               + s22_ref[...]).astype(bf16)                      # (3*group, 256)

    # conv3 (256->512, k(3,1)): single output position, K = 768
    xm3 = cat([rows(ym, h) for h in range(3)], axis=1)           # (group, 768)
    net2 = jnp.dot(xm3, w23_ref[...], preferred_element_type=f32)  # (group, 512)

    # ------- torch.cat((net1, net2), 1) + Linear(1024, 256), split by half -------
    out = (jnp.dot(net1.astype(bf16), wfc_ref[0, :, :], preferred_element_type=f32)
           + jnp.dot(net2.astype(bf16), wfc_ref[1, :, :], preferred_element_type=f32)
           + bfc_ref[...])
    o_ref[0, :, :] = out


# ----------------------------------------------------------------------------
# XLA glue: first-layer patch extraction from the raw input (tiny, pre-kernel)
# ----------------------------------------------------------------------------
def _m1_conv1_patches(xg):
    """xg: (G, group, 20, 13) -> bf16 (G, 7*8*group, 9); rows ordered (h, w, n)."""
    G, group = xg.shape[0], xg.shape[1]
    xp = jnp.pad(xg, ((0, 0), (0, 0), (1, 1), (2, 2)))
    taps = []
    for i in range(3):
        for j in range(3):
            taps.append(xp[:, :, i:i + 19:3, j:j + 15:2])      # (G, group, 7, 8)
    pat = jnp.stack(taps, axis=-1)                             # (G, group, 7, 8, 9)
    pat = jnp.transpose(pat, (0, 2, 3, 1, 4))                  # (G, 7, 8, group, 9)
    return pat.reshape(G, 7 * 8 * group, 9).astype(jnp.bfloat16)


def _m2_conv1_patches(xg):
    """xg: (G, group, 20, 13) -> bf16 (G, 6*group, 36); only post-MaxPool(1,3) rows."""
    G, group = xg.shape[0], xg.shape[1]
    taps = []
    for i in range(3):
        taps.append(xg[:, :, i:i + 16:3, 0:12])                # (G, group, 6, 12)
    pat = jnp.concatenate(taps, axis=-1)                       # (G, group, 6, 36)
    pat = jnp.transpose(pat, (0, 2, 1, 3))                     # (G, 6, group, 36)
    return pat.reshape(G, 6 * group, 36).astype(jnp.bfloat16)


# ----------------------------------------------------------------------------
# Parameter initialization (deterministic, synthetic; BN folded, bf16 weights)
# ----------------------------------------------------------------------------
def _bn_fold(key, c):
    k1, k2, k3, k4 = jax.random.split(key, 4)
    gamma = 1.0 + 0.1 * jax.random.normal(k1, (c,), jnp.float32)
    beta = 0.1 * jax.random.normal(k2, (c,), jnp.float32)
    mean = 0.1 * jax.random.normal(k3, (c,), jnp.float32)
    var = jax.random.uniform(k4, (c,), jnp.float32, minval=0.5, maxval=1.5)
    scale = gamma / jnp.sqrt(var + BN_EPS)
    shift = (beta - mean * scale).reshape(1, c)
    return scale, shift


def _conv_w_mat(key, cout, cin, kh, kw, scale=None):
    """(Cout,Cin,kh,kw) -> im2col weight (kh*kw*Cin, Cout), BN scale folded, bf16."""
    w = jax.random.normal(key, (cout, cin, kh, kw), jnp.float32) * 0.05
    if scale is not None:
        w = w * scale[:, None, None, None]
    w = jnp.transpose(w, (2, 3, 1, 0)).reshape(kh * kw * cin, cout)
    return w.astype(jnp.bfloat16)


def init_params(key):
    ks = jax.random.split(key, 16)
    s1, sh1 = _bn_fold(ks[1], 64)
    s2, sh2 = _bn_fold(ks[3], 128)
    s3, sh3 = _bn_fold(ks[5], 256)
    # TODO(synk): BatchNorm1d(64) on a 4D tensor is invalid in PyTorch; modeled here
    # as eval-mode channel-wise normalization (folded scale/shift).
    t1, th1 = _bn_fold(ks[8], 64)
    t2, th2 = _bn_fold(ks[10], 256)

    prm = {}
    # --- model1: mfcc_encoder (bias-free convs; BN scale folded into weights) ---
    prm["w_m1c1"] = _conv_w_mat(ks[0], 64, 1, 3, 3, scale=s1)
    prm["s_m1c1"] = sh1
    prm["w_m1c2"] = _conv_w_mat(ks[2], 128, 64, 3, 3, scale=s2)
    prm["s_m1c2"] = sh2
    prm["w_m1c3"] = _conv_w_mat(ks[4], 256, 128, 3, 3, scale=s3)
    prm["s_m1c3"] = sh3
    prm["w_m1c4"] = _conv_w_mat(ks[6], 512, 256, 2, 2)
    # --- model2: mfcc_encoder_alter ---
    prm["w_m2c1"] = _conv_w_mat(ks[7], 64, 1, 3, 12, scale=t1)
    prm["s_m2c1"] = th1
    prm["w_m2c2"] = _conv_w_mat(ks[9], 256, 64, 3, 1, scale=t2)
    prm["s_m2c2"] = th2
    prm["w_m2c3"] = _conv_w_mat(ks[11], 512, 256, 3, 1)
    # --- fc: Linear(1024, 256), split into the net1/net2 halves of the concat ---
    fc_w = jax.random.normal(ks[12], (256, 1024), jnp.float32) * 0.03
    fc_b = 0.01 * jax.random.normal(ks[13], (256,), jnp.float32)
    prm["w_fc"] = jnp.transpose(fc_w).reshape(2, 512, 256).astype(jnp.bfloat16)
    prm["b_fc"] = fc_b.reshape(1, 256)
    return prm


# ----------------------------------------------------------------------------
# Forward pass wrapper
# ----------------------------------------------------------------------------
def _const_index_map(ndim):
    return lambda g: (0,) * ndim


def mfcc_encoder_two_forward(x, prm):
    # x: (B, T, mfcc_length, mfcc_width) -> (B, T, 256)
    B, T = x.shape[0], x.shape[1]
    n = B * T
    group = _choose_group(n)
    x0 = x.reshape(n, MFCC_LENGTH, MFCC_WIDTH).astype(jnp.float32)
    pad_n = (-n) % group
    if pad_n:
        x0 = jnp.concatenate(
            [x0, jnp.zeros((pad_n, MFCC_LENGTH, MFCC_WIDTH), jnp.float32)], axis=0)
    G = x0.shape[0] // group
    xg = x0.reshape(G, group, MFCC_LENGTH, MFCC_WIDTH)

    p1 = _m1_conv1_patches(xg)      # (G, 56*group, 9)  bf16
    p2 = _m2_conv1_patches(xg)      # (G, 6*group, 36)  bf16

    weight_args = (
        prm["w_m1c1"], prm["s_m1c1"], prm["w_m1c2"], prm["s_m1c2"],
        prm["w_m1c3"], prm["s_m1c3"], prm["w_m1c4"],
        prm["w_m2c1"], prm["s_m2c1"], prm["w_m2c2"], prm["s_m2c2"], prm["w_m2c3"],
        prm["w_fc"], prm["b_fc"],
    )

    in_specs = [
        pl.BlockSpec((1, 7 * 8 * group, 9), lambda g: (g, 0, 0)),
        pl.BlockSpec((1, 6 * group, 36), lambda g: (g, 0, 0)),
    ] + [pl.BlockSpec(w.shape, _const_index_map(w.ndim)) for w in weight_args]

    out = pl.pallas_call(
        functools.partial(_mfcc_fused_kernel, group),
        out_shape=jax.ShapeDtypeStruct((G, group, 256), jnp.float32),
        grid=(G,),
        in_specs=in_specs,
        out_specs=pl.BlockSpec((1, group, 256), lambda g: (g, 0, 0)),
        scratch_shapes=[
            pltpu.VMEM((9, 9, group, 64), jnp.bfloat16),   # m1 conv1 out, zero-padded
            pltpu.VMEM((7, 1, group, 64), jnp.bfloat16),   # m2 conv1+pool1 out, padded
        ],
        compiler_params=pltpu.CompilerParams(
            dimension_semantics=("parallel",),
            vmem_limit_bytes=48 * 1024 * 1024,   # sized against v7x's 64 MiB physical
        ),
    )(p1, p2, *weight_args)

    out = out.reshape(G * group, 256)[:n]
    return out.reshape(B, T, 256)


if __name__ == "__main__":
    key = jax.random.PRNGKey(0)
    k_param, k_data = jax.random.split(key)
    params = init_params(k_param)

    B, T = 2, 4
    x = jax.random.normal(k_data, (B, T, MFCC_LENGTH, MFCC_WIDTH), jnp.float32)

    fwd = jax.jit(mfcc_encoder_two_forward)
    out = fwd(x, params)
    out = jax.block_until_ready(out)
    assert out.shape == (B, T, 256), out.shape
    print("KERNEL_OK")
</pallas_src>

<mosaic_0001>
module attributes {stable_mosaic.version = 11 : i64} {
  func.func @_mfcc_fused_kernel(%arg0: i32, %arg1: memref<1x896x9xbf16, #tpu.memory_space<vmem>>, %arg2: memref<1x96x36xbf16, #tpu.memory_space<vmem>>, %arg3: memref<9x64xbf16, #tpu.memory_space<vmem>>, %arg4: memref<1x64xf32, #tpu.memory_space<vmem>>, %arg5: memref<576x128xbf16, #tpu.memory_space<vmem>>, %arg6: memref<1x128xf32, #tpu.memory_space<vmem>>, %arg7: memref<1152x256xbf16, #tpu.memory_space<vmem>>, %arg8: memref<1x256xf32, #tpu.memory_space<vmem>>, %arg9: memref<1024x512xbf16, #tpu.memory_space<vmem>>, %arg10: memref<36x64xbf16, #tpu.memory_space<vmem>>, %arg11: memref<1x64xf32, #tpu.memory_space<vmem>>, %arg12: memref<192x256xbf16, #tpu.memory_space<vmem>>, %arg13: memref<1x256xf32, #tpu.memory_space<vmem>>, %arg14: memref<768x512xbf16, #tpu.memory_space<vmem>>, %arg15: memref<2x512x256xbf16, #tpu.memory_space<vmem>>, %arg16: memref<1x256xf32, #tpu.memory_space<vmem>>, %arg17: memref<1x16x256xf32, #tpu.memory_space<vmem>>, %arg18: memref<9x9x16x64xbf16, #tpu.memory_space<vmem>>, %arg19: memref<7x1x16x64xbf16, #tpu.memory_space<vmem>>) attributes {dimension_semantics = [#tpu.dimension_semantics<parallel>], iteration_bounds = array<i64: 1>, scalar_prefetch = 0 : i64, scratch_operands = 2 : i64, tpu.core_type = #tpu.core_type<tc>, window_params = [{transform_indices = @transform_0, window_bounds = array<i64: 1, 896, 9>}, {transform_indices = @transform_1, window_bounds = array<i64: 1, 96, 36>}, {pipeline_mode = #tpu.pipeline_mode<synchronous>, transform_indices = @transform_2, window_bounds = array<i64: 9, 64>}, {pipeline_mode = #tpu.pipeline_mode<synchronous>, transform_indices = @transform_3, window_bounds = array<i64: 1, 64>}, {pipeline_mode = #tpu.pipeline_mode<synchronous>, transform_indices = @transform_4, window_bounds = array<i64: 576, 128>}, {pipeline_mode = #tpu.pipeline_mode<synchronous>, transform_indices = @transform_5, window_bounds = array<i64: 1, 128>}, {pipeline_mode = #tpu.pipeline_mode<synchronous>, transform_indices = @transform_6, window_bounds = array<i64: 1152, 256>}, {pipeline_mode = #tpu.pipeline_mode<synchronous>, transform_indices = @transform_7, window_bounds = array<i64: 1, 256>}, {pipeline_mode = #tpu.pipeline_mode<synchronous>, transform_indices = @transform_8, window_bounds = array<i64: 1024, 512>}, {pipeline_mode = #tpu.pipeline_mode<synchronous>, transform_indices = @transform_9, window_bounds = array<i64: 36, 64>}, {pipeline_mode = #tpu.pipeline_mode<synchronous>, transform_indices = @transform_10, window_bounds = array<i64: 1, 64>}, {pipeline_mode = #tpu.pipeline_mode<synchronous>, transform_indices = @transform_11, window_bounds = array<i64: 192, 256>}, {pipeline_mode = #tpu.pipeline_mode<synchronous>, transform_indices = @transform_12, window_bounds = array<i64: 1, 256>}, {pipeline_mode = #tpu.pipeline_mode<synchronous>, transform_indices = @transform_13, window_bounds = array<i64: 768, 512>}, {pipeline_mode = #tpu.pipeline_mode<synchronous>, transform_indices = @transform_14, window_bounds = array<i64: 2, 512, 256>}, {pipeline_mode = #tpu.pipeline_mode<synchronous>, transform_indices = @transform_15, window_bounds = array<i64: 1, 256>}, {transform_indices = @transform_16, window_bounds = array<i64: 1, 16, 256>}]} {
    %cst = arith.constant 0.000000e+00 : bf16
    %0 = vector.broadcast %cst : bf16 to vector<9x16x64xbf16>
    %cst_0 = arith.constant 0.000000e+00 : bf16
    %1 = vector.broadcast %cst_0 : bf16 to vector<16x64xbf16>
    %c0 = arith.constant 0 : index
    %c0_1 = arith.constant 0 : index
    %c0_2 = arith.constant 0 : index
    %c0_3 = arith.constant 0 : index
    %2 = vector.load %arg18[%c0, %c0_1, %c0_2, %c0_3] : memref<9x9x16x64xbf16, #tpu.memory_space<vmem>>, vector<1x9x16x64xbf16>
    %3 = vector.shape_cast %2 : vector<1x9x16x64xbf16> to vector<9x16x64xbf16>
    %4 = vector.shape_cast %0 : vector<9x16x64xbf16> to vector<1x9x16x64xbf16>
    tpu.vector_store %arg18[%c0, %c0_1, %c0_2, %c0_3], %4 {strides = array<i32>} : memref<9x9x16x64xbf16, #tpu.memory_space<vmem>>, vector<1x9x16x64xbf16>,
    %c8 = arith.constant 8 : index
    %c0_4 = arith.constant 0 : index
    %c0_5 = arith.constant 0 : index
    %c0_6 = arith.constant 0 : index
    %5 = vector.load %arg18[%c8, %c0_4, %c0_5, %c0_6] : memref<9x9x16x64xbf16, #tpu.memory_space<vmem>>, vector<1x9x16x64xbf16>
    %6 = vector.shape_cast %5 : vector<1x9x16x64xbf16> to vector<9x16x64xbf16>
    %7 = vector.shape_cast %0 : vector<9x16x64xbf16> to vector<1x9x16x64xbf16>
    tpu.vector_store %arg18[%c8, %c0_4, %c0_5, %c0_6], %7 {strides = array<i32>} : memref<9x9x16x64xbf16, #tpu.memory_space<vmem>>, vector<1x9x16x64xbf16>,
    %c1 = arith.constant 1 : index
    %c0_7 = arith.constant 0 : index
    %c0_8 = arith.constant 0 : index
    %c0_9 = arith.constant 0 : index
    %8 = vector.load %arg18[%c1, %c0_7, %c0_8, %c0_9] : memref<9x9x16x64xbf16, #tpu.memory_space<vmem>>, vector<1x1x16x64xbf16>
    %9 = vector.shape_cast %8 : vector<1x1x16x64xbf16> to vector<16x64xbf16>
    %10 = vector.shape_cast %1 : vector<16x64xbf16> to vector<1x1x16x64xbf16>
    tpu.vector_store %arg18[%c1, %c0_7, %c0_8, %c0_9], %10 {strides = array<i32>} : memref<9x9x16x64xbf16, #tpu.memory_space<vmem>>, vector<1x1x16x64xbf16>,
    %c2 = arith.constant 2 : index
    %c0_10 = arith.constant 0 : index
    %c0_11 = arith.constant 0 : index
    %c0_12 = arith.constant 0 : index
    %11 = vector.load %arg18[%c2, %c0_10, %c0_11, %c0_12] : memref<9x9x16x64xbf16, #tpu.memory_space<vmem>>, vector<1x1x16x64xbf16>
    %12 = vector.shape_cast %11 : vector<1x1x16x64xbf16> to vector<16x64xbf16>
    %13 = vector.shape_cast %1 : vector<16x64xbf16> to vector<1x1x16x64xbf16>
    tpu.vector_store %arg18[%c2, %c0_10, %c0_11, %c0_12], %13 {strides = array<i32>} : memref<9x9x16x64xbf16, #tpu.memory_space<vmem>>, vector<1x1x16x64xbf16>,
    %c3 = arith.constant 3 : index
    %c0_13 = arith.constant 0 : index
    %c0_14 = arith.constant 0 : index
    %c0_15 = arith.constant 0 : index
    %14 = vector.load %arg18[%c3, %c0_13, %c0_14, %c0_15] : memref<9x9x16x64xbf16, #tpu.memory_space<vmem>>, vector<1x1x16x64xbf16>
    %15 = vector.shape_cast %14 : vector<1x1x16x64xbf16> to vector<16x64xbf16>
    %16 = vector.shape_cast %1 : vector<16x64xbf16> to vector<1x1x16x64xbf16>
    tpu.vector_store %arg18[%c3, %c0_13, %c0_14, %c0_15], %16 {strides = array<i32>} : memref<9x9x16x64xbf16, #tpu.memory_space<vmem>>, vector<1x1x16x64xbf16>,
    %c4 = arith.constant 4 : index
    %c0_16 = arith.constant 0 : index
    %c0_17 = arith.constant 0 : index
    %c0_18 = arith.constant 0 : index
    %17 = vector.load %arg18[%c4, %c0_16, %c0_17, %c0_18] : memref<9x9x16x64xbf16, #tpu.memory_space<vmem>>, vector<1x1x16x64xbf16>
    %18 = vector.shape_cast %17 : vector<1x1x16x64xbf16> to vector<16x64xbf16>
    %19 = vector.shape_cast %1 : vector<16x64xbf16> to vector<1x1x16x64xbf16>
    tpu.vector_store %arg18[%c4, %c0_16, %c0_17, %c0_18], %19 {strides = array<i32>} : memref<9x9x16x64xbf16, #tpu.memory_space<vmem>>, vector<1x1x16x64xbf16>,
    %c5 = arith.constant 5 : index
    %c0_19 = arith.constant 0 : index
    %c0_20 = arith.constant 0 : index
    %c0_21 = arith.constant 0 : index
    %20 = vector.load %arg18[%c5, %c0_19, %c0_20, %c0_21] : memref<9x9x16x64xbf16, #tpu.memory_space<vmem>>, vector<1x1x16x64xbf16>
    %21 = vector.shape_cast %20 : vector<1x1x16x64xbf16> to vector<16x64xbf16>
    %22 = vector.shape_cast %1 : vector<16x64xbf16> to vector<1x1x16x64xbf16>
    tpu.vector_store %arg18[%c5, %c0_19, %c0_20, %c0_21], %22 {strides = array<i32>} : memref<9x9x16x64xbf16, #tpu.memory_space<vmem>>, vector<1x1x16x64xbf16>,
    %c6 = arith.constant 6 : index
    %c0_22 = arith.constant 0 : index
    %c0_23 = arith.constant 0 : index
    %c0_24 = arith.constant 0 : index
    %23 = vector.load %arg18[%c6, %c0_22, %c0_23, %c0_24] : memref<9x9x16x64xbf16, #tpu.memory_space<vmem>>, vector<1x1x16x64xbf16>
    %24 = vector.shape_cast %23 : vector<1x1x16x64xbf16> to vector<16x64xbf16>
    %25 = vector.shape_cast %1 : vector<16x64xbf16> to vector<1x1x16x64xbf16>
    tpu.vector_store %arg18[%c6, %c0_22, %c0_23, %c0_24], %25 {strides = array<i32>} : memref<9x9x16x64xbf16, #tpu.memory_space<vmem>>, vector<1x1x16x64xbf16>,
    %c7 = arith.constant 7 : index
    %c0_25 = arith.constant 0 : index
    %c0_26 = arith.constant 0 : index
    %c0_27 = arith.constant 0 : index
    %26 = vector.load %arg18[%c7, %c0_25, %c0_26, %c0_27] : memref<9x9x16x64xbf16, #tpu.memory_space<vmem>>, vector<1x1x16x64xbf16>
    %27 = vector.shape_cast %26 : vector<1x1x16x64xbf16> to vector<16x64xbf16>
    %28 = vector.shape_cast %1 : vector<16x64xbf16> to vector<1x1x16x64xbf16>
    tpu.vector_store %arg18[%c7, %c0_25, %c0_26, %c0_27], %28 {strides = array<i32>} : memref<9x9x16x64xbf16, #tpu.memory_space<vmem>>, vector<1x1x16x64xbf16>,
    %c0_28 = arith.constant 0 : index
    %c0_29 = arith.constant 0 : index
    %c0_30 = arith.constant 0 : index
    %c0_31 = arith.constant 0 : index
    %29 = vector.load %arg19[%c0_28, %c0_29, %c0_30, %c0_31] : memref<7x1x16x64xbf16, #tpu.memory_space<vmem>>, vector<1x1x16x64xbf16>
    %30 = vector.shape_cast %29 : vector<1x1x16x64xbf16> to vector<16x64xbf16>
    %31 = vector.shape_cast %1 : vector<16x64xbf16> to vector<1x1x16x64xbf16>
    tpu.vector_store %arg19[%c0_28, %c0_29, %c0_30, %c0_31], %31 {strides = array<i32>} : memref<7x1x16x64xbf16, #tpu.memory_space<vmem>>, vector<1x1x16x64xbf16>,
    %c0_32 = arith.constant 0 : index
    %c0_33 = arith.constant 0 : index
    %c0_34 = arith.constant 0 : index
    %32 = vector.load %arg1[%c0_32, %c0_33, %c0_34] : memref<1x896x9xbf16, #tpu.memory_space<vmem>>, vector<1x896x9xbf16>
    %33 = vector.shape_cast %32 : vector<1x896x9xbf16> to vector<896x9xbf16>
    %c0_35 = arith.constant 0 : index
    %c0_36 = arith.constant 0 : index
    %34 = vector.load %arg3[%c0_35, %c0_36] : memref<9x64xbf16, #tpu.memory_space<vmem>>, vector<9x64xbf16>
    %cst_37 = arith.constant dense<0.000000e+00> : vector<896x64xf32>
    %35 = tpu.matmul %33, %34, %cst_37 {dimension_numbers = #tpu.dot_dimension_numbers<[1], [0], [0], [1], [0, 0, 1, 1], [], []>} : vector<896x9xbf16>, vector<9x64xbf16>, vector<896x64xf32> -> vector<896x64xf32>
    %c0_38 = arith.constant 0 : index
    %c0_39 = arith.constant 0 : index
    %36 = vector.load %arg4[%c0_38, %c0_39] : memref<1x64xf32, #tpu.memory_space<vmem>>, vector<1x64xf32>
    %37 = vector.broadcast %36 : vector<1x64xf32> to vector<896x64xf32>
    %38 = arith.addf %35, %37 : vector<896x64xf32>
    %cst_40 = arith.constant 0.000000e+00 : f32
    %39 = vector.broadcast %cst_40 : f32 to vector<896x64xf32>
    %40 = arith.cmpf oge, %38, %39 : vector<896x64xf32>
    %cst_41 = arith.constant 2.000000e-01 : f32
    %41 = vector.broadcast %cst_41 : f32 to vector<896x64xf32>
    %42 = arith.mulf %41, %38 : vector<896x64xf32>
    %43 = arith.select %40, %38, %42 : vector<896x64xi1>, vector<896x64xf32>
    %44 = arith.truncf %43 : vector<896x64xf32> to vector<896x64xbf16>
    %45 = vector.extract_strided_slice %44 {offsets = [0, 0], sizes = [128, 64], strides = [1, 1]} : vector<896x64xbf16> to vector<128x64xbf16>
    %46 = vector.shape_cast %45 : vector<128x64xbf16> to vector<8x16x64xbf16>
    %c1_42 = arith.constant 1 : index
    %c1_43 = arith.constant 1 : index
    %c0_44 = arith.constant 0 : index
    %c0_45 = arith.constant 0 : index
    %47 = vector.load %arg18[%c1_42, %c1_43, %c0_44, %c0_45] : memref<9x9x16x64xbf16, #tpu.memory_space<vmem>>, vector<1x8x16x64xbf16>
    %48 = vector.shape_cast %47 : vector<1x8x16x64xbf16> to vector<8x16x64xbf16>
    %49 = vector.shape_cast %46 : vector<8x16x64xbf16> to vector<1x8x16x64xbf16>
    tpu.vector_store %arg18[%c1_42, %c1_43, %c0_44, %c0_45], %49 {strides = array<i32>} : memref<9x9x16x64xbf16, #tpu.memory_space<vmem>>, vector<1x8x16x64xbf16>,
    %50 = vector.extract_strided_slice %44 {offsets = [128, 0], sizes = [128, 64], strides = [1, 1]} : vector<896x64xbf16> to vector<128x64xbf16>
    %51 = vector.shape_cast %50 : vector<128x64xbf16> to vector<8x16x64xbf16>
    %c2_46 = arith.constant 2 : index
    %c1_47 = arith.constant 1 : index
    %c0_48 = arith.constant 0 : index
    %c0_49 = arith.constant 0 : index
    %52 = vector.load %arg18[%c2_46, %c1_47, %c0_48, %c0_49] : memref<9x9x16x64xbf16, #tpu.memory_space<vmem>>, vector<1x8x16x64xbf16>
    %53 = vector.shape_cast %52 : vector<1x8x16x64xbf16> to vector<8x16x64xbf16>
    %54 = vector.shape_cast %51 : vector<8x16x64xbf16> to vector<1x8x16x64xbf16>
    tpu.vector_store %arg18[%c2_46, %c1_47, %c0_48, %c0_49], %54 {strides = array<i32>} : memref<9x9x16x64xbf16, #tpu.memory_space<vmem>>, vector<1x8x16x64xbf16>,
    %55 = vector.extract_strided_slice %44 {offsets = [256, 0], sizes = [128, 64], strides = [1, 1]} : vector<896x64xbf16> to vector<128x64xbf16>
    %56 = vector.shape_cast %55 : vector<128x64xbf16> to vector<8x16x64xbf16>
    %c3_50 = arith.constant 3 : index
    %c1_51 = arith.constant 1 : index
    %c0_52 = arith.constant 0 : index
    %c0_53 = arith.constant 0 : index
    %57 = vector.load %arg18[%c3_50, %c1_51, %c0_52, %c0_53] : memref<9x9x16x64xbf16, #tpu.memory_space<vmem>>, vector<1x8x16x64xbf16>
    %58 = vector.shape_cast %57 : vector<1x8x16x64xbf16> to vector<8x16x64xbf16>
    %59 = vector.shape_cast %56 : vector<8x16x64xbf16> to vector<1x8x16x64xbf16>
    tpu.vector_store %arg18[%c3_50, %c1_51, %c0_52, %c0_53], %59 {strides = array<i32>} : memref<9x9x16x64xbf16, #tpu.memory_space<vmem>>, vector<1x8x16x64xbf16>,
    %60 = vector.extract_strided_slice %44 {offsets = [384, 0], sizes = [128, 64], strides = [1, 1]} : vector<896x64xbf16> to vector<128x64xbf16>
    %61 = vector.shape_cast %60 : vector<128x64xbf16> to vector<8x16x64xbf16>
    %c4_54 = arith.constant 4 : index
    %c1_55 = arith.constant 1 : index
    %c0_56 = arith.constant 0 : index
    %c0_57 = arith.constant 0 : index
    %62 = vector.load %arg18[%c4_54, %c1_55, %c0_56, %c0_57] : memref<9x9x16x64xbf16, #tpu.memory_space<vmem>>, vector<1x8x16x64xbf16>
    %63 = vector.shape_cast %62 : vector<1x8x16x64xbf16> to vector<8x16x64xbf16>
    %64 = vector.shape_cast %61 : vector<8x16x64xbf16> to vector<1x8x16x64xbf16>
    tpu.vector_store %arg18[%c4_54, %c1_55, %c0_56, %c0_57], %64 {strides = array<i32>} : memref<9x9x16x64xbf16, #tpu.memory_space<vmem>>, vector<1x8x16x64xbf16>,
    %65 = vector.extract_strided_slice %44 {offsets = [512, 0], sizes = [128, 64], strides = [1, 1]} : vector<896x64xbf16> to vector<128x64xbf16>
    %66 = vector.shape_cast %65 : vector<128x64xbf16> to vector<8x16x64xbf16>
    %c5_58 = arith.constant 5 : index
    %c1_59 = arith.constant 1 : index
    %c0_60 = arith.constant 0 : index
    %c0_61 = arith.constant 0 : index
    %67 = vector.load %arg18[%c5_58, %c1_59, %c0_60, %c0_61] : memref<9x9x16x64xbf16, #tpu.memory_space<vmem>>, vector<1x8x16x64xbf16>
    %68 = vector.shape_cast %67 : vector<1x8x16x64xbf16> to vector<8x16x64xbf16>
    %69 = vector.shape_cast %66 : vector<8x16x64xbf16> to vector<1x8x16x64xbf16>
    tpu.vector_store %arg18[%c5_58, %c1_59, %c0_60, %c0_61], %69 {strides = array<i32>} : memref<9x9x16x64xbf16, #tpu.memory_space<vmem>>, vector<1x8x16x64xbf16>,
    %70 = vector.extract_strided_slice %44 {offsets = [640, 0], sizes = [128, 64], strides = [1, 1]} : vector<896x64xbf16> to vector<128x64xbf16>
    %71 = vector.shape_cast %70 : vector<128x64xbf16> to vector<8x16x64xbf16>
    %c6_62 = arith.constant 6 : index
    %c1_63 = arith.constant 1 : index
    %c0_64 = arith.constant 0 : index
    %c0_65 = arith.constant 0 : index
    %72 = vector.load %arg18[%c6_62, %c1_63, %c0_64, %c0_65] : memref<9x9x16x64xbf16, #tpu.memory_space<vmem>>, vector<1x8x16x64xbf16>
    %73 = vector.shape_cast %72 : vector<1x8x16x64xbf16> to vector<8x16x64xbf16>
    %74 = vector.shape_cast %71 : vector<8x16x64xbf16> to vector<1x8x16x64xbf16>
    tpu.vector_store %arg18[%c6_62, %c1_63, %c0_64, %c0_65], %74 {strides = array<i32>} : memref<9x9x16x64xbf16, #tpu.memory_space<vmem>>, vector<1x8x16x64xbf16>,
    %75 = vector.extract_strided_slice %44 {offsets = [768, 0], sizes = [128, 64], strides = [1, 1]} : vector<896x64xbf16> to vector<128x64xbf16>
    %76 = vector.shape_cast %75 : vector<128x64xbf16> to vector<8x16x64xbf16>
    %c7_66 = arith.constant 7 : index
    %c1_67 = arith.constant 1 : index
    %c0_68 = arith.constant 0 : index
    %c0_69 = arith.constant 0 : index
    %77 = vector.load %arg18[%c7_66, %c1_67, %c0_68, %c0_69] : memref<9x9x16x64xbf16, #tpu.memory_space<vmem>>, vector<1x8x16x64xbf16>
    %78 = vector.shape_cast %77 : vector<1x8x16x64xbf16> to vector<8x16x64xbf16>
    %79 = vector.shape_cast %76 : vector<8x16x64xbf16> to vector<1x8x16x64xbf16>
    tpu.vector_store %arg18[%c7_66, %c1_67, %c0_68, %c0_69], %79 {strides = array<i32>} : memref<9x9x16x64xbf16, #tpu.memory_space<vmem>>, vector<1x8x16x64xbf16>,
    %c0_70 = arith.constant 0 : index
    %c0_71 = arith.constant 0 : index
    %c0_72 = arith.constant 0 : index
    %c0_73 = arith.constant 0 : index
    %80 = vector.load %arg18[%c0_70, %c0_71, %c0_72, %c0_73] : memref<9x9x16x64xbf16, #tpu.memory_space<vmem>>, vector<1x1x16x64xbf16>
    %81 = vector.shape_cast %80 : vector<1x1x16x64xbf16> to vector<16x64xbf16>
    %c0_74 = arith.constant 0 : index
    %c1_75 = arith.constant 1 : index
    %c0_76 = arith.constant 0 : index
    %c0_77 = arith.constant 0 : index
    %82 = vector.load %arg18[%c0_74, %c1_75, %c0_76, %c0_77] : memref<9x9x16x64xbf16, #tpu.memory_space<vmem>>, vector<1x1x16x64xbf16>
    %83 = vector.shape_cast %82 : vector<1x1x16x64xbf16> to vector<16x64xbf16>
    %c0_78 = arith.constant 0 : index
    %c2_79 = arith.constant 2 : index
    %c0_80 = arith.constant 0 : index
    %c0_81 = arith.constant 0 : index
    %84 = vector.load %arg18[%c0_78, %c2_79, %c0_80, %c0_81] : memref<9x9x16x64xbf16, #tpu.memory_space<vmem>>, vector<1x1x16x64xbf16>
    %85 = vector.shape_cast %84 : vector<1x1x16x64xbf16> to vector<16x64xbf16>
    %c1_82 = arith.constant 1 : index
    %c0_83 = arith.constant 0 : index
    %c0_84 = arith.constant 0 : index
    %c0_85 = arith.constant 0 : index
    %86 = vector.load %arg18[%c1_82, %c0_83, %c0_84, %c0_85] : memref<9x9x16x64xbf16, #tpu.memory_space<vmem>>, vector<1x1x16x64xbf16>
    %87 = vector.shape_cast %86 : vector<1x1x16x64xbf16> to vector<16x64xbf16>
    %c1_86 = arith.constant 1 : index
    %c1_87 = arith.constant 1 : index
    %c0_88 = arith.constant 0 : index
    %c0_89 = arith.constant 0 : index
    %88 = vector.load %arg18[%c1_86, %c1_87, %c0_88, %c0_89] : memref<9x9x16x64xbf16, #tpu.memory_space<vmem>>, vector<1x1x16x64xbf16>
    %89 = vector.shape_cast %88 : vector<1x1x16x64xbf16> to vector<16x64xbf16>
    %c1_90 = arith.constant 1 : index
    %c2_91 = arith.constant 2 : index
    %c0_92 = arith.constant 0 : index
    %c0_93 = arith.constant 0 : index
    %90 = vector.load %arg18[%c1_90, %c2_91, %c0_92, %c0_93] : memref<9x9x16x64xbf16, #tpu.memory_space<vmem>>, vector<1x1x16x64xbf16>
    %91 = vector.shape_cast %90 : vector<1x1x16x64xbf16> to vector<16x64xbf16>
    %c2_94 = arith.constant 2 : index
    %c0_95 = arith.constant 0 : index
    %c0_96 = arith.constant 0 : index
    %c0_97 = arith.constant 0 : index
    %92 = vector.load %arg18[%c2_94, %c0_95, %c0_96, %c0_97] : memref<9x9x16x64xbf16, #tpu.memory_space<vmem>>, vector<1x1x16x64xbf16>
    %93 = vector.shape_cast %92 : vector<1x1x16x64xbf16> to vector<16x64xbf16>
    %c2_98 = arith.constant 2 : index
    %c1_99 = arith.constant 1 : index
    %c0_100 = arith.constant 0 : index
    %c0_101 = arith.constant 0 : index
    %94 = vector.load %arg18[%c2_98, %c1_99, %c0_100, %c0_101] : memref<9x9x16x64xbf16, #tpu.memory_space<vmem>>, vector<1x1x16x64xbf16>
    %95 = vector.shape_cast %94 : vector<1x1x16x64xbf16> to vector<16x64xbf16>
    %c2_102 = arith.constant 2 : index
    %c2_103 = arith.constant 2 : index
    %c0_104 = arith.constant 0 : index
    %c0_105 = arith.constant 0 : index
    %96 = vector.load %arg18[%c2_102, %c2_103, %c0_104, %c0_105] : memref<9x9x16x64xbf16, #tpu.memory_space<vmem>>, vector<1x1x16x64xbf16>
    %97 = vector.shape_cast %96 : vector<1x1x16x64xbf16> to vector<16x64xbf16>
    %98 = tpu.concatenate %81, %83, %85, %87, %89, %91, %93, %95, %97 in 1 : vector<16x64xbf16>, vector<16x64xbf16>, vector<16x64xbf16>, vector<16x64xbf16>, vector<16x64xbf16>, vector<16x64xbf16>, vector<16x64xbf16>, vector<16x64xbf16>, vector<16x64xbf16> -> vector<16x576xbf16>
    %c0_106 = arith.constant 0 : index
    %c2_107 = arith.constant 2 : index
    %c0_108 = arith.constant 0 : index
    %c0_109 = arith.constant 0 : index
    %99 = vector.load %arg18[%c0_106, %c2_107, %c0_108, %c0_109] : memref<9x9x16x64xbf16, #tpu.memory_space<vmem>>, vector<1x1x16x64xbf16>
    %100 = vector.shape_cast %99 : vector<1x1x16x64xbf16> to vector<16x64xbf16>
    %c0_110 = arith.constant 0 : index
    %c3_111 = arith.constant 3 : index
    %c0_112 = arith.constant 0 : index
    %c0_113 = arith.constant 0 : index
    %101 = vector.load %arg18[%c0_110, %c3_111, %c0_112, %c0_113] : memref<9x9x16x64xbf16, #tpu.memory_space<vmem>>, vector<1x1x16x64xbf16>
    %102 = vector.shape_cast %101 : vector<1x1x16x64xbf16> to vector<16x64xbf16>
    %c0_114 = arith.constant 0 : index
    %c4_115 = arith.constant 4 : index
    %c0_116 = arith.constant 0 : index
    %c0_117 = arith.constant 0 : index
    %103 = vector.load %arg18[%c0_114, %c4_115, %c0_116, %c0_117] : memref<9x9x16x64xbf16, #tpu.memory_space<vmem>>, vector<1x1x16x64xbf16>
    %104 = vector.shape_cast %103 : vector<1x1x16x64xbf16> to vector<16x64xbf16>
    %c1_118 = arith.constant 1 : index
    %c2_119 = arith.constant 2 : index
    %c0_120 = arith.constant 0 : index
    %c0_121 = arith.constant 0 : index
    %105 = vector.load %arg18[%c1_118, %c2_119, %c0_120, %c0_121] : memref<9x9x16x64xbf16, #tpu.memory_space<vmem>>, vector<1x1x16x64xbf16>
    %106 = vector.shape_cast %105 : vector<1x1x16x64xbf16> to vector<16x64xbf16>
    %c1_122 = arith.constant 1 : index
    %c3_123 = arith.constant 3 : index
    %c0_124 = arith.constant 0 : index
    %c0_125 = arith.constant 0 : index
    %107 = vector.load %arg18[%c1_122, %c3_123, %c0_124, %c0_125] : memref<9x9x16x64xbf16, #tpu.memory_space<vmem>>, vector<1x1x16x64xbf16>
    %108 = vector.shape_cast %107 : vector<1x1x16x64xbf16> to vector<16x64xbf16>
    %c1_126 = arith.constant 1 : index
    %c4_127 = arith.constant 4 : index
    %c0_128 = arith.constant 0 : index
    %c0_129 = arith.constant 0 : index
    %109 = vector.load %arg18[%c1_126, %c4_127, %c0_128, %c0_129] : memref<9x9x16x64xbf16, #tpu.memory_space<vmem>>, vector<1x1x16x64xbf16>
    %110 = vector.shape_cast %109 : vector<1x1x16x64xbf16> to vector<16x64xbf16>
    %c2_130 = arith.constant 2 : index
    %c2_131 = arith.constant 2 : index
    %c0_132 = arith.constant 0 : index
    %c0_133 = arith.constant 0 : index
    %111 = vector.load %arg18[%c2_130, %c2_131, %c0_132, %c0_133] : memref<9x9x16x64xbf16, #tpu.memory_space<vmem>>, vector<1x1x16x64xbf16>
    %112 = vector.shape_cast %111 : vector<1x1x16x64xbf16> to vector<16x64xbf16>
    %c2_134 = arith.constant 2 : index
    %c3_135 = arith.constant 3 : index
    %c0_136 = arith.constant 0 : index
    %c0_137 = arith.constant 0 : index
    %113 = vector.load %arg18[%c2_134, %c3_135, %c0_136, %c0_137] : memref<9x9x16x64xbf16, #tpu.memory_space<vmem>>, vector<1x1x16x64xbf16>
    %114 = vector.shape_cast %113 : vector<1x1x16x64xbf16> to vector<16x64xbf16>
    %c2_138 = arith.constant 2 : index
    %c4_139 = arith.constant 4 : index
    %c0_140 = arith.constant 0 : index
    %c0_141 = arith.constant 0 : index
    %115 = vector.load %arg18[%c2_138, %c4_139, %c0_140, %c0_141] : memref<9x9x16x64xbf16, #tpu.memory_space<vmem>>, vector<1x1x16x64xbf16>
    %116 = vector.shape_cast %115 : vector<1x1x16x64xbf16> to vector<16x64xbf16>
    %117 = tpu.concatenate %100, %102, %104, %106, %108, %110, %112, %114, %116 in 1 : vector<16x64xbf16>, vector<16x64xbf16>, vector<16x64xbf16>, vector<16x64xbf16>, vector<16x64xbf16>, vector<16x64xbf16>, vector<16x64xbf16>, vector<16x64xbf16>, vector<16x64xbf16> -> vector<16x576xbf16>
    %c0_142 = arith.constant 0 : index
    %c4_143 = arith.constant 4 : index
    %c0_144 = arith.constant 0 : index
    %c0_145 = arith.constant 0 : index
    %118 = vector.load %arg18[%c0_142, %c4_143, %c0_144, %c0_145] : memref<9x9x16x64xbf16, #tpu.memory_space<vmem>>, vector<1x1x16x64xbf16>
    %119 = vector.shape_cast %118 : vector<1x1x16x64xbf16> to vector<16x64xbf16>
    %c0_146 = arith.constant 0 : index
    %c5_147 = arith.constant 5 : index
    %c0_148 = arith.constant 0 : index
    %c0_149 = arith.constant 0 : index
    %120 = vector.load %arg18[%c0_146, %c5_147, %c0_148, %c0_149] : memref<9x9x16x64xbf16, #tpu.memory_space<vmem>>, vector<1x1x16x64xbf16>
    %121 = vector.shape_cast %120 : vector<1x1x16x64xbf16> to vector<16x64xbf16>
    %c0_150 = arith.constant 0 : index
    %c6_151 = arith.constant 6 : index
    %c0_152 = arith.constant 0 : index
    %c0_153 = arith.constant 0 : index
    %122 = vector.load %arg18[%c0_150, %c6_151, %c0_152, %c0_153] : memref<9x9x16x64xbf16, #tpu.memory_space<vmem>>, vector<1x1x16x64xbf16>
    %123 = vector.shape_cast %122 : vector<1x1x16x64xbf16> to vector<16x64xbf16>
    %c1_154 = arith.constant 1 : index
    %c4_155 = arith.constant 4 : index
    %c0_156 = arith.constant 0 : index
    %c0_157 = arith.constant 0 : index
    %124 = vector.load %arg18[%c1_154, %c4_155, %c0_156, %c0_157] : memref<9x9x16x64xbf16, #tpu.memory_space<vmem>>, vector<1x1x16x64xbf16>
    %125 = vector.shape_cast %124 : vector<1x1x16x64xbf16> to vector<16x64xbf16>
    %c1_158 = arith.constant 1 : index
    %c5_159 = arith.constant 5 : index
    %c0_160 = arith.constant 0 : index
    %c0_161 = arith.constant 0 : index
    %126 = vector.load %arg18[%c1_158, %c5_159, %c0_160, %c0_161] : memref<9x9x16x64xbf16, #tpu.memory_space<vmem>>, vector<1x1x16x64xbf16>
    %127 = vector.shape_cast %126 : vector<1x1x16x64xbf16> to vector<16x64xbf16>
    %c1_162 = arith.constant 1 : index
    %c6_163 = arith.constant 6 : index
    %c0_164 = arith.constant 0 : index
    %c0_165 = arith.constant 0 : index
    %128 = vector.load %arg18[%c1_162, %c6_163, %c0_164, %c0_165] : memref<9x9x16x64xbf16, #tpu.memory_space<vmem>>, vector<1x1x16x64xbf16>
    %129 = vector.shape_cast %128 : vector<1x1x16x64xbf16> to vector<16x64xbf16>
    %c2_166 = arith.constant 2 : index
    %c4_167 = arith.constant 4 : index
    %c0_168 = arith.constant 0 : index
    %c0_169 = arith.constant 0 : index
    %130 = vector.load %arg18[%c2_166, %c4_167, %c0_168, %c0_169] : memref<9x9x16x64xbf16, #tpu.memory_space<vmem>>, vector<1x1x16x64xbf16>
    %131 = vector.shape_cast %130 : vector<1x1x16x64xbf16> to vector<16x64xbf16>
    %c2_170 = arith.constant 2 : index
    %c5_171 = arith.constant 5 : index
    %c0_172 = arith.constant 0 : index
    %c0_173 = arith.constant 0 : index
    %132 = vector.load %arg18[%c2_170, %c5_171, %c0_172, %c0_173] : memref<9x9x16x64xbf16, #tpu.memory_space<vmem>>, vector<1x1x16x64xbf16>
    %133 = vector.shape_cast %132 : vector<1x1x16x64xbf16> to vector<16x64xbf16>
    %c2_174 = arith.constant 2 : index
    %c6_175 = arith.constant 6 : index
    %c0_176 = arith.constant 0 : index
    %c0_177 = arith.constant 0 : index
    %134 = vector.load %arg18[%c2_174, %c6_175, %c0_176, %c0_177] : memref<9x9x16x64xbf16, #tpu.memory_space<vmem>>, vector<1x1x16x64xbf16>
    %135 = vector.shape_cast %134 : vector<1x1x16x64xbf16> to vector<16x64xbf16>
    %136 = tpu.concatenate %119, %121, %123, %125, %127, %129, %131, %133, %135 in 1 : vector<16x64xbf16>, vector<16x64xbf16>, vector<16x64xbf16>, vector<16x64xbf16>, vector<16x64xbf16>, vector<16x64xbf16>, vector<16x64xbf16>, vector<16x64xbf16>, vector<16x64xbf16> -> vector<16x576xbf16>
    %c0_178 = arith.constant 0 : index
    %c6_179 = arith.constant 6 : index
    %c0_180 = arith.constant 0 : index
    %c0_181 = arith.constant 0 : index
    %137 = vector.load %arg18[%c0_178, %c6_179, %c0_180, %c0_181] : memref<9x9x16x64xbf16, #tpu.memory_space<vmem>>, vector<1x1x16x64xbf16>
    %138 = vector.shape_cast %137 : vector<1x1x16x64xbf16> to vector<16x64xbf16>
    %c0_182 = arith.constant 0 : index
    %c7_183 = arith.constant 7 : index
    %c0_184 = arith.constant 0 : index
    %c0_185 = arith.constant 0 : index
    %139 = vector.load %arg18[%c0_182, %c7_183, %c0_184, %c0_185] : memref<9x9x16x64xbf16, #tpu.memory_space<vmem>>, vector<1x1x16x64xbf16>
    %140 = vector.shape_cast %139 : vector<1x1x16x64xbf16> to vector<16x64xbf16>
    %c0_186 = arith.constant 0 : index
    %c8_187 = arith.constant 8 : index
    %c0_188 = arith.constant 0 : index
    %c0_189 = arith.constant 0 : index
    %141 = vector.load %arg18[%c0_186, %c8_187, %c0_188, %c0_189] : memref<9x9x16x64xbf16, #tpu.memory_space<vmem>>, vector<1x1x16x64xbf16>
    %142 = vector.shape_cast %141 : vector<1x1x16x64xbf16> to vector<16x64xbf16>
    %c1_190 = arith.constant 1 : index
    %c6_191 = arith.constant 6 : index
    %c0_192 = arith.constant 0 : index
    %c0_193 = arith.constant 0 : index
    %143 = vector.load %arg18[%c1_190, %c6_191, %c0_192, %c0_193] : memref<9x9x16x64xbf16, #tpu.memory_space<vmem>>, vector<1x1x16x64xbf16>
    %144 = vector.shape_cast %143 : vector<1x1x16x64xbf16> to vector<16x64xbf16>
    %c1_194 = arith.constant 1 : index
    %c7_195 = arith.constant 7 : index
    %c0_196 = arith.constant 0 : index
    %c0_197 = arith.constant 0 : index
    %145 = vector.load %arg18[%c1_194, %c7_195, %c0_196, %c0_197] : memref<9x9x16x64xbf16, #tpu.memory_space<vmem>>, vector<1x1x16x64xbf16>
    %146 = vector.shape_cast %145 : vector<1x1x16x64xbf16> to vector<16x64xbf16>
    %c1_198 = arith.constant 1 : index
    %c8_199 = arith.constant 8 : index
    %c0_200 = arith.constant 0 : index
    %c0_201 = arith.constant 0 : index
    %147 = vector.load %arg18[%c1_198, %c8_199, %c0_200, %c0_201] : memref<9x9x16x64xbf16, #tpu.memory_space<vmem>>, vector<1x1x16x64xbf16>
    %148 = vector.shape_cast %147 : vector<1x1x16x64xbf16> to vector<16x64xbf16>
    %c2_202 = arith.constant 2 : index
    %c6_203 = arith.constant 6 : index
    %c0_204 = arith.constant 0 : index
    %c0_205 = arith.constant 0 : index
    %149 = vector.load %arg18[%c2_202, %c6_203, %c0_204, %c0_205] : memref<9x9x16x64xbf16, #tpu.memory_space<vmem>>, vector<1x1x16x64xbf16>
    %150 = vector.shape_cast %149 : vector<1x1x16x64xbf16> to vector<16x64xbf16>
    %c2_206 = arith.constant 2 : index
    %c7_207 = arith.constant 7 : index
    %c0_208 = arith.constant 0 : index
    %c0_209 = arith.constant 0 : index
    %151 = vector.load %arg18[%c2_206, %c7_207, %c0_208, %c0_209] : memref<9x9x16x64xbf16, #tpu.memory_space<vmem>>, vector<1x1x16x64xbf16>
    %152 = vector.shape_cast %151 : vector<1x1x16x64xbf16> to vector<16x64xbf16>
    %c2_210 = arith.constant 2 : index
    %c8_211 = arith.constant 8 : index
    %c0_212 = arith.constant 0 : index
    %c0_213 = arith.constant 0 : index
    %153 = vector.load %arg18[%c2_210, %c8_211, %c0_212, %c0_213] : memref<9x9x16x64xbf16, #tpu.memory_space<vmem>>, vector<1x1x16x64xbf16>
    %154 = vector.shape_cast %153 : vector<1x1x16x64xbf16> to vector<16x64xbf16>
    %155 = tpu.concatenate %138, %140, %142, %144, %146, %148, %150, %152, %154 in 1 : vector<16x64xbf16>, vector<16x64xbf16>, vector<16x64xbf16>, vector<16x64xbf16>, vector<16x64xbf16>, vector<16x64xbf16>, vector<16x64xbf16>, vector<16x64xbf16>, vector<16x64xbf16> -> vector<16x576xbf16>
    %c2_214 = arith.constant 2 : index
    %c0_215 = arith.constant 0 : index
    %c0_216 = arith.constant 0 : index
    %c0_217 = arith.constant 0 : index
    %156 = vector.load %arg18[%c2_214, %c0_215, %c0_216, %c0_217] : memref<9x9x16x64xbf16, #tpu.memory_space<vmem>>, vector<1x1x16x64xbf16>
    %157 = vector.shape_cast %156 : vector<1x1x16x64xbf16> to vector<16x64xbf16>
    %c2_218 = arith.constant 2 : index
    %c1_219 = arith.constant 1 : index
    %c0_220 = arith.constant 0 : index
    %c0_221 = arith.constant 0 : index
    %158 = vector.load %arg18[%c2_218, %c1_219, %c0_220, %c0_221] : memref<9x9x16x64xbf16, #tpu.memory_space<vmem>>, vector<1x1x16x64xbf16>
    %159 = vector.shape_cast %158 : vector<1x1x16x64xbf16> to vector<16x64xbf16>
    %c2_222 = arith.constant 2 : index
    %c2_223 = arith.constant 2 : index
    %c0_224 = arith.constant 0 : index
    %c0_225 = arith.constant 0 : index
    %160 = vector.load %arg18[%c2_222, %c2_223, %c0_224, %c0_225] : memref<9x9x16x64xbf16, #tpu.memory_space<vmem>>, vector<1x1x16x64xbf16>
    %161 = vector.shape_cast %160 : vector<1x1x16x64xbf16> to vector<16x64xbf16>
    %c3_226 = arith.constant 3 : index
    %c0_227 = arith.constant 0 : index
    %c0_228 = arith.constant 0 : index
    %c0_229 = arith.constant 0 : index
    %162 = vector.load %arg18[%c3_226, %c0_227, %c0_228, %c0_229] : memref<9x9x16x64xbf16, #tpu.memory_space<vmem>>, vector<1x1x16x64xbf16>
    %163 = vector.shape_cast %162 : vector<1x1x16x64xbf16> to vector<16x64xbf16>
    %c3_230 = arith.constant 3 : index
    %c1_231 = arith.constant 1 : index
    %c0_232 = arith.constant 0 : index
    %c0_233 = arith.constant 0 : index
    %164 = vector.load %arg18[%c3_230, %c1_231, %c0_232, %c0_233] : memref<9x9x16x64xbf16, #tpu.memory_space<vmem>>, vector<1x1x16x64xbf16>
    %165 = vector.shape_cast %164 : vector<1x1x16x64xbf16> to vector<16x64xbf16>
    %c3_234 = arith.constant 3 : index
    %c2_235 = arith.constant 2 : index
    %c0_236 = arith.constant 0 : index
    %c0_237 = arith.constant 0 : index
    %166 = vector.load %arg18[%c3_234, %c2_235, %c0_236, %c0_237] : memref<9x9x16x64xbf16, #tpu.memory_space<vmem>>, vector<1x1x16x64xbf16>
    %167 = vector.shape_cast %166 : vector<1x1x16x64xbf16> to vector<16x64xbf16>
    %c4_238 = arith.constant 4 : index
    %c0_239 = arith.constant 0 : index
    %c0_240 = arith.constant 0 : index
    %c0_241 = arith.constant 0 : index
    %168 = vector.load %arg18[%c4_238, %c0_239, %c0_240, %c0_241] : memref<9x9x16x64xbf16, #tpu.memory_space<vmem>>, vector<1x1x16x64xbf16>
    %169 = vector.shape_cast %168 : vector<1x1x16x64xbf16> to vector<16x64xbf16>
    %c4_242 = arith.constant 4 : index
    %c1_243 = arith.constant 1 : index
    %c0_244 = arith.constant 0 : index
    %c0_245 = arith.constant 0 : index
    %170 = vector.load %arg18[%c4_242, %c1_243, %c0_244, %c0_245] : memref<9x9x16x64xbf16, #tpu.memory_space<vmem>>, vector<1x1x16x64xbf16>
    %171 = vector.shape_cast %170 : vector<1x1x16x64xbf16> to vector<16x64xbf16>
    %c4_246 = arith.constant 4 : index
    %c2_247 = arith.constant 2 : index
    %c0_248 = arith.constant 0 : index
    %c0_249 = arith.constant 0 : index
    %172 = vector.load %arg18[%c4_246, %c2_247, %c0_248, %c0_249] : memref<9x9x16x64xbf16, #tpu.memory_space<vmem>>, vector<1x1x16x64xbf16>
    %173 = vector.shape_cast %172 : vector<1x1x16x64xbf16> to vector<16x64xbf16>
    %174 = tpu.concatenate %157, %159, %161, %163, %165, %167, %169, %171, %173 in 1 : vector<16x64xbf16>, vector<16x64xbf16>, vector<16x64xbf16>, vector<16x64xbf16>, vector<16x64xbf16>, vector<16x64xbf16>, vector<16x64xbf16>, vector<16x64xbf16>, vector<16x64xbf16> -> vector<16x576xbf16>
    %c2_250 = arith.constant 2 : index
    %c2_251 = arith.constant 2 : index
    %c0_252 = arith.constant 0 : index
    %c0_253 = arith.constant 0 : index
    %175 = vector.load %arg18[%c2_250, %c2_251, %c0_252, %c0_253] : memref<9x9x16x64xbf16, #tpu.memory_space<vmem>>, vector<1x1x16x64xbf16>
    %176 = vector.shape_cast %175 : vector<1x1x16x64xbf16> to vector<16x64xbf16>
    %c2_254 = arith.constant 2 : index
    %c3_255 = arith.constant 3 : index
    %c0_256 = arith.constant 0 : index
    %c0_257 = arith.constant 0 : index
    %177 = vector.load %arg18[%c2_254, %c3_255, %c0_256, %c0_257] : memref<9x9x16x64xbf16, #tpu.memory_space<vmem>>, vector<1x1x16x64xbf16>
    %178 = vector.shape_cast %177 : vector<1x1x16x64xbf16> to vector<16x64xbf16>
    %c2_258 = arith.constant 2 : index
    %c4_259 = arith.constant 4 : index
    %c0_260 = arith.constant 0 : index
    %c0_261 = arith.constant 0 : index
    %179 = vector.load %arg18[%c2_258, %c4_259, %c0_260, %c0_261] : memref<9x9x16x64xbf16, #tpu.memory_space<vmem>>, vector<1x1x16x64xbf16>
    %180 = vector.shape_cast %179 : vector<1x1x16x64xbf16> to vector<16x64xbf16>
    %c3_262 = arith.constant 3 : index
    %c2_263 = arith.constant 2 : index
    %c0_264 = arith.constant 0 : index
    %c0_265 = arith.constant 0 : index
    %181 = vector.load %arg18[%c3_262, %c2_263, %c0_264, %c0_265] : memref<9x9x16x64xbf16, #tpu.memory_space<vmem>>, vector<1x1x16x64xbf16>
    %182 = vector.shape_cast %181 : vector<1x1x16x64xbf16> to vector<16x64xbf16>
    %c3_266 = arith.constant 3 : index
    %c3_267 = arith.constant 3 : index
    %c0_268 = arith.constant 0 : index
    %c0_269 = arith.constant 0 : index
    %183 = vector.load %arg18[%c3_266, %c3_267, %c0_268, %c0_269] : memref<9x9x16x64xbf16, #tpu.memory_space<vmem>>, vector<1x1x16x64xbf16>
    %184 = vector.shape_cast %183 : vector<1x1x16x64xbf16> to vector<16x64xbf16>
    %c3_270 = arith.constant 3 : index
    %c4_271 = arith.constant 4 : index
    %c0_272 = arith.constant 0 : index
    %c0_273 = arith.constant 0 : index
    %185 = vector.load %arg18[%c3_270, %c4_271, %c0_272, %c0_273] : memref<9x9x16x64xbf16, #tpu.memory_space<vmem>>, vector<1x1x16x64xbf16>
    %186 = vector.shape_cast %185 : vector<1x1x16x64xbf16> to vector<16x64xbf16>
    %c4_274 = arith.constant 4 : index
    %c2_275 = arith.constant 2 : index
    %c0_276 = arith.constant 0 : index
    %c0_277 = arith.constant 0 : index
    %187 = vector.load %arg18[%c4_274, %c2_275, %c0_276, %c0_277] : memref<9x9x16x64xbf16, #tpu.memory_space<vmem>>, vector<1x1x16x64xbf16>
    %188 = vector.shape_cast %187 : vector<1x1x16x64xbf16> to vector<16x64xbf16>
    %c4_278 = arith.constant 4 : index
    %c3_279 = arith.constant 3 : index
    %c0_280 = arith.constant 0 : index
    %c0_281 = arith.constant 0 : index
    %189 = vector.load %arg18[%c4_278, %c3_279, %c0_280, %c0_281] : memref<9x9x16x64xbf16, #tpu.memory_space<vmem>>, vector<1x1x16x64xbf16>
    %190 = vector.shape_cast %189 : vector<1x1x16x64xbf16> to vector<16x64xbf16>
    %c4_282 = arith.constant 4 : index
    %c4_283 = arith.constant 4 : index
    %c0_284 = arith.constant 0 : index
    %c0_285 = arith.constant 0 : index
    %191 = vector.load %arg18[%c4_282, %c4_283, %c0_284, %c0_285] : memref<9x9x16x64xbf16, #tpu.memory_space<vmem>>, vector<1x1x16x64xbf16>
    %192 = vector.shape_cast %191 : vector<1x1x16x64xbf16> to vector<16x64xbf16>
    %193 = tpu.concatenate %176, %178, %180, %182, %184, %186, %188, %190, %192 in 1 : vector<16x64xbf16>, vector<16x64xbf16>, vector<16x64xbf16>, vector<16x64xbf16>, vector<16x64xbf16>, vector<16x64xbf16>, vector<16x64xbf16>, vector<16x64xbf16>, vector<16x64xbf16> -> vector<16x576xbf16>
    %c2_286 = arith.constant 2 : index
    %c4_287 = arith.constant 4 : index
    %c0_288 = arith.constant 0 : index
    %c0_289 = arith.constant 0 : index
    %194 = vector.load %arg18[%c2_286, %c4_287, %c0_288, %c0_289] : memref<9x9x16x64xbf16, #tpu.memory_space<vmem>>, vector<1x1x16x64xbf16>
    %195 = vector.shape_cast %194 : vector<1x1x16x64xbf16> to vector<16x64xbf16>
    %c2_290 = arith.constant 2 : index
    %c5_291 = arith.constant 5 : index
    %c0_292 = arith.constant 0 : index
    %c0_293 = arith.constant 0 : index
    %196 = vector.load %arg18[%c2_290, %c5_291, %c0_292, %c0_293] : memref<9x9x16x64xbf16, #tpu.memory_space<vmem>>, vector<1x1x16x64xbf16>
    %197 = vector.shape_cast %196 : vector<1x1x16x64xbf16> to vector<16x64xbf16>
    %c2_294 = arith.constant 2 : index
    %c6_295 = arith.constant 6 : index
    %c0_296 = arith.constant 0 : index
    %c0_297 = arith.constant 0 : index
    %198 = vector.load %arg18[%c2_294, %c6_295, %c0_296, %c0_297] : memref<9x9x16x64xbf16, #tpu.memory_space<vmem>>, vector<1x1x16x64xbf16>
    %199 = vector.shape_cast %198 : vector<1x1x16x64xbf16> to vector<16x64xbf16>
    %c3_298 = arith.constant 3 : index
    %c4_299 = arith.constant 4 : index
    %c0_300 = arith.constant 0 : index
    %c0_301 = arith.constant 0 : index
    %200 = vector.load %arg18[%c3_298, %c4_299, %c0_300, %c0_301] : memref<9x9x16x64xbf16, #tpu.memory_space<vmem>>, vector<1x1x16x64xbf16>
    %201 = vector.shape_cast %200 : vector<1x1x16x64xbf16> to vector<16x64xbf16>
    %c3_302 = arith.constant 3 : index
    %c5_303 = arith.constant 5 : index
    %c0_304 = arith.constant 0 : index
    %c0_305 = arith.constant 0 : index
    %202 = vector.load %arg18[%c3_302, %c5_303, %c0_304, %c0_305] : memref<9x9x16x64xbf16, #tpu.memory_space<vmem>>, vector<1x1x16x64xbf16>
    %203 = vector.shape_cast %202 : vector<1x1x16x64xbf16> to vector<16x64xbf16>
    %c3_306 = arith.constant 3 : index
    %c6_307 = arith.constant 6 : index
    %c0_308 = arith.constant 0 : index
    %c0_309 = arith.constant 0 : index
    %204 = vector.load %arg18[%c3_306, %c6_307, %c0_308, %c0_309] : memref<9x9x16x64xbf16, #tpu.memory_space<vmem>>, vector<1x1x16x64xbf16>
    %205 = vector.shape_cast %204 : vector<1x1x16x64xbf16> to vector<16x64xbf16>
    %c4_310 = arith.constant 4 : index
    %c4_311 = arith.constant 4 : index
    %c0_312 = arith.constant 0 : index
    %c0_313 = arith.constant 0 : index
    %206 = vector.load %arg18[%c4_310, %c4_311, %c0_312, %c0_313] : memref<9x9x16x64xbf16, #tpu.memory_space<vmem>>, vector<1x1x16x64xbf16>
    %207 = vector.shape_cast %206 : vector<1x1x16x64xbf16> to vector<16x64xbf16>
    %c4_314 = arith.constant 4 : index
    %c5_315 = arith.constant 5 : index
    %c0_316 = arith.constant 0 : index
    %c0_317 = arith.constant 0 : index
    %208 = vector.load %arg18[%c4_314, %c5_315, %c0_316, %c0_317] : memref<9x9x16x64xbf16, #tpu.memory_space<vmem>>, vector<1x1x16x64xbf16>
    %209 = vector.shape_cast %208 : vector<1x1x16x64xbf16> to vector<16x64xbf16>
    %c4_318 = arith.constant 4 : index
    %c6_319 = arith.constant 6 : index
    %c0_320 = arith.constant 0 : index
    %c0_321 = arith.constant 0 : index
    %210 = vector.load %arg18[%c4_318, %c6_319, %c0_320, %c0_321] : memref<9x9x16x64xbf16, #tpu.memory_space<vmem>>, vector<1x1x16x64xbf16>
    %211 = vector.shape_cast %210 : vector<1x1x16x64xbf16> to vector<16x64xbf16>
    %212 = tpu.concatenate %195, %197, %199, %201, %203, %205, %207, %209, %211 in 1 : vector<16x64xbf16>, vector<16x64xbf16>, vector<16x64xbf16>, vector<16x64xbf16>, vector<16x64xbf16>, vector<16x64xbf16>, vector<16x64xbf16>, vector<16x64xbf16>, vector<16x64xbf16> -> vector<16x576xbf16>
    %c2_322 = arith.constant 2 : index
    %c6_323 = arith.constant 6 : index
    %c0_324 = arith.constant 0 : index
    %c0_325 = arith.constant 0 : index
    %213 = vector.load %arg18[%c2_322, %c6_323, %c0_324, %c0_325] : memref<9x9x16x64xbf16, #tpu.memory_space<vmem>>, vector<1x1x16x64xbf16>
    %214 = vector.shape_cast %213 : vector<1x1x16x64xbf16> to vector<16x64xbf16>
    %c2_326 = arith.constant 2 : index
    %c7_327 = arith.constant 7 : index
    %c0_328 = arith.constant 0 : index
    %c0_329 = arith.constant 0 : index
    %215 = vector.load %arg18[%c2_326, %c7_327, %c0_328, %c0_329] : memref<9x9x16x64xbf16, #tpu.memory_space<vmem>>, vector<1x1x16x64xbf16>
    %216 = vector.shape_cast %215 : vector<1x1x16x64xbf16> to vector<16x64xbf16>
    %c2_330 = arith.constant 2 : index
    %c8_331 = arith.constant 8 : index
    %c0_332 = arith.constant 0 : index
    %c0_333 = arith.constant 0 : index
    %217 = vector.load %arg18[%c2_330, %c8_331, %c0_332, %c0_333] : memref<9x9x16x64xbf16, #tpu.memory_space<vmem>>, vector<1x1x16x64xbf16>
    %218 = vector.shape_cast %217 : vector<1x1x16x64xbf16> to vector<16x64xbf16>
    %c3_334 = arith.constant 3 : index
    %c6_335 = arith.constant 6 : index
    %c0_336 = arith.constant 0 : index
    %c0_337 = arith.constant 0 : index
    %219 = vector.load %arg18[%c3_334, %c6_335, %c0_336, %c0_337] : memref<9x9x16x64xbf16, #tpu.memory_space<vmem>>, vector<1x1x16x64xbf16>
    %220 = vector.shape_cast %219 : vector<1x1x16x64xbf16> to vector<16x64xbf16>
    %c3_338 = arith.constant 3 : index
    %c7_339 = arith.constant 7 : index
    %c0_340 = arith.constant 0 : index
    %c0_341 = arith.constant 0 : index
    %221 = vector.load %arg18[%c3_338, %c7_339, %c0_340, %c0_341] : memref<9x9x16x64xbf16, #tpu.memory_space<vmem>>, vector<1x1x16x64xbf16>
    %222 = vector.shape_cast %221 : vector<1x1x16x64xbf16> to vector<16x64xbf16>
    %c3_342 = arith.constant 3 : index
    %c8_343 = arith.constant 8 : index
    %c0_344 = arith.constant 0 : index
    %c0_345 = arith.constant 0 : index
    %223 = vector.load %arg18[%c3_342, %c8_343, %c0_344, %c0_345] : memref<9x9x16x64xbf16, #tpu.memory_space<vmem>>, vector<1x1x16x64xbf16>
    %224 = vector.shape_cast %223 : vector<1x1x16x64xbf16> to vector<16x64xbf16>
    %c4_346 = arith.constant 4 : index
    %c6_347 = arith.constant 6 : index
    %c0_348 = arith.constant 0 : index
    %c0_349 = arith.constant 0 : index
    %225 = vector.load %arg18[%c4_346, %c6_347, %c0_348, %c0_349] : memref<9x9x16x64xbf16, #tpu.memory_space<vmem>>, vector<1x1x16x64xbf16>
    %226 = vector.shape_cast %225 : vector<1x1x16x64xbf16> to vector<16x64xbf16>
    %c4_350 = arith.constant 4 : index
    %c7_351 = arith.constant 7 : index
    %c0_352 = arith.constant 0 : index
    %c0_353 = arith.constant 0 : index
    %227 = vector.load %arg18[%c4_350, %c7_351, %c0_352, %c0_353] : memref<9x9x16x64xbf16, #tpu.memory_space<vmem>>, vector<1x1x16x64xbf16>
    %228 = vector.shape_cast %227 : vector<1x1x16x64xbf16> to vector<16x64xbf16>
    %c4_354 = arith.constant 4 : index
    %c8_355 = arith.constant 8 : index
    %c0_356 = arith.constant 0 : index
    %c0_357 = arith.constant 0 : index
    %229 = vector.load %arg18[%c4_354, %c8_355, %c0_356, %c0_357] : memref<9x9x16x64xbf16, #tpu.memory_space<vmem>>, vector<1x1x16x64xbf16>
    %230 = vector.shape_cast %229 : vector<1x1x16x64xbf16> to vector<16x64xbf16>
    %231 = tpu.concatenate %214, %216, %218, %220, %222, %224, %226, %228, %230 in 1 : vector<16x64xbf16>, vector<16x64xbf16>, vector<16x64xbf16>, vector<16x64xbf16>, vector<16x64xbf16>, vector<16x64xbf16>, vector<16x64xbf16>, vector<16x64xbf16>, vector<16x64xbf16> -> vector<16x576xbf16>
    %c4_358 = arith.constant 4 : index
    %c0_359 = arith.constant 0 : index
    %c0_360 = arith.constant 0 : index
    %c0_361 = arith.constant 0 : index
    %232 = vector.load %arg18[%c4_358, %c0_359, %c0_360, %c0_361] : memref<9x9x16x64xbf16, #tpu.memory_space<vmem>>, vector<1x1x16x64xbf16>
    %233 = vector.shape_cast %232 : vector<1x1x16x64xbf16> to vector<16x64xbf16>
    %c4_362 = arith.constant 4 : index
    %c1_363 = arith.constant 1 : index
    %c0_364 = arith.constant 0 : index
    %c0_365 = arith.constant 0 : index
    %234 = vector.load %arg18[%c4_362, %c1_363, %c0_364, %c0_365] : memref<9x9x16x64xbf16, #tpu.memory_space<vmem>>, vector<1x1x16x64xbf16>
    %235 = vector.shape_cast %234 : vector<1x1x16x64xbf16> to vector<16x64xbf16>
    %c4_366 = arith.constant 4 : index
    %c2_367 = arith.constant 2 : index
    %c0_368 = arith.constant 0 : index
    %c0_369 = arith.constant 0 : index
    %236 = vector.load %arg18[%c4_366, %c2_367, %c0_368, %c0_369] : memref<9x9x16x64xbf16, #tpu.memory_space<vmem>>, vector<1x1x16x64xbf16>
    %237 = vector.shape_cast %236 : vector<1x1x16x64xbf16> to vector<16x64xbf16>
    %c5_370 = arith.constant 5 : index
    %c0_371 = arith.constant 0 : index
    %c0_372 = arith.constant 0 : index
    %c0_373 = arith.constant 0 : index
    %238 = vector.load %arg18[%c5_370, %c0_371, %c0_372, %c0_373] : memref<9x9x16x64xbf16, #tpu.memory_space<vmem>>, vector<1x1x16x64xbf16>
    %239 = vector.shape_cast %238 : vector<1x1x16x64xbf16> to vector<16x64xbf16>
    %c5_374 = arith.constant 5 : index
    %c1_375 = arith.constant 1 : index
    %c0_376 = arith.constant 0 : index
    %c0_377 = arith.constant 0 : index
    %240 = vector.load %arg18[%c5_374, %c1_375, %c0_376, %c0_377] : memref<9x9x16x64xbf16, #tpu.memory_space<vmem>>, vector<1x1x16x64xbf16>
    %241 = vector.shape_cast %240 : vector<1x1x16x64xbf16> to vector<16x64xbf16>
    %c5_378 = arith.constant 5 : index
    %c2_379 = arith.constant 2 : index
    %c0_380 = arith.constant 0 : index
    %c0_381 = arith.constant 0 : index
    %242 = vector.load %arg18[%c5_378, %c2_379, %c0_380, %c0_381] : memref<9x9x16x64xbf16, #tpu.memory_space<vmem>>, vector<1x1x16x64xbf16>
    %243 = vector.shape_cast %242 : vector<1x1x16x64xbf16> to vector<16x64xbf16>
    %c6_382 = arith.constant 6 : index
    %c0_383 = arith.constant 0 : index
    %c0_384 = arith.constant 0 : index
    %c0_385 = arith.constant 0 : index
    %244 = vector.load %arg18[%c6_382, %c0_383, %c0_384, %c0_385] : memref<9x9x16x64xbf16, #tpu.memory_space<vmem>>, vector<1x1x16x64xbf16>
    %245 = vector.shape_cast %244 : vector<1x1x16x64xbf16> to vector<16x64xbf16>
    %c6_386 = arith.constant 6 : index
    %c1_387 = arith.constant 1 : index
    %c0_388 = arith.constant 0 : index
    %c0_389 = arith.constant 0 : index
    %246 = vector.load %arg18[%c6_386, %c1_387, %c0_388, %c0_389] : memref<9x9x16x64xbf16, #tpu.memory_space<vmem>>, vector<1x1x16x64xbf16>
    %247 = vector.shape_cast %246 : vector<1x1x16x64xbf16> to vector<16x64xbf16>
    %c6_390 = arith.constant 6 : index
    %c2_391 = arith.constant 2 : index
    %c0_392 = arith.constant 0 : index
    %c0_393 = arith.constant 0 : index
    %248 = vector.load %arg18[%c6_390, %c2_391, %c0_392, %c0_393] : memref<9x9x16x64xbf16, #tpu.memory_space<vmem>>, vector<1x1x16x64xbf16>
    %249 = vector.shape_cast %248 : vector<1x1x16x64xbf16> to vector<16x64xbf16>
    %250 = tpu.concatenate %233, %235, %237, %239, %241, %243, %245, %247, %249 in 1 : vector<16x64xbf16>, vector<16x64xbf16>, vector<16x64xbf16>, vector<16x64xbf16>, vector<16x64xbf16>, vector<16x64xbf16>, vector<16x64xbf16>, vector<16x64xbf16>, vector<16x64xbf16> -> vector<16x576xbf16>
    %c4_394 = arith.constant 4 : index
    %c2_395 = arith.constant 2 : index
    %c0_396 = arith.constant 0 : index
    %c0_397 = arith.constant 0 : index
    %251 = vector.load %arg18[%c4_394, %c2_395, %c0_396, %c0_397] : memref<9x9x16x64xbf16, #tpu.memory_space<vmem>>, vector<1x1x16x64xbf16>
    %252 = vector.shape_cast %251 : vector<1x1x16x64xbf16> to vector<16x64xbf16>
    %c4_398 = arith.constant 4 : index
    %c3_399 = arith.constant 3 : index
    %c0_400 = arith.constant 0 : index
    %c0_401 = arith.constant 0 : index
    %253 = vector.load %arg18[%c4_398, %c3_399, %c0_400, %c0_401] : memref<9x9x16x64xbf16, #tpu.memory_space<vmem>>, vector<1x1x16x64xbf16>
    %254 = vector.shape_cast %253 : vector<1x1x16x64xbf16> to vector<16x64xbf16>
    %c4_402 = arith.constant 4 : index
    %c4_403 = arith.constant 4 : index
    %c0_404 = arith.constant 0 : index
    %c0_405 = arith.constant 0 : index
    %255 = vector.load %arg18[%c4_402, %c4_403, %c0_404, %c0_405] : memref<9x9x16x64xbf16, #tpu.memory_space<vmem>>, vector<1x1x16x64xbf16>
    %256 = vector.shape_cast %255 : vector<1x1x16x64xbf16> to vector<16x64xbf16>
    %c5_406 = arith.constant 5 : index
    %c2_407 = arith.constant 2 : index
    %c0_408 = arith.constant 0 : index
    %c0_409 = arith.constant 0 : index
    %257 = vector.load %arg18[%c5_406, %c2_407, %c0_408, %c0_409] : memref<9x9x16x64xbf16, #tpu.memory_space<vmem>>, vector<1x1x16x64xbf16>
    %258 = vector.shape_cast %257 : vector<1x1x16x64xbf16> to vector<16x64xbf16>
    %c5_410 = arith.constant 5 : index
    %c3_411 = arith.constant 3 : index
    %c0_412 = arith.constant 0 : index
    %c0_413 = arith.constant 0 : index
    %259 = vector.load %arg18[%c5_410, %c3_411, %c0_412, %c0_413] : memref<9x9x16x64xbf16, #tpu.memory_space<vmem>>, vector<1x1x16x64xbf16>
    %260 = vector.shape_cast %259 : vector<1x1x16x64xbf16> to vector<16x64xbf16>
    %c5_414 = arith.constant 5 : index
    %c4_415 = arith.constant 4 : index
    %c0_416 = arith.constant 0 : index
    %c0_417 = arith.constant 0 : index
    %261 = vector.load %arg18[%c5_414, %c4_415, %c0_416, %c0_417] : memref<9x9x16x64xbf16, #tpu.memory_space<vmem>>, vector<1x1x16x64xbf16>
    %262 = vector.shape_cast %261 : vector<1x1x16x64xbf16> to vector<16x64xbf16>
    %c6_418 = arith.constant 6 : index
    %c2_419 = arith.constant 2 : index
    %c0_420 = arith.constant 0 : index
    %c0_421 = arith.constant 0 : index
    %263 = vector.load %arg18[%c6_418, %c2_419, %c0_420, %c0_421] : memref<9x9x16x64xbf16, #tpu.memory_space<vmem>>, vector<1x1x16x64xbf16>
    %264 = vector.shape_cast %263 : vector<1x1x16x64xbf16> to vector<16x64xbf16>
    %c6_422 = arith.constant 6 : index
    %c3_423 = arith.constant 3 : index
    %c0_424 = arith.constant 0 : index
    %c0_425 = arith.constant 0 : index
    %265 = vector.load %arg18[%c6_422, %c3_423, %c0_424, %c0_425] : memref<9x9x16x64xbf16, #tpu.memory_space<vmem>>, vector<1x1x16x64xbf16>
    %266 = vector.shape_cast %265 : vector<1x1x16x64xbf16> to vector<16x64xbf16>
    %c6_426 = arith.constant 6 : index
    %c4_427 = arith.constant 4 : index
    %c0_428 = arith.constant 0 : index
    %c0_429 = arith.constant 0 : index
    %267 = vector.load %arg18[%c6_426, %c4_427, %c0_428, %c0_429] : memref<9x9x16x64xbf16, #tpu.memory_space<vmem>>, vector<1x1x16x64xbf16>
    %268 = vector.shape_cast %267 : vector<1x1x16x64xbf16> to vector<16x64xbf16>
    %269 = tpu.concatenate %252, %254, %256, %258, %260, %262, %264, %266, %268 in 1 : vector<16x64xbf16>, vector<16x64xbf16>, vector<16x64xbf16>, vector<16x64xbf16>, vector<16x64xbf16>, vector<16x64xbf16>, vector<16x64xbf16>, vector<16x64xbf16>, vector<16x64xbf16> -> vector<16x576xbf16>
    %c4_430 = arith.constant 4 : index
    %c4_431 = arith.constant 4 : index
    %c0_432 = arith.constant 0 : index
    %c0_433 = arith.constant 0 : index
    %270 = vector.load %arg18[%c4_430, %c4_431, %c0_432, %c0_433] : memref<9x9x16x64xbf16, #tpu.memory_space<vmem>>, vector<1x1x16x64xbf16>
    %271 = vector.shape_cast %270 : vector<1x1x16x64xbf16> to vector<16x64xbf16>
    %c4_434 = arith.constant 4 : index
    %c5_435 = arith.constant 5 : index
    %c0_436 = arith.constant 0 : index
    %c0_437 = arith.constant 0 : index
    %272 = vector.load %arg18[%c4_434, %c5_435, %c0_436, %c0_437] : memref<9x9x16x64xbf16, #tpu.memory_space<vmem>>, vector<1x1x16x64xbf16>
    %273 = vector.shape_cast %272 : vector<1x1x16x64xbf16> to vector<16x64xbf16>
    %c4_438 = arith.constant 4 : index
    %c6_439 = arith.constant 6 : index
    %c0_440 = arith.constant 0 : index
    %c0_441 = arith.constant 0 : index
    %274 = vector.load %arg18[%c4_438, %c6_439, %c0_440, %c0_441] : memref<9x9x16x64xbf16, #tpu.memory_space<vmem>>, vector<1x1x16x64xbf16>
    %275 = vector.shape_cast %274 : vector<1x1x16x64xbf16> to vector<16x64xbf16>
    %c5_442 = arith.constant 5 : index
    %c4_443 = arith.constant 4 : index
    %c0_444 = arith.constant 0 : index
    %c0_445 = arith.constant 0 : index
    %276 = vector.load %arg18[%c5_442, %c4_443, %c0_444, %c0_445] : memref<9x9x16x64xbf16, #tpu.memory_space<vmem>>, vector<1x1x16x64xbf16>
    %277 = vector.shape_cast %276 : vector<1x1x16x64xbf16> to vector<16x64xbf16>
    %c5_446 = arith.constant 5 : index
    %c5_447 = arith.constant 5 : index
    %c0_448 = arith.constant 0 : index
    %c0_449 = arith.constant 0 : index
    %278 = vector.load %arg18[%c5_446, %c5_447, %c0_448, %c0_449] : memref<9x9x16x64xbf16, #tpu.memory_space<vmem>>, vector<1x1x16x64xbf16>
    %279 = vector.shape_cast %278 : vector<1x1x16x64xbf16> to vector<16x64xbf16>
    %c5_450 = arith.constant 5 : index
    %c6_451 = arith.constant 6 : index
    %c0_452 = arith.constant 0 : index
    %c0_453 = arith.constant 0 : index
    %280 = vector.load %arg18[%c5_450, %c6_451, %c0_452, %c0_453] : memref<9x9x16x64xbf16, #tpu.memory_space<vmem>>, vector<1x1x16x64xbf16>
    %281 = vector.shape_cast %280 : vector<1x1x16x64xbf16> to vector<16x64xbf16>
    %c6_454 = arith.constant 6 : index
    %c4_455 = arith.constant 4 : index
    %c0_456 = arith.constant 0 : index
    %c0_457 = arith.constant 0 : index
    %282 = vector.load %arg18[%c6_454, %c4_455, %c0_456, %c0_457] : memref<9x9x16x64xbf16, #tpu.memory_space<vmem>>, vector<1x1x16x64xbf16>
    %283 = vector.shape_cast %282 : vector<1x1x16x64xbf16> to vector<16x64xbf16>
    %c6_458 = arith.constant 6 : index
    %c5_459 = arith.constant 5 : index
    %c0_460 = arith.constant 0 : index
    %c0_461 = arith.constant 0 : index
    %284 = vector.load %arg18[%c6_458, %c5_459, %c0_460, %c0_461] : memref<9x9x16x64xbf16, #tpu.memory_space<vmem>>, vector<1x1x16x64xbf16>
    %285 = vector.shape_cast %284 : vector<1x1x16x64xbf16> to vector<16x64xbf16>
    %c6_462 = arith.constant 6 : index
    %c6_463 = arith.constant 6 : index
    %c0_464 = arith.constant 0 : index
    %c0_465 = arith.constant 0 : index
    %286 = vector.load %arg18[%c6_462, %c6_463, %c0_464, %c0_465] : memref<9x9x16x64xbf16, #tpu.memory_space<vmem>>, vector<1x1x16x64xbf16>
    %287 = vector.shape_cast %286 : vector<1x1x16x64xbf16> to vector<16x64xbf16>
    %288 = tpu.concatenate %271, %273, %275, %277, %279, %281, %283, %285, %287 in 1 : vector<16x64xbf16>, vector<16x64xbf16>, vector<16x64xbf16>, vector<16x64xbf16>, vector<16x64xbf16>, vector<16x64xbf16>, vector<16x64xbf16>, vector<16x64xbf16>, vector<16x64xbf16> -> vector<16x576xbf16>
    %c4_466 = arith.constant 4 : index
    %c6_467 = arith.constant 6 : index
    %c0_468 = arith.constant 0 : index
    %c0_469 = arith.constant 0 : index
    %289 = vector.load %arg18[%c4_466, %c6_467, %c0_468, %c0_469] : memref<9x9x16x64xbf16, #tpu.memory_space<vmem>>, vector<1x1x16x64xbf16>
    %290 = vector.shape_cast %289 : vector<1x1x16x64xbf16> to vector<16x64xbf16>
    %c4_470 = arith.constant 4 : index
    %c7_471 = arith.constant 7 : index
    %c0_472 = arith.constant 0 : index
    %c0_473 = arith.constant 0 : index
    %291 = vector.load %arg18[%c4_470, %c7_471, %c0_472, %c0_473] : memref<9x9x16x64xbf16, #tpu.memory_space<vmem>>, vector<1x1x16x64xbf16>
    %292 = vector.shape_cast %291 : vector<1x1x16x64xbf16> to vector<16x64xbf16>
    %c4_474 = arith.constant 4 : index
    %c8_475 = arith.constant 8 : index
    %c0_476 = arith.constant 0 : index
    %c0_477 = arith.constant 0 : index
    %293 = vector.load %arg18[%c4_474, %c8_475, %c0_476, %c0_477] : memref<9x9x16x64xbf16, #tpu.memory_space<vmem>>, vector<1x1x16x64xbf16>
    %294 = vector.shape_cast %293 : vector<1x1x16x64xbf16> to vector<16x64xbf16>
    %c5_478 = arith.constant 5 : index
    %c6_479 = arith.constant 6 : index
    %c0_480 = arith.constant 0 : index
    %c0_481 = arith.constant 0 : index
    %295 = vector.load %arg18[%c5_478, %c6_479, %c0_480, %c0_481] : memref<9x9x16x64xbf16, #tpu.memory_space<vmem>>, vector<1x1x16x64xbf16>
    %296 = vector.shape_cast %295 : vector<1x1x16x64xbf16> to vector<16x64xbf16>
    %c5_482 = arith.constant 5 : index
    %c7_483 = arith.constant 7 : index
    %c0_484 = arith.constant 0 : index
    %c0_485 = arith.constant 0 : index
    %297 = vector.load %arg18[%c5_482, %c7_483, %c0_484, %c0_485] : memref<9x9x16x64xbf16, #tpu.memory_space<vmem>>, vector<1x1x16x64xbf16>
    %298 = vector.shape_cast %297 : vector<1x1x16x64xbf16> to vector<16x64xbf16>
    %c5_486 = arith.constant 5 : index
    %c8_487 = arith.constant 8 : index
    %c0_488 = arith.constant 0 : index
    %c0_489 = arith.constant 0 : index
    %299 = vector.load %arg18[%c5_486, %c8_487, %c0_488, %c0_489] : memref<9x9x16x64xbf16, #tpu.memory_space<vmem>>, vector<1x1x16x64xbf16>
    %300 = vector.shape_cast %299 : vector<1x1x16x64xbf16> to vector<16x64xbf16>
    %c6_490 = arith.constant 6 : index
    %c6_491 = arith.constant 6 : index
    %c0_492 = arith.constant 0 : index
    %c0_493 = arith.constant 0 : index
    %301 = vector.load %arg18[%c6_490, %c6_491, %c0_492, %c0_493] : memref<9x9x16x64xbf16, #tpu.memory_space<vmem>>, vector<1x1x16x64xbf16>
    %302 = vector.shape_cast %301 : vector<1x1x16x64xbf16> to vector<16x64xbf16>
    %c6_494 = arith.constant 6 : index
    %c7_495 = arith.constant 7 : index
    %c0_496 = arith.constant 0 : index
    %c0_497 = arith.constant 0 : index
    %303 = vector.load %arg18[%c6_494, %c7_495, %c0_496, %c0_497] : memref<9x9x16x64xbf16, #tpu.memory_space<vmem>>, vector<1x1x16x64xbf16>
    %304 = vector.shape_cast %303 : vector<1x1x16x64xbf16> to vector<16x64xbf16>
    %c6_498 = arith.constant 6 : index
    %c8_499 = arith.constant 8 : index
    %c0_500 = arith.constant 0 : index
    %c0_501 = arith.constant 0 : index
    %305 = vector.load %arg18[%c6_498, %c8_499, %c0_500, %c0_501] : memref<9x9x16x64xbf16, #tpu.memory_space<vmem>>, vector<1x1x16x64xbf16>
    %306 = vector.shape_cast %305 : vector<1x1x16x64xbf16> to vector<16x64xbf16>
    %307 = tpu.concatenate %290, %292, %294, %296, %298, %300, %302, %304, %306 in 1 : vector<16x64xbf16>, vector<16x64xbf16>, vector<16x64xbf16>, vector<16x64xbf16>, vector<16x64xbf16>, vector<16x64xbf16>, vector<16x64xbf16>, vector<16x64xbf16>, vector<16x64xbf16> -> vector<16x576xbf16>
    %c6_502 = arith.constant 6 : index
    %c0_503 = arith.constant 0 : index
    %c0_504 = arith.constant 0 : index
    %c0_505 = arith.constant 0 : index
    %308 = vector.load %arg18[%c6_502, %c0_503, %c0_504, %c0_505] : memref<9x9x16x64xbf16, #tpu.memory_space<vmem>>, vector<1x1x16x64xbf16>
    %309 = vector.shape_cast %308 : vector<1x1x16x64xbf16> to vector<16x64xbf16>
    %c6_506 = arith.constant 6 : index
    %c1_507 = arith.constant 1 : index
    %c0_508 = arith.constant 0 : index
    %c0_509 = arith.constant 0 : index
    %310 = vector.load %arg18[%c6_506, %c1_507, %c0_508, %c0_509] : memref<9x9x16x64xbf16, #tpu.memory_space<vmem>>, vector<1x1x16x64xbf16>
    %311 = vector.shape_cast %310 : vector<1x1x16x64xbf16> to vector<16x64xbf16>
    %c6_510 = arith.constant 6 : index
    %c2_511 = arith.constant 2 : index
    %c0_512 = arith.constant 0 : index
    %c0_513 = arith.constant 0 : index
    %312 = vector.load %arg18[%c6_510, %c2_511, %c0_512, %c0_513] : memref<9x9x16x64xbf16, #tpu.memory_space<vmem>>, vector<1x1x16x64xbf16>
    %313 = vector.shape_cast %312 : vector<1x1x16x64xbf16> to vector<16x64xbf16>
    %c7_514 = arith.constant 7 : index
    %c0_515 = arith.constant 0 : index
    %c0_516 = arith.constant 0 : index
    %c0_517 = arith.constant 0 : index
    %314 = vector.load %arg18[%c7_514, %c0_515, %c0_516, %c0_517] : memref<9x9x16x64xbf16, #tpu.memory_space<vmem>>, vector<1x1x16x64xbf16>
    %315 = vector.shape_cast %314 : vector<1x1x16x64xbf16> to vector<16x64xbf16>
    %c7_518 = arith.constant 7 : index
    %c1_519 = arith.constant 1 : index
    %c0_520 = arith.constant 0 : index
    %c0_521 = arith.constant 0 : index
    %316 = vector.load %arg18[%c7_518, %c1_519, %c0_520, %c0_521] : memref<9x9x16x64xbf16, #tpu.memory_space<vmem>>, vector<1x1x16x64xbf16>
    %317 = vector.shape_cast %316 : vector<1x1x16x64xbf16> to vector<16x64xbf16>
    %c7_522 = arith.constant 7 : index
    %c2_523 = arith.constant 2 : index
    %c0_524 = arith.constant 0 : index
    %c0_525 = arith.constant 0 : index
    %318 = vector.load %arg18[%c7_522, %c2_523, %c0_524, %c0_525] : memref<9x9x16x64xbf16, #tpu.memory_space<vmem>>, vector<1x1x16x64xbf16>
    %319 = vector.shape_cast %318 : vector<1x1x16x64xbf16> to vector<16x64xbf16>
    %c8_526 = arith.constant 8 : index
    %c0_527 = arith.constant 0 : index
    %c0_528 = arith.constant 0 : index
    %c0_529 = arith.constant 0 : index
    %320 = vector.load %arg18[%c8_526, %c0_527, %c0_528, %c0_529] : memref<9x9x16x64xbf16, #tpu.memory_space<vmem>>, vector<1x1x16x64xbf16>
    %321 = vector.shape_cast %320 : vector<1x1x16x64xbf16> to vector<16x64xbf16>
    %c8_530 = arith.constant 8 : index
    %c1_531 = arith.constant 1 : index
    %c0_532 = arith.constant 0 : index
    %c0_533 = arith.constant 0 : index
    %322 = vector.load %arg18[%c8_530, %c1_531, %c0_532, %c0_533] : memref<9x9x16x64xbf16, #tpu.memory_space<vmem>>, vector<1x1x16x64xbf16>
    %323 = vector.shape_cast %322 : vector<1x1x16x64xbf16> to vector<16x64xbf16>
    %c8_534 = arith.constant 8 : index
    %c2_535 = arith.constant 2 : index
    %c0_536 = arith.constant 0 : index
    %c0_537 = arith.constant 0 : index
    %324 = vector.load %arg18[%c8_534, %c2_535, %c0_536, %c0_537] : memref<9x9x16x64xbf16, #tpu.memory_space<vmem>>, vector<1x1x16x64xbf16>
    %325 = vector.shape_cast %324 : vector<1x1x16x64xbf16> to vector<16x64xbf16>
    %326 = tpu.concatenate %309, %311, %313, %315, %317, %319, %321, %323, %325 in 1 : vector<16x64xbf16>, vector<16x64xbf16>, vector<16x64xbf16>, vector<16x64xbf16>, vector<16x64xbf16>, vector<16x64xbf16>, vector<16x64xbf16>, vector<16x64xbf16>, vector<16x64xbf16> -> vector<16x576xbf16>
    %c6_538 = arith.constant 6 : index
    %c2_539 = arith.constant 2 : index
    %c0_540 = arith.constant 0 : index
    %c0_541 = arith.constant 0 : index
    %327 = vector.load %arg18[%c6_538, %c2_539, %c0_540, %c0_541] : memref<9x9x16x64xbf16, #tpu.memory_space<vmem>>, vector<1x1x16x64xbf16>
    %328 = vector.shape_cast %327 : vector<1x1x16x64xbf16> to vector<16x64xbf16>
    %c6_542 = arith.constant 6 : index
    %c3_543 = arith.constant 3 : index
    %c0_544 = arith.constant 0 : index
    %c0_545 = arith.constant 0 : index
    %329 = vector.load %arg18[%c6_542, %c3_543, %c0_544, %c0_545] : memref<9x9x16x64xbf16, #tpu.memory_space<vmem>>, vector<1x1x16x64xbf16>
    %330 = vector.shape_cast %329 : vector<1x1x16x64xbf16> to vector<16x64xbf16>
    %c6_546 = arith.constant 6 : index
    %c4_547 = arith.constant 4 : index
    %c0_548 = arith.constant 0 : index
    %c0_549 = arith.constant 0 : index
    %331 = vector.load %arg18[%c6_546, %c4_547, %c0_548, %c0_549] : memref<9x9x16x64xbf16, #tpu.memory_space<vmem>>, vector<1x1x16x64xbf16>
    %332 = vector.shape_cast %331 : vector<1x1x16x64xbf16> to vector<16x64xbf16>
    %c7_550 = arith.constant 7 : index
    %c2_551 = arith.constant 2 : index
    %c0_552 = arith.constant 0 : index
    %c0_553 = arith.constant 0 : index
    %333 = vector.load %arg18[%c7_550, %c2_551, %c0_552, %c0_553] : memref<9x9x16x64xbf16, #tpu.memory_space<vmem>>, vector<1x1x16x64xbf16>
    %334 = vector.shape_cast %333 : vector<1x1x16x64xbf16> to vector<16x64xbf16>
    %c7_554 = arith.constant 7 : index
    %c3_555 = arith.constant 3 : index
    %c0_556 = arith.constant 0 : index
    %c0_557 = arith.constant 0 : index
    %335 = vector.load %arg18[%c7_554, %c3_555, %c0_556, %c0_557] : memref<9x9x16x64xbf16, #tpu.memory_space<vmem>>, vector<1x1x16x64xbf16>
    %336 = vector.shape_cast %335 : vector<1x1x16x64xbf16> to vector<16x64xbf16>
    %c7_558 = arith.constant 7 : index
    %c4_559 = arith.constant 4 : index
    %c0_560 = arith.constant 0 : index
    %c0_561 = arith.constant 0 : index
    %337 = vector.load %arg18[%c7_558, %c4_559, %c0_560, %c0_561] : memref<9x9x16x64xbf16, #tpu.memory_space<vmem>>, vector<1x1x16x64xbf16>
    %338 = vector.shape_cast %337 : vector<1x1x16x64xbf16> to vector<16x64xbf16>
    %c8_562 = arith.constant 8 : index
    %c2_563 = arith.constant 2 : index
    %c0_564 = arith.constant 0 : index
    %c0_565 = arith.constant 0 : index
    %339 = vector.load %arg18[%c8_562, %c2_563, %c0_564, %c0_565] : memref<9x9x16x64xbf16, #tpu.memory_space<vmem>>, vector<1x1x16x64xbf16>
    %340 = vector.shape_cast %339 : vector<1x1x16x64xbf16> to vector<16x64xbf16>
    %c8_566 = arith.constant 8 : index
    %c3_567 = arith.constant 3 : index
    %c0_568 = arith.constant 0 : index
    %c0_569 = arith.constant 0 : index
    %341 = vector.load %arg18[%c8_566, %c3_567, %c0_568, %c0_569] : memref<9x9x16x64xbf16, #tpu.memory_space<vmem>>, vector<1x1x16x64xbf16>
    %342 = vector.shape_cast %341 : vector<1x1x16x64xbf16> to vector<16x64xbf16>
    %c8_570 = arith.constant 8 : index
    %c4_571 = arith.constant 4 : index
    %c0_572 = arith.constant 0 : index
    %c0_573 = arith.constant 0 : index
    %343 = vector.load %arg18[%c8_570, %c4_571, %c0_572, %c0_573] : memref<9x9x16x64xbf16, #tpu.memory_space<vmem>>, vector<1x1x16x64xbf16>
    %344 = vector.shape_cast %343 : vector<1x1x16x64xbf16> to vector<16x64xbf16>
    %345 = tpu.concatenate %328, %330, %332, %334, %336, %338, %340, %342, %344 in 1 : vector<16x64xbf16>, vector<16x64xbf16>, vector<16x64xbf16>, vector<16x64xbf16>, vector<16x64xbf16>, vector<16x64xbf16>, vector<16x64xbf16>, vector<16x64xbf16>, vector<16x64xbf16> -> vector<16x576xbf16>
    %c6_574 = arith.constant 6 : index
    %c4_575 = arith.constant 4 : index
    %c0_576 = arith.constant 0 : index
    %c0_577 = arith.constant 0 : index
    %346 = vector.load %arg18[%c6_574, %c4_575, %c0_576, %c0_577] : memref<9x9x16x64xbf16, #tpu.memory_space<vmem>>, vector<1x1x16x64xbf16>
    %347 = vector.shape_cast %346 : vector<1x1x16x64xbf16> to vector<16x64xbf16>
    %c6_578 = arith.constant 6 : index
    %c5_579 = arith.constant 5 : index
    %c0_580 = arith.constant 0 : index
    %c0_581 = arith.constant 0 : index
    %348 = vector.load %arg18[%c6_578, %c5_579, %c0_580, %c0_581] : memref<9x9x16x64xbf16, #tpu.memory_space<vmem>>, vector<1x1x16x64xbf16>
    %349 = vector.shape_cast %348 : vector<1x1x16x64xbf16> to vector<16x64xbf16>
    %c6_582 = arith.constant 6 : index
    %c6_583 = arith.constant 6 : index
    %c0_584 = arith.constant 0 : index
    %c0_585 = arith.constant 0 : index
    %350 = vector.load %arg18[%c6_582, %c6_583, %c0_584, %c0_585] : memref<9x9x16x64xbf16, #tpu.memory_space<vmem>>, vector<1x1x16x64xbf16>
    %351 = vector.shape_cast %350 : vector<1x1x16x64xbf16> to vector<16x64xbf16>
    %c7_586 = arith.constant 7 : index
    %c4_587 = arith.constant 4 : index
    %c0_588 = arith.constant 0 : index
    %c0_589 = arith.constant 0 : index
    %352 = vector.load %arg18[%c7_586, %c4_587, %c0_588, %c0_589] : memref<9x9x16x64xbf16, #tpu.memory_space<vmem>>, vector<1x1x16x64xbf16>
    %353 = vector.shape_cast %352 : vector<1x1x16x64xbf16> to vector<16x64xbf16>
    %c7_590 = arith.constant 7 : index
    %c5_591 = arith.constant 5 : index
    %c0_592 = arith.constant 0 : index
    %c0_593 = arith.constant 0 : index
    %354 = vector.load %arg18[%c7_590, %c5_591, %c0_592, %c0_593] : memref<9x9x16x64xbf16, #tpu.memory_space<vmem>>, vector<1x1x16x64xbf16>
    %355 = vector.shape_cast %354 : vector<1x1x16x64xbf16> to vector<16x64xbf16>
    %c7_594 = arith.constant 7 : index
    %c6_595 = arith.constant 6 : index
    %c0_596 = arith.constant 0 : index
    %c0_597 = arith.constant 0 : index
    %356 = vector.load %arg18[%c7_594, %c6_595, %c0_596, %c0_597] : memref<9x9x16x64xbf16, #tpu.memory_space<vmem>>, vector<1x1x16x64xbf16>
    %357 = vector.shape_cast %356 : vector<1x1x16x64xbf16> to vector<16x64xbf16>
    %c8_598 = arith.constant 8 : index
    %c4_599 = arith.constant 4 : index
    %c0_600 = arith.constant 0 : index
    %c0_601 = arith.constant 0 : index
    %358 = vector.load %arg18[%c8_598, %c4_599, %c0_600, %c0_601] : memref<9x9x16x64xbf16, #tpu.memory_space<vmem>>, vector<1x1x16x64xbf16>
    %359 = vector.shape_cast %358 : vector<1x1x16x64xbf16> to vector<16x64xbf16>
    %c8_602 = arith.constant 8 : index
    %c5_603 = arith.constant 5 : index
    %c0_604 = arith.constant 0 : index
    %c0_605 = arith.constant 0 : index
    %360 = vector.load %arg18[%c8_602, %c5_603, %c0_604, %c0_605] : memref<9x9x16x64xbf16, #tpu.memory_space<vmem>>, vector<1x1x16x64xbf16>
    %361 = vector.shape_cast %360 : vector<1x1x16x64xbf16> to vector<16x64xbf16>
    %c8_606 = arith.constant 8 : index
    %c6_607 = arith.constant 6 : index
    %c0_608 = arith.constant 0 : index
    %c0_609 = arith.constant 0 : index
    %362 = vector.load %arg18[%c8_606, %c6_607, %c0_608, %c0_609] : memref<9x9x16x64xbf16, #tpu.memory_space<vmem>>, vector<1x1x16x64xbf16>
    %363 = vector.shape_cast %362 : vector<1x1x16x64xbf16> to vector<16x64xbf16>
    %364 = tpu.concatenate %347, %349, %351, %353, %355, %357, %359, %361, %363 in 1 : vector<16x64xbf16>, vector<16x64xbf16>, vector<16x64xbf16>, vector<16x64xbf16>, vector<16x64xbf16>, vector<16x64xbf16>, vector<16x64xbf16>, vector<16x64xbf16>, vector<16x64xbf16> -> vector<16x576xbf16>
    %c6_610 = arith.constant 6 : index
    %c6_611 = arith.constant 6 : index
    %c0_612 = arith.constant 0 : index
    %c0_613 = arith.constant 0 : index
    %365 = vector.load %arg18[%c6_610, %c6_611, %c0_612, %c0_613] : memref<9x9x16x64xbf16, #tpu.memory_space<vmem>>, vector<1x1x16x64xbf16>
    %366 = vector.shape_cast %365 : vector<1x1x16x64xbf16> to vector<16x64xbf16>
    %c6_614 = arith.constant 6 : index
    %c7_615 = arith.constant 7 : index
    %c0_616 = arith.constant 0 : index
    %c0_617 = arith.constant 0 : index
    %367 = vector.load %arg18[%c6_614, %c7_615, %c0_616, %c0_617] : memref<9x9x16x64xbf16, #tpu.memory_space<vmem>>, vector<1x1x16x64xbf16>
    %368 = vector.shape_cast %367 : vector<1x1x16x64xbf16> to vector<16x64xbf16>
    %c6_618 = arith.constant 6 : index
    %c8_619 = arith.constant 8 : index
    %c0_620 = arith.constant 0 : index
    %c0_621 = arith.constant 0 : index
    %369 = vector.load %arg18[%c6_618, %c8_619, %c0_620, %c0_621] : memref<9x9x16x64xbf16, #tpu.memory_space<vmem>>, vector<1x1x16x64xbf16>
    %370 = vector.shape_cast %369 : vector<1x1x16x64xbf16> to vector<16x64xbf16>
    %c7_622 = arith.constant 7 : index
    %c6_623 = arith.constant 6 : index
    %c0_624 = arith.constant 0 : index
    %c0_625 = arith.constant 0 : index
    %371 = vector.load %arg18[%c7_622, %c6_623, %c0_624, %c0_625] : memref<9x9x16x64xbf16, #tpu.memory_space<vmem>>, vector<1x1x16x64xbf16>
    %372 = vector.shape_cast %371 : vector<1x1x16x64xbf16> to vector<16x64xbf16>
    %c7_626 = arith.constant 7 : index
    %c7_627 = arith.constant 7 : index
    %c0_628 = arith.constant 0 : index
    %c0_629 = arith.constant 0 : index
    %373 = vector.load %arg18[%c7_626, %c7_627, %c0_628, %c0_629] : memref<9x9x16x64xbf16, #tpu.memory_space<vmem>>, vector<1x1x16x64xbf16>
    %374 = vector.shape_cast %373 : vector<1x1x16x64xbf16> to vector<16x64xbf16>
    %c7_630 = arith.constant 7 : index
    %c8_631 = arith.constant 8 : index
    %c0_632 = arith.constant 0 : index
    %c0_633 = arith.constant 0 : index
    %375 = vector.load %arg18[%c7_630, %c8_631, %c0_632, %c0_633] : memref<9x9x16x64xbf16, #tpu.memory_space<vmem>>, vector<1x1x16x64xbf16>
    %376 = vector.shape_cast %375 : vector<1x1x16x64xbf16> to vector<16x64xbf16>
    %c8_634 = arith.constant 8 : index
    %c6_635 = arith.constant 6 : index
    %c0_636 = arith.constant 0 : index
    %c0_637 = arith.constant 0 : index
    %377 = vector.load %arg18[%c8_634, %c6_635, %c0_636, %c0_637] : memref<9x9x16x64xbf16, #tpu.memory_space<vmem>>, vector<1x1x16x64xbf16>
    %378 = vector.shape_cast %377 : vector<1x1x16x64xbf16> to vector<16x64xbf16>
    %c8_638 = arith.constant 8 : index
    %c7_639 = arith.constant 7 : index
    %c0_640 = arith.constant 0 : index
    %c0_641 = arith.constant 0 : index
    %379 = vector.load %arg18[%c8_638, %c7_639, %c0_640, %c0_641] : memref<9x9x16x64xbf16, #tpu.memory_space<vmem>>, vector<1x1x16x64xbf16>
    %380 = vector.shape_cast %379 : vector<1x1x16x64xbf16> to vector<16x64xbf16>
    %c8_642 = arith.constant 8 : index
    %c8_643 = arith.constant 8 : index
    %c0_644 = arith.constant 0 : index
    %c0_645 = arith.constant 0 : index
    %381 = vector.load %arg18[%c8_642, %c8_643, %c0_644, %c0_645] : memref<9x9x16x64xbf16, #tpu.memory_space<vmem>>, vector<1x1x16x64xbf16>
    %382 = vector.shape_cast %381 : vector<1x1x16x64xbf16> to vector<16x64xbf16>
    %383 = tpu.concatenate %366, %368, %370, %372, %374, %376, %378, %380, %382 in 1 : vector<16x64xbf16>, vector<16x64xbf16>, vector<16x64xbf16>, vector<16x64xbf16>, vector<16x64xbf16>, vector<16x64xbf16>, vector<16x64xbf16>, vector<16x64xbf16>, vector<16x64xbf16> -> vector<16x576xbf16>
    %384 = tpu.concatenate %98, %117, %136, %155, %174, %193, %212, %231, %250, %269, %288, %307, %326, %345, %364, %383 in 0 : vector<16x576xbf16>, vector<16x576xbf16>, vector<16x576xbf16>, vector<16x576xbf16>, vector<16x576xbf16>, vector<16x576xbf16>, vector<16x576xbf16>, vector<16x576xbf16>, vector<16x576xbf16>, vector<16x576xbf16>, vector<16x576xbf16>, vector<16x576xbf16>, vector<16x576xbf16>, vector<16x576xbf16>, vector<16x576xbf16>, vector<16x576xbf16> -> vector<256x576xbf16>
    %c0_646 = arith.constant 0 : index
    %c0_647 = arith.constant 0 : index
    %385 = vector.load %arg5[%c0_646, %c0_647] : memref<576x128xbf16, #tpu.memory_space<vmem>>, vector<576x128xbf16>
    %cst_648 = arith.constant dense<0.000000e+00> : vector<256x128xf32>
    %386 = tpu.matmul %384, %385, %cst_648 {dimension_numbers = #tpu.dot_dimension_numbers<[1], [0], [0], [1], [0, 0, 1, 1], [], []>} : vector<256x576xbf16>, vector<576x128xbf16>, vector<256x128xf32> -> vector<256x128xf32>
    %c0_649 = arith.constant 0 : index
    %c0_650 = arith.constant 0 : index
    %387 = vector.load %arg6[%c0_649, %c0_650] : memref<1x128xf32, #tpu.memory_space<vmem>>, vector<1x128xf32>
    %388 = vector.broadcast %387 : vector<1x128xf32> to vector<256x128xf32>
    %389 = arith.addf %386, %388 : vector<256x128xf32>
    %cst_651 = arith.constant 0.000000e+00 : f32
    %390 = vector.broadcast %cst_651 : f32 to vector<256x128xf32>
    %391 = arith.cmpf oge, %389, %390 : vector<256x128xf32>
    %cst_652 = arith.constant 2.000000e-01 : f32
    %392 = vector.broadcast %cst_652 : f32 to vector<256x128xf32>
    %393 = arith.mulf %392, %389 : vector<256x128xf32>
    %394 = arith.select %391, %389, %393 : vector<256x128xi1>, vector<256x128xf32>
    %395 = arith.truncf %394 : vector<256x128xf32> to vector<256x128xbf16>
    %396 = vector.extract_strided_slice %395 {offsets = [0, 0], sizes = [16, 128], strides = [1, 1]} : vector<256x128xbf16> to vector<16x128xbf16>
    %397 = vector.extract_strided_slice %395 {offsets = [16, 0], sizes = [16, 128], strides = [1, 1]} : vector<256x128xbf16> to vector<16x128xbf16>
    %398 = vector.extract_strided_slice %395 {offsets = [32, 0], sizes = [16, 128], strides = [1, 1]} : vector<256x128xbf16> to vector<16x128xbf16>
    %399 = vector.extract_strided_slice %395 {offsets = [64, 0], sizes = [16, 128], strides = [1, 1]} : vector<256x128xbf16> to vector<16x128xbf16>
    %400 = vector.extract_strided_slice %395 {offsets = [80, 0], sizes = [16, 128], strides = [1, 1]} : vector<256x128xbf16> to vector<16x128xbf16>
    %401 = vector.extract_strided_slice %395 {offsets = [96, 0], sizes = [16, 128], strides = [1, 1]} : vector<256x128xbf16> to vector<16x128xbf16>
    %402 = vector.extract_strided_slice %395 {offsets = [128, 0], sizes = [16, 128], strides = [1, 1]} : vector<256x128xbf16> to vector<16x128xbf16>
    %403 = vector.extract_strided_slice %395 {offsets = [144, 0], sizes = [16, 128], strides = [1, 1]} : vector<256x128xbf16> to vector<16x128xbf16>
    %404 = vector.extract_strided_slice %395 {offsets = [160, 0], sizes = [16, 128], strides = [1, 1]} : vector<256x128xbf16> to vector<16x128xbf16>
    %405 = tpu.concatenate %396, %397, %398, %399, %400, %401, %402, %403, %404 in 1 : vector<16x128xbf16>, vector<16x128xbf16>, vector<16x128xbf16>, vector<16x128xbf16>, vector<16x128xbf16>, vector<16x128xbf16>, vector<16x128xbf16>, vector<16x128xbf16>, vector<16x128xbf16> -> vector<16x1152xbf16>
    %406 = vector.extract_strided_slice %395 {offsets = [16, 0], sizes = [16, 128], strides = [1, 1]} : vector<256x128xbf16> to vector<16x128xbf16>
    %407 = vector.extract_strided_slice %395 {offsets = [32, 0], sizes = [16, 128], strides = [1, 1]} : vector<256x128xbf16> to vector<16x128xbf16>
    %408 = vector.extract_strided_slice %395 {offsets = [48, 0], sizes = [16, 128], strides = [1, 1]} : vector<256x128xbf16> to vector<16x128xbf16>
    %409 = vector.extract_strided_slice %395 {offsets = [80, 0], sizes = [16, 128], strides = [1, 1]} : vector<256x128xbf16> to vector<16x128xbf16>
    %410 = vector.extract_strided_slice %395 {offsets = [96, 0], sizes = [16, 128], strides = [1, 1]} : vector<256x128xbf16> to vector<16x128xbf16>
    %411 = vector.extract_strided_slice %395 {offsets = [112, 0], sizes = [16, 128], strides = [1, 1]} : vector<256x128xbf16> to vector<16x128xbf16>
    %412 = vector.extract_strided_slice %395 {offsets = [144, 0], sizes = [16, 128], strides = [1, 1]} : vector<256x128xbf16> to vector<16x128xbf16>
    %413 = vector.extract_strided_slice %395 {offsets = [160, 0], sizes = [16, 128], strides = [1, 1]} : vector<256x128xbf16> to vector<16x128xbf16>
    %414 = vector.extract_strided_slice %395 {offsets = [176, 0], sizes = [16, 128], strides = [1, 1]} : vector<256x128xbf16> to vector<16x128xbf16>
    %415 = tpu.concatenate %406, %407, %408, %409, %410, %411, %412, %413, %414 in 1 : vector<16x128xbf16>, vector<16x128xbf16>, vector<16x128xbf16>, vector<16x128xbf16>, vector<16x128xbf16>, vector<16x128xbf16>, vector<16x128xbf16>, vector<16x128xbf16>, vector<16x128xbf16> -> vector<16x1152xbf16>
    %416 = vector.extract_strided_slice %395 {offsets = [64, 0], sizes = [16, 128], strides = [1, 1]} : vector<256x128xbf16> to vector<16x128xbf16>
    %417 = vector.extract_strided_slice %395 {offsets = [80, 0], sizes = [16, 128], strides = [1, 1]} : vector<256x128xbf16> to vector<16x128xbf16>
    %418 = vector.extract_strided_slice %395 {offsets = [96, 0], sizes = [16, 128], strides = [1, 1]} : vector<256x128xbf16> to vector<16x128xbf16>
    %419 = vector.extract_strided_slice %395 {offsets = [128, 0], sizes = [16, 128], strides = [1, 1]} : vector<256x128xbf16> to vector<16x128xbf16>
    %420 = vector.extract_strided_slice %395 {offsets = [144, 0], sizes = [16, 128], strides = [1, 1]} : vector<256x128xbf16> to vector<16x128xbf16>
    %421 = vector.extract_strided_slice %395 {offsets = [160, 0], sizes = [16, 128], strides = [1, 1]} : vector<256x128xbf16> to vector<16x128xbf16>
    %422 = vector.extract_strided_slice %395 {offsets = [192, 0], sizes = [16, 128], strides = [1, 1]} : vector<256x128xbf16> to vector<16x128xbf16>
    %423 = vector.extract_strided_slice %395 {offsets = [208, 0], sizes = [16, 128], strides = [1, 1]} : vector<256x128xbf16> to vector<16x128xbf16>
    %424 = vector.extract_strided_slice %395 {offsets = [224, 0], sizes = [16, 128], strides = [1, 1]} : vector<256x128xbf16> to vector<16x128xbf16>
    %425 = tpu.concatenate %416, %417, %418, %419, %420, %421, %422, %423, %424 in 1 : vector<16x128xbf16>, vector<16x128xbf16>, vector<16x128xbf16>, vector<16x128xbf16>, vector<16x128xbf16>, vector<16x128xbf16>, vector<16x128xbf16>, vector<16x128xbf16>, vector<16x128xbf16> -> vector<16x1152xbf16>
    %426 = vector.extract_strided_slice %395 {offsets = [80, 0], sizes = [16, 128], strides = [1, 1]} : vector<256x128xbf16> to vector<16x128xbf16>
    %427 = vector.extract_strided_slice %395 {offsets = [96, 0], sizes = [16, 128], strides = [1, 1]} : vector<256x128xbf16> to vector<16x128xbf16>
    %428 = vector.extract_strided_slice %395 {offsets = [112, 0], sizes = [16, 128], strides = [1, 1]} : vector<256x128xbf16> to vector<16x128xbf16>
    %429 = vector.extract_strided_slice %395 {offsets = [144, 0], sizes = [16, 128], strides = [1, 1]} : vector<256x128xbf16> to vector<16x128xbf16>
    %430 = vector.extract_strided_slice %395 {offsets = [160, 0], sizes = [16, 128], strides = [1, 1]} : vector<256x128xbf16> to vector<16x128xbf16>
    %431 = vector.extract_strided_slice %395 {offsets = [176, 0], sizes = [16, 128], strides = [1, 1]} : vector<256x128xbf16> to vector<16x128xbf16>
    %432 = vector.extract_strided_slice %395 {offsets = [208, 0], sizes = [16, 128], strides = [1, 1]} : vector<256x128xbf16> to vector<16x128xbf16>
    %433 = vector.extract_strided_slice %395 {offsets = [224, 0], sizes = [16, 128], strides = [1, 1]} : vector<256x128xbf16> to vector<16x128xbf16>
    %434 = vector.extract_strided_slice %395 {offsets = [240, 0], sizes = [16, 128], strides = [1, 1]} : vector<256x128xbf16> to vector<16x128xbf16>
    %435 = tpu.concatenate %426, %427, %428, %429, %430, %431, %432, %433, %434 in 1 : vector<16x128xbf16>, vector<16x128xbf16>, vector<16x128xbf16>, vector<16x128xbf16>, vector<16x128xbf16>, vector<16x128xbf16>, vector<16x128xbf16>, vector<16x128xbf16>, vector<16x128xbf16> -> vector<16x1152xbf16>
    %436 = tpu.concatenate %405, %415, %425, %435 in 0 : vector<16x1152xbf16>, vector<16x1152xbf16>, vector<16x1152xbf16>, vector<16x1152xbf16> -> vector<64x1152xbf16>
    %c0_653 = arith.constant 0 : index
    %c0_654 = arith.constant 0 : index
    %437 = vector.load %arg7[%c0_653, %c0_654] : memref<1152x256xbf16, #tpu.memory_space<vmem>>, vector<1152x256xbf16>
    %cst_655 = arith.constant dense<0.000000e+00> : vector<64x256xf32>
    %438 = tpu.matmul %436, %437, %cst_655 {dimension_numbers = #tpu.dot_dimension_numbers<[1], [0], [0], [1], [0, 0, 1, 1], [], []>} : vector<64x1152xbf16>, vector<1152x256xbf16>, vector<64x256xf32> -> vector<64x256xf32>
    %c0_656 = arith.constant 0 : index
    %c0_657 = arith.constant 0 : index
    %439 = vector.load %arg8[%c0_656, %c0_657] : memref<1x256xf32, #tpu.memory_space<vmem>>, vector<1x256xf32>
    %440 = vector.broadcast %439 : vector<1x256xf32> to vector<64x256xf32>
    %441 = arith.addf %438, %440 : vector<64x256xf32>
    %cst_658 = arith.constant 0.000000e+00 : f32
    %442 = vector.broadcast %cst_658 : f32 to vector<64x256xf32>
    %443 = arith.cmpf oge, %441, %442 : vector<64x256xf32>
    %cst_659 = arith.constant 2.000000e-01 : f32
    %444 = vector.broadcast %cst_659 : f32 to vector<64x256xf32>
    %445 = arith.mulf %444, %441 : vector<64x256xf32>
    %446 = arith.select %443, %441, %445 : vector<64x256xi1>, vector<64x256xf32>
    %447 = arith.truncf %446 : vector<64x256xf32> to vector<64x256xbf16>
    %448 = vector.extract_strided_slice %447 {offsets = [0, 0], sizes = [16, 256], strides = [1, 1]} : vector<64x256xbf16> to vector<16x256xbf16>
    %449 = vector.extract_strided_slice %447 {offsets = [16, 0], sizes = [16, 256], strides = [1, 1]} : vector<64x256xbf16> to vector<16x256xbf16>
    %450 = vector.extract_strided_slice %447 {offsets = [32, 0], sizes = [16, 256], strides = [1, 1]} : vector<64x256xbf16> to vector<16x256xbf16>
    %451 = vector.extract_strided_slice %447 {offsets = [48, 0], sizes = [16, 256], strides = [1, 1]} : vector<64x256xbf16> to vector<16x256xbf16>
    %452 = tpu.concatenate %448, %449, %450, %451 in 1 : vector<16x256xbf16>, vector<16x256xbf16>, vector<16x256xbf16>, vector<16x256xbf16> -> vector<16x1024xbf16>
    %c0_660 = arith.constant 0 : index
    %c0_661 = arith.constant 0 : index
    %453 = vector.load %arg9[%c0_660, %c0_661] : memref<1024x512xbf16, #tpu.memory_space<vmem>>, vector<1024x512xbf16>
    %cst_662 = arith.constant dense<0.000000e+00> : vector<16x512xf32>
    %454 = tpu.matmul %452, %453, %cst_662 {dimension_numbers = #tpu.dot_dimension_numbers<[1], [0], [0], [1], [0, 0, 1, 1], [], []>} : vector<16x1024xbf16>, vector<1024x512xbf16>, vector<16x512xf32> -> vector<16x512xf32>
    %c0_663 = arith.constant 0 : index
    %c0_664 = arith.constant 0 : index
    %c0_665 = arith.constant 0 : index
    %455 = vector.load %arg2[%c0_663, %c0_664, %c0_665] : memref<1x96x36xbf16, #tpu.memory_space<vmem>>, vector<1x96x36xbf16>
    %456 = vector.shape_cast %455 : vector<1x96x36xbf16> to vector<96x36xbf16>
    %c0_666 = arith.constant 0 : index
    %c0_667 = arith.constant 0 : index
    %457 = vector.load %arg10[%c0_666, %c0_667] : memref<36x64xbf16, #tpu.memory_space<vmem>>, vector<36x64xbf16>
    %cst_668 = arith.constant dense<0.000000e+00> : vector<96x64xf32>
    %458 = tpu.matmul %456, %457, %cst_668 {dimension_numbers = #tpu.dot_dimension_numbers<[1], [0], [0], [1], [0, 0, 1, 1], [], []>} : vector<96x36xbf16>, vector<36x64xbf16>, vector<96x64xf32> -> vector<96x64xf32>
    %c0_669 = arith.constant 0 : index
    %c0_670 = arith.constant 0 : index
    %459 = vector.load %arg11[%c0_669, %c0_670] : memref<1x64xf32, #tpu.memory_space<vmem>>, vector<1x64xf32>
    %460 = vector.broadcast %459 : vector<1x64xf32> to vector<96x64xf32>
    %461 = arith.addf %458, %460 : vector<96x64xf32>
    %cst_671 = arith.constant 0.000000e+00 : f32
    %462 = vector.broadcast %cst_671 : f32 to vector<96x64xf32>
    %463 = arith.cmpf oge, %461, %462 : vector<96x64xf32>
    %cst_672 = arith.constant 2.000000e-01 : f32
    %464 = vector.broadcast %cst_672 : f32 to vector<96x64xf32>
    %465 = arith.mulf %464, %461 : vector<96x64xf32>
    %466 = arith.select %463, %461, %465 : vector<96x64xi1>, vector<96x64xf32>
    %467 = arith.truncf %466 : vector<96x64xf32> to vector<96x64xbf16>
    %468 = vector.shape_cast %467 : vector<96x64xbf16> to vector<6x16x64xbf16>
    %c1_673 = arith.constant 1 : index
    %c0_674 = arith.constant 0 : index
    %c0_675 = arith.constant 0 : index
    %c0_676 = arith.constant 0 : index
    %469 = vector.load %arg19[%c1_673, %c0_674, %c0_675, %c0_676] : memref<7x1x16x64xbf16, #tpu.memory_space<vmem>>, vector<6x1x16x64xbf16>
    %470 = vector.shape_cast %469 : vector<6x1x16x64xbf16> to vector<6x16x64xbf16>
    %471 = vector.shape_cast %468 : vector<6x16x64xbf16> to vector<6x1x16x64xbf16>
    tpu.vector_store %arg19[%c1_673, %c0_674, %c0_675, %c0_676], %471 {strides = array<i32>} : memref<7x1x16x64xbf16, #tpu.memory_space<vmem>>, vector<6x1x16x64xbf16>,
    %c0_677 = arith.constant 0 : index
    %c0_678 = arith.constant 0 : index
    %c0_679 = arith.constant 0 : index
    %c0_680 = arith.constant 0 : index
    %472 = vector.load %arg19[%c0_677, %c0_678, %c0_679, %c0_680] : memref<7x1x16x64xbf16, #tpu.memory_space<vmem>>, vector<1x1x16x64xbf16>
    %473 = vector.shape_cast %472 : vector<1x1x16x64xbf16> to vector<16x64xbf16>
    %c1_681 = arith.constant 1 : index
    %c0_682 = arith.constant 0 : index
    %c0_683 = arith.constant 0 : index
    %c0_684 = arith.constant 0 : index
    %474 = vector.load %arg19[%c1_681, %c0_682, %c0_683, %c0_684] : memref<7x1x16x64xbf16, #tpu.memory_space<vmem>>, vector<1x1x16x64xbf16>
    %475 = vector.shape_cast %474 : vector<1x1x16x64xbf16> to vector<16x64xbf16>
    %c2_685 = arith.constant 2 : index
    %c0_686 = arith.constant 0 : index
    %c0_687 = arith.constant 0 : index
    %c0_688 = arith.constant 0 : index
    %476 = vector.load %arg19[%c2_685, %c0_686, %c0_687, %c0_688] : memref<7x1x16x64xbf16, #tpu.memory_space<vmem>>, vector<1x1x16x64xbf16>
    %477 = vector.shape_cast %476 : vector<1x1x16x64xbf16> to vector<16x64xbf16>
    %478 = tpu.concatenate %473, %475, %477 in 1 : vector<16x64xbf16>, vector<16x64xbf16>, vector<16x64xbf16> -> vector<16x192xbf16>
    %c2_689 = arith.constant 2 : index
    %c0_690 = arith.constant 0 : index
    %c0_691 = arith.constant 0 : index
    %c0_692 = arith.constant 0 : index
    %479 = vector.load %arg19[%c2_689, %c0_690, %c0_691, %c0_692] : memref<7x1x16x64xbf16, #tpu.memory_space<vmem>>, vector<1x1x16x64xbf16>
    %480 = vector.shape_cast %479 : vector<1x1x16x64xbf16> to vector<16x64xbf16>
    %c3_693 = arith.constant 3 : index
    %c0_694 = arith.constant 0 : index
    %c0_695 = arith.constant 0 : index
    %c0_696 = arith.constant 0 : index
    %481 = vector.load %arg19[%c3_693, %c0_694, %c0_695, %c0_696] : memref<7x1x16x64xbf16, #tpu.memory_space<vmem>>, vector<1x1x16x64xbf16>
    %482 = vector.shape_cast %481 : vector<1x1x16x64xbf16> to vector<16x64xbf16>
    %c4_697 = arith.constant 4 : index
    %c0_698 = arith.constant 0 : index
    %c0_699 = arith.constant 0 : index
    %c0_700 = arith.constant 0 : index
    %483 = vector.load %arg19[%c4_697, %c0_698, %c0_699, %c0_700] : memref<7x1x16x64xbf16, #tpu.memory_space<vmem>>, vector<1x1x16x64xbf16>
    %484 = vector.shape_cast %483 : vector<1x1x16x64xbf16> to vector<16x64xbf16>
    %485 = tpu.concatenate %480, %482, %484 in 1 : vector<16x64xbf16>, vector<16x64xbf16>, vector<16x64xbf16> -> vector<16x192xbf16>
    %c4_701 = arith.constant 4 : index
    %c0_702 = arith.constant 0 : index
    %c0_703 = arith.constant 0 : index
    %c0_704 = arith.constant 0 : index
    %486 = vector.load %arg19[%c4_701, %c0_702, %c0_703, %c0_704] : memref<7x1x16x64xbf16, #tpu.memory_space<vmem>>, vector<1x1x16x64xbf16>
    %487 = vector.shape_cast %486 : vector<1x1x16x64xbf16> to vector<16x64xbf16>
    %c5_705 = arith.constant 5 : index
    %c0_706 = arith.constant 0 : index
    %c0_707 = arith.constant 0 : index
    %c0_708 = arith.constant 0 : index
    %488 = vector.load %arg19[%c5_705, %c0_706, %c0_707, %c0_708] : memref<7x1x16x64xbf16, #tpu.memory_space<vmem>>, vector<1x1x16x64xbf16>
    %489 = vector.shape_cast %488 : vector<1x1x16x64xbf16> to vector<16x64xbf16>
    %c6_709 = arith.constant 6 : index
    %c0_710 = arith.constant 0 : index
    %c0_711 = arith.constant 0 : index
    %c0_712 = arith.constant 0 : index
    %490 = vector.load %arg19[%c6_709, %c0_710, %c0_711, %c0_712] : memref<7x1x16x64xbf16, #tpu.memory_space<vmem>>, vector<1x1x16x64xbf16>
    %491 = vector.shape_cast %490 : vector<1x1x16x64xbf16> to vector<16x64xbf16>
    %492 = tpu.concatenate %487, %489, %491 in 1 : vector<16x64xbf16>, vector<16x64xbf16>, vector<16x64xbf16> -> vector<16x192xbf16>
    %493 = tpu.concatenate %478, %485, %492 in 0 : vector<16x192xbf16>, vector<16x192xbf16>, vector<16x192xbf16> -> vector<48x192xbf16>
    %c0_713 = arith.constant 0 : index
    %c0_714 = arith.constant 0 : index
    %494 = vector.load %arg12[%c0_713, %c0_714] : memref<192x256xbf16, #tpu.memory_space<vmem>>, vector<192x256xbf16>
    %cst_715 = arith.constant dense<0.000000e+00> : vector<48x256xf32>
    %495 = tpu.matmul %493, %494, %cst_715 {dimension_numbers = #tpu.dot_dimension_numbers<[1], [0], [0], [1], [0, 0, 1, 1], [], []>} : vector<48x192xbf16>, vector<192x256xbf16>, vector<48x256xf32> -> vector<48x256xf32>
    %c0_716 = arith.constant 0 : index
    %c0_717 = arith.constant 0 : index
    %496 = vector.load %arg13[%c0_716, %c0_717] : memref<1x256xf32, #tpu.memory_space<vmem>>, vector<1x256xf32>
    %497 = vector.broadcast %496 : vector<1x256xf32> to vector<48x256xf32>
    %498 = arith.addf %495, %497 : vector<48x256xf32>
    %cst_718 = arith.constant 0.000000e+00 : f32
    %499 = vector.broadcast %cst_718 : f32 to vector<48x256xf32>
    %500 = arith.cmpf oge, %498, %499 : vector<48x256xf32>
    %cst_719 = arith.constant 2.000000e-01 : f32
    %501 = vector.broadcast %cst_719 : f32 to vector<48x256xf32>
    %502 = arith.mulf %501, %498 : vector<48x256xf32>
    %503 = arith.select %500, %498, %502 : vector<48x256xi1>, vector<48x256xf32>
    %504 = arith.truncf %503 : vector<48x256xf32> to vector<48x256xbf16>
    %505 = vector.extract_strided_slice %504 {offsets = [0, 0], sizes = [16, 256], strides = [1, 1]} : vector<48x256xbf16> to vector<16x256xbf16>
    %506 = vector.extract_strided_slice %504 {offsets = [16, 0], sizes = [16, 256], strides = [1, 1]} : vector<48x256xbf16> to vector<16x256xbf16>
    %507 = vector.extract_strided_slice %504 {offsets = [32, 0], sizes = [16, 256], strides = [1, 1]} : vector<48x256xbf16> to vector<16x256xbf16>
    %508 = tpu.concatenate %505, %506, %507 in 1 : vector<16x256xbf16>, vector<16x256xbf16>, vector<16x256xbf16> -> vector<16x768xbf16>
    %c0_720 = arith.constant 0 : index
    %c0_721 = arith.constant 0 : index
    %509 = vector.load %arg14[%c0_720, %c0_721] : memref<768x512xbf16, #tpu.memory_space<vmem>>, vector<768x512xbf16>
    %cst_722 = arith.constant dense<0.000000e+00> : vector<16x512xf32>
    %510 = tpu.matmul %508, %509, %cst_722 {dimension_numbers = #tpu.dot_dimension_numbers<[1], [0], [0], [1], [0, 0, 1, 1], [], []>} : vector<16x768xbf16>, vector<768x512xbf16>, vector<16x512xf32> -> vector<16x512xf32>
    %511 = arith.truncf %454 : vector<16x512xf32> to vector<16x512xbf16>
    %c0_723 = arith.constant 0 : index
    %c0_724 = arith.constant 0 : index
    %c0_725 = arith.constant 0 : index
    %512 = vector.load %arg15[%c0_723, %c0_724, %c0_725] : memref<2x512x256xbf16, #tpu.memory_space<vmem>>, vector<1x512x256xbf16>
    %513 = vector.shape_cast %512 : vector<1x512x256xbf16> to vector<512x256xbf16>
    %cst_726 = arith.constant dense<0.000000e+00> : vector<16x256xf32>
    %514 = tpu.matmul %511, %513, %cst_726 {dimension_numbers = #tpu.dot_dimension_numbers<[1], [0], [0], [1], [0, 0, 1, 1], [], []>} : vector<16x512xbf16>, vector<512x256xbf16>, vector<16x256xf32> -> vector<16x256xf32>
    %515 = arith.truncf %510 : vector<16x512xf32> to vector<16x512xbf16>
    %c1_727 = arith.constant 1 : index
    %c0_728 = arith.constant 0 : index
    %c0_729 = arith.constant 0 : index
    %516 = vector.load %arg15[%c1_727, %c0_728, %c0_729] : memref<2x512x256xbf16, #tpu.memory_space<vmem>>, vector<1x512x256xbf16>
    %517 = vector.shape_cast %516 : vector<1x512x256xbf16> to vector<512x256xbf16>
    %cst_730 = arith.constant dense<0.000000e+00> : vector<16x256xf32>
    %518 = tpu.matmul %515, %517, %cst_730 {dimension_numbers = #tpu.dot_dimension_numbers<[1], [0], [0], [1], [0, 0, 1, 1], [], []>} : vector<16x512xbf16>, vector<512x256xbf16>, vector<16x256xf32> -> vector<16x256xf32>
    %519 = arith.addf %514, %518 : vector<16x256xf32>
    %c0_731 = arith.constant 0 : index
    %c0_732 = arith.constant 0 : index
    %520 = vector.load %arg16[%c0_731, %c0_732] : memref<1x256xf32, #tpu.memory_space<vmem>>, vector<1x256xf32>
    %521 = vector.broadcast %520 : vector<1x256xf32> to vector<16x256xf32>
    %522 = arith.addf %519, %521 : vector<16x256xf32>
    %c0_733 = arith.constant 0 : index
    %c0_734 = arith.constant 0 : index
    %c0_735 = arith.constant 0 : index
    %523 = vector.load %arg17[%c0_733, %c0_734, %c0_735] : memref<1x16x256xf32, #tpu.memory_space<vmem>>, vector<1x16x256xf32>
    %524 = vector.shape_cast %523 : vector<1x16x256xf32> to vector<16x256xf32>
    %525 = vector.shape_cast %522 : vector<16x256xf32> to vector<1x16x256xf32>
    tpu.vector_store %arg17[%c0_733, %c0_734, %c0_735], %525 {strides = array<i32>} : memref<1x16x256xf32, #tpu.memory_space<vmem>>, vector<1x16x256xf32>,
    return
  }
  func.func @transform_0(%arg0: i32) -> (i32, i32, i32) {
    %c0_i32 = arith.constant 0 : i32
    %c0_i32_0 = arith.constant 0 : i32
    %c0_i32_1 = arith.constant 0 : i32
    return %arg0, %c0_i32, %c0_i32_0 : i32, i32, i32
  }
  func.func @transform_1(%arg0: i32) -> (i32, i32, i32) {
    %c0_i32 = arith.constant 0 : i32
    %c0_i32_0 = arith.constant 0 : i32
    %c0_i32_1 = arith.constant 0 : i32
    return %arg0, %c0_i32, %c0_i32_0 : i32, i32, i32
  }
  func.func @transform_2(%arg0: i32) -> (i32, i32) {
    %c0_i32 = arith.constant 0 : i32
    %c0_i32_0 = arith.constant 0 : i32
    %c0_i32_1 = arith.constant 0 : i32
    return %c0_i32, %c0_i32_0 : i32, i32
  }
  func.func @transform_3(%arg0: i32) -> (i32, i32) {
    %c0_i32 = arith.constant 0 : i32
    %c0_i32_0 = arith.constant 0 : i32
    %c0_i32_1 = arith.constant 0 : i32
    return %c0_i32, %c0_i32_0 : i32, i32
  }
  func.func @transform_4(%arg0: i32) -> (i32, i32) {
    %c0_i32 = arith.constant 0 : i32
    %c0_i32_0 = arith.constant 0 : i32
    %c0_i32_1 = arith.constant 0 : i32
    return %c0_i32, %c0_i32_0 : i32, i32
  }
  func.func @transform_5(%arg0: i32) -> (i32, i32) {
    %c0_i32 = arith.constant 0 : i32
    %c0_i32_0 = arith.constant 0 : i32
    %c0_i32_1 = arith.constant 0 : i32
    return %c0_i32, %c0_i32_0 : i32, i32
  }
  func.func @transform_6(%arg0: i32) -> (i32, i32) {
    %c0_i32 = arith.constant 0 : i32
    %c0_i32_0 = arith.constant 0 : i32
    %c0_i32_1 = arith.constant 0 : i32
    return %c0_i32, %c0_i32_0 : i32, i32
  }
  func.func @transform_7(%arg0: i32) -> (i32, i32) {
    %c0_i32 = arith.constant 0 : i32
    %c0_i32_0 = arith.constant 0 : i32
    %c0_i32_1 = arith.constant 0 : i32
    return %c0_i32, %c0_i32_0 : i32, i32
  }
  func.func @transform_8(%arg0: i32) -> (i32, i32) {
    %c0_i32 = arith.constant 0 : i32
    %c0_i32_0 = arith.constant 0 : i32
    %c0_i32_1 = arith.constant 0 : i32
    return %c0_i32, %c0_i32_0 : i32, i32
  }
  func.func @transform_9(%arg0: i32) -> (i32, i32) {
    %c0_i32 = arith.constant 0 : i32
    %c0_i32_0 = arith.constant 0 : i32
    %c0_i32_1 = arith.constant 0 : i32
    return %c0_i32, %c0_i32_0 : i32, i32
  }
  func.func @transform_10(%arg0: i32) -> (i32, i32) {
    %c0_i32 = arith.constant 0 : i32
    %c0_i32_0 = arith.constant 0 : i32
    %c0_i32_1 = arith.constant 0 : i32
    return %c0_i32, %c0_i32_0 : i32, i32
  }
  func.func @transform_11(%arg0: i32) -> (i32, i32) {
    %c0_i32 = arith.constant 0 : i32
    %c0_i32_0 = arith.constant 0 : i32
    %c0_i32_1 = arith.constant 0 : i32
    return %c0_i32, %c0_i32_0 : i32, i32
  }
  func.func @transform_12(%arg0: i32) -> (i32, i32) {
    %c0_i32 = arith.constant 0 : i32
    %c0_i32_0 = arith.constant 0 : i32
    %c0_i32_1 = arith.constant 0 : i32
    return %c0_i32, %c0_i32_0 : i32, i32
  }
  func.func @transform_13(%arg0: i32) -> (i32, i32) {
    %c0_i32 = arith.constant 0 : i32
    %c0_i32_0 = arith.constant 0 : i32
    %c0_i32_1 = arith.constant 0 : i32
    return %c0_i32, %c0_i32_0 : i32, i32
  }
  func.func @transform_14(%arg0: i32) -> (i32, i32, i32) {
    %c0_i32 = arith.constant 0 : i32
    %c0_i32_0 = arith.constant 0 : i32
    %c0_i32_1 = arith.constant 0 : i32
    %c0_i32_2 = arith.constant 0 : i32
    return %c0_i32, %c0_i32_0, %c0_i32_1 : i32, i32, i32
  }
  func.func @transform_15(%arg0: i32) -> (i32, i32) {
    %c0_i32 = arith.constant 0 : i32
    %c0_i32_0 = arith.constant 0 : i32
    %c0_i32_1 = arith.constant 0 : i32
    return %c0_i32, %c0_i32_0 : i32, i32
  }
  func.func @transform_16(%arg0: i32) -> (i32, i32, i32) {
    %c0_i32 = arith.constant 0 : i32
    %c0_i32_0 = arith.constant 0 : i32
    %c0_i32_1 = arith.constant 0 : i32
    return %arg0, %c0_i32, %c0_i32_0 : i32, i32, i32
  }
}

</mosaic_0001>

<bundles_post_ra>
// kernel: mfcc_encoder_two_forward.1
= control target key start
LH: loop header
LB: loop body
LE: loop exit
PB: predicated region body
PF: predicated region fallthrough
CT: control target
= control target key end

     0   :  { %s16743_s0 = inlined_call_operand.vmem [shape: bf16[1,896,9], index: 0, kind: input, shape index: {}]   ;;  %s16744_s1 = inlined_call_operand.vmem [shape: bf16[1,96,36], index: 1, kind: input, shape index: {}]   ;;  %s16745_s2 = inlined_call_operand.vmem [shape: bf16[9,64], index: 2, kind: input, shape index: {}]   ;;  %s16746_s3 = inlined_call_operand.vmem [shape: f32[1,64], index: 3, kind: input, shape index: {}]   ;;  %s16747_s4 = inlined_call_operand.hbm [shape: bf16[576,128], index: 4, kind: input, shape index: {}]   ;;  %s16748_s5 = inlined_call_operand.hbm [shape: f32[1,128], index: 5, kind: input, shape index: {}]   ;;  %s16749_s6 = inlined_call_operand.vmem [shape: bf16[1152,256], index: 6, kind: input, shape index: {}]   ;;  %s16750_s7 = inlined_call_operand.vmem [shape: f32[1,256], index: 7, kind: input, shape index: {}]   ;;  %s16751_s8 = inlined_call_operand.vmem [shape: bf16[1024,512], index: 8, kind: input, shape index: {}]   ;;  %s16752_s9 = inlined_call_operand.vmem [shape: bf16[36,64], index: 9, kind: input, shape index: {}]   ;;  %s16753_s10 = inlined_call_operand.hbm [shape: f32[1,64], index: 10, kind: input, shape index: {}]   ;;  %s16754_s11 = inlined_call_operand.vmem [shape: bf16[192,256], index: 11, kind: input, shape index: {}]   ;;  %s16755_s12 = inlined_call_operand.hbm [shape: f32[1,256], index: 12, kind: input, shape index: {}]   ;;  %s16756_s13 = inlined_call_operand.vmem [shape: bf16[768,512], index: 13, kind: input, shape index: {}]   ;;  %s16757_s14 = inlined_call_operand.hbm [shape: bf16[2,512,256], index: 14, kind: input, shape index: {}]   ;;  %s16758_s15 = inlined_call_operand.hbm [shape: f32[1,256], index: 15, kind: input, shape index: {}]   ;;  %s16759_s16 = inlined_call_operand.vmem [shape: f32[1,16,256], index: 16, kind: output, shape index: {}]  }
   0x1   :  { %16763 = sst [smem:[#allocation23_spill]] %s16743_s0 }
   0x2   :  { %21 = vsyncpa [#allocation5], 0 }
   0x3   :  { %22 = vsyncpa [#allocation7], 0 }
   0x4   :  { %23 = vsyncpa [#allocation10], 0 }
   0x5   :  { %24 = vsyncpa [#allocation13], 0  ;;  %s13356_s21 = smov [#allocation6]   ;;  %s13357_s23 = smov [#allocation9]  }
   0x6   :  { %s51_s22 = sshll.u32 %s13356_s21, 4  ;;  %s81_s24 = sshll.u32 %s13357_s23, 4  ;;  %s52_s22 = int_to_ptr.vmem [resolvable:$true] %s51_s22  ;;  %s82_s24 = int_to_ptr.vmem [resolvable:$true] %s81_s24 }
   0x7   :  { %s13236_s25 = scalar_lea.vmem %s52_s22, 16  ;;  %s13240_s26 = scalar_lea.vmem %s52_s22, 32 }
   0x8   :  { %p13237_p0 = scmp.ne.s32.totalorder %s52_s22, %s13236_s25  ;;  %p13241_p1 = scmp.lt.s32.totalorder %s52_s22, %s52_s22 }
   0x9   :  { %p13242_p2 = scmp.lt.s32.totalorder %s13240_s26, %s13236_s25 }
   0xb   :  { %p13243_p3 = por %p13242_p2, %p13241_p1 }
   0xd   :  { %p13244_p4 = pnand %p13243_p3, %p13237_p0 }
   0xf   :  { %13247 = shalt.err (!%p13244_p4)
}
  0x10   :  { %54 = dma.hbm_to_vmem [thread:$0]  %s16748_s5, 16, %s52_s22, [#allocation7]  }
  0x11   :  { %s13256_s29 = scalar_lea.vmem %s82_s24, 32  ;;  %p13261_p6 = scmp.lt.s32.totalorder %s82_s24, %s82_s24 }
  0x12   :  { %p13257_p5 = scmp.ne.s32.totalorder %s82_s24, %s13256_s29  ;;  %p13262_p7 = scmp.lt.s32.totalorder %s13256_s29, %s13256_s29 }
  0x14   :  { %p13263_p8 = por %p13262_p7, %p13261_p6 }
  0x16   :  { %p13264_p9 = pnand %p13263_p8, %p13257_p5 }
  0x18   :  { %13267 = shalt.err (!%p13264_p9)
}
  0x19   :  { %84 = dma.hbm_to_vmem [thread:$0]  %s16755_s12, 32, %s82_s24, [#allocation10]  }
  0x1a   :  { %s13358_s17 = smov [#allocation4]  }
  0x1b   :  { %s38_s18 = sshll.u32 %s13358_s17, 4  ;;  %s39_s18 = int_to_ptr.vmem [resolvable:$true] %s38_s18 }
  0x1c   :  { %s13276_s19 = scalar_lea.vmem %s39_s18, 4608  ;;  %p13281_p11 = scmp.lt.s32.totalorder %s39_s18, %s39_s18 }
  0x1d   :  { %p13277_p10 = scmp.ne.s32.totalorder %s39_s18, %s13276_s19  ;;  %p13282_p12 = scmp.lt.s32.totalorder %s13276_s19, %s13276_s19 }
  0x1f   :  { %p13283_p13 = por %p13282_p12, %p13281_p11 }
  0x21   :  { %p13284_p0 = pnand %p13283_p13, %p13277_p10 }
  0x23   :  { %13287 = shalt.err (!%p13284_p0)
}
  0x24   :  { %s13359_s5 = smov 64   ;;  %s13360_s20 = smov 4  }
  0x25   :  { %44 = dma.hbm_to_vmem [thread:$0]  %s16747_s4, 4608, %s39_s18, [#allocation5], %s13359_s5, %s13359_s5, %s13360_s20  }
  0x26   :  { %s13361_s23 = smov [#allocation8]   ;;  %s13362_s24 = smov [#allocation11]  }
  0x27   :  { %s69_s12 = sshll.u32 %s13361_s23, 4  ;;  %s92_s25 = sshll.u32 %s13362_s24, 4  ;;  %s70_s12 = int_to_ptr.vmem [resolvable:$true] %s69_s12  ;;  %s93_s25 = int_to_ptr.vmem [resolvable:$true] %s92_s25 }
  0x28   :  { %s13296_s26 = scalar_lea.vmem %s70_s12, 16  ;;  %s13300_s27 = scalar_lea.vmem %s70_s12, 32 }
  0x29   :  { %p13297_p1 = scmp.ne.s32.totalorder %s70_s12, %s13296_s26  ;;  %p13301_p2 = scmp.lt.s32.totalorder %s70_s12, %s70_s12 }
  0x2a   :  { %p13302_p3 = scmp.lt.s32.totalorder %s13300_s27, %s13296_s26 }
  0x2c   :  { %p13303_p4 = por %p13302_p3, %p13301_p2 }
  0x2e   :  { %p13304_p5 = pnand %p13303_p4, %p13297_p1 }
  0x30   :  { %13307 = shalt.err (!%p13304_p5)
}
  0x31   :  { %72 = dma.hbm_to_vmem [thread:$0]  %s16753_s10, 16, %s70_s12, [#allocation7]  }
  0x32   :  { %s13316_s30 = scalar_lea.vmem %s93_s25, 16384  ;;  %p13321_p7 = scmp.lt.s32.totalorder %s93_s25, %s93_s25 }
  0x33   :  { %p13317_p6 = scmp.ne.s32.totalorder %s93_s25, %s13316_s30  ;;  %p13322_p8 = scmp.lt.s32.totalorder %s13316_s30, %s13316_s30 }
  0x35   :  { %p13323_p9 = por %p13322_p8, %p13321_p7 }
  0x37   :  { %p13324_p10 = pnand %p13323_p9, %p13317_p6 }
  0x39   :  { %13327 = shalt.err (!%p13324_p10)
}
  0x3a   :  { %s13363_s4 = smov 128   ;;  %s13364_s0 = smov 8  }
  0x3b   :  { %98 = dma.hbm_to_vmem [thread:$0]  %s16757_s14, 16384, %s93_s25, [#allocation10], %s13363_s4, %s13363_s4, %s13364_s0  }
  0x3c   :  { %s13365_s19 = smov [#allocation12]  }
  0x3d   :  { %s105_s20 = sshll.u32 %s13365_s19, 4  ;;  %s106_s20 = int_to_ptr.vmem [resolvable:$true] %s105_s20 }
  0x3e   :  { %s13336_s21 = scalar_lea.vmem %s106_s20, 32  ;;  %p13341_p12 = scmp.lt.s32.totalorder %s106_s20, %s106_s20 }
  0x3f   :  { %p13337_p11 = scmp.ne.s32.totalorder %s106_s20, %s13336_s21  ;;  %p13342_p13 = scmp.lt.s32.totalorder %s13336_s21, %s13336_s21 }
  0x41   :  { %p13343_p0 = por %p13342_p13, %p13341_p12 }
  0x43   :  { %p13344_p1 = pnand %p13343_p0, %p13337_p11 }
  0x45   :  { %13347 = shalt.err (!%p13344_p1)
}
  0x46   :  { %108 = dma.hbm_to_vmem [thread:$0]  %s16758_s15, 32, %s106_s20, [#allocation13]  }
  0x47   :  { %13348 = dma.done.wait [#allocation5], 4608  }
  0x48   :  { %13349 = vsyncadd [#allocation5], 4294962688 }
  0x49   :  { %13350 = dma.done.wait [#allocation7], 32  }
  0x4a   :  { %13351 = vsyncadd [#allocation7], 4294967264 }
  0x4b   :  { %13352 = dma.done.wait [#allocation10], 16416  }
  0x4c   :  { %13353 = vsyncadd [#allocation10], 4294950880 }
  0x4d   :  { %13354 = dma.done.wait [#allocation13], 32  }
  0x4e   :  { %13355 = vsyncadd [#allocation13], 4294967264  ;;  %vm764_vm0 = vcmask 1043456   ;;  %vm765_vm1 = vcmask 1044480   ;;  %v13366_v0 = vmov 65535   ;;  %vm595_vm2 = vcmask 72704  }
  0x4f   :  { %v766_v1 = vsel %vm764_vm0, 4294967295, %v13366_v0  ;;  %v11910_v3 = vld [vmem:[%s16745_s2] sm:$0x1f]   ;;  %s16764_s24 = sld [smem:[#allocation23_spill]]  ;;  %vm128_vm3 = vcmask 519168   ;;  %v16761_v25 = vmov 0  }
  0x50   :  { %v767_v2 = vsel %vm765_vm1, %v766_v1, 0  ;;  %167 = vst.msk [vmem:[#allocation2 + $0x48] sm:$0xf] %vm128_vm3, %v16761_v25  ;;  %168 = vst.msk [vmem:[#allocation2 + $0x4c] sm:$0xf] %vm128_vm3, %v16761_v25  ;;  %v11974_v39 = vld [vmem:[#allocation4 + $0x118] sm:$0xff]  }
  0x51   :  { %v769_v5 = vand.u32 %v11910_v3, %v767_v2  ;;  %129 = vst.msk [vmem:[#allocation2] sm:$0xf] %vm128_vm3, %v16761_v25  ;;  %130 = vst.msk [vmem:[#allocation2 + $0x4] sm:$0xf] %vm128_vm3, %v16761_v25  ;;  %v11975_v40 = vld [vmem:[#allocation4 + $0x110] sm:$0xff]   ;;  %v11978_v43 = vld [vmem:[#allocation4 + $0x108] sm:$0xff]  }
  0x52   :  { %131 = vst.msk [vmem:[#allocation2 + $0x8] sm:$0xf] %vm128_vm3, %v16761_v25  ;;  %132 = vst.msk [vmem:[#allocation2 + $0xc] sm:$0xf] %vm128_vm3, %v16761_v25  ;;  %v11981_v44 = vld [vmem:[#allocation4 + $0x100] sm:$0xff]   ;;  %v11990_v57 = vld [vmem:[#allocation4 + $0x78] sm:$0xff]  }
  0x53   :  { %11725 = vmatprep.subr.bf16.mxu0 %v769_v5  ;;  %133 = vst.msk [vmem:[#allocation2 + $0x10] sm:$0xf] %vm128_vm3, %v16761_v25  ;;  %134 = vst.msk [vmem:[#allocation2 + $0x14] sm:$0xf] %vm128_vm3, %v16761_v25  ;;  %v11992_v58 = vld [vmem:[#allocation4 + $0x38] sm:$0xff]   ;;  %11472 = vmatprep.subr.bf16.mxu1 %v11990_v57  ;;  %v11993_v59 = vld [vmem:[#allocation4 + $0x70] sm:$0xff]  }
  0x54   :  { %11726 = vmatpush3.bf16.msra.mxu0 %v769_v5  ;;  %135 = vst.msk [vmem:[#allocation2 + $0x18] sm:$0xf] %vm128_vm3, %v16761_v25  ;;  %136 = vst.msk [vmem:[#allocation2 + $0x1c] sm:$0xf] %vm128_vm3, %v16761_v25  ;;  %11473 = vmatpush3.bf16.msra.mxu1 %v11992_v58  ;;  %v11995_v60 = vld [vmem:[#allocation4 + $0x30] sm:$0xff]   ;;  %v11996_v63 = vld [vmem:[#allocation4 + $0x68] sm:$0xff]  }
  0x55   :  { %v11911_v4 = vld [vmem:[%s16764_s24] sm:$0xff]   ;;  %v11912_v6 = vld [vmem:[%s16764_s24 + $0x8] sm:$0xff]   ;;  %v11913_v7 = vld [vmem:[%s16764_s24 + $0x10] sm:$0xff]   ;;  %137 = vst.msk [vmem:[#allocation2 + $0x20] sm:$0xf] %vm128_vm3, %v16761_v25  ;;  %11839 = vmatprep.subr.bf16.mxu0 %v11974_v39  ;;  %11474 = vmatprep.subr.bf16.mxu1 %v11993_v59  ;;  %vm2230_vm4 = vcmask 523264  }
  0x56   :  { %11727 = vmatprep.mubr.msk.bf16.mxu0 %vm595_vm2, %v11911_v4  ;;  %v11914_v8 = vld [vmem:[%s16764_s24 + $0x18] sm:$0xff]   ;;  %v11915_v9 = vld [vmem:[%s16764_s24 + $0x20] sm:$0xff]   ;;  %v11916_v10 = vld [vmem:[%s16764_s24 + $0x28] sm:$0xff]   ;;  %138 = vst.msk [vmem:[#allocation2 + $0x24] sm:$0xf] %vm128_vm3, %v16761_v25 }
  0x57   :  { %11728 = vmatmul.mubr.msk.bf16.vlgmr.msra.gmra.mxu0 %vm595_vm2, %v11912_v6  ;;  %v11917_v11 = vld [vmem:[%s16764_s24 + $0x30] sm:$0xff]   ;;  %v11918_v12 = vld [vmem:[%s16764_s24 + $0x38] sm:$0xff]   ;;  %v11919_v13 = vld [vmem:[%s16764_s24 + $0x40] sm:$0xff]   ;;  %139 = vst.msk [vmem:[#allocation2 + $0x28] sm:$0xf] %vm128_vm3, %v16761_v25 }
  0x58   :  { %11731 = vmatprep.mubr.msk.bf16.mxu0 %vm595_vm2, %v11913_v7  ;;  %v11920_v14 = vld [vmem:[%s16764_s24 + $0x48] sm:$0xff]   ;;  %v11921_v15 = vld [vmem:[%s16764_s24 + $0x50] sm:$0xff]   ;;  %v11922_v16 = vld [vmem:[%s16764_s24 + $0x58] sm:$0xff]   ;;  %140 = vst.msk [vmem:[#allocation2 + $0x2c] sm:$0xf] %vm128_vm3, %v16761_v25  ;;  %11840 = vmatpush3.bf16.msra.mxu0 %v11974_v39 }
  0x59   :  { %v11923_v17 = vld [vmem:[%s16764_s24 + $0x60] sm:$0xff]   ;;  %v11924_v18 = vld [vmem:[%s16764_s24 + $0x68] sm:$0xff]   ;;  %v11925_v19 = vld [vmem:[%s16764_s24 + $0x70] sm:$0xff]   ;;  %141 = vst.msk [vmem:[#allocation2 + $0x30] sm:$0xf] %vm128_vm3, %v16761_v25  ;;  %11841 = vmatprep.subr.bf16.mxu0 %v11975_v40  ;;  %11475 = vmatpush3.bf16.msra.mxu1 %v11995_v60 }
  0x5a   :  { %v11926_v20 = vld [vmem:[%s16764_s24 + $0x78] sm:$0xff]   ;;  %v11927_v21 = vld [vmem:[%s16764_s24 + $0x80] sm:$0xff]   ;;  %v11928_v22 = vld [vmem:[%s16764_s24 + $0x88] sm:$0xff]   ;;  %142 = vst.msk [vmem:[#allocation2 + $0x34] sm:$0xf] %vm128_vm3, %v16761_v25  ;;  %11476 = vmatprep.subr.bf16.mxu1 %v11996_v63 }
  0x5b   :  { %v11929_v23 = vld [vmem:[%s16764_s24 + $0x90] sm:$0xff]   ;;  %v11930_v24 = vld [vmem:[%s16764_s24 + $0x98] sm:$0xff]   ;;  %143 = vst.msk [vmem:[#allocation2 + $0x38] sm:$0xf] %vm128_vm3, %v16761_v25  ;;  %144 = vst.msk [vmem:[#allocation2 + $0x3c] sm:$0xf] %vm128_vm3, %v16761_v25 }
  0x5c   :  { %145 = vst.msk [vmem:[#allocation2 + $0x40] sm:$0xf] %vm128_vm3, %v16761_v25  ;;  %146 = vst.msk [vmem:[#allocation2 + $0x44] sm:$0xf] %vm128_vm3, %v16761_v25  ;;  %v11931_v26 = vld [vmem:[%s16764_s24 + $0xa0] sm:$0xff]   ;;  %v11932_v27 = vld [vmem:[%s16764_s24 + $0xa8] sm:$0xff]   ;;  %11842 = vmatpush3.bf16.msra.mxu0 %v11975_v40 }
  0x5d   :  { %148 = vst.msk [vmem:[#allocation2 + $0x240] sm:$0xf] %vm128_vm3, %v16761_v25  ;;  %149 = vst.msk [vmem:[#allocation2 + $0x244] sm:$0xf] %vm128_vm3, %v16761_v25  ;;  %v11963_v28 = vld [vmem:[#allocation2 + $0x48] sm:$0xff]   ;;  %v11933_v29 = vld [vmem:[%s16764_s24 + $0xb0] sm:$0xff]   ;;  %11843 = vmatprep.subr.bf16.mxu0 %v11978_v43 }
  0x5e   :  { %150 = vst.msk [vmem:[#allocation2 + $0x248] sm:$0xf] %vm128_vm3, %v16761_v25  ;;  %151 = vst.msk [vmem:[#allocation2 + $0x24c] sm:$0xf] %vm128_vm3, %v16761_v25  ;;  %2199 = vrot.lane.b32.xlu0 %v11963_v28, %s13359_s5  ;;  %v11966_v30 = vld [vmem:[#allocation2 + $0x8] sm:$0xff]   ;;  %v11935_v32 = vld [vmem:[%s16764_s24 + $0xc0] sm:$0xff]  }
  0x5f   :  { %11732 = vmatmul.mubr.msk.bf16.gmra.mxu0 %vm595_vm2, %v11914_v8  ;;  %152 = vst.msk [vmem:[#allocation2 + $0x250] sm:$0xf] %vm128_vm3, %v16761_v25  ;;  %153 = vst.msk [vmem:[#allocation2 + $0x254] sm:$0xf] %vm128_vm3, %v16761_v25  ;;  %v11934_v31 = vld [vmem:[%s16764_s24 + $0xb8] sm:$0xff]   ;;  %v11936_v33 = vld [vmem:[%s16764_s24 + $0xc8] sm:$0xff]  }
  0x60   :  { %11735 = vmatprep.mubr.msk.bf16.mxu0 %vm595_vm2, %v11915_v9  ;;  %154 = vst.msk [vmem:[#allocation2 + $0x258] sm:$0xf] %vm128_vm3, %v16761_v25  ;;  %155 = vst.msk [vmem:[#allocation2 + $0x25c] sm:$0xf] %vm128_vm3, %v16761_v25  ;;  %v11937_v34 = vld [vmem:[%s16764_s24 + $0xd0] sm:$0xff]   ;;  %v11938_v35 = vld [vmem:[%s16764_s24 + $0xd8] sm:$0xff]   ;;  %11844 = vmatpush3.bf16.msra.mxu0 %v11978_v43 }
  0x61   :  { %156 = vst.msk [vmem:[#allocation2 + $0x260] sm:$0xf] %vm128_vm3, %v16761_v25  ;;  %157 = vst.msk [vmem:[#allocation2 + $0x264] sm:$0xf] %vm128_vm3, %v16761_v25  ;;  %v11939_v36 = vld [vmem:[%s16764_s24 + $0xe0] sm:$0xff]   ;;  %v11940_v37 = vld [vmem:[%s16764_s24 + $0xe8] sm:$0xff]   ;;  %11845 = vmatprep.subr.bf16.mxu0 %v11981_v44 }
  0x62   :  { %158 = vst.msk [vmem:[#allocation2 + $0x268] sm:$0xf] %vm128_vm3, %v16761_v25  ;;  %159 = vst.msk [vmem:[#allocation2 + $0x26c] sm:$0xf] %vm128_vm3, %v16761_v25  ;;  %2187 = vrot.lane.b32.xlu0 %v11966_v30, %s13359_s5  ;;  %v11941_v38 = vld [vmem:[%s16764_s24 + $0xf0] sm:$0xff]   ;;  %v11942_v41 = vld [vmem:[%s16764_s24 + $0xf8] sm:$0xff]  }
  0x63   :  { %160 = vst.msk [vmem:[#allocation2 + $0x270] sm:$0xf] %vm128_vm3, %v16761_v25  ;;  %161 = vst.msk [vmem:[#allocation2 + $0x274] sm:$0xf] %vm128_vm3, %v16761_v25  ;;  %v11943_v42 = vld [vmem:[%s16764_s24 + $0x100] sm:$0xff]   ;;  %v11944_v45 = vld [vmem:[%s16764_s24 + $0x108] sm:$0xff]  }
  0x64   :  { %162 = vst.msk [vmem:[#allocation2 + $0x278] sm:$0xf] %vm128_vm3, %v16761_v25  ;;  %163 = vst.msk [vmem:[#allocation2 + $0x27c] sm:$0xf] %vm128_vm3, %v16761_v25  ;;  %11846 = vmatpush3.bf16.msra.mxu0 %v11981_v44  ;;  %v11945_v46 = vld [vmem:[%s16764_s24 + $0x110] sm:$0xff]   ;;  %v11946_v47 = vld [vmem:[%s16764_s24 + $0x118] sm:$0xff]  }
  0x65   :  { %164 = vst.msk [vmem:[#allocation2 + $0x280] sm:$0xf] %vm128_vm3, %v16761_v25  ;;  %165 = vst.msk [vmem:[#allocation2 + $0x284] sm:$0xf] %vm128_vm3, %v16761_v25  ;;  %v11947_v48 = vld [vmem:[%s16764_s24 + $0x120] sm:$0xff]   ;;  %v11948_v49 = vld [vmem:[%s16764_s24 + $0x128] sm:$0xff]  }
  0x66   :  { %170 = vst.msk [vmem:[#allocation2 + $0x90] sm:$0xf] %vm128_vm3, %v16761_v25  ;;  %171 = vst.msk [vmem:[#allocation2 + $0x94] sm:$0xf] %vm128_vm3, %v16761_v25  ;;  %v11949_v50 = vld [vmem:[%s16764_s24 + $0x130] sm:$0xff]   ;;  %v11950_v51 = vld [vmem:[%s16764_s24 + $0x138] sm:$0xff]  }
  0x67   :  { %11736 = vmatmul.mubr.msk.bf16.gmra.mxu0 %vm595_vm2, %v11916_v10  ;;  %173 = vst.msk [vmem:[#allocation2 + $0xd8] sm:$0xf] %vm128_vm3, %v16761_v25  ;;  %174 = vst.msk [vmem:[#allocation2 + $0xdc] sm:$0xf] %vm128_vm3, %v16761_v25  ;;  %v11951_v52 = vld [vmem:[%s16764_s24 + $0x140] sm:$0xff]   ;;  %v11952_v53 = vld [vmem:[%s16764_s24 + $0x148] sm:$0xff]  }
  0x68   :  { %11739 = vmatprep.mubr.msk.bf16.mxu0 %vm595_vm2, %v11917_v11  ;;  %176 = vst.msk [vmem:[#allocation2 + $0x120] sm:$0xf] %vm128_vm3, %v16761_v25  ;;  %177 = vst.msk [vmem:[#allocation2 + $0x124] sm:$0xf] %vm128_vm3, %v16761_v25  ;;  %v11953_v54 = vld [vmem:[%s16764_s24 + $0x150] sm:$0xff]   ;;  %v11954_v55 = vld [vmem:[%s16764_s24 + $0x158] sm:$0xff]  }
  0x69   :  { %179 = vst.msk [vmem:[#allocation2 + $0x168] sm:$0xf] %vm128_vm3, %v16761_v25  ;;  %180 = vst.msk [vmem:[#allocation2 + $0x16c] sm:$0xf] %vm128_vm3, %v16761_v25  ;;  %v11955_v56 = vld [vmem:[%s16764_s24 + $0x160] sm:$0xff]   ;;  %v11956_v61 = vld [vmem:[%s16764_s24 + $0x168] sm:$0xff]  }
  0x6a   :  { %182 = vst.msk [vmem:[#allocation2 + $0x1b0] sm:$0xf] %vm128_vm3, %v16761_v25  ;;  %183 = vst.msk [vmem:[#allocation2 + $0x1b4] sm:$0xf] %vm128_vm3, %v16761_v25  ;;  %v11957_v62 = vld [vmem:[%s16764_s24 + $0x170] sm:$0xff]   ;;  %v11997_v0 = vld [vmem:[#allocation4 + $0x28] sm:$0xff]  }
  0x6b   :  { %185 = vst.msk [vmem:[#allocation2 + $0x1f8] sm:$0xf] %vm128_vm3, %v16761_v25  ;;  %186 = vst.msk [vmem:[#allocation2 + $0x1fc] sm:$0xf] %vm128_vm3, %v16761_v25  ;;  %11477 = vmatpush3.bf16.msra.mxu1 %v11997_v0  ;;  %v11998_v1 = vld [vmem:[#allocation4 + $0x60] sm:$0xff]   ;;  %v11958_v3 = vld [vmem:[%s16764_s24 + $0x178] sm:$0xff]  }
  0x6c   :  { %187 = vst.msk [vmem:[#allocation3] sm:$0xf] %vm128_vm3, %v16761_v25  ;;  %188 = vst.msk [vmem:[#allocation3 + $0x4] sm:$0xf] %vm128_vm3, %v16761_v25  ;;  %v11999_v2 = vld [vmem:[#allocation4 + $0x20] sm:$0xff]   ;;  %11478 = vmatprep.subr.bf16.mxu1 %v11998_v1  ;;  %v11959_v4 = vld [vmem:[%s16764_s24 + $0x180] sm:$0xff]  }
  0x6d   :  { %v12000_v5 = vld [vmem:[#allocation4 + $0x58] sm:$0xff]   ;;  %v12004_v7 = vld [vmem:[#allocation4 + $0x50] sm:$0xff]   ;;  %v11961_v10 = vld [vmem:[%s16764_s24 + $0x190] sm:$0xff]  }
  0x6e   :  { %v12002_v6 = vld [vmem:[#allocation4 + $0x18] sm:$0xff]   ;;  %v12005_v8 = vld [vmem:[#allocation4 + $0x10] sm:$0xff]   ;;  %v12006_v11 = vld [vmem:[#allocation4 + $0x48] sm:$0xff]  }
  0x6f   :  { %11740 = vmatmul.mubr.msk.bf16.gmra.mxu0 %vm595_vm2, %v11918_v12  ;;  %11479 = vmatpush3.bf16.msra.mxu1 %v11999_v2  ;;  %v11960_v9 = vld [vmem:[%s16764_s24 + $0x188] sm:$0xff]   ;;  %v13787_v12 = vld [vmem:[%s16746_s3] ss:$0 sm:$0xff] }
  0x70   :  { %11743 = vmatprep.mubr.msk.bf16.mxu0 %vm595_vm2, %v11919_v13  ;;  %11480 = vmatprep.subr.bf16.mxu1 %v12000_v5  ;;  %v12008_v13 = vld [vmem:[#allocation4 + $0x8] sm:$0xff]  }
  0x73   :  { %11481 = vmatpush3.bf16.msra.mxu1 %v12002_v6 }
  0x74   :  { %11482 = vmatprep.subr.bf16.mxu1 %v12004_v7 }
  0x77   :  { %11744 = vmatmul.mubr.msk.bf16.gmra.mxu0 %vm595_vm2, %v11920_v14  ;;  %11483 = vmatpush3.bf16.msra.mxu1 %v12005_v8 }
  0x78   :  { %11747 = vmatprep.mubr.msk.bf16.mxu0 %vm595_vm2, %v11921_v15  ;;  %11484 = vmatprep.subr.bf16.mxu1 %v12006_v11  ;;  %v12010_v15 = vld [vmem:[#allocation4 + $0x40] sm:$0xff]  }
  0x7b   :  { %11485 = vmatpush3.bf16.msra.mxu1 %v12008_v13 }
  0x7c   :  { %11486 = vmatprep.subr.bf16.mxu1 %v12010_v15  ;;  %v11968_v15 = vld [vmem:[#allocation2 + $0x18] sm:$0xff]  }
  0x7f   :  { %11748 = vmatmul.mubr.msk.bf16.gmra.mxu0 %vm595_vm2, %v11922_v16 }
  0x80   :  { %11751 = vmatprep.mubr.msk.bf16.mxu0 %vm595_vm2, %v11923_v17  ;;  %v12011_v17 = vld [vmem:[#allocation4] sm:$0xff]  }
  0x81   :  { %11487 = vmatpush3.bf16.msra.mxu1 %v12011_v17 }
  0x87   :  { %11752 = vmatmul.mubr.msk.bf16.gmra.mxu0 %vm595_vm2, %v11924_v18 }
  0x88   :  { %11755 = vmatprep.mubr.msk.bf16.mxu0 %vm595_vm2, %v11925_v19  ;;  %v12012_v19 = vld [vmem:[#allocation2 + $0x10] sm:$0xff]  }
  0x8f   :  { %11756 = vmatmul.mubr.msk.bf16.gmra.mxu0 %vm595_vm2, %v11926_v20 }
  0x90   :  { %11759 = vmatprep.mubr.msk.bf16.mxu0 %vm595_vm2, %v11927_v21  ;;  %v11962_v21 = vld [vmem:[%s16764_s24 + $0x198] sm:$0xff]  }
  0x97   :  { %11760 = vmatmul.mubr.msk.bf16.gmra.mxu0 %vm595_vm2, %v11928_v22  ;;  %v12013_v22 = vld [vmem:[#allocation2] sm:$0xff]  }
  0x98   :  { %11763 = vmatprep.mubr.msk.bf16.mxu0 %vm595_vm2, %v11929_v23 }
  0x9f   :  { %11764 = vmatmul.mubr.msk.bf16.gmra.mxu0 %vm595_vm2, %v11930_v24 }
  0xa0   :  { %11767 = vmatprep.mubr.msk.bf16.mxu0 %vm595_vm2, %v11931_v26  ;;  %v11964_v26 = vld [vmem:[%s16764_s24 + $0x1a0] sm:$0xff]  }
  0xa7   :  { %11768 = vmatmul.mubr.msk.bf16.gmra.mxu0 %vm595_vm2, %v11932_v27 }
  0xa8   :  { %11771 = vmatprep.mubr.msk.bf16.mxu0 %vm595_vm2, %v11933_v29 }
  0xaf   :  { %11772 = vmatmul.mubr.msk.bf16.gmra.mxu0 %vm595_vm2, %v11934_v31 }
  0xb0   :  { %11775 = vmatprep.mubr.msk.bf16.mxu0 %vm595_vm2, %v11935_v32 }
  0xb7   :  { %11776 = vmatmul.mubr.msk.bf16.gmra.mxu0 %vm595_vm2, %v11936_v33 }
  0xb8   :  { %11779 = vmatprep.mubr.msk.bf16.mxu0 %vm595_vm2, %v11937_v34 }
  0xbf   :  { %11780 = vmatmul.mubr.msk.bf16.gmra.mxu0 %vm595_vm2, %v11938_v35 }
  0xc0   :  { %11783 = vmatprep.mubr.msk.bf16.mxu0 %vm595_vm2, %v11939_v36 }
  0xc7   :  { %11784 = vmatmul.mubr.msk.bf16.gmra.mxu0 %vm595_vm2, %v11940_v37 }
  0xc8   :  { %11787 = vmatprep.mubr.msk.bf16.mxu0 %vm595_vm2, %v11941_v38 }
  0xcf   :  { %11788 = vmatmul.mubr.msk.bf16.gmra.mxu0 %vm595_vm2, %v11942_v41 }
  0xd0   :  { %11791 = vmatprep.mubr.msk.bf16.mxu0 %vm595_vm2, %v11943_v42  ;;  %v2200_v14 = vpop.permute.xlu0 %2199 }
  0xd1   :  { %v2237_v28 = vsel %vm2230_vm4, %v12012_v19, %v2200_v14 }
  0xd2   :  { %3412 = vmatprep.mubr.bf16.mxu1 %v2237_v28 }
  0xd4   :  { %v2188_v27 = vpop.permute.xlu0 %2187 }
  0xd5   :  { %v2233_v30 = vsel %vm2230_vm4, %v12013_v22, %v2188_v27 }
  0xd6   :  { %3413 = vmatmul.mubr.bf16.vlgmr.msra.gmra.mxu1 %v2233_v30 }
  0xd7   :  { %11792 = vmatmul.mubr.msk.bf16.gmra.mxu0 %vm595_vm2, %v11944_v45 }
  0xd8   :  { %11795 = vmatprep.mubr.msk.bf16.mxu0 %vm595_vm2, %v11945_v46  ;;  %v11965_v46 = vld [vmem:[%s16764_s24 + $0x1a8] sm:$0xff]  }
  0xdf   :  { %11796 = vmatmul.mubr.msk.bf16.gmra.mxu0 %vm595_vm2, %v11946_v47 }
  0xe0   :  { %11799 = vmatprep.mubr.msk.bf16.mxu0 %vm595_vm2, %v11947_v48 }
  0xe7   :  { %11800 = vmatmul.mubr.msk.bf16.gmra.mxu0 %vm595_vm2, %v11948_v49 }
  0xe8   :  { %11803 = vmatprep.mubr.msk.bf16.mxu0 %vm595_vm2, %v11949_v50  ;;  %v11976_v50 = vld [vmem:[%s16764_s24 + $0x1b0] sm:$0xff]  }
  0xef   :  { %11804 = vmatmul.mubr.msk.bf16.gmra.mxu0 %vm595_vm2, %v11950_v51 }
  0xf0   :  { %11807 = vmatprep.mubr.msk.bf16.mxu0 %vm595_vm2, %v11951_v52 }
  0xf7   :  { %11808 = vmatmul.mubr.msk.bf16.gmra.mxu0 %vm595_vm2, %v11952_v53 }
  0xf8   :  { %11811 = vmatprep.mubr.msk.bf16.mxu0 %vm595_vm2, %v11953_v54 }
  0xff   :  { %11812 = vmatmul.mubr.msk.bf16.gmra.mxu0 %vm595_vm2, %v11954_v55 }
 0x100   :  { %11815 = vmatprep.mubr.msk.bf16.mxu0 %vm595_vm2, %v11955_v56 }
 0x107   :  { %11816 = vmatmul.mubr.msk.bf16.gmra.mxu0 %vm595_vm2, %v11956_v61 }
 0x108   :  { %11819 = vmatprep.mubr.msk.bf16.mxu0 %vm595_vm2, %v11957_v62 }
 0x10f   :  { %11820 = vmatmul.mubr.msk.bf16.gmra.mxu0 %vm595_vm2, %v11958_v3 }
 0x110   :  { %11823 = vmatprep.mubr.msk.bf16.mxu0 %vm595_vm2, %v11959_v4  ;;  %v11977_v4 = vld [vmem:[%s16764_s24 + $0x1b8] sm:$0xff]  }
 0x117   :  { %v11729_v16 = vpop.f32.mrf.mxu0  ;;  %11824 = vmatmul.mubr.msk.bf16.gmra.mxu0 %vm595_vm2, %v11960_v9 }
 0x118   :  { %v814_v18 = vadd.f32 %v11729_v16, %v13787_v12  ;;  %11827 = vmatprep.mubr.msk.bf16.mxu0 %vm595_vm2, %v11961_v10 }
 0x119   :  { %v805_v20 = vpop.f32.mrf.mxu0 }
 0x11a   :  { %vm1254_vm5 = vcmp.ge.f32.partialorder %v814_v18, 0.0  ;;  %v1366_v23 = vmul.f32 0.2, %v814_v18  ;;  %v806_v24 = vadd.f32 %v13787_v12, %v805_v20 }
 0x11b   :  { %v11730_v29 = vpop.f32.mrf.mxu0 }
 0x11c   :  { %v1478_v31 = vsel %vm1254_vm5, %v814_v18, %v1366_v23  ;;  %vm1252_vm6 = vcmp.ge.f32.partialorder %v806_v24, 0.0  ;;  %v1364_v32 = vmul.f32 0.2, %v806_v24  ;;  %v817_v33 = vadd.f32 %v11730_v29, %v13787_v12 }
 0x11d   :  { %v11293_v34 = vpack.c.bf16 %v1478_v31, %v1478_v31  ;;  %v808_v35 = vpop.f32.mrf.mxu0 }
 0x11e   :  { %v1476_v36 = vsel %vm1252_vm6, %v806_v24, %v1364_v32  ;;  %vm1255_vm7 = vcmp.ge.f32.partialorder %v817_v33, 0.0  ;;  %v1367_v37 = vmul.f32 0.2, %v817_v33  ;;  %v809_v38 = vadd.f32 %v13787_v12, %v808_v35 }
 0x11f   :  { %1703 = vst.msk [vmem:[#allocation2 + $0x58] sm:$0xf] %vm128_vm3, %v11293_v34  ;;  %v11291_v39 = vpack.c.bf16 %v1476_v36, %v1476_v36  ;;  %v11733_v40 = vpop.f32.mrf.mxu0  ;;  %11828 = vmatmul.mubr.msk.bf16.gmra.mxu0 %vm595_vm2, %v11962_v21  ;;  %v11970_v21 = vld [vmem:[#allocation2 + $0x28] sm:$0xff]  }
 0x120   :  { %v1479_v41 = vsel %vm1255_vm7, %v817_v33, %v1367_v37  ;;  %vm1253_vm8 = vcmp.ge.f32.partialorder %v809_v38, 0.0  ;;  %v1365_v42 = vmul.f32 0.2, %v809_v38  ;;  %v830_v43 = vadd.f32 %v11733_v40, %v13787_v12  ;;  %11831 = vmatprep.mubr.msk.bf16.mxu0 %vm595_vm2, %v11964_v26 }
 0x121   :  { %1701 = vst.msk [vmem:[#allocation2 + $0x50] sm:$0xf] %vm128_vm3, %v11291_v39  ;;  %v11294_v44 = vpack.c.bf16 %v1479_v41, %v1479_v41  ;;  %v821_v45 = vpop.f32.mrf.mxu0  ;;  %v11972_v39 = vld [vmem:[#allocation2 + $0x38] sm:$0xff]  }
 0x122   :  { %v1477_v47 = vsel %vm1253_vm8, %v809_v38, %v1365_v42  ;;  %vm1258_vm9 = vcmp.ge.f32.partialorder %v830_v43, 0.0  ;;  %v1370_v48 = vmul.f32 0.2, %v830_v43  ;;  %v822_v49 = vadd.f32 %v13787_v12, %v821_v45 }
 0x123   :  { %1704 = vst.msk [vmem:[#allocation2 + $0x5c] sm:$0xf] %vm128_vm3, %v11294_v44  ;;  %v11292_v51 = vpack.c.bf16 %v1477_v47, %v1477_v47  ;;  %v11734_v52 = vpop.f32.mrf.mxu0 }
 0x124   :  { %v1482_v53 = vsel %vm1258_vm9, %v830_v43, %v1370_v48  ;;  %vm1256_vm10 = vcmp.ge.f32.partialorder %v822_v49, 0.0  ;;  %v1368_v54 = vmul.f32 0.2, %v822_v49  ;;  %v833_v55 = vadd.f32 %v11734_v52, %v13787_v12 }
 0x125   :  { %1702 = vst.msk [vmem:[#allocation2 + $0x54] sm:$0xf] %vm128_vm3, %v11292_v51  ;;  %v11297_v56 = vpack.c.bf16 %v1482_v53, %v1482_v53  ;;  %v824_v57 = vpop.f32.mrf.mxu0 }
 0x126   :  { %v1480_v58 = vsel %vm1256_vm10, %v822_v49, %v1368_v54  ;;  %vm1259_vm11 = vcmp.ge.f32.partialorder %v833_v55, 0.0  ;;  %v1371_v59 = vmul.f32 0.2, %v833_v55  ;;  %v825_v60 = vadd.f32 %v13787_v12, %v824_v57 }
 0x127   :  { %1707 = vst.msk [vmem:[#allocation2 + $0x68] sm:$0xf] %vm128_vm3, %v11297_v56  ;;  %v11295_v61 = vpack.c.bf16 %v1480_v58, %v1480_v58  ;;  %v11737_v62 = vpop.f32.mrf.mxu0  ;;  %11832 = vmatmul.mubr.msk.bf16.gmra.mxu0 %vm595_vm2, %v11965_v46 }
 0x128   :  { %v1483_v63 = vsel %vm1259_vm11, %v833_v55, %v1371_v59  ;;  %vm1257_vm12 = vcmp.ge.f32.partialorder %v825_v60, 0.0  ;;  %v1369_v0 = vmul.f32 0.2, %v825_v60  ;;  %v846_v1 = vadd.f32 %v11737_v62, %v13787_v12  ;;  %11835 = vmatprep.mubr.msk.bf16.mxu0 %vm595_vm2, %v11976_v50 }
 0x129   :  { %1705 = vst.msk [vmem:[#allocation2 + $0x60] sm:$0xf] %vm128_vm3, %v11295_v61  ;;  %v11298_v2 = vpack.c.bf16 %v1483_v63, %v1483_v63  ;;  %v837_v3 = vpop.f32.mrf.mxu0  ;;  %v11973_v61 = vld [vmem:[#allocation2 + $0xd8] sm:$0xff]  }
 0x12a   :  { %v1481_v5 = vsel %vm1257_vm12, %v825_v60, %v1369_v0  ;;  %vm1262_vm13 = vcmp.ge.f32.partialorder %v846_v1, 0.0  ;;  %v1374_v6 = vmul.f32 0.2, %v846_v1  ;;  %v838_v7 = vadd.f32 %v13787_v12, %v837_v3  ;;  %v11967_v8 = vld [vmem:[#allocation2 + $0x58] sm:$0xff]  }
 0x12b   :  { %1708 = vst.msk [vmem:[#allocation2 + $0x6c] sm:$0xf] %vm128_vm3, %v11298_v2  ;;  %v11296_v9 = vpack.c.bf16 %v1481_v5, %v1481_v5  ;;  %v11738_v10 = vpop.f32.mrf.mxu0  ;;  %2211 = vrot.lane.b32.xlu1 %v11967_v8, %s13359_s5 }
 0x12c   :  { %v1486_v11 = vsel %vm1262_vm13, %v846_v1, %v1374_v6  ;;  %vm1260_vm14 = vcmp.ge.f32.partialorder %v838_v7, 0.0  ;;  %v1372_v13 = vmul.f32 0.2, %v838_v7  ;;  %v849_v14 = vadd.f32 %v11738_v10, %v13787_v12 }
 0x12d   :  { %1706 = vst.msk [vmem:[#allocation2 + $0x64] sm:$0xf] %vm128_vm3, %v11296_v9  ;;  %v11301_v16 = vpack.c.bf16 %v1486_v11, %v1486_v11  ;;  %v840_v17 = vpop.f32.mrf.mxu0 }
 0x12e   :  { %v1484_v18 = vsel %vm1260_vm14, %v838_v7, %v1372_v13  ;;  %vm1263_vm15 = vcmp.ge.f32.partialorder %v849_v14, 0.0  ;;  %v1375_v19 = vmul.f32 0.2, %v849_v14  ;;  %v841_v20 = vadd.f32 %v13787_v12, %v840_v17 }
 0x12f   :  { %1711 = vst.msk [vmem:[#allocation2 + $0x78] sm:$0xf] %vm128_vm3, %v11301_v16  ;;  %v11299_v22 = vpack.c.bf16 %v1484_v18, %v1484_v18  ;;  %v11741_v23 = vpop.f32.mrf.mxu0  ;;  %11836 = vmatmul.mubr.msk.bf16.gmra.mxu0 %vm595_vm2, %v11977_v4  ;;  %2270 = vrot.lane.b32.xlu1 %v11968_v15, %s13359_s5 }
 0x130   :  { %v1487_v24 = vsel %vm1263_vm15, %v849_v14, %v1375_v19  ;;  %vm1261_vm0 = vcmp.ge.f32.partialorder %v841_v20, 0.0  ;;  %v1373_v26 = vmul.f32 0.2, %v841_v20  ;;  %v862_v27 = vadd.f32 %v11741_v23, %v13787_v12 }
 0x131   :  { %1709 = vst.msk [vmem:[#allocation2 + $0x70] sm:$0xf] %vm128_vm3, %v11299_v22  ;;  %v11302_v28 = vpack.c.bf16 %v1487_v24, %v1487_v24  ;;  %v853_v29 = vpop.f32.mrf.mxu0 }
 0x132   :  { %v1485_v30 = vsel %vm1261_vm0, %v841_v20, %v1373_v26  ;;  %vm1266_vm1 = vcmp.ge.f32.partialorder %v862_v27, 0.0  ;;  %v1378_v31 = vmul.f32 0.2, %v862_v27  ;;  %v854_v32 = vadd.f32 %v13787_v12, %v853_v29  ;;  %v11969_v33 = vld [vmem:[#allocation2 + $0x68] sm:$0xff]  }
 0x133   :  { %1712 = vst.msk [vmem:[#allocation2 + $0x7c] sm:$0xf] %vm128_vm3, %v11302_v28  ;;  %v11300_v34 = vpack.c.bf16 %v1485_v30, %v1485_v30  ;;  %v11742_v35 = vpop.f32.mrf.mxu0  ;;  %2287 = vrot.lane.b32.xlu0 %v11969_v33, %s13359_s5  ;;  %2338 = vrot.lane.b32.xlu1 %v11970_v21, %s13359_s5 }
 0x134   :  { %v1490_v36 = vsel %vm1266_vm1, %v862_v27, %v1378_v31  ;;  %vm1264_vm2 = vcmp.ge.f32.partialorder %v854_v32, 0.0  ;;  %v1376_v37 = vmul.f32 0.2, %v854_v32  ;;  %v865_v38 = vadd.f32 %v11742_v35, %v13787_v12 }
 0x135   :  { %1710 = vst.msk [vmem:[#allocation2 + $0x74] sm:$0xf] %vm128_vm3, %v11300_v34  ;;  %v11305_v40 = vpack.c.bf16 %v1490_v36, %v1490_v36  ;;  %v856_v41 = vpop.f32.mrf.mxu0 }
 0x136   :  { %v1488_v42 = vsel %vm1264_vm2, %v854_v32, %v1376_v37  ;;  %vm1267_vm5 = vcmp.ge.f32.partialorder %v865_v38, 0.0  ;;  %v1379_v43 = vmul.f32 0.2, %v865_v38  ;;  %v857_v44 = vadd.f32 %v13787_v12, %v856_v41 }
 0x137   :  { %1715 = vst.msk [vmem:[#allocation2 + $0x88] sm:$0xf] %vm128_vm3, %v11305_v40  ;;  %v11303_v45 = vpack.c.bf16 %v1488_v42, %v1488_v42  ;;  %v11745_v46 = vpop.f32.mrf.mxu0  ;;  %2406 = vrot.lane.b32.xlu1 %v11972_v39, %s13359_s5 }
 0x138   :  { %v1491_v47 = vsel %vm1267_vm5, %v865_v38, %v1379_v43  ;;  %vm1265_vm6 = vcmp.ge.f32.partialorder %v857_v44, 0.0  ;;  %v1377_v48 = vmul.f32 0.2, %v857_v44  ;;  %v878_v49 = vadd.f32 %v11745_v46, %v13787_v12 }
 0x139   :  { %1713 = vst.msk [vmem:[#allocation2 + $0x80] sm:$0xf] %vm128_vm3, %v11303_v45  ;;  %v11306_v50 = vpack.c.bf16 %v1491_v47, %v1491_v47  ;;  %v869_v51 = vpop.f32.mrf.mxu0 }
 0x13a   :  { %v1489_v52 = vsel %vm1265_vm6, %v857_v44, %v1377_v48  ;;  %vm1270_vm7 = vcmp.ge.f32.partialorder %v878_v49, 0.0  ;;  %v1382_v53 = vmul.f32 0.2, %v878_v49  ;;  %v870_v54 = vadd.f32 %v13787_v12, %v869_v51  ;;  %v11971_v55 = vld [vmem:[#allocation2 + $0x78] sm:$0xff]  }
 0x13b   :  { %1716 = vst.msk [vmem:[#allocation2 + $0x8c] sm:$0xf] %vm128_vm3, %v11306_v50  ;;  %v11304_v56 = vpack.c.bf16 %v1489_v52, %v1489_v52  ;;  %v11746_v57 = vpop.f32.mrf.mxu0  ;;  %2355 = vrot.lane.b32.xlu0 %v11971_v55, %s13359_s5 }
 0x13c   :  { %v1494_v58 = vsel %vm1270_vm7, %v878_v49, %v1382_v53  ;;  %vm1268_vm8 = vcmp.ge.f32.partialorder %v870_v54, 0.0  ;;  %v1380_v59 = vmul.f32 0.2, %v870_v54  ;;  %v881_v60 = vadd.f32 %v11746_v57, %v13787_v12 }
 0x13d   :  { %1714 = vst.msk [vmem:[#allocation2 + $0x84] sm:$0xf] %vm128_vm3, %v11304_v56  ;;  %v11309_v62 = vpack.c.bf16 %v1494_v58, %v1494_v58  ;;  %v872_v63 = vpop.f32.mrf.mxu0 }
 0x13e   :  { %v1492_v0 = vsel %vm1268_vm8, %v870_v54, %v1380_v59  ;;  %vm1271_vm9 = vcmp.ge.f32.partialorder %v881_v60, 0.0  ;;  %v1383_v1 = vmul.f32 0.2, %v881_v60  ;;  %v873_v2 = vadd.f32 %v13787_v12, %v872_v63 }
 0x13f   :  { %1776 = vst.msk [vmem:[#allocation2 + $0xa0] sm:$0xf] %vm128_vm3, %v11309_v62  ;;  %v11307_v3 = vpack.c.bf16 %v1492_v0, %v1492_v0  ;;  %v11749_v4 = vpop.f32.mrf.mxu0  ;;  %2470 = vrot.lane.b32.xlu0 %v11973_v61, %s13359_s5 }
 0x140   :  { %v1495_v5 = vsel %vm1271_vm9, %v881_v60, %v1383_v1  ;;  %vm1269_vm10 = vcmp.ge.f32.partialorder %v873_v2, 0.0  ;;  %v1381_v6 = vmul.f32 0.2, %v873_v2  ;;  %v894_v7 = vadd.f32 %v11749_v4, %v13787_v12 }
 0x141   :  { %1774 = vst.msk [vmem:[#allocation2 + $0x98] sm:$0xf] %vm128_vm3, %v11307_v3  ;;  %v11310_v8 = vpack.c.bf16 %v1495_v5, %v1495_v5  ;;  %v885_v9 = vpop.f32.mrf.mxu0 }
 0x142   :  { %v1493_v10 = vsel %vm1269_vm10, %v873_v2, %v1381_v6  ;;  %vm1274_vm11 = vcmp.ge.f32.partialorder %v894_v7, 0.0  ;;  %v1386_v11 = vmul.f32 0.2, %v894_v7  ;;  %v886_v13 = vadd.f32 %v13787_v12, %v885_v9 }
 0x143   :  { %1777 = vst.msk [vmem:[#allocation2 + $0xa4] sm:$0xf] %vm128_vm3, %v11310_v8  ;;  %v11308_v14 = vpack.c.bf16 %v1493_v10, %v1493_v10  ;;  %v11750_v15 = vpop.f32.mrf.mxu0 }
 0x144   :  { %v1498_v16 = vsel %vm1274_vm11, %v894_v7, %v1386_v11  ;;  %vm1272_vm12 = vcmp.ge.f32.partialorder %v886_v13, 0.0  ;;  %v1384_v17 = vmul.f32 0.2, %v886_v13  ;;  %v897_v18 = vadd.f32 %v11750_v15, %v13787_v12 }
 0x145   :  { %1775 = vst.msk [vmem:[#allocation2 + $0x9c] sm:$0xf] %vm128_vm3, %v11308_v14  ;;  %v11313_v19 = vpack.c.bf16 %v1498_v16, %v1498_v16  ;;  %v888_v20 = vpop.f32.mrf.mxu0 }
 0x146   :  { %v1496_v21 = vsel %vm1272_vm12, %v886_v13, %v1384_v17  ;;  %vm1275_vm13 = vcmp.ge.f32.partialorder %v897_v18, 0.0  ;;  %v1387_v22 = vmul.f32 0.2, %v897_v18  ;;  %v889_v23 = vadd.f32 %v13787_v12, %v888_v20 }
 0x147   :  { %1780 = vst.msk [vmem:[#allocation2 + $0xb0] sm:$0xf] %vm128_vm3, %v11313_v19  ;;  %v11311_v24 = vpack.c.bf16 %v1496_v21, %v1496_v21  ;;  %v11753_v26 = vpop.f32.mrf.mxu0 }
 0x148   :  { %v1499_v27 = vsel %vm1275_vm13, %v897_v18, %v1387_v22  ;;  %vm1273_vm14 = vcmp.ge.f32.partialorder %v889_v23, 0.0  ;;  %v1385_v28 = vmul.f32 0.2, %v889_v23  ;;  %v910_v29 = vadd.f32 %v11753_v26, %v13787_v12 }
 0x149   :  { %1778 = vst.msk [vmem:[#allocation2 + $0xa8] sm:$0xf] %vm128_vm3, %v11311_v24  ;;  %v11314_v30 = vpack.c.bf16 %v1499_v27, %v1499_v27  ;;  %v901_v31 = vpop.f32.mrf.mxu0 }
 0x14a   :  { %v1497_v32 = vsel %vm1273_vm14, %v889_v23, %v1385_v28  ;;  %vm1278_vm15 = vcmp.ge.f32.partialorder %v910_v29, 0.0  ;;  %v1390_v33 = vmul.f32 0.2, %v910_v29  ;;  %v902_v34 = vadd.f32 %v13787_v12, %v901_v31  ;;  %v11979_v35 = vld [vmem:[#allocation2 + $0xa0] sm:$0xff]  }
 0x14b   :  { %1781 = vst.msk [vmem:[#allocation2 + $0xb4] sm:$0xf] %vm128_vm3, %v11314_v30  ;;  %v11312_v36 = vpack.c.bf16 %v1497_v32, %v1497_v32  ;;  %v11754_v37 = vpop.f32.mrf.mxu0  ;;  %11847 = vmatprep.mubr.msk.bf16.mxu0 %vm2230_vm4, %v11979_v35 }
 0x14c   :  { %v1502_v38 = vsel %vm1278_vm15, %v910_v29, %v1390_v33  ;;  %vm1276_vm0 = vcmp.ge.f32.partialorder %v902_v34, 0.0  ;;  %v1388_v39 = vmul.f32 0.2, %v902_v34  ;;  %v913_v40 = vadd.f32 %v11754_v37, %v13787_v12  ;;  %v11980_v41 = vld [vmem:[#allocation2 + $0x98] sm:$0xff]  }
 0x14d   :  { %1779 = vst.msk [vmem:[#allocation2 + $0xac] sm:$0xf] %vm128_vm3, %v11312_v36  ;;  %v11317_v42 = vpack.c.bf16 %v1502_v38, %v1502_v38  ;;  %v904_v43 = vpop.f32.mrf.mxu0  ;;  %2223 = vrot.lane.b32.xlu1 %v11980_v41, %s13359_s5 }
 0x14e   :  { %v1500_v44 = vsel %vm1276_vm0, %v902_v34, %v1388_v39  ;;  %vm1279_vm1 = vcmp.ge.f32.partialorder %v913_v40, 0.0  ;;  %v1391_v45 = vmul.f32 0.2, %v913_v40  ;;  %v905_v46 = vadd.f32 %v13787_v12, %v904_v43 }
 0x14f   :  { %1784 = vst.msk [vmem:[#allocation2 + $0xc0] sm:$0xf] %vm128_vm3, %v11317_v42  ;;  %v11315_v47 = vpack.c.bf16 %v1500_v44, %v1500_v44  ;;  %v11757_v48 = vpop.f32.mrf.mxu0 }
 0x150   :  { %v1503_v49 = vsel %vm1279_vm1, %v913_v40, %v1391_v45  ;;  %vm1277_vm2 = vcmp.ge.f32.partialorder %v905_v46, 0.0  ;;  %v1389_v50 = vmul.f32 0.2, %v905_v46  ;;  %v926_v51 = vadd.f32 %v11757_v48, %v13787_v12 }
 0x151   :  { %1782 = vst.msk [vmem:[#allocation2 + $0xb8] sm:$0xf] %vm128_vm3, %v11315_v47  ;;  %v11318_v52 = vpack.c.bf16 %v1503_v49, %v1503_v49  ;;  %v917_v53 = vpop.f32.mrf.mxu0 }
 0x152   :  { %v1501_v54 = vsel %vm1277_vm2, %v905_v46, %v1389_v50  ;;  %vm1282_vm5 = vcmp.ge.f32.partialorder %v926_v51, 0.0  ;;  %v1394_v55 = vmul.f32 0.2, %v926_v51  ;;  %v918_v56 = vadd.f32 %v13787_v12, %v917_v53  ;;  %v11982_v57 = vld [vmem:[#allocation2 + $0xb0] sm:$0xff]  }
 0x153   :  { %1785 = vst.msk [vmem:[#allocation2 + $0xc4] sm:$0xf] %vm128_vm3, %v11318_v52  ;;  %v11316_v58 = vpack.c.bf16 %v1501_v54, %v1501_v54  ;;  %v11758_v59 = vpop.f32.mrf.mxu0  ;;  %11848 = vmatmul.mubr.msk.bf16.vlgmr.msra.gmra.mxu0 %vm2230_vm4, %v11982_v57  ;;  %v13905_v50 = vld [vmem:[%s16746_s3] ss:$0 sm:$0xff] }
 0x154   :  { %v1506_v60 = vsel %vm1282_vm5, %v926_v51, %v1394_v55  ;;  %vm1280_vm6 = vcmp.ge.f32.partialorder %v918_v56, 0.0  ;;  %v1392_v61 = vmul.f32 0.2, %v918_v56  ;;  %v929_v62 = vadd.f32 %v11758_v59, %v13787_v12  ;;  %v11983_v63 = vld [vmem:[#allocation2 + $0xa8] sm:$0xff]  }
 0x155   :  { %1783 = vst.msk [vmem:[#allocation2 + $0xbc] sm:$0xf] %vm128_vm3, %v11316_v58  ;;  %v11321_v0 = vpack.c.bf16 %v1506_v60, %v1506_v60  ;;  %v920_v1 = vpop.f32.mrf.mxu0  ;;  %2294 = vrot.lane.b32.xlu1 %v11983_v63, %s13359_s5 }
 0x156   :  { %v1504_v2 = vsel %vm1280_vm6, %v918_v56, %v1392_v61  ;;  %vm1283_vm7 = vcmp.ge.f32.partialorder %v929_v62, 0.0  ;;  %v1395_v3 = vmul.f32 0.2, %v929_v62  ;;  %v921_v4 = vadd.f32 %v13787_v12, %v920_v1 }
 0x157   :  { %1788 = vst.msk [vmem:[#allocation2 + $0xd0] sm:$0xf] %vm128_vm3, %v11321_v0  ;;  %v11319_v5 = vpack.c.bf16 %v1504_v2, %v1504_v2  ;;  %v11761_v6 = vpop.f32.mrf.mxu0 }
 0x158   :  { %v1507_v7 = vsel %vm1283_vm7, %v929_v62, %v1395_v3  ;;  %vm1281_vm8 = vcmp.ge.f32.partialorder %v921_v4, 0.0  ;;  %v1393_v8 = vmul.f32 0.2, %v921_v4  ;;  %v942_v9 = vadd.f32 %v11761_v6, %v13787_v12 }
 0x159   :  { %1786 = vst.msk [vmem:[#allocation2 + $0xc8] sm:$0xf] %vm128_vm3, %v11319_v5  ;;  %v11322_v10 = vpack.c.bf16 %v1507_v7, %v1507_v7  ;;  %v933_v11 = vpop.f32.mrf.mxu0 }
 0x15a   :  { %v1505_v13 = vsel %vm1281_vm8, %v921_v4, %v1393_v8  ;;  %vm1286_vm9 = vcmp.ge.f32.partialorder %v942_v9, 0.0  ;;  %v1398_v14 = vmul.f32 0.2, %v942_v9  ;;  %v934_v15 = vadd.f32 %v13787_v12, %v933_v11  ;;  %v11984_v16 = vld [vmem:[#allocation2 + $0xc0] sm:$0xff]  }
 0x15b   :  { %1789 = vst.msk [vmem:[#allocation2 + $0xd4] sm:$0xf] %vm128_vm3, %v11322_v10  ;;  %v11320_v17 = vpack.c.bf16 %v1505_v13, %v1505_v13  ;;  %v11762_v18 = vpop.f32.mrf.mxu0  ;;  %11851 = vmatprep.mubr.msk.bf16.mxu0 %vm2230_vm4, %v11984_v16 }
 0x15c   :  { %v1510_v19 = vsel %vm1286_vm9, %v942_v9, %v1398_v14  ;;  %vm1284_vm10 = vcmp.ge.f32.partialorder %v934_v15, 0.0  ;;  %v1396_v20 = vmul.f32 0.2, %v934_v15  ;;  %v945_v21 = vadd.f32 %v11762_v18, %v13787_v12  ;;  %v11985_v22 = vld [vmem:[#allocation2 + $0xb8] sm:$0xff]  }
 0x15d   :  { %1787 = vst.msk [vmem:[#allocation2 + $0xcc] sm:$0xf] %vm128_vm3, %v11320_v17  ;;  %v11325_v23 = vpack.c.bf16 %v1510_v19, %v1510_v19  ;;  %v936_v24 = vpop.f32.mrf.mxu0  ;;  %2362 = vrot.lane.b32.xlu1 %v11985_v22, %s13359_s5 }
 0x15e   :  { %v1508_v26 = vsel %vm1284_vm10, %v934_v15, %v1396_v20  ;;  %vm1287_vm11 = vcmp.ge.f32.partialorder %v945_v21, 0.0  ;;  %v1399_v27 = vmul.f32 0.2, %v945_v21  ;;  %v937_v28 = vadd.f32 %v13787_v12, %v936_v24 }
 0x15f   :  { %1849 = vst.msk [vmem:[#allocation2 + $0xe8] sm:$0xf] %vm128_vm3, %v11325_v23  ;;  %v11323_v29 = vpack.c.bf16 %v1508_v26, %v1508_v26  ;;  %v11765_v30 = vpop.f32.mrf.mxu0 }
 0x160   :  { %v1511_v31 = vsel %vm1287_vm11, %v945_v21, %v1399_v27  ;;  %vm1285_vm12 = vcmp.ge.f32.partialorder %v937_v28, 0.0  ;;  %v1397_v32 = vmul.f32 0.2, %v937_v28  ;;  %v958_v33 = vadd.f32 %v11765_v30, %v13787_v12 }
 0x161   :  { %1847 = vst.msk [vmem:[#allocation2 + $0xe0] sm:$0xf] %vm128_vm3, %v11323_v29  ;;  %v11326_v34 = vpack.c.bf16 %v1511_v31, %v1511_v31  ;;  %v949_v35 = vpop.f32.mrf.mxu0  ;;  %v12039_v29 = vld [vmem:[#allocation4 + $0xb8] sm:$0xff]  }
 0x162   :  { %v1509_v36 = vsel %vm1285_vm12, %v937_v28, %v1397_v32  ;;  %vm1290_vm13 = vcmp.ge.f32.partialorder %v958_v33, 0.0  ;;  %v1402_v37 = vmul.f32 0.2, %v958_v33  ;;  %v950_v38 = vadd.f32 %v13787_v12, %v949_v35  ;;  %v11986_v39 = vld [vmem:[#allocation2 + $0xd0] sm:$0xff]   ;;  %v12038_v28 = vld [vmem:[#allocation4 + $0xf8] sm:$0xff]  }
 0x163   :  { %1850 = vst.msk [vmem:[#allocation2 + $0xec] sm:$0xf] %vm128_vm3, %v11326_v34  ;;  %v11324_v40 = vpack.c.bf16 %v1509_v36, %v1509_v36  ;;  %v11766_v41 = vpop.f32.mrf.mxu0  ;;  %11852 = vmatmul.mubr.msk.bf16.gmra.mxu0 %vm2230_vm4, %v11986_v39  ;;  %11584 = vmatprep.subr.bf16.mxu1 %v12038_v28 }
 0x164   :  { %v1514_v42 = vsel %vm1290_vm13, %v958_v33, %v1402_v37  ;;  %vm1288_vm14 = vcmp.ge.f32.partialorder %v950_v38, 0.0  ;;  %v1400_v43 = vmul.f32 0.2, %v950_v38  ;;  %v961_v44 = vadd.f32 %v11766_v41, %v13787_v12  ;;  %v11987_v45 = vld [vmem:[#allocation2 + $0xc8] sm:$0xff]   ;;  %11585 = vmatpush3.bf16.msra.mxu1 %v12039_v29 }
 0x165   :  { %1848 = vst.msk [vmem:[#allocation2 + $0xe4] sm:$0xf] %vm128_vm3, %v11324_v40  ;;  %v11329_v46 = vpack.c.bf16 %v1514_v42, %v1514_v42  ;;  %v952_v47 = vpop.f32.mrf.mxu0  ;;  %2430 = vrot.lane.b32.xlu1 %v11987_v45, %s13359_s5 }
 0x166   :  { %v1512_v48 = vsel %vm1288_vm14, %v950_v38, %v1400_v43  ;;  %vm1291_vm15 = vcmp.ge.f32.partialorder %v961_v44, 0.0  ;;  %v1403_v49 = vmul.f32 0.2, %v961_v44  ;;  %v953_v51 = vadd.f32 %v13905_v50, %v952_v47 }
 0x167   :  { %1853 = vst.msk [vmem:[#allocation2 + $0xf8] sm:$0xf] %vm128_vm3, %v11329_v46  ;;  %v11327_v12 = vpack.c.bf16 %v1512_v48, %v1512_v48  ;;  %v11769_v52 = vpop.f32.mrf.mxu0 }
 0x168   :  { %v1515_v53 = vsel %vm1291_vm15, %v961_v44, %v1403_v49  ;;  %vm1289_vm0 = vcmp.ge.f32.partialorder %v953_v51, 0.0  ;;  %v1401_v54 = vmul.f32 0.2, %v953_v51  ;;  %v974_v55 = vadd.f32 %v13905_v50, %v11769_v52  ;;  %v11994_v49 = vld [vmem:[#allocation2 + $0x168] sm:$0xff]  }
 0x169   :  { %1851 = vst.msk [vmem:[#allocation2 + $0xf0] sm:$0xf] %vm128_vm3, %v11327_v12  ;;  %v11330_v56 = vpack.c.bf16 %v1515_v53, %v1515_v53  ;;  %v965_v57 = vpop.f32.mrf.mxu0 }
 0x16a   :  { %v1513_v58 = vsel %vm1289_vm0, %v953_v51, %v1401_v54  ;;  %vm1294_vm1 = vcmp.ge.f32.partialorder %v974_v55, 0.0  ;;  %v1406_v59 = vmul.f32 0.2, %v974_v55  ;;  %v966_v60 = vadd.f32 %v13905_v50, %v965_v57  ;;  %v11988_v61 = vld [vmem:[#allocation2 + $0xe8] sm:$0xff]  }
 0x16b   :  { %1854 = vst.msk [vmem:[#allocation2 + $0xfc] sm:$0xf] %vm128_vm3, %v11330_v56  ;;  %v11328_v62 = vpack.c.bf16 %v1513_v58, %v1513_v58  ;;  %v11770_v63 = vpop.f32.mrf.mxu0  ;;  %2482 = vrot.lane.b32.xlu0 %v11988_v61, %s13359_s5 }
 0x16c   :  { %v1518_v0 = vsel %vm1294_vm1, %v974_v55, %v1406_v59  ;;  %vm1292_vm2 = vcmp.ge.f32.partialorder %v966_v60, 0.0  ;;  %v1404_v1 = vmul.f32 0.2, %v966_v60  ;;  %v977_v2 = vadd.f32 %v13905_v50, %v11770_v63 }
 0x16d   :  { %1852 = vst.msk [vmem:[#allocation2 + $0xf4] sm:$0xf] %vm128_vm3, %v11328_v62  ;;  %v11333_v3 = vpack.c.bf16 %v1518_v0, %v1518_v0  ;;  %v968_v4 = vpop.f32.mrf.mxu0 }
 0x16e   :  { %v1516_v5 = vsel %vm1292_vm2, %v966_v60, %v1404_v1  ;;  %vm1295_vm5 = vcmp.ge.f32.partialorder %v977_v2, 0.0  ;;  %v1407_v6 = vmul.f32 0.2, %v977_v2  ;;  %v969_v7 = vadd.f32 %v13905_v50, %v968_v4 }
 0x16f   :  { %1857 = vst.msk [vmem:[#allocation2 + $0x108] sm:$0xf] %vm128_vm3, %v11333_v3  ;;  %v11331_v8 = vpack.c.bf16 %v1516_v5, %v1516_v5  ;;  %v11773_v9 = vpop.f32.mrf.mxu0 }
 0x170   :  { %v1519_v10 = vsel %vm1295_vm5, %v977_v2, %v1407_v6  ;;  %vm1293_vm6 = vcmp.ge.f32.partialorder %v969_v7, 0.0  ;;  %v1405_v11 = vmul.f32 0.2, %v969_v7  ;;  %v990_v13 = vadd.f32 %v13905_v50, %v11773_v9 }
 0x171   :  { %1855 = vst.msk [vmem:[#allocation2 + $0x100] sm:$0xf] %vm128_vm3, %v11331_v8  ;;  %v11334_v14 = vpack.c.bf16 %v1519_v10, %v1519_v10  ;;  %v981_v15 = vpop.f32.mrf.mxu0 }
 0x172   :  { %v1517_v16 = vsel %vm1293_vm6, %v969_v7, %v1405_v11  ;;  %vm1298_vm7 = vcmp.ge.f32.partialorder %v990_v13, 0.0  ;;  %v1410_v17 = vmul.f32 0.2, %v990_v13  ;;  %v982_v18 = vadd.f32 %v13905_v50, %v981_v15  ;;  %v11989_v19 = vld [vmem:[#allocation2 + $0xf8] sm:$0xff]  }
 0x173   :  { %1858 = vst.msk [vmem:[#allocation2 + $0x10c] sm:$0xf] %vm128_vm3, %v11334_v14  ;;  %v11332_v20 = vpack.c.bf16 %v1517_v16, %v1517_v16  ;;  %v11774_v21 = vpop.f32.mrf.mxu0  ;;  %2534 = vrot.lane.b32.xlu0 %v11989_v19, %s13359_s5 }
 0x174   :  { %v1522_v22 = vsel %vm1298_vm7, %v990_v13, %v1410_v17  ;;  %vm1296_vm8 = vcmp.ge.f32.partialorder %v982_v18, 0.0  ;;  %v1408_v23 = vmul.f32 0.2, %v982_v18  ;;  %v993_v24 = vadd.f32 %v13905_v50, %v11774_v21  ;;  %v12044_v17 = vld [vmem:[#allocation4 + $0xf0] sm:$0xff]  }
 0x175   :  { %1856 = vst.msk [vmem:[#allocation2 + $0x104] sm:$0xf] %vm128_vm3, %v11332_v20  ;;  %v11337_v26 = vpack.c.bf16 %v1522_v22, %v1522_v22  ;;  %v984_v27 = vpop.f32.mrf.mxu0  ;;  %v12045_v20 = vld [vmem:[#allocation4 + $0xb0] sm:$0xff]   ;;  %11586 = vmatprep.subr.bf16.mxu1 %v12044_v17 }
 0x176   :  { %v1520_v30 = vsel %vm1296_vm8, %v982_v18, %v1408_v23  ;;  %vm1299_vm9 = vcmp.ge.f32.partialorder %v993_v24, 0.0  ;;  %v1411_v31 = vmul.f32 0.2, %v993_v24  ;;  %v985_v32 = vadd.f32 %v13905_v50, %v984_v27  ;;  %11587 = vmatpush3.bf16.msra.mxu1 %v12045_v20 }
 0x177   :  { %1861 = vst.msk [vmem:[#allocation2 + $0x118] sm:$0xf] %vm128_vm3, %v11337_v26  ;;  %v11335_v33 = vpack.c.bf16 %v1520_v30, %v1520_v30  ;;  %v11777_v34 = vpop.f32.mrf.mxu0 }
 0x178   :  { %v1523_v35 = vsel %vm1299_vm9, %v993_v24, %v1411_v31  ;;  %vm1297_vm10 = vcmp.ge.f32.partialorder %v985_v32, 0.0  ;;  %v1409_v36 = vmul.f32 0.2, %v985_v32  ;;  %v1006_v37 = vadd.f32 %v13905_v50, %v11777_v34 }
 0x179   :  { %1859 = vst.msk [vmem:[#allocation2 + $0x110] sm:$0xf] %vm128_vm3, %v11335_v33  ;;  %v11338_v38 = vpack.c.bf16 %v1523_v35, %v1523_v35  ;;  %v997_v39 = vpop.f32.mrf.mxu0 }
 0x17a   :  { %v1521_v40 = vsel %vm1297_vm10, %v985_v32, %v1409_v36  ;;  %vm1302_vm11 = vcmp.ge.f32.partialorder %v1006_v37, 0.0  ;;  %v1414_v41 = vmul.f32 0.2, %v1006_v37  ;;  %v998_v42 = vadd.f32 %v13905_v50, %v997_v39  ;;  %v11991_v43 = vld [vmem:[#allocation2 + $0x108] sm:$0xff]  }
 0x17b   :  { %1862 = vst.msk [vmem:[#allocation2 + $0x11c] sm:$0xf] %vm128_vm3, %v11338_v38  ;;  %v11336_v44 = vpack.c.bf16 %v1521_v40, %v1521_v40  ;;  %v11778_v45 = vpop.f32.mrf.mxu0  ;;  %2580 = vrot.lane.b32.xlu0 %v11991_v43, %s13359_s5 }
 0x17c   :  { %v1526_v46 = vsel %vm1302_vm11, %v1006_v37, %v1414_v41  ;;  %vm1300_vm12 = vcmp.ge.f32.partialorder %v998_v42, 0.0  ;;  %v1412_v47 = vmul.f32 0.2, %v998_v42  ;;  %v1009_v48 = vadd.f32 %v13905_v50, %v11778_v45 }
 0x17d   :  { %1860 = vst.msk [vmem:[#allocation2 + $0x114] sm:$0xf] %vm128_vm3, %v11336_v44  ;;  %v11341_v51 = vpack.c.bf16 %v1526_v46, %v1526_v46  ;;  %v1000_v12 = vpop.f32.mrf.mxu0 }
 0x17e   :  { %v1524_v52 = vsel %vm1300_vm12, %v998_v42, %v1412_v47  ;;  %vm1303_vm13 = vcmp.ge.f32.partialorder %v1009_v48, 0.0  ;;  %v1415_v53 = vmul.f32 0.2, %v1009_v48  ;;  %v1001_v54 = vadd.f32 %v13905_v50, %v1000_v12 }
 0x17f   :  { %1922 = vst.msk [vmem:[#allocation2 + $0x130] sm:$0xf] %vm128_vm3, %v11341_v51  ;;  %v11339_v55 = vpack.c.bf16 %v1524_v52, %v1524_v52  ;;  %v11781_v56 = vpop.f32.mrf.mxu0  ;;  %2670 = vrot.lane.b32.xlu0 %v11994_v49, %s13359_s5 }
 0x180   :  { %v1527_v57 = vsel %vm1303_vm13, %v1009_v48, %v1415_v53  ;;  %vm1301_vm14 = vcmp.ge.f32.partialorder %v1001_v54, 0.0  ;;  %v1413_v58 = vmul.f32 0.2, %v1001_v54  ;;  %v1022_v59 = vadd.f32 %v13905_v50, %v11781_v56 }
 0x181   :  { %1920 = vst.msk [vmem:[#allocation2 + $0x128] sm:$0xf] %vm128_vm3, %v11339_v55  ;;  %v11342_v60 = vpack.c.bf16 %v1527_v57, %v1527_v57  ;;  %v1013_v61 = vpop.f32.mrf.mxu0 }
 0x182   :  { %v1525_v62 = vsel %vm1301_vm14, %v1001_v54, %v1413_v58  ;;  %vm1306_vm15 = vcmp.ge.f32.partialorder %v1022_v59, 0.0  ;;  %v1418_v63 = vmul.f32 0.2, %v1022_v59  ;;  %v1014_v0 = vadd.f32 %v13905_v50, %v1013_v61 }
 0x183   :  { %1923 = vst.msk [vmem:[#allocation2 + $0x134] sm:$0xf] %vm128_vm3, %v11342_v60  ;;  %v11340_v1 = vpack.c.bf16 %v1525_v62, %v1525_v62  ;;  %v11782_v2 = vpop.f32.mrf.mxu0 }
 0x184   :  { %v1530_v3 = vsel %vm1306_vm15, %v1022_v59, %v1418_v63  ;;  %vm1304_vm0 = vcmp.ge.f32.partialorder %v1014_v0, 0.0  ;;  %v1416_v4 = vmul.f32 0.2, %v1014_v0  ;;  %v1025_v5 = vadd.f32 %v13905_v50, %v11782_v2 }
 0x185   :  { %1921 = vst.msk [vmem:[#allocation2 + $0x12c] sm:$0xf] %vm128_vm3, %v11340_v1  ;;  %v11345_v6 = vpack.c.bf16 %v1530_v3, %v1530_v3  ;;  %v1016_v7 = vpop.f32.mrf.mxu0  ;;  %v13968_v3 = vld [vmem:[#allocation2 + $0x20] sm:$0xff]  }
 0x186   :  { %v1528_v8 = vsel %vm1304_vm0, %v1014_v0, %v1416_v4  ;;  %vm1307_vm1 = vcmp.ge.f32.partialorder %v1025_v5, 0.0  ;;  %v1419_v9 = vmul.f32 0.2, %v1025_v5  ;;  %v1017_v10 = vadd.f32 %v13905_v50, %v1016_v7  ;;  %v12046_v0 = vld [vmem:[#allocation4 + $0xe8] sm:$0xff]  }
 0x187   :  { %1926 = vst.msk [vmem:[#allocation2 + $0x140] sm:$0xf] %vm128_vm3, %v11345_v6  ;;  %v11343_v11 = vpack.c.bf16 %v1528_v8, %v1528_v8  ;;  %v11785_v13 = vpop.f32.mrf.mxu0  ;;  %v12047_v4 = vld [vmem:[#allocation4 + $0xa8] sm:$0xff]   ;;  %11588 = vmatprep.subr.bf16.mxu1 %v12046_v0 }
 0x188   :  { %v1531_v14 = vsel %vm1307_vm1, %v1025_v5, %v1419_v9  ;;  %vm1305_vm2 = vcmp.ge.f32.partialorder %v1017_v10, 0.0  ;;  %v1417_v15 = vmul.f32 0.2, %v1017_v10  ;;  %v1038_v16 = vadd.f32 %v13905_v50, %v11785_v13  ;;  %11589 = vmatpush3.bf16.msra.mxu1 %v12047_v4 }
 0x189   :  { %1924 = vst.msk [vmem:[#allocation2 + $0x138] sm:$0xf] %vm128_vm3, %v11343_v11  ;;  %v11346_v18 = vpack.c.bf16 %v1531_v14, %v1531_v14  ;;  %v1029_v19 = vpop.f32.mrf.mxu0 }
 0x18a   :  { %v1529_v21 = vsel %vm1305_vm2, %v1017_v10, %v1417_v15  ;;  %vm1310_vm5 = vcmp.ge.f32.partialorder %v1038_v16, 0.0  ;;  %v1422_v22 = vmul.f32 0.2, %v1038_v16  ;;  %v1030_v23 = vadd.f32 %v13905_v50, %v1029_v19  ;;  %v12001_v24 = vld [vmem:[#allocation2 + $0x130] sm:$0xff]  }
 0x18b   :  { %1927 = vst.msk [vmem:[#allocation2 + $0x144] sm:$0xf] %vm128_vm3, %v11346_v18  ;;  %v11344_v26 = vpack.c.bf16 %v1529_v21, %v1529_v21  ;;  %v11786_v27 = vpop.f32.mrf.mxu0  ;;  %11855 = vmatprep.mubr.msk.bf16.mxu0 %vm2230_vm4, %v12001_v24 }
 0x18c   :  { %v1534_v28 = vsel %vm1310_vm5, %v1038_v16, %v1422_v22  ;;  %vm1308_vm6 = vcmp.ge.f32.partialorder %v1030_v23, 0.0  ;;  %v1420_v29 = vmul.f32 0.2, %v1030_v23  ;;  %v1041_v30 = vadd.f32 %v13905_v50, %v11786_v27  ;;  %v12003_v31 = vld [vmem:[#allocation2 + $0x128] sm:$0xff]  }
 0x18d   :  { %1925 = vst.msk [vmem:[#allocation2 + $0x13c] sm:$0xf] %vm128_vm3, %v11344_v26  ;;  %v11349_v32 = vpack.c.bf16 %v1534_v28, %v1534_v28  ;;  %v1032_v33 = vpop.f32.mrf.mxu0  ;;  %2494 = vrot.lane.b32.xlu1 %v12003_v31, %s13359_s5  ;;  %v13985_v31 = vld [vmem:[#allocation2 + $0x30] sm:$0xff]  }
 0x18e   :  { %v1532_v34 = vsel %vm1308_vm6, %v1030_v23, %v1420_v29  ;;  %vm1311_vm7 = vcmp.ge.f32.partialorder %v1041_v30, 0.0  ;;  %v1423_v35 = vmul.f32 0.2, %v1041_v30  ;;  %v1033_v36 = vadd.f32 %v13905_v50, %v1032_v33 }
 0x18f   :  { %1930 = vst.msk [vmem:[#allocation2 + $0x150] sm:$0xf] %vm128_vm3, %v11349_v32  ;;  %v11347_v37 = vpack.c.bf16 %v1532_v34, %v1532_v34  ;;  %v11789_v38 = vpop.f32.mrf.mxu0 }
 0x190   :  { %v1535_v39 = vsel %vm1311_vm7, %v1041_v30, %v1423_v35  ;;  %vm1309_vm8 = vcmp.ge.f32.partialorder %v1033_v36, 0.0  ;;  %v1421_v40 = vmul.f32 0.2, %v1033_v36  ;;  %v1054_v41 = vadd.f32 %v13905_v50, %v11789_v38 }
 0x191   :  { %1928 = vst.msk [vmem:[#allocation2 + $0x148] sm:$0xf] %vm128_vm3, %v11347_v37  ;;  %v11350_v42 = vpack.c.bf16 %v1535_v39, %v1535_v39  ;;  %v1045_v43 = vpop.f32.mrf.mxu0  ;;  %v13217_v39 = vld [vmem:[#allocation2 + $0x10] sm:$0xff]  }
 0x192   :  { %v1533_v44 = vsel %vm1309_vm8, %v1033_v36, %v1421_v40  ;;  %vm1314_vm9 = vcmp.ge.f32.partialorder %v1054_v41, 0.0  ;;  %v1426_v45 = vmul.f32 0.2, %v1054_v41  ;;  %v1046_v46 = vadd.f32 %v13905_v50, %v1045_v43  ;;  %v12007_v47 = vld [vmem:[#allocation2 + $0x140] sm:$0xff]  }
 0x193   :  { %1931 = vst.msk [vmem:[#allocation2 + $0x154] sm:$0xf] %vm128_vm3, %v11350_v42  ;;  %v11348_v48 = vpack.c.bf16 %v1533_v44, %v1533_v44  ;;  %v11790_v49 = vpop.f32.mrf.mxu0  ;;  %11856 = vmatmul.mubr.msk.bf16.gmra.mxu0 %vm2230_vm4, %v12007_v47 }
 0x194   :  { %v1538_v51 = vsel %vm1314_vm9, %v1054_v41, %v1426_v45  ;;  %vm1312_vm10 = vcmp.ge.f32.partialorder %v1046_v46, 0.0  ;;  %v1424_v12 = vmul.f32 0.2, %v1046_v46  ;;  %v1057_v52 = vadd.f32 %v13905_v50, %v11790_v49  ;;  %v12009_v53 = vld [vmem:[#allocation2 + $0x138] sm:$0xff]  }
 0x195   :  { %1929 = vst.msk [vmem:[#allocation2 + $0x14c] sm:$0xf] %vm128_vm3, %v11348_v48  ;;  %v11353_v54 = vpack.c.bf16 %v1538_v51, %v1538_v51  ;;  %v1048_v55 = vpop.f32.mrf.mxu0  ;;  %2541 = vrot.lane.b32.xlu1 %v12009_v53, %s13359_s5 }
 0x196   :  { %v1536_v56 = vsel %vm1312_vm10, %v1046_v46, %v1424_v12  ;;  %vm1315_vm11 = vcmp.ge.f32.partialorder %v1057_v52, 0.0  ;;  %v1427_v57 = vmul.f32 0.2, %v1057_v52  ;;  %v1049_v58 = vadd.f32 %v13905_v50, %v1048_v55 }
 0x197   :  { %1934 = vst.msk [vmem:[#allocation2 + $0x160] sm:$0xf] %vm128_vm3, %v11353_v54  ;;  %v11351_v59 = vpack.c.bf16 %v1536_v56, %v1536_v56  ;;  %v11793_v60 = vpop.f32.mrf.mxu0 }
 0x198   :  { %v1539_v61 = vsel %vm1315_vm11, %v1057_v52, %v1427_v57  ;;  %vm1313_vm12 = vcmp.ge.f32.partialorder %v1049_v58, 0.0  ;;  %v1425_v62 = vmul.f32 0.2, %v1049_v58  ;;  %v1070_v63 = vadd.f32 %v13905_v50, %v11793_v60 }
 0x199   :  { %1932 = vst.msk [vmem:[#allocation2 + $0x158] sm:$0xf] %vm128_vm3, %v11351_v59  ;;  %v11354_v1 = vpack.c.bf16 %v1539_v61, %v1539_v61  ;;  %v1061_v2 = vpop.f32.mrf.mxu0  ;;  %v12022_v61 = vld [vmem:[#allocation2 + $0x40] sm:$0xff]  }
 0x19a   :  { %v1537_v5 = vsel %vm1313_vm12, %v1049_v58, %v1425_v62  ;;  %vm1318_vm13 = vcmp.ge.f32.partialorder %v1070_v63, 0.0  ;;  %v1430_v6 = vmul.f32 0.2, %v1070_v63  ;;  %v1062_v7 = vadd.f32 %v13905_v50, %v1061_v2  ;;  %v12014_v8 = vld [vmem:[#allocation2 + $0x150] sm:$0xff]   ;;  %v12048_v62 = vld [vmem:[#allocation4 + $0xe0] sm:$0xff]  }
 0x19b   :  { %1935 = vst.msk [vmem:[#allocation2 + $0x164] sm:$0xf] %vm128_vm3, %v11354_v1  ;;  %v11352_v9 = vpack.c.bf16 %v1537_v5, %v1537_v5  ;;  %v11794_v10 = vpop.f32.mrf.mxu0  ;;  %11859 = vmatprep.mubr.msk.bf16.mxu0 %vm2230_vm4, %v12014_v8  ;;  %11590 = vmatprep.subr.bf16.mxu1 %v12048_v62 }
 0x19c   :  { %v1542_v11 = vsel %vm1318_vm13, %v1070_v63, %v1430_v6  ;;  %vm1316_vm14 = vcmp.ge.f32.partialorder %v1062_v7, 0.0  ;;  %v1428_v13 = vmul.f32 0.2, %v1062_v7  ;;  %v1073_v14 = vadd.f32 %v13905_v50, %v11794_v10  ;;  %v12016_v15 = vld [vmem:[#allocation2 + $0x148] sm:$0xff]   ;;  %v12049_v63 = vld [vmem:[#allocation4 + $0xa0] sm:$0xff]  }
 0x19d   :  { %1933 = vst.msk [vmem:[#allocation2 + $0x15c] sm:$0xf] %vm128_vm3, %v11352_v9  ;;  %v11357_v16 = vpack.c.bf16 %v1542_v11, %v1542_v11  ;;  %v1064_v17 = vpop.f32.mrf.mxu0  ;;  %v13976_v21 = vpop.permute.xlu1 %2211  ;;  %2587 = vrot.lane.b32.xlu1 %v12016_v15, %s13359_s5  ;;  %11591 = vmatpush3.bf16.msra.mxu1 %v12049_v63 }
 0x19e   :  { %v1540_v18 = vsel %vm1316_vm14, %v1062_v7, %v1428_v13  ;;  %vm1319_vm15 = vcmp.ge.f32.partialorder %v1073_v14, 0.0  ;;  %v1431_v19 = vmul.f32 0.2, %v1073_v14  ;;  %v1065_v20 = vadd.f32 %v13905_v50, %v1064_v17 }
 0x19f   :  { %1995 = vst.msk [vmem:[#allocation2 + $0x178] sm:$0xf] %vm128_vm3, %v11357_v16  ;;  %v11355_v22 = vpack.c.bf16 %v1540_v18, %v1540_v18  ;;  %v11797_v23 = vpop.f32.mrf.mxu0  ;;  %v2305_v24 = vsel %vm2230_vm4, %v13968_v3, %v13976_v21 }
 0x1a0   :  { %v1543_v26 = vsel %vm1319_vm15, %v1073_v14, %v1431_v19  ;;  %vm1317_vm0 = vcmp.ge.f32.partialorder %v1065_v20, 0.0  ;;  %v1429_v27 = vmul.f32 0.2, %v1065_v20  ;;  %v1086_v28 = vadd.f32 %v13905_v50, %v11797_v23  ;;  %3420 = vmatprep.mubr.bf16.mxu1 %v2305_v24 }
 0x1a1   :  { %1993 = vst.msk [vmem:[#allocation2 + $0x170] sm:$0xf] %vm128_vm3, %v11355_v22  ;;  %v11358_v29 = vpack.c.bf16 %v1543_v26, %v1543_v26  ;;  %v1077_v30 = vpop.f32.mrf.mxu0  ;;  %v2271_v35 = vpop.permute.xlu1 %2270 }
 0x1a2   :  { %v1541_v32 = vsel %vm1317_vm0, %v1065_v20, %v1429_v27  ;;  %vm1322_vm1 = vcmp.ge.f32.partialorder %v1086_v28, 0.0  ;;  %v1434_v33 = vmul.f32 0.2, %v1086_v28  ;;  %v1078_v34 = vadd.f32 %v13905_v50, %v1077_v30  ;;  %v12018_v36 = vld [vmem:[#allocation2 + $0x160] sm:$0xff]  }
 0x1a3   :  { %1996 = vst.msk [vmem:[#allocation2 + $0x17c] sm:$0xf] %vm128_vm3, %v11358_v29  ;;  %v11356_v37 = vpack.c.bf16 %v1541_v32, %v1541_v32  ;;  %v11798_v38 = vpop.f32.mrf.mxu0  ;;  %v2302_v40 = vsel %vm2230_vm4, %v13217_v39, %v2271_v35  ;;  %11860 = vmatmul.mubr.msk.bf16.gmra.mxu0 %vm2230_vm4, %v12018_v36  ;;  %v14022_v36 = vld [vmem:[#allocation2 + $0xa0] sm:$0xff]  }
 0x1a4   :  { %v1546_v41 = vsel %vm1322_vm1, %v1086_v28, %v1434_v33  ;;  %vm1320_vm2 = vcmp.ge.f32.partialorder %v1078_v34, 0.0  ;;  %v1432_v42 = vmul.f32 0.2, %v1078_v34  ;;  %v1089_v43 = vadd.f32 %v13905_v50, %v11798_v38  ;;  %3421 = vmatmul.mubr.bf16.gmra.mxu1 %v2302_v40  ;;  %v12019_v44 = vld [vmem:[#allocation2 + $0x158] sm:$0xff]  }
 0x1a5   :  { %1994 = vst.msk [vmem:[#allocation2 + $0x174] sm:$0xf] %vm128_vm3, %v11356_v37  ;;  %v11361_v45 = vpack.c.bf16 %v1546_v41, %v1546_v41  ;;  %v1080_v46 = vpop.f32.mrf.mxu0  ;;  %2633 = vrot.lane.b32.xlu1 %v12019_v44, %s13359_s5  ;;  %v13995_v51 = vpop.permute.xlu0 %2287  ;;  %v12052_v40 = vld [vmem:[#allocation4 + $0xd8] sm:$0xff]  }
 0x1a6   :  { %v1544_v47 = vsel %vm1320_vm2, %v1078_v34, %v1432_v42  ;;  %vm1323_vm5 = vcmp.ge.f32.partialorder %v1089_v43, 0.0  ;;  %v1435_v48 = vmul.f32 0.2, %v1089_v43  ;;  %v1081_v49 = vadd.f32 %v13905_v50, %v1080_v46  ;;  %v2339_v12 = vpop.permute.xlu1 %2338  ;;  %v12053_v41 = vld [vmem:[#allocation4 + $0x98] sm:$0xff]   ;;  %v14032_v46 = vld [vmem:[%s16746_s3] ss:$0 sm:$0xff]  ;;  %11592 = vmatprep.subr.bf16.mxu1 %v12052_v40 }
 0x1a7   :  { %1999 = vst.msk [vmem:[#allocation2 + $0x188] sm:$0xf] %vm128_vm3, %v11361_v45  ;;  %v11359_v52 = vpack.c.bf16 %v1544_v47, %v1544_v47  ;;  %v11801_v53 = vpop.f32.mrf.mxu0  ;;  %v2373_v54 = vsel %vm2230_vm4, %v13985_v31, %v13995_v51  ;;  %v2370_v60 = vsel %vm2230_vm4, %v13968_v3, %v2339_v12  ;;  %11593 = vmatpush3.bf16.msra.mxu1 %v12053_v41 }
 0x1a8   :  { %v1547_v55 = vsel %vm1323_vm5, %v1089_v43, %v1435_v48  ;;  %vm1321_vm6 = vcmp.ge.f32.partialorder %v1081_v49, 0.0  ;;  %v1433_v56 = vmul.f32 0.2, %v1081_v49  ;;  %v1102_v57 = vadd.f32 %v13905_v50, %v11801_v53  ;;  %3428 = vmatprep.mubr.bf16.mxu1 %v2373_v54 }
 0x1a9   :  { %1997 = vst.msk [vmem:[#allocation2 + $0x180] sm:$0xf] %vm128_vm3, %v11359_v52  ;;  %v11362_v58 = vpack.c.bf16 %v1547_v55, %v1547_v55  ;;  %v1093_v59 = vpop.f32.mrf.mxu0 }
 0x1aa   :  { %v1545_v0 = vsel %vm1321_vm6, %v1081_v49, %v1433_v56  ;;  %vm1326_vm7 = vcmp.ge.f32.partialorder %v1102_v57, 0.0  ;;  %v1438_v1 = vmul.f32 0.2, %v1102_v57  ;;  %v1094_v2 = vadd.f32 %v13905_v50, %v1093_v59  ;;  %v12021_v4 = vld [vmem:[#allocation2 + $0x178] sm:$0xff]   ;;  %v2407_v16 = vpop.permute.xlu1 %2406 }
 0x1ab   :  { %2000 = vst.msk [vmem:[#allocation2 + $0x18c] sm:$0xf] %vm128_vm3, %v11362_v58  ;;  %v11360_v5 = vpack.c.bf16 %v1545_v0, %v1545_v0  ;;  %v11802_v6 = vpop.f32.mrf.mxu0  ;;  %2682 = vrot.lane.b32.xlu0 %v12021_v4, %s13359_s5  ;;  %v2438_v27 = vsel %vm2230_vm4, %v13985_v31, %v2407_v16  ;;  %v12025_v59 = vld [vmem:[#allocation2 + $0x1f8] sm:$0xff]  }
 0x1ac   :  { %v1550_v7 = vsel %vm1326_vm7, %v1102_v57, %v1438_v1  ;;  %vm1324_vm8 = vcmp.ge.f32.partialorder %v1094_v2, 0.0  ;;  %v1436_v8 = vmul.f32 0.2, %v1094_v2  ;;  %v1105_v9 = vadd.f32 %v13905_v50, %v11802_v6  ;;  %3429 = vmatmul.mubr.bf16.gmra.mxu1 %v2370_v60  ;;  %v12026_v1 = vld [vmem:[#allocation2 + $0x90] sm:$0xff]  }
 0x1ad   :  { %1998 = vst.msk [vmem:[#allocation2 + $0x184] sm:$0xf] %vm128_vm3, %v11360_v5  ;;  %v11365_v3 = vpack.c.bf16 %v1550_v7, %v1550_v7  ;;  %v1096_v10 = vpop.f32.mrf.mxu0  ;;  %v14011_v15 = vpop.permute.xlu0 %2355 }
 0x1ae   :  { %v1548_v11 = vsel %vm1324_vm8, %v1094_v2, %v1436_v8  ;;  %vm1327_vm9 = vcmp.ge.f32.partialorder %v1105_v9, 0.0  ;;  %v1439_v13 = vmul.f32 0.2, %v1105_v9  ;;  %v1097_v14 = vadd.f32 %v13905_v50, %v1096_v10 }
 0x1af   :  { %2003 = vst.msk [vmem:[#allocation2 + $0x198] sm:$0xf] %vm128_vm3, %v11365_v3  ;;  %v11363_v17 = vpack.c.bf16 %v1548_v11, %v1548_v11  ;;  %v11805_v18 = vpop.f32.mrf.mxu0  ;;  %v2441_v19 = vsel %vm2230_vm4, %v12022_v61, %v14011_v15 }
 0x1b0   :  { %v1551_v20 = vsel %vm1327_vm9, %v1105_v9, %v1439_v13  ;;  %vm1325_vm10 = vcmp.ge.f32.partialorder %v1097_v14, 0.0  ;;  %v1437_v22 = vmul.f32 0.2, %v1097_v14  ;;  %v1118_v23 = vadd.f32 %v13905_v50, %v11805_v18  ;;  %3436 = vmatprep.mubr.bf16.mxu1 %v2441_v19 }
 0x1b1   :  { %2001 = vst.msk [vmem:[#allocation2 + $0x190] sm:$0xf] %vm128_vm3, %v11363_v17  ;;  %v11366_v24 = vpack.c.bf16 %v1551_v20, %v1551_v20  ;;  %v1109_v26 = vpop.f32.mrf.mxu0  ;;  %v2471_v32 = vpop.permute.xlu0 %2470 }
 0x1b2   :  { %v1549_v28 = vsel %vm1325_vm10, %v1097_v14, %v1437_v22  ;;  %vm1330_vm11 = vcmp.ge.f32.partialorder %v1118_v23, 0.0  ;;  %v1442_v29 = vmul.f32 0.2, %v1118_v23  ;;  %v1110_v30 = vadd.f32 %v13905_v50, %v1109_v26  ;;  %v12023_v33 = vld [vmem:[#allocation2 + $0x188] sm:$0xff]  }
 0x1b3   :  { %2004 = vst.msk [vmem:[#allocation2 + $0x19c] sm:$0xf] %vm128_vm3, %v11366_v24  ;;  %v11364_v34 = vpack.c.bf16 %v1549_v28, %v1549_v28  ;;  %v11806_v35 = vpop.f32.mrf.mxu0  ;;  %v2502_v37 = vsel %vm2230_vm4, %v14022_v36, %v2471_v32  ;;  %2734 = vrot.lane.b32.xlu0 %v12023_v33, %s13359_s5 }
 0x1b4   :  { %v1554_v38 = vsel %vm1330_vm11, %v1118_v23, %v1442_v29  ;;  %vm1328_vm12 = vcmp.ge.f32.partialorder %v1110_v30, 0.0  ;;  %v1440_v39 = vmul.f32 0.2, %v1110_v30  ;;  %v1121_v31 = vadd.f32 %v13905_v50, %v11806_v35  ;;  %3437 = vmatmul.mubr.bf16.gmra.mxu1 %v2438_v27 }
 0x1b5   :  { %2002 = vst.msk [vmem:[#allocation2 + $0x194] sm:$0xf] %vm128_vm3, %v11364_v34  ;;  %v11369_v42 = vpack.c.bf16 %v1554_v38, %v1554_v38  ;;  %v1112_v43 = vpop.f32.mrf.mxu0  ;;  %3444 = vmatprep.mubr.bf16.mxu1 %v2502_v37 }
 0x1b6   :  { %v1552_v44 = vsel %vm1328_vm12, %v1110_v30, %v1440_v39  ;;  %vm1331_vm13 = vcmp.ge.f32.partialorder %v1121_v31, 0.0  ;;  %v1443_v45 = vmul.f32 0.2, %v1121_v31  ;;  %v1113_v50 = vadd.f32 %v14032_v46, %v1112_v43 }
 0x1b7   :  { %2007 = vst.msk [vmem:[#allocation2 + $0x1a8] sm:$0xf] %vm128_vm3, %v11369_v42  ;;  %v11367_v47 = vpack.c.bf16 %v1552_v44, %v1552_v44  ;;  %v11809_v48 = vpop.f32.mrf.mxu0  ;;  %v12057_v42 = vld [vmem:[#allocation4 + $0x90] sm:$0xff]  }
 0x1b8   :  { %v1555_v49 = vsel %vm1331_vm13, %v1121_v31, %v1443_v45  ;;  %vm1329_vm14 = vcmp.ge.f32.partialorder %v1113_v50, 0.0  ;;  %v1441_v12 = vmul.f32 0.2, %v1113_v50  ;;  %v1134_v52 = vadd.f32 %v14032_v46, %v11809_v48  ;;  %v12056_v31 = vld [vmem:[#allocation4 + $0xd0] sm:$0xff]  }
 0x1b9   :  { %2005 = vst.msk [vmem:[#allocation2 + $0x1a0] sm:$0xf] %vm128_vm3, %v11367_v47  ;;  %v11370_v53 = vpack.c.bf16 %v1555_v49, %v1555_v49  ;;  %v1125_v54 = vpop.f32.mrf.mxu0  ;;  %11594 = vmatprep.subr.bf16.mxu1 %v12056_v31 }
 0x1ba   :  { %v1553_v55 = vsel %vm1329_vm14, %v1113_v50, %v1441_v12  ;;  %vm1334_vm15 = vcmp.ge.f32.partialorder %v1134_v52, 0.0  ;;  %v1446_v56 = vmul.f32 0.2, %v1134_v52  ;;  %v1126_v57 = vadd.f32 %v14032_v46, %v1125_v54  ;;  %v12024_v58 = vld [vmem:[#allocation2 + $0x198] sm:$0xff]   ;;  %11595 = vmatpush3.bf16.msra.mxu1 %v12057_v42 }
 0x1bb   :  { %2008 = vst.msk [vmem:[#allocation2 + $0x1ac] sm:$0xf] %vm128_vm3, %v11370_v53  ;;  %v11368_v60 = vpack.c.bf16 %v1553_v55, %v1553_v55  ;;  %v11810_v61 = vpop.f32.mrf.mxu0  ;;  %2780 = vrot.lane.b32.xlu0 %v12024_v58, %s13359_s5 }
 0x1bc   :  { %v1558_v62 = vsel %vm1334_vm15, %v1134_v52, %v1446_v56  ;;  %vm1332_vm0 = vcmp.ge.f32.partialorder %v1126_v57, 0.0  ;;  %v1444_v63 = vmul.f32 0.2, %v1126_v57  ;;  %v1137_v0 = vadd.f32 %v14032_v46, %v11810_v61 }
 0x1bd   :  { %2006 = vst.msk [vmem:[#allocation2 + $0x1a4] sm:$0xf] %vm128_vm3, %v11368_v60  ;;  %v11373_v2 = vpack.c.bf16 %v1558_v62, %v1558_v62  ;;  %v1128_v4 = vpop.f32.mrf.mxu0 }
 0x1be   :  { %v1556_v5 = vsel %vm1332_vm0, %v1126_v57, %v1444_v63  ;;  %vm1335_vm1 = vcmp.ge.f32.partialorder %v1137_v0, 0.0  ;;  %v1447_v6 = vmul.f32 0.2, %v1137_v0  ;;  %v1129_v7 = vadd.f32 %v14032_v46, %v1128_v4 }
 0x1bf   :  { %2068 = vst.msk [vmem:[#allocation2 + $0x1c0] sm:$0xf] %vm128_vm3, %v11373_v2  ;;  %v11371_v8 = vpack.c.bf16 %v1556_v5, %v1556_v5  ;;  %v11813_v9 = vpop.f32.mrf.mxu0  ;;  %v2224_v13 = vpop.permute.xlu1 %2223  ;;  %2871 = vrot.lane.b32.xlu0 %v12025_v59, %s13359_s5 }
 0x1c0   :  { %v1559_v3 = vsel %vm1335_vm1, %v1137_v0, %v1447_v6  ;;  %vm1333_vm2 = vcmp.ge.f32.partialorder %v1129_v7, 0.0  ;;  %v1445_v10 = vmul.f32 0.2, %v1129_v7  ;;  %v1150_v11 = vadd.f32 %v14032_v46, %v11813_v9 }
 0x1c1   :  { %2066 = vst.msk [vmem:[#allocation2 + $0x1b8] sm:$0xf] %vm128_vm3, %v11371_v8  ;;  %v11374_v14 = vpack.c.bf16 %v1559_v3, %v1559_v3  ;;  %v1141_v16 = vpop.f32.mrf.mxu0  ;;  %v14049_v17 = vsel %vm2230_vm4, %v12026_v1, %v2224_v13 }
 0x1c2   :  { %v1557_v18 = vsel %vm1333_vm2, %v1129_v7, %v1445_v10  ;;  %vm1338_vm5 = vcmp.ge.f32.partialorder %v1150_v11, 0.0  ;;  %v1450_v19 = vmul.f32 0.2, %v1150_v11  ;;  %v1142_v20 = vadd.f32 %v14032_v46, %v1141_v16  ;;  %3445 = vmatmul.mubr.bf16.gmra.mxu1 %v14049_v17 }
 0x1c3   :  { %2069 = vst.msk [vmem:[#allocation2 + $0x1c4] sm:$0xf] %vm128_vm3, %v11374_v14  ;;  %v11372_v22 = vpack.c.bf16 %v1557_v18, %v1557_v18  ;;  %v11814_v23 = vpop.f32.mrf.mxu0 }
 0x1c4   :  { %v1562_v24 = vsel %vm1338_vm5, %v1150_v11, %v1450_v19  ;;  %vm1336_vm6 = vcmp.ge.f32.partialorder %v1142_v20, 0.0  ;;  %v1448_v26 = vmul.f32 0.2, %v1142_v20  ;;  %v1153_v27 = vadd.f32 %v14032_v46, %v11814_v23 }
 0x1c5   :  { %2067 = vst.msk [vmem:[#allocation2 + $0x1bc] sm:$0xf] %vm128_vm3, %v11372_v22  ;;  %v11377_v28 = vpack.c.bf16 %v1562_v24, %v1562_v24  ;;  %v1144_v29 = vpop.f32.mrf.mxu0 }
 0x1c6   :  { %v1560_v30 = vsel %vm1336_vm6, %v1142_v20, %v1448_v26  ;;  %vm1339_vm7 = vcmp.ge.f32.partialorder %v1153_v27, 0.0  ;;  %v1451_v32 = vmul.f32 0.2, %v1153_v27  ;;  %v1145_v33 = vadd.f32 %v14032_v46, %v1144_v29 }
 0x1c7   :  { %2072 = vst.msk [vmem:[#allocation2 + $0x1d0] sm:$0xf] %vm128_vm3, %v11377_v28  ;;  %v11375_v34 = vpack.c.bf16 %v1560_v30, %v1560_v30  ;;  %v11817_v35 = vpop.f32.mrf.mxu0  ;;  %v12059_v30 = vld [vmem:[#allocation4 + $0x88] sm:$0xff]  }
 0x1c8   :  { %v1563_v37 = vsel %vm1339_vm7, %v1153_v27, %v1451_v32  ;;  %vm1337_vm8 = vcmp.ge.f32.partialorder %v1145_v33, 0.0  ;;  %v1449_v38 = vmul.f32 0.2, %v1145_v33  ;;  %v1166_v39 = vadd.f32 %v14032_v46, %v11817_v35  ;;  %v12058_v27 = vld [vmem:[#allocation4 + $0xc8] sm:$0xff]  }
 0x1c9   :  { %2070 = vst.msk [vmem:[#allocation2 + $0x1c8] sm:$0xf] %vm128_vm3, %v11375_v34  ;;  %v11378_v40 = vpack.c.bf16 %v1563_v37, %v1563_v37  ;;  %v1157_v41 = vpop.f32.mrf.mxu0  ;;  %11596 = vmatprep.subr.bf16.mxu1 %v12058_v27 }
 0x1ca   :  { %v1561_v43 = vsel %vm1337_vm8, %v1145_v33, %v1449_v38  ;;  %vm1342_vm9 = vcmp.ge.f32.partialorder %v1166_v39, 0.0  ;;  %v1454_v44 = vmul.f32 0.2, %v1166_v39  ;;  %v1158_v45 = vadd.f32 %v14032_v46, %v1157_v41  ;;  %v14061_v50 = vld [vmem:[#allocation2 + $0x1c0] sm:$0xff]   ;;  %11597 = vmatpush3.bf16.msra.mxu1 %v12059_v30 }
 0x1cb   :  { %2073 = vst.msk [vmem:[#allocation2 + $0x1d4] sm:$0xf] %vm128_vm3, %v11378_v40  ;;  %v11376_v47 = vpack.c.bf16 %v1561_v43, %v1561_v43  ;;  %v11818_v48 = vpop.f32.mrf.mxu0  ;;  %11863 = vmatprep.mubr.msk.bf16.mxu0 %vm2230_vm4, %v14061_v50 }
 0x1cc   :  { %v1566_v49 = vsel %vm1342_vm9, %v1166_v39, %v1454_v44  ;;  %vm1340_vm10 = vcmp.ge.f32.partialorder %v1158_v45, 0.0  ;;  %v1452_v12 = vmul.f32 0.2, %v1158_v45  ;;  %v1169_v52 = vadd.f32 %v14032_v46, %v11818_v48  ;;  %v12028_v53 = vld [vmem:[#allocation2 + $0x1b8] sm:$0xff]   ;;  %v2295_v39 = vpop.permute.xlu1 %2294 }
 0x1cd   :  { %2071 = vst.msk [vmem:[#allocation2 + $0x1cc] sm:$0xf] %vm128_vm3, %v11376_v47  ;;  %v11381_v54 = vpack.c.bf16 %v1566_v49, %v1566_v49  ;;  %v1160_v55 = vpop.f32.mrf.mxu0  ;;  %2694 = vrot.lane.b32.xlu1 %v12028_v53, %s13359_s5  ;;  %v13220_v53 = vld [vmem:[#allocation2 + $0xb0] sm:$0xff]  }
 0x1ce   :  { %v1564_v56 = vsel %vm1340_vm10, %v1158_v45, %v1452_v12  ;;  %vm1343_vm11 = vcmp.ge.f32.partialorder %v1169_v52, 0.0  ;;  %v1455_v57 = vmul.f32 0.2, %v1169_v52  ;;  %v1161_v58 = vadd.f32 %v14032_v46, %v1160_v55 }
 0x1cf   :  { %2076 = vst.msk [vmem:[#allocation2 + $0x1e0] sm:$0xf] %vm128_vm3, %v11381_v54  ;;  %v11379_v59 = vpack.c.bf16 %v1564_v56, %v1564_v56  ;;  %v11821_v60 = vpop.f32.mrf.mxu0  ;;  %v14103_v55 = vsel %vm2230_vm4, %v14022_v36, %v2295_v39 }
 0x1d0   :  { %v1567_v61 = vsel %vm1343_vm11, %v1169_v52, %v1455_v57  ;;  %vm1341_vm12 = vcmp.ge.f32.partialorder %v1161_v58, 0.0  ;;  %v1453_v62 = vmul.f32 0.2, %v1161_v58  ;;  %v1182_v63 = vadd.f32 %v14032_v46, %v11821_v60 }
 0x1d1   :  { %2074 = vst.msk [vmem:[#allocation2 + $0x1d8] sm:$0xf] %vm128_vm3, %v11379_v59  ;;  %v11382_v0 = vpack.c.bf16 %v1567_v61, %v1567_v61  ;;  %v1173_v1 = vpop.f32.mrf.mxu0  ;;  %v11488_v61 = vpop.f32.mrf.mxu1 }
 0x1d2   :  { %v1565_v2 = vsel %vm1341_vm12, %v1161_v58, %v1453_v62  ;;  %vm1346_vm13 = vcmp.ge.f32.partialorder %v1182_v63, 0.0  ;;  %v1458_v4 = vmul.f32 0.2, %v1182_v63  ;;  %v1174_v5 = vadd.f32 %v14032_v46, %v1173_v1  ;;  %v14074_v6 = vld [vmem:[#allocation2 + $0x1d0] sm:$0xff]  }
 0x1d3   :  { %2077 = vst.msk [vmem:[#allocation2 + $0x1e4] sm:$0xf] %vm128_vm3, %v11382_v0  ;;  %v11380_v7 = vpack.c.bf16 %v1565_v2, %v1565_v2  ;;  %v11822_v8 = vpop.f32.mrf.mxu0  ;;  %11864 = vmatmul.mubr.msk.bf16.gmra.mxu0 %vm2230_vm4, %v14074_v6 }
 0x1d4   :  { %v1570_v9 = vsel %vm1346_vm13, %v1182_v63, %v1458_v4  ;;  %vm1344_vm14 = vcmp.ge.f32.partialorder %v1174_v5, 0.0  ;;  %v1456_v3 = vmul.f32 0.2, %v1174_v5  ;;  %v1185_v10 = vadd.f32 %v14032_v46, %v11822_v8  ;;  %v12030_v11 = vld [vmem:[#allocation2 + $0x1c8] sm:$0xff]   ;;  %v2363_v4 = vpop.permute.xlu1 %2362 }
 0x1d5   :  { %2075 = vst.msk [vmem:[#allocation2 + $0x1dc] sm:$0xf] %vm128_vm3, %v11380_v7  ;;  %v11385_v13 = vpack.c.bf16 %v1570_v9, %v1570_v9  ;;  %v1176_v14 = vpop.f32.mrf.mxu0  ;;  %2741 = vrot.lane.b32.xlu1 %v12030_v11, %s13359_s5  ;;  %v14126_v27 = vsel %vm2230_vm4, %v13220_v53, %v2363_v4 }
 0x1d6   :  { %v1568_v16 = vsel %vm1344_vm14, %v1174_v5, %v1456_v3  ;;  %vm1347_vm15 = vcmp.ge.f32.partialorder %v1185_v10, 0.0  ;;  %v1459_v18 = vmul.f32 0.2, %v1185_v10  ;;  %v1177_v19 = vadd.f32 %v14032_v46, %v1176_v14  ;;  %v11489_v3 = vpop.f32.mrf.mxu1 }
 0x1d7   :  { %2080 = vst.msk [vmem:[#allocation2 + $0x1f0] sm:$0xf] %vm128_vm3, %v11385_v13  ;;  %v11383_v20 = vpack.c.bf16 %v1568_v16, %v1568_v16  ;;  %v11825_v22 = vpop.f32.mrf.mxu0  ;;  %v14116_v13 = vadd.f32 %v11489_v3, %v11488_v61 }
 0x1d8   :  { %v1571_v23 = vsel %vm1347_vm15, %v1185_v10, %v1459_v18  ;;  %vm1345_vm0 = vcmp.ge.f32.partialorder %v1177_v19, 0.0  ;;  %v1457_v24 = vmul.f32 0.2, %v1177_v19  ;;  %v1198_v26 = vadd.f32 %v14032_v46, %v11825_v22 }
 0x1d9   :  { %2078 = vst.msk [vmem:[#allocation2 + $0x1e8] sm:$0xf] %vm128_vm3, %v11383_v20  ;;  %v11386_v28 = vpack.c.bf16 %v1571_v23, %v1571_v23  ;;  %v1189_v29 = vpop.f32.mrf.mxu0  ;;  %v12035_v20 = vld [vmem:[#allocation2 + $0x118] sm:$0xff]  }
 0x1da   :  { %v1569_v32 = vsel %vm1345_vm0, %v1177_v19, %v1457_v24  ;;  %vm1350_vm1 = vcmp.ge.f32.partialorder %v1198_v26, 0.0  ;;  %v1462_v33 = vmul.f32 0.2, %v1198_v26  ;;  %v1190_v34 = vadd.f32 %v14032_v46, %v1189_v29  ;;  %v14087_v35 = vld [vmem:[#allocation2 + $0x1e0] sm:$0xff]  }
 0x1db   :  { %2081 = vst.msk [vmem:[#allocation2 + $0x1f4] sm:$0xf] %vm128_vm3, %v11386_v28  ;;  %v11384_v37 = vpack.c.bf16 %v1569_v32, %v1569_v32  ;;  %v11826_v38 = vpop.f32.mrf.mxu0  ;;  %11867 = vmatprep.mubr.msk.bf16.mxu0 %vm2230_vm4, %v14087_v35  ;;  %v13221_v24 = vld [vmem:[#allocation2 + $0xc0] sm:$0xff]   ;;  %v12050_v32 = vld [vmem:[#allocation2 + $0x248] sm:$0xff]  }
 0x1dc   :  { %v1574_v31 = vsel %vm1350_vm1, %v1198_v26, %v1462_v33  ;;  %vm1348_vm2 = vcmp.ge.f32.partialorder %v1190_v34, 0.0  ;;  %v1460_v40 = vmul.f32 0.2, %v1190_v34  ;;  %v1201_v41 = vadd.f32 %v14032_v46, %v11826_v38  ;;  %v12032_v42 = vld [vmem:[#allocation2 + $0x1d8] sm:$0xff]   ;;  %v12063_v38 = vld [vmem:[#allocation4 + $0x80] sm:$0xff]  }
 0x1dd   :  { %2079 = vst.msk [vmem:[#allocation2 + $0x1ec] sm:$0xf] %vm128_vm3, %v11384_v37  ;;  %v11389_v43 = vpack.c.bf16 %v1574_v31, %v1574_v31  ;;  %v1192_v44 = vpop.f32.mrf.mxu0  ;;  %2787 = vrot.lane.b32.xlu1 %v12032_v42, %s13359_s5  ;;  %v14096_v49 = vpop.permute.xlu0 %2482  ;;  %v12062_v37 = vld [vmem:[#allocation4 + $0xc0] sm:$0xff]  }
 0x1de   :  { %v1572_v45 = vsel %vm1348_vm2, %v1190_v34, %v1460_v40  ;;  %vm1351_vm5 = vcmp.ge.f32.partialorder %v1201_v41, 0.0  ;;  %v1463_v47 = vmul.f32 0.2, %v1201_v41  ;;  %v1193_v48 = vadd.f32 %v14032_v46, %v1192_v44  ;;  %11598 = vmatprep.subr.bf16.mxu1 %v12062_v37  ;;  %v2431_v44 = vpop.permute.xlu1 %2430 }
 0x1df   :  { %2141 = vst.msk [vmem:[#allocation2 + $0x208] sm:$0xf] %vm128_vm3, %v11389_v43  ;;  %v11387_v12 = vpack.c.bf16 %v1572_v45, %v1572_v45  ;;  %v11829_v52 = vpop.f32.mrf.mxu0  ;;  %v2548_v54 = vsel %vm2230_vm4, %v13220_v53, %v14096_v49  ;;  %11599 = vmatpush3.bf16.msra.mxu1 %v12063_v38 }
 0x1e0   :  { %v1575_v56 = vsel %vm1351_vm5, %v1201_v41, %v1463_v47  ;;  %vm1349_vm6 = vcmp.ge.f32.partialorder %v1193_v48, 0.0  ;;  %v1461_v57 = vmul.f32 0.2, %v1193_v48  ;;  %v1214_v58 = vadd.f32 %v14032_v46, %v11829_v52  ;;  %3452 = vmatprep.mubr.bf16.mxu1 %v2548_v54 }
 0x1e1   :  { %2139 = vst.msk [vmem:[#allocation2 + $0x200] sm:$0xf] %vm128_vm3, %v11387_v12  ;;  %v11390_v59 = vpack.c.bf16 %v1575_v56, %v1575_v56  ;;  %v1205_v60 = vpop.f32.mrf.mxu0  ;;  %3453 = vmatmul.mubr.bf16.gmra.mxu1 %v14103_v55  ;;  %v12051_v12 = vld [vmem:[#allocation2 + $0x268] sm:$0xff]  }
 0x1e2   :  { %v1573_v62 = vsel %vm1349_vm6, %v1193_v48, %v1461_v57  ;;  %vm1354_vm7 = vcmp.ge.f32.partialorder %v1214_v58, 0.0  ;;  %v1466_v63 = vmul.f32 0.2, %v1214_v58  ;;  %v1206_v0 = vadd.f32 %v14032_v46, %v1205_v60  ;;  %v14109_v36 = vld [vmem:[#allocation2 + $0x1f0] sm:$0xff]  }
 0x1e3   :  { %2142 = vst.msk [vmem:[#allocation2 + $0x20c] sm:$0xf] %vm128_vm3, %v11390_v59  ;;  %v11388_v1 = vpack.c.bf16 %v1573_v62, %v1573_v62  ;;  %v11830_v2 = vpop.f32.mrf.mxu0  ;;  %11868 = vmatmul.mubr.msk.bf16.gmra.mxu0 %vm2230_vm4, %v14109_v36  ;;  %v13222_v60 = vld [vmem:[#allocation2 + $0xd0] sm:$0xff]   ;;  %v14145_v62 = vsel %vm2230_vm4, %v13221_v24, %v2431_v44 }
 0x1e4   :  { %v1578_v5 = vsel %vm1354_vm7, %v1214_v58, %v1466_v63  ;;  %vm1352_vm8 = vcmp.ge.f32.partialorder %v1206_v0, 0.0  ;;  %v1464_v7 = vmul.f32 0.2, %v1206_v0  ;;  %v1217_v8 = vadd.f32 %v14032_v46, %v11830_v2  ;;  %v12034_v9 = vld [vmem:[#allocation2 + $0x1e8] sm:$0xff]  }
 0x1e5   :  { %2140 = vst.msk [vmem:[#allocation2 + $0x204] sm:$0xf] %vm128_vm3, %v11388_v1  ;;  %v11393_v10 = vpack.c.bf16 %v1578_v5, %v1578_v5  ;;  %v1208_v11 = vpop.f32.mrf.mxu0  ;;  %2833 = vrot.lane.b32.xlu1 %v12034_v9, %s13359_s5  ;;  %v14120_v19 = vpop.permute.xlu0 %2534 }
 0x1e6   :  { %v1576_v14 = vsel %vm1352_vm8, %v1206_v0, %v1464_v7  ;;  %vm1355_vm9 = vcmp.ge.f32.partialorder %v1217_v8, 0.0  ;;  %v1467_v16 = vmul.f32 0.2, %v1217_v8  ;;  %v1209_v18 = vadd.f32 %v14032_v46, %v1208_v11 }
 0x1e7   :  { %2145 = vst.msk [vmem:[#allocation2 + $0x218] sm:$0xf] %vm128_vm3, %v11393_v10  ;;  %v11391_v22 = vpack.c.bf16 %v1576_v14, %v1576_v14  ;;  %v11833_v23 = vpop.f32.mrf.mxu0  ;;  %v2594_v26 = vsel %vm2230_vm4, %v13221_v24, %v14120_v19  ;;  %v13223_v14 = vld [vmem:[#allocation2 + $0x130] sm:$0xff]  }
 0x1e8   :  { %v1579_v28 = vsel %vm1355_vm9, %v1217_v8, %v1467_v16  ;;  %vm1353_vm10 = vcmp.ge.f32.partialorder %v1209_v18, 0.0  ;;  %v1465_v29 = vmul.f32 0.2, %v1209_v18  ;;  %v1230_v30 = vadd.f32 %v14032_v46, %v11833_v23  ;;  %3460 = vmatprep.mubr.bf16.mxu1 %v2594_v26 }
 0x1e9   :  { %2143 = vst.msk [vmem:[#allocation2 + $0x210] sm:$0xf] %vm128_vm3, %v11391_v22  ;;  %v11394_v33 = vpack.c.bf16 %v1579_v28, %v1579_v28  ;;  %v1221_v34 = vpop.f32.mrf.mxu0  ;;  %3461 = vmatmul.mubr.bf16.gmra.mxu1 %v14126_v27  ;;  %2626 = vrot.lane.b32.xlu1 %v12035_v20, %s13359_s5 }
 0x1ea   :  { %v1577_v39 = vsel %vm1353_vm10, %v1209_v18, %v1465_v29  ;;  %vm1358_vm11 = vcmp.ge.f32.partialorder %v1230_v30, 0.0  ;;  %v1470_v31 = vmul.f32 0.2, %v1230_v30  ;;  %v1222_v40 = vadd.f32 %v14032_v46, %v1221_v34  ;;  %v12036_v41 = vld [vmem:[#allocation2 + $0x208] sm:$0xff]  }
 0x1eb   :  { %2146 = vst.msk [vmem:[#allocation2 + $0x21c] sm:$0xf] %vm128_vm3, %v11394_v33  ;;  %v11392_v42 = vpack.c.bf16 %v1577_v39, %v1577_v39  ;;  %v11834_v43 = vpop.f32.mrf.mxu0  ;;  %2883 = vrot.lane.b32.xlu0 %v12036_v41, %s13359_s5  ;;  %v12042_v41 = vld [vmem:[#allocation2 + $0x120] sm:$0xff]  }
 0x1ec   :  { %v1582_v45 = vsel %vm1358_vm11, %v1230_v30, %v1470_v31  ;;  %vm1356_vm12 = vcmp.ge.f32.partialorder %v1222_v40, 0.0  ;;  %v1468_v47 = vmul.f32 0.2, %v1222_v40  ;;  %v1233_v48 = vadd.f32 %v14032_v46, %v11834_v43 }
 0x1ed   :  { %2144 = vst.msk [vmem:[#allocation2 + $0x214] sm:$0xf] %vm128_vm3, %v11392_v42  ;;  %v11397_v52 = vpack.c.bf16 %v1582_v45, %v1582_v45  ;;  %v1224_v53 = vpop.f32.mrf.mxu0  ;;  %v14138_v58 = vpop.permute.xlu0 %2580  ;;  %2895 = vrot.lane.b32.xlu1 %v12050_v32, %s13359_s5  ;;  %v12043_v42 = vld [vmem:[#allocation2 + $0x1a8] sm:$0xff]   ;;  %v12064_v45 = vld [vmem:[#allocation2 + $0x258] sm:$0xff]  }
 0x1ee   :  { %v1580_v54 = vsel %vm1356_vm12, %v1222_v40, %v1468_v47  ;;  %vm1359_vm13 = vcmp.ge.f32.partialorder %v1233_v48, 0.0  ;;  %v1471_v56 = vmul.f32 0.2, %v1233_v48  ;;  %v1225_v57 = vadd.f32 %v14032_v46, %v1224_v53  ;;  %v12041_v40 = vld [vmem:[#allocation2 + $0x88] sm:$0xff]   ;;  %v12066_v47 = vld [vmem:[#allocation2 + $0x278] sm:$0xff]  }
 0x1ef   :  { %2149 = vst.msk [vmem:[#allocation2 + $0x228] sm:$0xf] %vm128_vm3, %v11397_v52  ;;  %v11395_v59 = vpack.c.bf16 %v1580_v54, %v1580_v54  ;;  %v2641_v61 = vsel %vm2230_vm4, %v13222_v60, %v14138_v58  ;;  %v11837_v63 = vpop.f32.mrf.mxu0  ;;  %v13224_v52 = vld [vmem:[#allocation2 + $0x140] sm:$0xff]  }
 0x1f0   :  { %v1583_v0 = vsel %vm1359_vm13, %v1233_v48, %v1471_v56  ;;  %vm1357_vm14 = vcmp.ge.f32.partialorder %v1225_v57, 0.0  ;;  %v1469_v1 = vmul.f32 0.2, %v1225_v57  ;;  %3468 = vmatprep.mubr.bf16.mxu1 %v2641_v61  ;;  %v1246_v2 = vadd.f32 %v14032_v46, %v11837_v63 }
 0x1f1   :  { %2147 = vst.msk [vmem:[#allocation2 + $0x220] sm:$0xf] %vm128_vm3, %v11395_v59  ;;  %v11398_v4 = vpack.c.bf16 %v1583_v0, %v1583_v0  ;;  %3469 = vmatmul.mubr.bf16.gmra.mxu1 %v14145_v62  ;;  %v1237_v5 = vpop.f32.mrf.mxu0  ;;  %v2671_v8 = vpop.permute.xlu0 %2670  ;;  %2988 = vrot.lane.b32.xlu1 %v12051_v12, %s13359_s5  ;;  %v13225_v59 = vld [vmem:[#allocation2 + $0x150] sm:$0xff]  }
 0x1f2   :  { %v1581_v7 = vsel %vm1357_vm14, %v1225_v57, %v1469_v1  ;;  %v12037_v9 = vld [vmem:[#allocation2 + $0x218] sm:$0xff]   ;;  %vm1362_vm15 = vcmp.ge.f32.partialorder %v1246_v2, 0.0  ;;  %v1474_v3 = vmul.f32 0.2, %v1246_v2  ;;  %v1238_v10 = vadd.f32 %v14032_v46, %v1237_v5  ;;  %v13226_v1 = vld [vmem:[#allocation2 + $0x160] sm:$0xff]  }
 0x1f3   :  { %2150 = vst.msk [vmem:[#allocation2 + $0x22c] sm:$0xf] %vm128_vm3, %v11398_v4  ;;  %v11396_v11 = vpack.c.bf16 %v1581_v7, %v1581_v7  ;;  %v2702_v16 = vsel %vm2230_vm4, %v13223_v14, %v2671_v8  ;;  %v11838_v18 = vpop.f32.mrf.mxu0  ;;  %2935 = vrot.lane.b32.xlu0 %v12037_v9, %s13359_s5  ;;  %v12055_v8 = vld [vmem:[#allocation2 + $0x1b0] sm:$0xff]  }
 0x1f4   :  { %3476 = vmatprep.mubr.bf16.mxu1 %v2702_v16  ;;  %v1586_v20 = vsel %vm1362_vm15, %v1246_v2, %v1474_v3  ;;  %vm1360_vm0 = vcmp.ge.f32.partialorder %v1238_v10, 0.0  ;;  %v1472_v22 = vmul.f32 0.2, %v1238_v10  ;;  %v1249_v23 = vadd.f32 %v14032_v46, %v11838_v18  ;;  %v14211_v16 = vpop.f32.mrf.mxu1 }
 0x1f5   :  { %2148 = vst.msk [vmem:[#allocation2 + $0x224] sm:$0xf] %vm128_vm3, %v11396_v11  ;;  %v11401_v24 = vpack.c.bf16 %v1586_v20, %v1586_v20  ;;  %v1240_v26 = vpop.f32.mrf.mxu0  ;;  %v14205_v11 = vld [vmem:[#allocation2 + $0x250] sm:$0xff]  }
 0x1f6   :  { %v1584_v28 = vsel %vm1360_vm0, %v1238_v10, %v1472_v22  ;;  %vm1363_vm1 = vcmp.ge.f32.partialorder %v1249_v23, 0.0  ;;  %v1475_v29 = vmul.f32 0.2, %v1249_v23  ;;  %v1241_v30 = vadd.f32 %v14032_v46, %v1240_v26  ;;  %v12081_v10 = vld [vmem:[%s16749_s6 + $0x74] ss:$8 sps:$4 sm:$0xff]   ;;  %11871 = vmatprep.mubr.msk.bf16.mxu0 %vm2230_vm4, %v14205_v11 }
 0x1f7   :  { %2153 = vst.msk [vmem:[#allocation2 + $0x238] sm:$0xf] %vm128_vm3, %v11401_v24  ;;  %v11399_v32 = vpack.c.bf16 %v1584_v28, %v1584_v28  ;;  %4851 = vmatprep.subr.bf16.mxu1 %v12081_v10  ;;  %v14224_v24 = vpop.f32.mrf.mxu1 }
 0x1f8   :  { %v1587_v33 = vsel %vm1363_vm1, %v1249_v23, %v1475_v29  ;;  %vm1361_vm2 = vcmp.ge.f32.partialorder %v1241_v30, 0.0  ;;  %v1473_v34 = vmul.f32 0.2, %v1241_v30 }
 0x1f9   :  { %2151 = vst.msk [vmem:[#allocation2 + $0x230] sm:$0xf] %vm128_vm3, %v11399_v32  ;;  %v11402_v37 = vpack.c.bf16 %v1587_v33, %v1587_v33 }
 0x1fa   :  { %v12040_v38 = vld [vmem:[#allocation2 + $0x228] sm:$0xff]   ;;  %v1585_v39 = vsel %vm1361_vm2, %v1241_v30, %v1473_v34 }
 0x1fb   :  { %2154 = vst.msk [vmem:[#allocation2 + $0x23c] sm:$0xf] %vm128_vm3, %v11402_v37  ;;  %v11400_v31 = vpack.c.bf16 %v1585_v39, %v1585_v39  ;;  %2981 = vrot.lane.b32.xlu0 %v12040_v38, %s13359_s5  ;;  %v14243_v38 = vld [vmem:[#allocation2 + $0x270] sm:$0xff]   ;;  %v12095_v39 = vld [vmem:[#allocation2 + $0x280] sm:$0xff]  }
 0x1fd   :  { %2152 = vst.msk [vmem:[#allocation2 + $0x234] sm:$0xf] %vm128_vm3, %v11400_v31 }
 0x1ff   :  { %v2495_v46 = vpop.permute.xlu1 %2494  ;;  %2423 = vrot.lane.b32.xlu0 %v12041_v40, %s13359_s5 }
 0x200   :  { %v14165_v43 = vsel %vm2230_vm4, %v12042_v41, %v2495_v46 }
 0x201   :  { %3477 = vmatmul.mubr.bf16.gmra.mxu1 %v14165_v43 }
 0x202   :  { %v12054_v44 = vld [vmem:[#allocation2 + $0x238] sm:$0xff]  }
 0x203   :  { %2826 = vrot.lane.b32.xlu0 %v12043_v42, %s13359_s5  ;;  %3027 = vrot.lane.b32.xlu1 %v12054_v44, %s13359_s5 }
 0x207   :  { %2942 = vrot.lane.b32.xlu0 %v12064_v45, %s13359_s5  ;;  %v2542_v48 = vpop.permute.xlu1 %2541 }
 0x208   :  { %v14177_v54 = vsel %vm2230_vm4, %v13223_v14, %v2542_v48  ;;  %v14207_v14 = vld [vmem:[#allocation2 + $0x260] sm:$0xff]  }
 0x209   :  { %11872 = vmatmul.mubr.msk.bf16.gmra.mxu0 %vm2230_vm4, %v14207_v14 }
 0x20a   :  { %11875 = vmatprep.mubr.msk.bf16.mxu0 %vm2230_vm4, %v14243_v38 }
 0x20b   :  { %3034 = vrot.lane.b32.xlu0 %v12066_v47, %s13359_s5 }
 0x20f   :  { %v2588_v56 = vpop.permute.xlu1 %2587 }
 0x210   :  { %v14185_v61 = vsel %vm2230_vm4, %v13224_v52, %v2588_v56 }
 0x211   :  { %11876 = vmatmul.mubr.msk.bf16.gmra.mxu0 %vm2230_vm4, %v12095_v39  ;;  %v12069_v39 = vld [vmem:[#allocation2 + $0x80] sm:$0xff]  }
 0x217   :  { %v2634_v63 = vpop.permute.xlu1 %2633 }
 0x218   :  { %v14193_v4 = vsel %vm2230_vm4, %v13225_v59, %v2634_v63  ;;  %v12090_v63 = vld [vmem:[%s16749_s6 + $0x54] ss:$8 sps:$4 sm:$0xff]  }
 0x21d   :  { %v14172_v12 = vpop.permute.xlu0 %2682 }
 0x21e   :  { %v2748_v53 = vsel %vm2230_vm4, %v13224_v52, %v14172_v12  ;;  %v12015_v52 = vld [vmem:[#allocation2 + $0x50] sm:$0xff]  }
 0x21f   :  { %3484 = vmatprep.mubr.bf16.mxu1 %v2748_v53  ;;  %v2241_v56 = vsel %vm2230_vm4, %v12015_v52, %v13976_v21  ;;  %v12067_v21 = vld [vmem:[#allocation2 + $0x60] sm:$0xff]  }
 0x220   :  { %3485 = vmatmul.mubr.bf16.gmra.mxu1 %v14177_v54 }
 0x225   :  { %v14180_v57 = vpop.permute.xlu0 %2734 }
 0x226   :  { %v2794_v60 = vsel %vm2230_vm4, %v13225_v59, %v14180_v57 }
 0x227   :  { %3492 = vmatprep.mubr.bf16.mxu1 %v2794_v60  ;;  %v12084_v60 = vld [vmem:[%s16749_s6 + $0x60] ss:$8 sps:$4 sm:$0xff]  }
 0x228   :  { %3493 = vmatmul.mubr.bf16.gmra.mxu1 %v14185_v61 }
 0x22d   :  { %v14188_v0 = vpop.permute.xlu0 %2780 }
 0x22e   :  { %v2841_v2 = vsel %vm2230_vm4, %v13226_v1, %v14188_v0 }
 0x22f   :  { %3500 = vmatprep.mubr.bf16.mxu1 %v2841_v2  ;;  %v12094_v2 = vld [vmem:[%s16749_s6 + $0x44] ss:$8 sps:$4 sm:$0xff]  }
 0x230   :  { %3501 = vmatmul.mubr.bf16.gmra.mxu1 %v14193_v4 }
 0x231   :  { %v2872_v5 = vpop.permute.xlu0 %2871 }
 0x232   :  { %v2903_v7 = vsel %vm2230_vm4, %v14061_v50, %v2872_v5  ;;  %v2309_v5 = vsel %vm2230_vm4, %v12067_v21, %v13995_v51  ;;  %v12096_v51 = vld [vmem:[%s16749_s6 + $0x30] ss:$8 sps:$4 sm:$0xff]  }
 0x233   :  { %3508 = vmatprep.mubr.bf16.mxu1 %v2903_v7 }
 0x23f   :  { %v2695_v9 = vpop.permute.xlu1 %2694 }
 0x240   :  { %v14199_v3 = vsel %vm2230_vm4, %v12055_v8, %v2695_v9  ;;  %v12092_v8 = vld [vmem:[%s16749_s6 + $0x40] ss:$8 sps:$4 sm:$0xff]   ;;  %v12098_v9 = vld [vmem:[%s16749_s6 + $0x34] ss:$8 sps:$4 sm:$0xff]  }
 0x241   :  { %3509 = vmatmul.mubr.bf16.gmra.mxu1 %v14199_v3 }
 0x247   :  { %v2742_v18 = vpop.permute.xlu1 %2741 }
 0x248   :  { %v14222_v23 = vsel %vm2230_vm4, %v14061_v50, %v2742_v18 }
 0x24f   :  { %v2788_v28 = vpop.permute.xlu1 %2787 }
 0x250   :  { %v14234_v33 = vsel %vm2230_vm4, %v14074_v6, %v2788_v28  ;;  %v12099_v28 = vld [vmem:[%s16749_s6 + $0x20] ss:$8 sps:$4 sm:$0xff]  }
 0x257   :  { %v2834_v31 = vpop.permute.xlu1 %2833 }
 0x258   :  { %v14255_v42 = vsel %vm2230_vm4, %v14087_v35, %v2834_v31 }
 0x25d   :  { %v14215_v20 = vpop.permute.xlu0 %2883 }
 0x25e   :  { %v2949_v22 = vsel %vm2230_vm4, %v14074_v6, %v14215_v20 }
 0x25f   :  { %3516 = vmatprep.mubr.bf16.mxu1 %v2949_v22  ;;  %v12068_v22 = vld [vmem:[#allocation2 + $0x70] sm:$0xff]  }
 0x260   :  { %3517 = vmatmul.mubr.bf16.gmra.mxu1 %v14222_v23 }
 0x264   :  { %v11494_v26 = vpop.f32.mrf.mxu1 }
 0x265   :  { %v14227_v29 = vpop.permute.xlu0 %2935 }
 0x266   :  { %v2995_v30 = vsel %vm2230_vm4, %v14087_v35, %v14227_v29  ;;  %v11495_v32 = vpop.f32.mrf.mxu1  ;;  %v12086_v35 = vld [vmem:[%s16749_s6 + $0x64] ss:$8 sps:$4 sm:$0xff]  }
 0x267   :  { %3524 = vmatprep.mubr.bf16.mxu1 %v2995_v30  ;;  %v14236_v50 = vadd.f32 %v11495_v32, %v11494_v26  ;;  %v2377_v26 = vsel %vm2230_vm4, %v12068_v22, %v14011_v15  ;;  %v12104_v30 = vld [vmem:[%s16749_s6 + $0x14] ss:$8 sps:$4 sm:$0xff]   ;;  %v12102_v15 = vld [vmem:[%s16749_s6 + $0x10] ss:$8 sps:$4 sm:$0xff]  }
 0x268   :  { %3525 = vmatmul.mubr.bf16.gmra.mxu1 %v14234_v33  ;;  %v14239_v34 = vpop.f32.mrf.mxu1 }
 0x26a   :  { %v14241_v37 = vpop.f32.mrf.mxu1 }
 0x26c   :  { %v11500_v40 = vpop.f32.mrf.mxu1 }
 0x26d   :  { %v14247_v41 = vpop.permute.xlu0 %2981 }
 0x26e   :  { %v3042_v6 = vsel %vm2230_vm4, %v14109_v36, %v14247_v41  ;;  %v11501_v46 = vpop.f32.mrf.mxu1  ;;  %v12079_v36 = vld [vmem:[%s16749_s6 + $0x70] ss:$8 sps:$4 sm:$0xff]  }
 0x26f   :  { %3532 = vmatprep.mubr.bf16.mxu1 %v3042_v6  ;;  %v14257_v44 = vadd.f32 %v11501_v46, %v11500_v40  ;;  %v12105_v40 = vld [vmem:[%s16749_s6] ss:$8 sps:$4 sm:$0xff]   ;;  %v12110_v6 = vld [vmem:[%s16749_s6 + $0xf4] ss:$8 sps:$4 sm:$0xff]  }
 0x270   :  { %3533 = vmatmul.mubr.bf16.gmra.mxu1 %v14255_v42  ;;  %v14260_v45 = vpop.f32.mrf.mxu1  ;;  %v12070_v46 = vld [vmem:[#allocation2 + $0xe0] sm:$0xff]  }
 0x271   :  { %3573 = vmatprep.mubr.bf16.mxu1 %v14049_v17  ;;  %v2424_v32 = vpop.permute.xlu0 %2423  ;;  %v2506_v52 = vsel %vm2230_vm4, %v12070_v46, %v14096_v49  ;;  %v12075_v46 = vld [vmem:[#allocation2 + $0x170] sm:$0xff]  }
 0x272   :  { %v14263_v47 = vpop.f32.mrf.mxu1  ;;  %v2445_v31 = vsel %vm2230_vm4, %v12069_v39, %v2424_v32  ;;  %v12123_v32 = vld [vmem:[%s16749_s6 + $0x160] ss:$8 sps:$4 sm:$0xff]  }
 0x274   :  { %v11506_v48 = vpop.f32.mrf.mxu1 }
 0x276   :  { %v11507_v53 = vpop.f32.mrf.mxu1 }
 0x277   :  { %v14273_v59 = vadd.f32 %v11507_v53, %v11506_v48  ;;  %v12108_v48 = vld [vmem:[%s16749_s6 + $0xf0] ss:$8 sps:$4 sm:$0xff]  }
 0x278   :  { %3574 = vmatmul.mubr.bf16.vlgmr.msra.gmra.mxu1 %v2241_v56  ;;  %v14276_v17 = vpop.f32.mrf.mxu1 }
 0x279   :  { %3581 = vmatprep.mubr.bf16.mxu1 %v14103_v55  ;;  %4852 = vmatpush1.bf16.msra.mxu1 %v12079_v36  ;;  %v12088_v55 = vld [vmem:[%s16749_s6 + $0x50] ss:$8 sps:$4 sm:$0xff]   ;;  %v12111_v36 = vld [vmem:[%s16749_s6 + $0xe0] ss:$8 sps:$4 sm:$0xff]  }
 0x27a   :  { %4853 = vmatprep.subr.bf16.mxu1 %v12086_v35  ;;  %v14284_v1 = vpop.f32.mrf.mxu1  ;;  %v12071_v35 = vld [vmem:[#allocation2 + $0xf0] sm:$0xff]  }
 0x27d   :  { %4854 = vmatpush1.bf16.msra.mxu1 %v12084_v60  ;;  %v2552_v60 = vsel %vm2230_vm4, %v12071_v35, %v14120_v19  ;;  %v12137_v35 = vld [vmem:[%s16749_s6 + $0x134] ss:$8 sps:$4 sm:$0xff]  }
 0x27e   :  { %4855 = vmatprep.subr.bf16.mxu1 %v12090_v63 }
 0x280   :  { %3582 = vmatmul.mubr.bf16.gmra.mxu1 %v2309_v5  ;;  %v12116_v5 = vld [vmem:[%s16749_s6 + $0xd4] ss:$8 sps:$4 sm:$0xff]  }
 0x281   :  { %3589 = vmatprep.mubr.bf16.mxu1 %v14126_v27  ;;  %4856 = vmatpush1.bf16.msra.mxu1 %v12088_v55  ;;  %v12101_v27 = vld [vmem:[%s16749_s6 + $0x24] ss:$8 sps:$4 sm:$0xff]   ;;  %v12072_v55 = vld [vmem:[#allocation2 + $0x100] sm:$0xff]  }
 0x282   :  { %v11512_v7 = vpop.f32.mrf.mxu1  ;;  %4857 = vmatprep.subr.bf16.mxu1 %v12094_v2  ;;  %v12114_v2 = vld [vmem:[%s16749_s6 + $0xd0] ss:$8 sps:$4 sm:$0xff]   ;;  %v2598_v19 = vsel %vm2230_vm4, %v12072_v55, %v14138_v58 }
 0x284   :  { %v11513_v10 = vpop.f32.mrf.mxu1 }
 0x285   :  { %v14301_v18 = vadd.f32 %v11513_v10, %v11512_v7  ;;  %4858 = vmatpush1.bf16.msra.mxu1 %v12092_v8  ;;  %v12119_v8 = vld [vmem:[%s16749_s6 + $0x174] ss:$8 sps:$4 sm:$0xff]   ;;  %v12117_v10 = vld [vmem:[%s16749_s6 + $0x170] ss:$8 sps:$4 sm:$0xff]  }
 0x286   :  { %4859 = vmatprep.subr.bf16.mxu1 %v12098_v9  ;;  %v14344_v53 = vpop.f32.mrf.mxu1  ;;  %4924 = vmatprep.subr.bf16.mxu0 %v12119_v8 }
 0x287   :  { %4925 = vmatpush1.bf16.msra.mxu0 %v12117_v10 }
 0x288   :  { %3590 = vmatmul.mubr.bf16.gmra.mxu1 %v2377_v26  ;;  %v14346_v56 = vpop.f32.mrf.mxu1  ;;  %v12122_v26 = vld [vmem:[%s16749_s6 + $0xc4] ss:$8 sps:$4 sm:$0xff]  }
 0x289   :  { %3597 = vmatprep.mubr.bf16.mxu1 %v14145_v62  ;;  %4860 = vmatpush1.bf16.msra.mxu1 %v12096_v51  ;;  %v12107_v62 = vld [vmem:[%s16749_s6 + $0x4] ss:$8 sps:$4 sm:$0xff]   ;;  %v2627_v51 = vpop.permute.xlu1 %2626 }
 0x28a   :  { %4861 = vmatprep.subr.bf16.mxu1 %v12101_v27  ;;  %v12074_v27 = vld [vmem:[#allocation2 + $0x110] sm:$0xff]  }
 0x28b   :  { %v2645_v39 = vsel %vm2230_vm4, %v12074_v27, %v2627_v51  ;;  %v12152_v51 = vld [vmem:[%s16749_s6 + $0x104] ss:$8 sps:$4 sm:$0xff]   ;;  %v12150_v27 = vld [vmem:[%s16749_s6 + $0x100] ss:$8 sps:$4 sm:$0xff]  }
 0x28d   :  { %4862 = vmatpush1.bf16.msra.mxu1 %v12099_v28  ;;  %v12125_v28 = vld [vmem:[%s16749_s6 + $0x164] ss:$8 sps:$4 sm:$0xff]  }
 0x28e   :  { %4863 = vmatprep.subr.bf16.mxu1 %v12104_v30  ;;  %4926 = vmatprep.subr.bf16.mxu0 %v12125_v28  ;;  %v12149_v28 = vld [vmem:[%s16749_s6 + $0x94] ss:$8 sps:$4 sm:$0xff]  }
 0x28f   :  { %4927 = vmatpush1.bf16.msra.mxu0 %v12123_v32  ;;  %v12155_v32 = vld [vmem:[%s16749_s6 + $0x1f4] ss:$8 sps:$4 sm:$0xff]  }
 0x290   :  { %3598 = vmatmul.mubr.bf16.gmra.mxu1 %v2445_v31 }
 0x291   :  { %3605 = vmatprep.mubr.bf16.mxu1 %v14165_v43  ;;  %4864 = vmatpush1.bf16.msra.mxu1 %v12102_v15  ;;  %v12113_v43 = vld [vmem:[%s16749_s6 + $0xe4] ss:$8 sps:$4 sm:$0xff]  }
 0x292   :  { %4865 = vmatprep.subr.bf16.mxu1 %v12107_v62  ;;  %v12128_v62 = vld [vmem:[%s16749_s6 + $0x154] ss:$8 sps:$4 sm:$0xff]  }
 0x293   :  { %4928 = vmatprep.subr.bf16.mxu0 %v12128_v62  ;;  %v12078_v62 = vld [vmem:[#allocation2 + $0x1a0] sm:$0xff]  }
 0x295   :  { %4866 = vmatpush1.bf16.msra.mxu1 %v12105_v40  ;;  %v12126_v40 = vld [vmem:[%s16749_s6 + $0x150] ss:$8 sps:$4 sm:$0xff]  }
 0x296   :  { %4867 = vmatprep.subr.bf16.mxu1 %v12110_v6  ;;  %4929 = vmatpush1.bf16.msra.mxu0 %v12126_v40  ;;  %v12161_v40 = vld [vmem:[%s16749_s6 + $0x1e4] ss:$8 sps:$4 sm:$0xff]  }
 0x298   :  { %3606 = vmatmul.mubr.bf16.gmra.mxu1 %v2506_v52  ;;  %v12132_v52 = vld [vmem:[%s16749_s6 + $0x140] ss:$8 sps:$4 sm:$0xff]  }
 0x299   :  { %3613 = vmatprep.mubr.bf16.mxu1 %v14177_v54  ;;  %4868 = vmatpush2.bf16.msra.mxu1 %v12108_v48  ;;  %v12129_v48 = vld [vmem:[%s16749_s6 + $0xb0] ss:$8 sps:$4 sm:$0xff]  }
 0x29a   :  { %4869 = vmatprep.subr.bf16.mxu1 %v12113_v43  ;;  %v12134_v43 = vld [vmem:[%s16749_s6 + $0x144] ss:$8 sps:$4 sm:$0xff]  }
 0x29b   :  { %4930 = vmatprep.subr.bf16.mxu0 %v12134_v43 }
 0x29c   :  { %4931 = vmatpush1.bf16.msra.mxu0 %v12132_v52  ;;  %v12164_v52 = vld [vmem:[%s16749_s6 + $0x1d4] ss:$8 sps:$4 sm:$0xff]  }
 0x29d   :  { %4870 = vmatpush2.bf16.msra.mxu1 %v12111_v36  ;;  %v2706_v36 = vsel %vm2230_vm4, %v12075_v46, %v14172_v12  ;;  %4932 = vmatprep.subr.bf16.mxu0 %v12137_v35  ;;  %v12076_v12 = vld [vmem:[#allocation2 + $0x180] sm:$0xff]  }
 0x29e   :  { %4871 = vmatprep.subr.bf16.mxu1 %v12116_v5  ;;  %v12162_v35 = vld [vmem:[%s16749_s6 + $0x1d0] ss:$8 sps:$4 sm:$0xff]  }
 0x2a0   :  { %3614 = vmatmul.mubr.bf16.gmra.mxu1 %v2552_v60  ;;  %v12135_v60 = vld [vmem:[%s16749_s6 + $0x130] ss:$8 sps:$4 sm:$0xff]  }
 0x2a1   :  { %v11518_v63 = vpop.f32.mrf.mxu1  ;;  %3621 = vmatprep.mubr.bf16.mxu1 %v14185_v61  ;;  %4872 = vmatpush2.bf16.msra.mxu1 %v12114_v2  ;;  %v2752_v2 = vsel %vm2230_vm4, %v12076_v12, %v14180_v57  ;;  %v12140_v57 = vld [vmem:[%s16749_s6 + $0xa4] ss:$8 sps:$4 sm:$0xff]   ;;  %v12060_v12 = vld [vmem:[#allocation2 + $0x200] sm:$0xff]  }
 0x2a2   :  { %4873 = vmatprep.subr.bf16.mxu1 %v12122_v26  ;;  %4933 = vmatpush1.bf16.msra.mxu0 %v12135_v60  ;;  %v12147_v26 = vld [vmem:[%s16749_s6 + $0x90] ss:$8 sps:$4 sm:$0xff]  }
 0x2a3   :  { %v11519_v49 = vpop.f32.mrf.mxu1 }
 0x2a4   :  { %v14351_v54 = vadd.f32 %v11519_v49, %v11518_v63  ;;  %v12143_v49 = vld [vmem:[%s16749_s6 + $0x124] ss:$8 sps:$4 sm:$0xff]  }
 0x2a5   :  { %v14353_v21 = vpop.f32.mrf.mxu1  ;;  %4934 = vmatprep.subr.bf16.mxu0 %v12143_v49  ;;  %v12170_v49 = vld [vmem:[%s16749_s6 + $0x1c4] ss:$8 sps:$4 sm:$0xff]  }
 0x2a7   :  { %v14361_v7 = vpop.f32.mrf.mxu1 }
 0x2a8   :  { %3622 = vmatmul.mubr.bf16.gmra.mxu1 %v2598_v19  ;;  %v12146_v19 = vld [vmem:[%s16749_s6 + $0x114] ss:$8 sps:$4 sm:$0xff]  }
 0x2a9   :  { %v11524_v61 = vpop.f32.mrf.mxu1  ;;  %3629 = vmatprep.mubr.bf16.mxu1 %v14193_v4  ;;  %v12120_v4 = vld [vmem:[%s16749_s6 + $0xc0] ss:$8 sps:$4 sm:$0xff]  }
 0x2aa   :  { %4874 = vmatpush2.bf16.msra.mxu1 %v12120_v4 }
 0x2ab   :  { %v11525_v9 = vpop.f32.mrf.mxu1 }
 0x2ac   :  { %v14372_v22 = vadd.f32 %v11525_v9, %v11524_v61  ;;  %v12144_v61 = vld [vmem:[%s16749_s6 + $0x110] ss:$8 sps:$4 sm:$0xff]   ;;  %v12138_v9 = vld [vmem:[%s16749_s6 + $0xa0] ss:$8 sps:$4 sm:$0xff]  }
 0x2ad   :  { %v14374_v58 = vpop.f32.mrf.mxu1 }
 0x2af   :  { %v14385_v30 = vpop.f32.mrf.mxu1 }
 0x2b0   :  { %3630 = vmatmul.mubr.bf16.gmra.mxu1 %v2645_v39  ;;  %v12082_v39 = vld [vmem:[#allocation2 + $0x240] sm:$0xff]  }
 0x2b1   :  { %v11530_v15 = vpop.f32.mrf.mxu1  ;;  %3637 = vmatprep.mubr.bf16.mxu1 %v14199_v3  ;;  %v12131_v3 = vld [vmem:[%s16749_s6 + $0xb4] ss:$8 sps:$4 sm:$0xff]  }
 0x2b2   :  { %4875 = vmatprep.subr.bf16.mxu1 %v12131_v3  ;;  %v12159_v3 = vld [vmem:[%s16749_s6 + $0x1e0] ss:$8 sps:$4 sm:$0xff]  }
 0x2b3   :  { %v11531_v31 = vpop.f32.mrf.mxu1  ;;  %4876 = vmatpush2.bf16.msra.mxu1 %v12129_v48  ;;  %v12156_v48 = vld [vmem:[%s16749_s6 + $0x80] ss:$8 sps:$4 sm:$0xff]  }
 0x2b4   :  { %v14398_v6 = vadd.f32 %v11531_v31, %v11530_v15  ;;  %4877 = vmatprep.subr.bf16.mxu1 %v12140_v57  ;;  %v2896_v15 = vpop.permute.xlu1 %2895  ;;  %v12158_v31 = vld [vmem:[%s16749_s6 + $0x84] ss:$8 sps:$4 sm:$0xff]  }
 0x2b5   :  { %v14421_v63 = vpop.f32.mrf.mxu1  ;;  %v2911_v46 = vsel %vm2230_vm4, %v12082_v39, %v2896_v15 }
 0x2b7   :  { %v14429_v55 = vpop.f32.mrf.mxu1  ;;  %4878 = vmatpush2.bf16.msra.mxu1 %v12138_v9 }
 0x2b8   :  { %3638 = vmatmul.mubr.bf16.gmra.mxu1 %v2706_v36  ;;  %4879 = vmatprep.subr.bf16.mxu1 %v12149_v28  ;;  %v12167_v36 = vld [vmem:[%s16749_s6 + $0x274] ss:$8 sps:$4 sm:$0xff]   ;;  %v2989_v9 = vpop.permute.xlu1 %2988 }
 0x2b9   :  { %3645 = vmatprep.mubr.bf16.mxu1 %v14222_v23  ;;  %v12141_v23 = vld [vmem:[%s16749_s6 + $0x120] ss:$8 sps:$4 sm:$0xff]  }
 0x2ba   :  { %4935 = vmatpush1.bf16.msra.mxu0 %v12141_v23 }
 0x2bb   :  { %4936 = vmatprep.subr.bf16.mxu0 %v12146_v19  ;;  %4880 = vmatpush2.bf16.msra.mxu1 %v12147_v26  ;;  %v12176_v19 = vld [vmem:[%s16749_s6 + $0x1b4] ss:$8 sps:$4 sm:$0xff]  }
 0x2bc   :  { %4881 = vmatprep.subr.bf16.mxu1 %v12158_v31  ;;  %v12188_v26 = vld [vmem:[%s16749_s6 + $0x194] ss:$8 sps:$4 sm:$0xff]   ;;  %v12192_v31 = vld [vmem:[%s16749_s6 + $0x180] ss:$8 sps:$4 sm:$0xff]  }
 0x2be   :  { %4937 = vmatpush1.bf16.msra.mxu0 %v12144_v61 }
 0x2bf   :  { %4938 = vmatprep.subr.bf16.mxu0 %v12152_v51  ;;  %4882 = vmatpush2.bf16.msra.mxu1 %v12156_v48  ;;  %v12180_v51 = vld [vmem:[%s16749_s6 + $0x1a0] ss:$8 sps:$4 sm:$0xff]   ;;  %v12203_v48 = vld [vmem:[%s16749_s6 + $0x374] ss:$8 sps:$4 sm:$0xff]  }
 0x2c0   :  { %3646 = vmatmul.mubr.bf16.gmra.mxu1 %v2752_v2  ;;  %4997 = vmatprep.subr.bf16.mxu1 %v12167_v36  ;;  %v12168_v2 = vld [vmem:[%s16749_s6 + $0x1c0] ss:$8 sps:$4 sm:$0xff]  }
 0x2c1   :  { %v11536_v5 = vpop.f32.mrf.mxu1  ;;  %3653 = vmatprep.mubr.bf16.mxu1 %v14234_v33  ;;  %v12077_v33 = vld [vmem:[#allocation2 + $0x190] sm:$0xff]  }
 0x2c2   :  { %v2798_v4 = vsel %vm2230_vm4, %v12077_v33, %v14188_v0  ;;  %4939 = vmatpush1.bf16.msra.mxu0 %v12150_v27  ;;  %v12153_v0 = vld [vmem:[%s16749_s6 + $0x1f0] ss:$8 sps:$4 sm:$0xff]   ;;  %v3003_v33 = vsel %vm2230_vm4, %v14207_v14, %v2989_v9 }
 0x2c3   :  { %v11537_v8 = vpop.f32.mrf.mxu1  ;;  %4940 = vmatprep.subr.bf16.mxu0 %v12155_v32  ;;  %v12186_v14 = vld [vmem:[%s16749_s6 + $0x190] ss:$8 sps:$4 sm:$0xff]  }
 0x2c4   :  { %v14446_v10 = vadd.f32 %v11537_v8, %v11536_v5  ;;  %v2907_v5 = vsel %vm2230_vm4, %v12060_v12, %v14215_v20  ;;  %v12061_v8 = vld [vmem:[#allocation2 + $0x210] sm:$0xff]  }
 0x2c5   :  { %v14505_v61 = vpop.f32.mrf.mxu1  ;;  %v12182_v20 = vld [vmem:[%s16749_s6 + $0x1a4] ss:$8 sps:$4 sm:$0xff]   ;;  %v2953_v27 = vsel %vm2230_vm4, %v12061_v8, %v14227_v29  ;;  %v12065_v29 = vld [vmem:[#allocation2 + $0x220] sm:$0xff]  }
 0x2c6   :  { %4941 = vmatpush2.bf16.msra.mxu0 %v12153_v0 }
 0x2c7   :  { %4942 = vmatprep.subr.bf16.mxu0 %v12161_v40  ;;  %v14513_v57 = vpop.f32.mrf.mxu1  ;;  %v2999_v40 = vsel %vm2230_vm4, %v12065_v29, %v14247_v41 }
 0x2c8   :  { %3654 = vmatmul.mubr.bf16.gmra.mxu1 %v2798_v4 }
 0x2c9   :  { %3661 = vmatprep.mubr.bf16.mxu1 %v14255_v42  ;;  %v2827_v42 = vpop.permute.xlu0 %2826 }
 0x2ca   :  { %v2845_v43 = vsel %vm2230_vm4, %v12078_v62, %v2827_v42  ;;  %4943 = vmatpush2.bf16.msra.mxu0 %v12159_v3  ;;  %v12194_v42 = vld [vmem:[%s16749_s6 + $0x184] ss:$8 sps:$4 sm:$0xff]  }
 0x2cb   :  { %4944 = vmatprep.subr.bf16.mxu0 %v12164_v52 }
 0x2cd   :  { %v2943_v60 = vpop.permute.xlu0 %2942 }
 0x2ce   :  { %4945 = vmatpush2.bf16.msra.mxu0 %v12162_v35  ;;  %v2957_v23 = vsel %vm2230_vm4, %v14205_v11, %v2943_v60  ;;  %v12174_v11 = vld [vmem:[%s16749_s6 + $0x1b0] ss:$8 sps:$4 sm:$0xff]  }
 0x2cf   :  { %4946 = vmatprep.subr.bf16.mxu0 %v12170_v49 }
 0x2d0   :  { %3662 = vmatmul.mubr.bf16.gmra.mxu1 %v2845_v43  ;;  %v12073_v43 = vld [vmem:[#allocation2 + $0x230] sm:$0xff]  }
 0x2d1   :  { %3669 = vmatprep.mubr.bf16.mxu1 %v2911_v46  ;;  %v3035_v39 = vpop.permute.xlu0 %3034 }
 0x2d2   :  { %4947 = vmatpush2.bf16.msra.mxu0 %v12168_v2  ;;  %v3050_v62 = vsel %vm2230_vm4, %v14243_v38, %v3035_v39  ;;  %v3028_v38 = vpop.permute.xlu1 %3027 }
 0x2d3   :  { %4948 = vmatprep.subr.bf16.mxu0 %v12176_v19  ;;  %v3046_v41 = vsel %vm2230_vm4, %v12073_v43, %v3028_v38  ;;  %v14584_v38 = vld [vmem:[#allocation6] ss:$0 sm:$0xff] }
 0x2d6   :  { %4949 = vmatpush2.bf16.msra.mxu0 %v12174_v11 }
 0x2d7   :  { %4950 = vmatprep.subr.bf16.mxu0 %v12182_v20 }
 0x2d8   :  { %3670 = vmatmul.mubr.bf16.gmra.mxu1 %v2907_v5 }
 0x2d9   :  { %3677 = vmatprep.mubr.bf16.mxu1 %v2957_v23 }
 0x2da   :  { %4951 = vmatpush2.bf16.msra.mxu0 %v12180_v51 }
 0x2db   :  { %4952 = vmatprep.subr.bf16.mxu0 %v12188_v26 }
 0x2de   :  { %4953 = vmatpush2.bf16.msra.mxu0 %v12186_v14 }
 0x2df   :  { %4954 = vmatprep.subr.bf16.mxu0 %v12194_v42 }
 0x2e0   :  { %v11542_v4 = vpop.f32.mrf.mxu1  ;;  %3678 = vmatmul.mubr.bf16.gmra.mxu1 %v2953_v27 }
 0x2e1   :  { %3685 = vmatprep.mubr.bf16.mxu1 %v3003_v33 }
 0x2e2   :  { %v11543_v28 = vpop.f32.mrf.mxu1  ;;  %4955 = vmatpush2.bf16.msra.mxu0 %v12192_v31 }
 0x2e3   :  { %v14528_v32 = vadd.f32 %v11543_v28, %v11542_v4  ;;  %5070 = vmatprep.subr.bf16.mxu0 %v12203_v48 }
 0x2e4   :  { %v14530_v0 = vpop.f32.mrf.mxu1 }
 0x2e6   :  { %v14535_v15 = vpop.f32.mrf.mxu1 }
 0x2e8   :  { %v11548_v46 = vpop.f32.mrf.mxu1  ;;  %3686 = vmatmul.mubr.bf16.gmra.mxu1 %v2999_v40 }
 0x2e9   :  { %3693 = vmatprep.mubr.bf16.mxu1 %v3050_v62 }
 0x2ea   :  { %v11549_v3 = vpop.f32.mrf.mxu1 }
 0x2eb   :  { %v14547_v52 = vadd.f32 %v11549_v3, %v11548_v46  ;;  %v11849_v46 = vpop.f32.mrf.mxu0 }
 0x2ec   :  { %v14549_v36 = vpop.f32.mrf.mxu1 }
 0x2ed   :  { %v3736_v43 = vpop.f32.mrf.mxu0 }
 0x2ee   :  { %v14551_v35 = vpop.f32.mrf.mxu1 }
 0x2f0   :  { %v11554_v60 = vpop.f32.mrf.mxu1  ;;  %3694 = vmatmul.mubr.bf16.gmra.mxu1 %v3046_v41 }
 0x2f2   :  { %v11555_v12 = vpop.f32.mrf.mxu1 }
 0x2f3   :  { %v14554_v49 = vadd.f32 %v11555_v12, %v11554_v60  ;;  %v3415_v60 = vadd.f32 %v14116_v13, %v14584_v38  ;;  %v11493_v12 = vadd.f32 %v14224_v24, %v14211_v16  ;;  %v3423_v13 = vadd.f32 %v14236_v50, %v14584_v38 }
 0x2f4   :  { %v14556_v23 = vpop.f32.mrf.mxu1 }
 0x2f6   :  { %v14558_v2 = vpop.f32.mrf.mxu1 }
 0x301   :  { %v11560_v5 = vpop.f32.mrf.mxu1 }
 0x303   :  { %v11561_v19 = vpop.f32.mrf.mxu1 }
 0x304   :  { %v14560_v11 = vadd.f32 %v11561_v19, %v11560_v5 }
 0x305   :  { %v14562_v8 = vpop.f32.mrf.mxu1 }
 0x307   :  { %v14564_v9 = vpop.f32.mrf.mxu1 }
 0x320   :  { %v11566_v20 = vpop.f32.mrf.mxu1 }
 0x322   :  { %v11567_v33 = vpop.f32.mrf.mxu1 }
 0x323   :  { %v14566_v51 = vadd.f32 %v11567_v33, %v11566_v20  ;;  %v11850_v33 = vpop.f32.mrf.mxu0 }
 0x324   :  { %v14568_v27 = vpop.f32.mrf.mxu1 }
 0x326   :  { %v14570_v4 = vpop.f32.mrf.mxu1 }
 0x328   :  { %v11572_v26 = vpop.f32.mrf.mxu1 }
 0x32a   :  { %v11573_v28 = vpop.f32.mrf.mxu1 }
 0x32b   :  { %v14572_v14 = vadd.f32 %v11573_v28, %v11572_v26  ;;  %v3418_v28 = vadd.f32 %v11493_v12, %v14584_v38 }
 0x32c   :  { %v14574_v39 = vpop.f32.mrf.mxu1 }
 0x32d   :  { %16765 = vst [vmem:[#allocation18_spill] sm:$0xff] %v14572_v14 }
 0x32e   :  { %v14576_v29 = vpop.f32.mrf.mxu1 }
 0x32f   :  { %16766 = vst [vmem:[#allocation19_spill] sm:$0xff] %v14576_v29 }
 0x330   :  { %v11578_v42 = vpop.f32.mrf.mxu1 }
 0x332   :  { %v11579_v62 = vpop.f32.mrf.mxu1 }
 0x333   :  { %v14578_v31 = vadd.f32 %v11579_v62, %v11578_v42 }
 0x334   :  { %v14580_v40 = vpop.f32.mrf.mxu1 }
 0x335   :  { %16767 = vst [vmem:[#allocation20_spill] sm:$0xff] %v14578_v31  ;;  %16768 = vst [vmem:[#allocation21_spill] sm:$0xff] %v14580_v40  ;;  %v11499_v40 = vadd.f32 %v14241_v37, %v14239_v34 }
 0x336   :  { %v14582_v48 = vpop.f32.mrf.mxu1 }
 0x337   :  { %16769 = vst [vmem:[#allocation22_spill] sm:$0xff] %v14582_v48  ;;  %v3739_v48 = vpop.f32.mrf.mxu0 }
 0x338   :  { %v11600_v3 = vpop.f32.mrf.mxu1 }
 0x33a   :  { %v11601_v41 = vpop.f32.mrf.mxu1 }
 0x33b   :  { %v11602_v5 = vadd.f32 %v11601_v41, %v11600_v3 }
 0x33c   :  { %v11603_v19 = vpop.f32.mrf.mxu1 }
 0x33d   :  { %v3576_v20 = vadd.f32 %v11602_v5, %v3415_v60  ;;  %v3426_v5 = vadd.f32 %v11499_v40, %v14584_v38 }
 0x33e   :  { %v11604_v26 = vpop.f32.mrf.mxu1 }
 0x33f   :  { %v3737_v42 = vadd.f32 %v3736_v43, %v3576_v20  ;;  %v11605_v62 = vadd.f32 %v11604_v26, %v11603_v19  ;;  %v11853_v43 = vpop.f32.mrf.mxu0 }
 0x340   :  { %v11606_v25 = vpop.f32.mrf.mxu1 }
 0x341   :  { %v3579_v31 = vadd.f32 %v11605_v62, %v3418_v28  ;;  %v3895_v16 = vmul.f32 0.2, %v3737_v42  ;;  %vm3863_vm5 = vcmp.ge.f32.partialorder %v3737_v42, 0.0  ;;  %v3752_v50 = vpop.f32.mrf.mxu0 }
 0x342   :  { %v11607_v14 = vpop.f32.mrf.mxu1 }
 0x343   :  { %v3740_v24 = vadd.f32 %v3739_v48, %v3579_v31  ;;  %v11608_v3 = vadd.f32 %v11607_v14, %v11606_v25  ;;  %v3927_v20 = vsel %vm3863_vm5, %v3737_v42, %v3895_v16  ;;  %v11505_v25 = vadd.f32 %v14263_v47, %v14260_v45  ;;  %v11854_v16 = vpop.f32.mrf.mxu0 }
 0x344   :  { %v11609_v41 = vpop.f32.mrf.mxu1  ;;  %v3431_v31 = vadd.f32 %v14257_v44, %v14584_v38  ;;  %v12165_v44 = vld [vmem:[%s16749_s6 + $0x270] ss:$8 sps:$4 sm:$0xff]  }
 0x345   :  { %vm3864_vm6 = vcmp.ge.f32.partialorder %v3740_v24, 0.0  ;;  %v3896_v60 = vmul.f32 0.2, %v3740_v24  ;;  %v3584_v12 = vadd.f32 %v11608_v3, %v3423_v13 }
 0x346   :  { %v11610_v19 = vpop.f32.mrf.mxu1 }
 0x347   :  { %v3928_v26 = vsel %vm3864_vm6, %v3740_v24, %v3896_v60  ;;  %v3745_v28 = vadd.f32 %v11849_v46, %v3584_v12  ;;  %v11611_v34 = vadd.f32 %v11610_v19, %v11609_v41  ;;  %v3434_v24 = vadd.f32 %v11505_v25, %v14584_v38 }
 0x348   :  { %v3959_v37 = vpack.c.bf16 %v3928_v26, %v3927_v20  ;;  %v11612_v62 = vpop.f32.mrf.mxu1  ;;  %v3755_v20 = vpop.f32.mrf.mxu0  ;;  %v11511_v26 = vadd.f32 %v14284_v1, %v14276_v17  ;;  %v12179_v1 = vld [vmem:[%s16749_s6 + $0x254] ss:$8 sps:$4 sm:$0xff]  }
 0x349   :  { %v3587_v29 = vadd.f32 %v11611_v34, %v3426_v5  ;;  %v3897_v48 = vmul.f32 0.2, %v3745_v28  ;;  %vm3865_vm7 = vcmp.ge.f32.partialorder %v3745_v28, 0.0 }
 0x34a   :  { %v11613_v14 = vpop.f32.mrf.mxu1 }
 0x34b   :  { %v3748_v13 = vadd.f32 %v11850_v33, %v3587_v29  ;;  %v11614_v3 = vadd.f32 %v11613_v14, %v11612_v62  ;;  %v3929_v5 = vsel %vm3865_vm7, %v3745_v28, %v3897_v48  ;;  %v12173_v33 = vld [vmem:[%s16749_s6 + $0x264] ss:$8 sps:$4 sm:$0xff]   ;;  %v3439_v28 = vadd.f32 %v14273_v59, %v14584_v38  ;;  %v14617_v59 = vpop.f32.mrf.mxu0 }
 0x34c   :  { %v11615_v40 = vpop.f32.mrf.mxu1 }
 0x34d   :  { %v3592_v42 = vadd.f32 %v11614_v3, %v3431_v31  ;;  %vm3866_vm8 = vcmp.ge.f32.partialorder %v3748_v13, 0.0  ;;  %v3898_v46 = vmul.f32 0.2, %v3748_v13  ;;  %v12171_v31 = vld [vmem:[%s16749_s6 + $0x260] ss:$8 sps:$4 sm:$0xff]  }
 0x34e   :  { %v11616_v41 = vpop.f32.mrf.mxu1 }
 0x34f   :  { %v3753_v60 = vadd.f32 %v3752_v50, %v3592_v42  ;;  %v11617_v12 = vadd.f32 %v11616_v41, %v11615_v40  ;;  %v3930_v45 = vsel %vm3866_vm8, %v3748_v13, %v3898_v46  ;;  %v3442_v13 = vadd.f32 %v11511_v26, %v14584_v38 }
 0x350   :  { %v11618_v47 = vpop.f32.mrf.mxu1  ;;  %v3960_v19 = vpack.c.bf16 %v3930_v45, %v3929_v5  ;;  %v12185_v45 = vld [vmem:[%s16749_s6 + $0x244] ss:$8 sps:$4 sm:$0xff]  }
 0x351   :  { %v3595_v29 = vadd.f32 %v11617_v12, %v3434_v24  ;;  %v3899_v62 = vmul.f32 0.2, %v3753_v60  ;;  %vm3867_vm9 = vcmp.ge.f32.partialorder %v3753_v60, 0.0  ;;  %v12177_v12 = vld [vmem:[%s16749_s6 + $0x250] ss:$8 sps:$4 sm:$0xff]  }
 0x352   :  { %v11619_v34 = vpop.f32.mrf.mxu1  ;;  %4883 = vmatprep.mubr.bf16.mxu1 %v3960_v19 }
 0x353   :  { %v3756_v50 = vadd.f32 %v3755_v20, %v3595_v29  ;;  %v11620_v25 = vadd.f32 %v11619_v34, %v11618_v47  ;;  %4884 = vmatmul.mubr.bf16.vlgmr.msra.gmra.mxu1 %v3959_v37  ;;  %v3931_v42 = vsel %vm3867_vm9, %v3753_v60, %v3899_v62  ;;  %v3768_v47 = vpop.f32.mrf.mxu0  ;;  %v12183_v34 = vld [vmem:[%s16749_s6 + $0x240] ss:$8 sps:$4 sm:$0xff]  }
 0x354   :  { %4998 = vmatpush1.bf16.msra.mxu1 %v12165_v44  ;;  %v11621_v14 = vpop.f32.mrf.mxu1  ;;  %v3447_v44 = vadd.f32 %v14301_v18, %v14584_v38 }
 0x355   :  { %v3600_v48 = vadd.f32 %v11620_v25, %v3439_v28  ;;  %4999 = vmatprep.subr.bf16.mxu1 %v12173_v33  ;;  %vm3868_vm10 = vcmp.ge.f32.partialorder %v3756_v50, 0.0  ;;  %v3900_v17 = vmul.f32 0.2, %v3756_v50  ;;  %v11858_v18 = vpop.f32.mrf.mxu0 }
 0x356   :  { %v11622_v37 = vpop.f32.mrf.mxu1 }
 0x357   :  { %v3761_v3 = vadd.f32 %v11853_v43, %v3600_v48  ;;  %v11623_v40 = vadd.f32 %v11622_v37, %v11621_v14  ;;  %v3932_v46 = vsel %vm3868_vm10, %v3756_v50, %v3900_v17  ;;  %v11517_v43 = vadd.f32 %v14346_v56, %v14344_v53  ;;  %v12191_v56 = vld [vmem:[%s16749_s6 + $0x234] ss:$8 sps:$4 sm:$0xff]   ;;  %v12189_v48 = vld [vmem:[%s16749_s6 + $0x230] ss:$8 sps:$4 sm:$0xff]   ;;  %v3771_v37 = vpop.f32.mrf.mxu0 }
 0x358   :  { %5000 = vmatpush1.bf16.msra.mxu1 %v12171_v31  ;;  %v11624_v24 = vpop.f32.mrf.mxu1  ;;  %v14620_v41 = vpack.c.bf16 %v3932_v46, %v3931_v42  ;;  %v3455_v42 = vadd.f32 %v14351_v54, %v14584_v38 }
 0x359   :  { %v3603_v5 = vadd.f32 %v11623_v40, %v3442_v13  ;;  %5001 = vmatprep.subr.bf16.mxu1 %v12179_v1  ;;  %v3901_v29 = vmul.f32 0.2, %v3761_v3  ;;  %vm3869_vm11 = vcmp.ge.f32.partialorder %v3761_v3, 0.0  ;;  %v12197_v13 = vld [vmem:[%s16749_s6 + $0x224] ss:$8 sps:$4 sm:$0xff]  }
 0x35a   :  { %v11625_v60 = vpop.f32.mrf.mxu1  ;;  %4893 = vmatprep.mubr.bf16.mxu1 %v14620_v41 }
 0x35b   :  { %v3764_v33 = vadd.f32 %v11854_v16, %v3603_v5  ;;  %v11626_v20 = vadd.f32 %v11625_v60, %v11624_v24  ;;  %4894 = vmatmul.mubr.bf16.gmra.mxu1 %v3960_v19  ;;  %v3450_v16 = vadd.f32 %v11517_v43, %v14584_v38  ;;  %v14640_v25 = vsel %vm3869_vm11, %v3761_v3, %v3901_v29 }
 0x35c   :  { %5002 = vmatpush1.bf16.msra.mxu1 %v12177_v12  ;;  %v11627_v26 = vpop.f32.mrf.mxu1  ;;  %v11523_v3 = vadd.f32 %v14361_v7, %v14353_v21  ;;  %v12200_v21 = vld [vmem:[%s16749_s6 + $0x214] ss:$8 sps:$4 sm:$0xff]   ;;  %v14662_v7 = vpop.f32.mrf.mxu0 }
 0x35d   :  { %vm3870_vm12 = vcmp.ge.f32.partialorder %v3764_v33, 0.0  ;;  %v3902_v28 = vmul.f32 0.2, %v3764_v33  ;;  %v3608_v53 = vadd.f32 %v11626_v20, %v3447_v44  ;;  %5003 = vmatprep.subr.bf16.mxu1 %v12185_v45  ;;  %v12195_v45 = vld [vmem:[%s16749_s6 + $0x220] ss:$8 sps:$4 sm:$0xff]  }
 0x35e   :  { %v11628_v62 = vpop.f32.mrf.mxu1  ;;  %v3458_v54 = vadd.f32 %v11523_v3, %v14584_v38 }
 0x35f   :  { %v3769_v19 = vadd.f32 %v3768_v47, %v3608_v53  ;;  %v11629_v50 = vadd.f32 %v11628_v62, %v11627_v26  ;;  %v14642_v14 = vsel %vm3870_vm12, %v3764_v33, %v3902_v28  ;;  %v12198_v28 = vld [vmem:[%s16749_s6 + $0x210] ss:$8 sps:$4 sm:$0xff]   ;;  %v3784_v62 = vpop.f32.mrf.mxu0 }
 0x360   :  { %5004 = vmatpush1.bf16.msra.mxu1 %v12183_v34  ;;  %v11630_v31 = vpop.f32.mrf.mxu1  ;;  %v3962_v17 = vpack.c.bf16 %v14642_v14, %v14640_v25  ;;  %v12201_v53 = vld [vmem:[%s16749_s6 + $0x370] ss:$8 sps:$4 sm:$0xff]   ;;  %v12227_v14 = vld [vmem:[%s16749_s6 + $0x334] ss:$8 sps:$4 sm:$0xff]  }
 0x361   :  { %v3611_v1 = vadd.f32 %v11629_v50, %v3450_v16  ;;  %5005 = vmatprep.subr.bf16.mxu1 %v12191_v56  ;;  %v3903_v46 = vmul.f32 0.2, %v3769_v19  ;;  %vm3871_vm13 = vcmp.ge.f32.partialorder %v3769_v19, 0.0  ;;  %v12209_v16 = vld [vmem:[%s16749_s6 + $0x364] ss:$8 sps:$4 sm:$0xff]  }
 0x362   :  { %v11631_v40 = vpop.f32.mrf.mxu1 }
 0x363   :  { %v3772_v24 = vadd.f32 %v3771_v37, %v3611_v1  ;;  %v11632_v12 = vadd.f32 %v11631_v40, %v11630_v31  ;;  %v3935_v33 = vsel %vm3871_vm13, %v3769_v19, %v3903_v46  ;;  %v11529_v19 = vadd.f32 %v14385_v30, %v14374_v58  ;;  %v12204_v37 = vld [vmem:[%s16749_s6 + $0x200] ss:$8 sps:$4 sm:$0xff]   ;;  %v14695_v40 = vpop.f32.mrf.mxu0 }
 0x364   :  { %5006 = vmatpush1.bf16.msra.mxu1 %v12189_v48  ;;  %v11633_v5 = vpop.f32.mrf.mxu1  ;;  %v3463_v31 = vadd.f32 %v14372_v22, %v14584_v38  ;;  %v12207_v58 = vld [vmem:[%s16749_s6 + $0x360] ss:$8 sps:$4 sm:$0xff]   ;;  %v12212_v22 = vld [vmem:[%s16749_s6 + $0x2f4] ss:$8 sps:$4 sm:$0xff]  }
 0x365   :  { %v3616_v47 = vadd.f32 %v11632_v12, %v3455_v42  ;;  %5007 = vmatprep.subr.bf16.mxu1 %v12197_v13  ;;  %vm3872_vm14 = vcmp.ge.f32.partialorder %v3772_v24, 0.0  ;;  %v3904_v43 = vmul.f32 0.2, %v3772_v24  ;;  %v3466_v42 = vadd.f32 %v11529_v19, %v14584_v38 }
 0x366   :  { %v11634_v60 = vpop.f32.mrf.mxu1 }
 0x367   :  { %v3777_v44 = vadd.f32 %v14617_v59, %v3616_v47  ;;  %v11635_v29 = vadd.f32 %v11634_v60, %v11633_v5  ;;  %v3936_v20 = vsel %vm3872_vm14, %v3772_v24, %v3904_v43  ;;  %v12206_v59 = vld [vmem:[%s16749_s6 + $0x204] ss:$8 sps:$4 sm:$0xff]  }
 0x368   :  { %5008 = vmatpush1.bf16.msra.mxu1 %v12195_v45  ;;  %v11636_v26 = vpop.f32.mrf.mxu1  ;;  %v3963_v34 = vpack.c.bf16 %v3936_v20, %v3935_v33  ;;  %v3787_v33 = vpop.f32.mrf.mxu0  ;;  %v11535_v20 = vadd.f32 %v14429_v55, %v14421_v63  ;;  %v12216_v63 = vld [vmem:[%s16749_s6 + $0x2e0] ss:$8 sps:$4 sm:$0xff]  }
 0x369   :  { %v3619_v56 = vadd.f32 %v11635_v29, %v3458_v54  ;;  %5009 = vmatprep.subr.bf16.mxu1 %v12200_v21  ;;  %v3905_v48 = vmul.f32 0.2, %v3777_v44  ;;  %vm3873_vm15 = vcmp.ge.f32.partialorder %v3777_v44, 0.0  ;;  %v12210_v21 = vld [vmem:[%s16749_s6 + $0x2f0] ss:$8 sps:$4 sm:$0xff]  }
 0x36a   :  { %v11637_v50 = vpop.f32.mrf.mxu1  ;;  %4956 = vmatprep.mubr.bf16.mxu0 %v3963_v34  ;;  %v12213_v54 = vld [vmem:[%s16749_s6 + $0x350] ss:$8 sps:$4 sm:$0xff]   ;;  %v12221_v29 = vld [vmem:[%s16749_s6 + $0x344] ss:$8 sps:$4 sm:$0xff]  }
 0x36b   :  { %v3780_v1 = vadd.f32 %v11858_v18, %v3619_v56  ;;  %v11638_v13 = vadd.f32 %v11637_v50, %v11636_v26  ;;  %4957 = vmatmul.mubr.bf16.vlgmr.msra.gmra.mxu0 %v14620_v41  ;;  %v12215_v41 = vld [vmem:[%s16749_s6 + $0x354] ss:$8 sps:$4 sm:$0xff]   ;;  %v3937_v5 = vsel %vm3873_vm15, %v3777_v44, %v3905_v48  ;;  %v12218_v44 = vld [vmem:[%s16749_s6 + $0x2e4] ss:$8 sps:$4 sm:$0xff]  }
 0x36c   :  { %5010 = vmatpush1.bf16.msra.mxu1 %v12198_v28  ;;  %5071 = vmatpush1.bf16.msra.mxu0 %v12201_v53  ;;  %v11639_v3 = vpop.f32.mrf.mxu1  ;;  %v3471_v28 = vadd.f32 %v14398_v6, %v14584_v38  ;;  %v12219_v6 = vld [vmem:[%s16749_s6 + $0x340] ss:$8 sps:$4 sm:$0xff]  }
 0x36d   :  { %vm3874_vm0 = vcmp.ge.f32.partialorder %v3780_v1, 0.0  ;;  %v3906_v30 = vmul.f32 0.2, %v3780_v1  ;;  %v3624_v18 = vadd.f32 %v11638_v13, %v3463_v31  ;;  %5011 = vmatprep.subr.bf16.mxu1 %v12206_v59  ;;  %5072 = vmatprep.subr.bf16.mxu0 %v12209_v16 }
 0x36e   :  { %v11640_v46 = vpop.f32.mrf.mxu1 }
 0x36f   :  { %v3785_v24 = vadd.f32 %v3784_v62, %v3624_v18  ;;  %v11641_v12 = vadd.f32 %v11640_v46, %v11639_v3  ;;  %v3938_v45 = vsel %vm3874_vm0, %v3780_v1, %v3906_v30  ;;  %v3474_v62 = vadd.f32 %v11535_v20, %v14584_v38  ;;  %v12222_v3 = vld [vmem:[%s16749_s6 + $0x2d0] ss:$8 sps:$4 sm:$0xff]  }
 0x370   :  { %5012 = vmatpush1.bf16.msra.mxu1 %v12204_v37  ;;  %5073 = vmatpush1.bf16.msra.mxu0 %v12207_v58  ;;  %v11642_v47 = vpop.f32.mrf.mxu1  ;;  %v14699_v43 = vpack.c.bf16 %v3938_v45, %v3937_v5  ;;  %v12225_v58 = vld [vmem:[%s16749_s6 + $0x330] ss:$8 sps:$4 sm:$0xff]   ;;  %v11541_v18 = vadd.f32 %v14513_v57, %v14505_v61  ;;  %v3479_v46 = vadd.f32 %v14446_v10, %v14584_v38  ;;  %v12228_v61 = vld [vmem:[%s16749_s6 + $0x2c0] ss:$8 sps:$4 sm:$0xff]   ;;  %v12236_v10 = vld [vmem:[%s16749_s6 + $0x2b4] ss:$8 sps:$4 sm:$0xff]  }
 0x371   :  { %v3627_v60 = vadd.f32 %v11641_v12, %v3466_v42  ;;  %5013 = vmatprep.subr.bf16.mxu1 %v12212_v22  ;;  %5074 = vmatprep.subr.bf16.mxu0 %v12215_v41  ;;  %v3907_v53 = vmul.f32 0.2, %v3785_v24  ;;  %vm3875_vm1 = vcmp.ge.f32.partialorder %v3785_v24, 0.0  ;;  %v12233_v42 = vld [vmem:[%s16749_s6 + $0x324] ss:$8 sps:$4 sm:$0xff]  }
 0x372   :  { %v11643_v26 = vpop.f32.mrf.mxu1  ;;  %4903 = vmatprep.mubr.bf16.mxu1 %v14699_v43  ;;  %4966 = vmatprep.mubr.bf16.mxu0 %v14699_v43  ;;  %v12231_v45 = vld [vmem:[%s16749_s6 + $0x320] ss:$8 sps:$4 sm:$0xff]  }
 0x373   :  { %v3788_v56 = vadd.f32 %v3787_v33, %v3627_v60  ;;  %v11644_v59 = vadd.f32 %v11643_v26, %v11642_v47  ;;  %4904 = vmatmul.mubr.bf16.gmra.mxu1 %v3963_v34  ;;  %4967 = vmatmul.mubr.bf16.gmra.mxu0 %v3962_v17  ;;  %v12224_v34 = vld [vmem:[%s16749_s6 + $0x2d4] ss:$8 sps:$4 sm:$0xff]   ;;  %v14734_v17 = vpop.f32.mrf.mxu0  ;;  %v3939_v48 = vsel %vm3875_vm1, %v3785_v24, %v3907_v53  ;;  %v12234_v53 = vld [vmem:[%s16749_s6 + $0x2b0] ss:$8 sps:$4 sm:$0xff]  }
 0x374   :  { %5014 = vmatpush2.bf16.msra.mxu1 %v12210_v21  ;;  %5075 = vmatpush1.bf16.msra.mxu0 %v12213_v54  ;;  %v11645_v55 = vpop.f32.mrf.mxu1  ;;  %v12239_v21 = vld [vmem:[%s16749_s6 + $0x314] ss:$8 sps:$4 sm:$0xff]   ;;  %v3482_v60 = vadd.f32 %v11541_v18, %v14584_v38 }
 0x375   :  { %vm3876_vm2 = vcmp.ge.f32.partialorder %v3788_v56, 0.0  ;;  %v3908_v16 = vmul.f32 0.2, %v3788_v56  ;;  %v3632_v25 = vadd.f32 %v11644_v59, %v3471_v28  ;;  %5015 = vmatprep.subr.bf16.mxu1 %v12218_v44  ;;  %5076 = vmatprep.subr.bf16.mxu0 %v12221_v29  ;;  %v3800_v30 = vpop.f32.mrf.mxu0 }
 0x376   :  { %v11646_v19 = vpop.f32.mrf.mxu1 }
 0x377   :  { %v3793_v50 = vadd.f32 %v14662_v7, %v3632_v25  ;;  %v11647_v31 = vadd.f32 %v11646_v19, %v11645_v55  ;;  %v3940_v1 = vsel %vm3876_vm2, %v3788_v56, %v3908_v16  ;;  %v12230_v7 = vld [vmem:[%s16749_s6 + $0x2c4] ss:$8 sps:$4 sm:$0xff]   ;;  %v14773_v54 = vpop.f32.mrf.mxu0  ;;  %v12237_v56 = vld [vmem:[%s16749_s6 + $0x310] ss:$8 sps:$4 sm:$0xff]   ;;  %v11547_v16 = vadd.f32 %v14535_v15, %v14530_v0  ;;  %v12248_v0 = vld [vmem:[%s16749_s6 + $0x294] ss:$8 sps:$4 sm:$0xff]  }
 0x378   :  { %5016 = vmatpush2.bf16.msra.mxu1 %v12216_v63  ;;  %5077 = vmatpush1.bf16.msra.mxu0 %v12219_v6  ;;  %v11648_v13 = vpop.f32.mrf.mxu1  ;;  %v14739_v37 = vpack.c.bf16 %v3940_v1, %v3939_v48  ;;  %v12242_v55 = vld [vmem:[%s16749_s6 + $0x2a4] ss:$8 sps:$4 sm:$0xff]   ;;  %v12243_v1 = vld [vmem:[%s16749_s6 + $0x300] ss:$8 sps:$4 sm:$0xff]  }
 0x379   :  { %v3635_v22 = vadd.f32 %v11647_v31, %v3474_v62  ;;  %5017 = vmatprep.subr.bf16.mxu1 %v12224_v34  ;;  %5078 = vmatprep.subr.bf16.mxu0 %v12227_v14  ;;  %v3909_v24 = vmul.f32 0.2, %v3793_v50  ;;  %vm3877_vm5 = vcmp.ge.f32.partialorder %v3793_v50, 0.0  ;;  %v12245_v6 = vld [vmem:[%s16749_s6 + $0x304] ss:$8 sps:$4 sm:$0xff]   ;;  %v3803_v34 = vpop.f32.mrf.mxu0  ;;  %v3487_v14 = vadd.f32 %v14528_v32, %v14584_v38 }
 0x37a   :  { %v11649_v41 = vpop.f32.mrf.mxu1  ;;  %4913 = vmatprep.mubr.bf16.mxu1 %v14739_v37  ;;  %v12240_v31 = vld [vmem:[%s16749_s6 + $0x2a0] ss:$8 sps:$4 sm:$0xff]  }
 0x37b   :  { %v3796_v12 = vadd.f32 %v14695_v40, %v3635_v22  ;;  %v11650_v5 = vadd.f32 %v11649_v41, %v11648_v13  ;;  %4914 = vmatmul.mubr.bf16.gmra.mxu1 %v14699_v43  ;;  %v3941_v20 = vsel %vm3877_vm5, %v3793_v50, %v3909_v24  ;;  %v12251_v13 = vld [vmem:[%s16749_s6 + $0x3f4] ss:$8 sps:$4 sm:$0xff]   ;;  %v12246_v24 = vld [vmem:[%s16749_s6 + $0x290] ss:$8 sps:$4 sm:$0xff]  }
 0x37c   :  { %5018 = vmatpush2.bf16.msra.mxu1 %v12222_v3  ;;  %5079 = vmatpush1.bf16.msra.mxu0 %v12225_v58  ;;  %v11651_v57 = vpop.f32.mrf.mxu1  ;;  %v14807_v3 = vpop.f32.mrf.mxu0  ;;  %v3490_v58 = vadd.f32 %v11547_v16, %v14584_v38  ;;  %v12258_v16 = vld [vmem:[%s16749_s6 + $0x3d0] ss:$8 sps:$4 sm:$0xff]  }
 0x37d   :  { %vm3878_vm6 = vcmp.ge.f32.partialorder %v3796_v12, 0.0  ;;  %v3910_v40 = vmul.f32 0.2, %v3796_v12  ;;  %v3640_v47 = vadd.f32 %v11650_v5, %v3479_v46  ;;  %5029 = vmatprep.mubr.bf16.mxu1 %v14739_v37  ;;  %5019 = vmatprep.subr.bf16.mxu1 %v12230_v7 }
 0x37e   :  { %v11652_v44 = vpop.f32.mrf.mxu1  ;;  %5080 = vmatprep.subr.bf16.mxu0 %v12233_v42 }
 0x37f   :  { %v3801_v29 = vadd.f32 %v3800_v30, %v3640_v47  ;;  %v11653_v33 = vadd.f32 %v11652_v44, %v11651_v57  ;;  %v3942_v26 = vsel %vm3878_vm6, %v3796_v12, %v3910_v40  ;;  %v12249_v12 = vld [vmem:[%s16749_s6 + $0x3f0] ss:$8 sps:$4 sm:$0xff]   ;;  %v3816_v57 = vpop.f32.mrf.mxu0  ;;  %v3495_v40 = vadd.f32 %v14547_v52, %v14584_v38  ;;  %v12252_v44 = vld [vmem:[%s16749_s6 + $0x280] ss:$8 sps:$4 sm:$0xff]   ;;  %v12260_v52 = vld [vmem:[%s16749_s6 + $0x3d4] ss:$8 sps:$4 sm:$0xff]  }
 0x380   :  { %5020 = vmatpush2.bf16.msra.mxu1 %v12228_v61  ;;  %5081 = vmatpush1.bf16.msra.mxu0 %v12231_v45  ;;  %v11654_v28 = vpop.f32.mrf.mxu1  ;;  %v14783_v59 = vpack.c.bf16 %v3942_v26, %v3941_v20  ;;  %v12257_v61 = vld [vmem:[%s16749_s6 + $0x3e4] ss:$8 sps:$4 sm:$0xff]   ;;  %v11553_v45 = vadd.f32 %v14551_v35, %v14549_v36  ;;  %v12255_v35 = vld [vmem:[%s16749_s6 + $0x3e0] ss:$8 sps:$4 sm:$0xff]  }
 0x381   :  { %v3643_v63 = vadd.f32 %v11653_v33, %v3482_v60  ;;  %5021 = vmatprep.subr.bf16.mxu1 %v12236_v10  ;;  %5082 = vmatprep.subr.bf16.mxu0 %v12239_v21  ;;  %v3911_v62 = vmul.f32 0.2, %v3801_v29  ;;  %vm3879_vm7 = vcmp.ge.f32.partialorder %v3801_v29, 0.0  ;;  %v12263_v33 = vld [vmem:[%s16749_s6 + $0x474] ss:$8 sps:$4 sm:$0xff]   ;;  %v14844_v20 = vpop.f32.mrf.mxu0 }
 0x382   :  { %v11655_v25 = vpop.f32.mrf.mxu1  ;;  %v3498_v26 = vadd.f32 %v11553_v45, %v14584_v38  ;;  %v12278_v45 = vld [vmem:[%s16749_s6 + $0x3a4] ss:$8 sps:$4 sm:$0xff]  }
 0x383   :  { %v3804_v19 = vadd.f32 %v3803_v34, %v3643_v63  ;;  %v11656_v50 = vadd.f32 %v11655_v25, %v11654_v28  ;;  %v3943_v18 = vsel %vm3879_vm7, %v3801_v29, %v3911_v62  ;;  %v3819_v62 = vpop.f32.mrf.mxu0 }
 0x384   :  { %5022 = vmatpush2.bf16.msra.mxu1 %v12234_v53  ;;  %5083 = vmatpush1.bf16.msra.mxu0 %v12237_v56  ;;  %v11657_v48 = vpop.f32.mrf.mxu1 }
 0x385   :  { %v3648_v32 = vadd.f32 %v11656_v50, %v3487_v14  ;;  %5023 = vmatprep.subr.bf16.mxu1 %v12242_v55  ;;  %5084 = vmatprep.subr.bf16.mxu0 %v12245_v6  ;;  %vm3880_vm8 = vcmp.ge.f32.partialorder %v3804_v19, 0.0  ;;  %v3912_v15 = vmul.f32 0.2, %v3804_v19  ;;  %v12261_v14 = vld [vmem:[%s16749_s6 + $0x470] ss:$8 sps:$4 sm:$0xff]  }
 0x386   :  { %v11658_v22 = vpop.f32.mrf.mxu1 }
 0x387   :  { %v3809_v7 = vadd.f32 %v14734_v17, %v3648_v32  ;;  %v11659_v30 = vadd.f32 %v11658_v22, %v11657_v48  ;;  %v3944_v41 = vsel %vm3880_vm8, %v3804_v19, %v3912_v15  ;;  %v12254_v17 = vld [vmem:[%s16749_s6 + $0x284] ss:$8 sps:$4 sm:$0xff]   ;;  %v11559_v19 = vadd.f32 %v14558_v2, %v14556_v23  ;;  %v12264_v2 = vld [vmem:[%s16749_s6 + $0x3c0] ss:$8 sps:$4 sm:$0xff]  }
 0x388   :  { %5024 = vmatpush2.bf16.msra.mxu1 %v12240_v31  ;;  %5085 = vmatpush1.bf16.msra.mxu0 %v12243_v1  ;;  %v11660_v42 = vpop.f32.mrf.mxu1  ;;  %v14811_v46 = vpack.c.bf16 %v3944_v41, %v3943_v18  ;;  %v12266_v31 = vld [vmem:[%s16749_s6 + $0x3c4] ss:$8 sps:$4 sm:$0xff]   ;;  %v3503_v1 = vadd.f32 %v14554_v49, %v14584_v38  ;;  %v12267_v49 = vld [vmem:[%s16749_s6 + $0x460] ss:$8 sps:$4 sm:$0xff]  }
 0x389   :  { %v3651_v5 = vadd.f32 %v11659_v30, %v3490_v58  ;;  %5025 = vmatprep.subr.bf16.mxu1 %v12248_v0  ;;  %5086 = vmatprep.subr.bf16.mxu0 %v12251_v13  ;;  %v3913_v47 = vmul.f32 0.2, %v3809_v7  ;;  %vm3881_vm9 = vcmp.ge.f32.partialorder %v3809_v7, 0.0  ;;  %v12269_v48 = vld [vmem:[%s16749_s6 + $0x464] ss:$8 sps:$4 sm:$0xff]   ;;  %v14876_v13 = vpop.f32.mrf.mxu0  ;;  %v3506_v22 = vadd.f32 %v11559_v19, %v14584_v38 }
 0x38a   :  { %v11661_v10 = vpop.f32.mrf.mxu1  ;;  %4976 = vmatprep.mubr.bf16.mxu0 %v14811_v46  ;;  %v12275_v30 = vld [vmem:[%s16749_s6 + $0x454] ss:$8 sps:$4 sm:$0xff]   ;;  %v11571_v19 = vadd.f32 %v14570_v4, %v14568_v27  ;;  %v12288_v27 = vld [vmem:[%s16749_s6 + $0x380] ss:$8 sps:$4 sm:$0xff]  }
 0x38b   :  { %v3812_v21 = vadd.f32 %v14773_v54, %v3651_v5  ;;  %v11662_v60 = vadd.f32 %v11661_v10, %v11660_v42  ;;  %4977 = vmatmul.mubr.bf16.gmra.mxu0 %v14739_v37  ;;  %v3945_v63 = vsel %vm3881_vm9, %v3809_v7, %v3913_v47  ;;  %v12270_v5 = vld [vmem:[%s16749_s6 + $0x3b0] ss:$8 sps:$4 sm:$0xff]   ;;  %v11565_v10 = vadd.f32 %v14564_v9, %v14562_v8  ;;  %v12281_v47 = vld [vmem:[%s16749_s6 + $0x444] ss:$8 sps:$4 sm:$0xff]   ;;  %v12276_v8 = vld [vmem:[%s16749_s6 + $0x3a0] ss:$8 sps:$4 sm:$0xff]  }
 0x38c   :  { %5026 = vmatpush2.bf16.msra.mxu1 %v12246_v24  ;;  %5087 = vmatpush2.bf16.msra.mxu0 %v12249_v12  ;;  %v11663_v36 = vpop.f32.mrf.mxu1  ;;  %v12279_v9 = vld [vmem:[%s16749_s6 + $0x440] ss:$8 sps:$4 sm:$0xff]  }
 0x38d   :  { %vm3882_vm10 = vcmp.ge.f32.partialorder %v3812_v21, 0.0  ;;  %v3914_v54 = vmul.f32 0.2, %v3812_v21  ;;  %v3656_v29 = vadd.f32 %v11662_v60, %v3495_v40  ;;  %5027 = vmatprep.subr.bf16.mxu1 %v12254_v17  ;;  %5088 = vmatprep.subr.bf16.mxu0 %v12257_v61  ;;  %v3832_v61 = vpop.f32.mrf.mxu0 }
 0x38e   :  { %v11664_v28 = vpop.f32.mrf.mxu1 }
 0x38f   :  { %v3817_v53 = vadd.f32 %v3816_v57, %v3656_v29  ;;  %v11665_v56 = vadd.f32 %v11664_v28, %v11663_v36  ;;  %v3946_v55 = vsel %vm3882_vm10, %v3812_v21, %v3914_v54  ;;  %v3511_v21 = vadd.f32 %v14560_v11, %v14584_v38 }
 0x390   :  { %5028 = vmatpush2.bf16.msra.mxu1 %v12252_v44  ;;  %5089 = vmatpush2.bf16.msra.mxu0 %v12255_v35  ;;  %v11666_v6 = vpop.f32.mrf.mxu1  ;;  %v14848_v34 = vpack.c.bf16 %v3946_v55, %v3945_v63  ;;  %v3514_v29 = vadd.f32 %v11565_v10, %v14584_v38 }
 0x391   :  { %v3659_v25 = vadd.f32 %v11665_v56, %v3498_v26  ;;  %5090 = vmatprep.subr.bf16.mxu0 %v12260_v52  ;;  %5143 = vmatprep.subr.bf16.mxu1 %v12263_v33  ;;  %v3915_v0 = vmul.f32 0.2, %v3817_v53  ;;  %vm3883_vm11 = vcmp.ge.f32.partialorder %v3817_v53, 0.0  ;;  %v14915_v52 = vpop.f32.mrf.mxu0 }
 0x392   :  { %v11667_v50 = vpop.f32.mrf.mxu1  ;;  %4986 = vmatprep.mubr.bf16.mxu0 %v14848_v34 }
 0x393   :  { %v3820_v32 = vadd.f32 %v3819_v62, %v3659_v25  ;;  %v11668_v15 = vadd.f32 %v11667_v50, %v11666_v6  ;;  %5030 = vmatmul.mubr.bf16.vlgmr.msra.gmra.mxu1 %v14699_v43  ;;  %4987 = vmatmul.mubr.bf16.gmra.mxu0 %v14783_v59  ;;  %v3947_v42 = vsel %vm3883_vm11, %v3817_v53, %v3915_v0  ;;  %v3835_v55 = vpop.f32.mrf.mxu0  ;;  %v12282_v6 = vld [vmem:[%s16749_s6 + $0x390] ss:$8 sps:$4 sm:$0xff]   ;;  %v12290_v62 = vld [vmem:[%s16749_s6 + $0x384] ss:$8 sps:$4 sm:$0xff]  }
 0x394   :  { %5039 = vmatprep.mubr.bf16.mxu1 %v14783_v59  ;;  %5091 = vmatpush2.bf16.msra.mxu0 %v12258_v16  ;;  %v11669_v23 = vpop.f32.mrf.mxu1  ;;  %v12272_v59 = vld [vmem:[%s16749_s6 + $0x3b4] ss:$8 sps:$4 sm:$0xff]  }
 0x395   :  { %vm3884_vm12 = vcmp.ge.f32.partialorder %v3820_v32, 0.0  ;;  %v3916_v58 = vmul.f32 0.2, %v3820_v32  ;;  %v3664_v43 = vadd.f32 %v11668_v15, %v3503_v1  ;;  %5144 = vmatpush1.bf16.msra.mxu1 %v12261_v14  ;;  %5102 = vmatprep.mubr.bf16.mxu0 %v14848_v34  ;;  %v12285_v14 = vld [vmem:[%s16749_s6 + $0x430] ss:$8 sps:$4 sm:$0xff]   ;;  %v14947_v4 = vpop.f32.mrf.mxu0 }
 0x396   :  { %v11670_v7 = vpop.f32.mrf.mxu1  ;;  %5092 = vmatprep.subr.bf16.mxu0 %v12266_v31  ;;  %5145 = vmatprep.subr.bf16.mxu1 %v12269_v48  ;;  %v12293_v31 = vld [vmem:[%s16749_s6 + $0x424] ss:$8 sps:$4 sm:$0xff]   ;;  %v3519_v48 = vadd.f32 %v14566_v51, %v14584_v38  ;;  %v12291_v51 = vld [vmem:[%s16749_s6 + $0x420] ss:$8 sps:$4 sm:$0xff]  }
 0x397   :  { %v3825_v18 = vadd.f32 %v14807_v3, %v3664_v43  ;;  %v11671_v41 = vadd.f32 %v11670_v7, %v11669_v23  ;;  %v3948_v24 = vsel %vm3884_vm12, %v3820_v32, %v3916_v58  ;;  %v12273_v3 = vld [vmem:[%s16749_s6 + $0x450] ss:$8 sps:$4 sm:$0xff]   ;;  %v12296_v43 = vld [vmem:[%s16749_s6 + $0x414] ss:$8 sps:$4 sm:$0xff]  }
 0x398   :  { %5093 = vmatpush2.bf16.msra.mxu0 %v12264_v2  ;;  %v11672_v12 = vpop.f32.mrf.mxu1  ;;  %v14891_v17 = vpack.c.bf16 %v3948_v24, %v3947_v42  ;;  %v3848_v42 = vpop.f32.mrf.mxu0 }
 0x399   :  { %v3667_v57 = vadd.f32 %v11671_v41, %v3506_v22  ;;  %5146 = vmatpush1.bf16.msra.mxu1 %v12267_v49  ;;  %5094 = vmatprep.subr.bf16.mxu0 %v12272_v59  ;;  %v3917_v60 = vmul.f32 0.2, %v3825_v18  ;;  %vm3885_vm13 = vcmp.ge.f32.partialorder %v3825_v18, 0.0  ;;  %v3522_v49 = vadd.f32 %v11571_v19, %v14584_v38 }
 0x39a   :  { %v11673_v40 = vpop.f32.mrf.mxu1  ;;  %5147 = vmatprep.subr.bf16.mxu1 %v12275_v30 }
 0x39b   :  { %v3828_v44 = vadd.f32 %v14844_v20, %v3667_v57  ;;  %v11674_v36 = vadd.f32 %v11673_v40, %v11672_v12  ;;  %5040 = vmatmul.mubr.bf16.gmra.mxu1 %v14739_v37  ;;  %v12284_v37 = vld [vmem:[%s16749_s6 + $0x394] ss:$8 sps:$4 sm:$0xff]   ;;  %v3949_v53 = vsel %vm3885_vm13, %v3825_v18, %v3917_v60  ;;  %v12294_v12 = vld [vmem:[%s16749_s6 + $0x410] ss:$8 sps:$4 sm:$0xff]   ;;  %v16772_v60 = vmov 0  }
 0x39c   :  { %5049 = vmatprep.mubr.bf16.mxu1 %v14891_v17  ;;  %5095 = vmatpush2.bf16.msra.mxu0 %v12270_v5  ;;  %v11675_v35 = vpop.f32.mrf.mxu1  ;;  %v12287_v20 = vld [vmem:[%s16749_s6 + $0x434] ss:$8 sps:$4 sm:$0xff]   ;;  %v16770_v5 = vld [vmem:[#allocation19_spill] sm:$0xff] }
 0x39d   :  { %5148 = vmatpush1.bf16.msra.mxu1 %v12273_v3  ;;  %v3672_v11 = vadd.f32 %v11674_v36, %v3511_v21  ;;  %5096 = vmatprep.subr.bf16.mxu0 %v12278_v45  ;;  %vm3886_vm14 = vcmp.ge.f32.partialorder %v3828_v44, 0.0  ;;  %v3918_v54 = vmul.f32 0.2, %v3828_v44  ;;  %v16771_v3 = vld [vmem:[#allocation18_spill] sm:$0xff]  ;;  %v11878_v21 = vpop.f32.mrf.mxu0 }
 0x39e   :  { %v11676_v33 = vpop.f32.mrf.mxu1  ;;  %5149 = vmatprep.subr.bf16.mxu1 %v12281_v47  ;;  %v3527_v45 = vadd.f32 %v16771_v3, %v14584_v38  ;;  %v12326_v3 = vld [vmem:[%s16751_s8 + $0x44] ss:$16 sps:$4 sm:$0xff]  }
 0x39f   :  { %v11677_v26 = vadd.f32 %v11676_v33, %v11675_v35  ;;  %v3833_v28 = vadd.f32 %v3832_v61, %v3672_v11  ;;  %v3950_v56 = vsel %vm3886_vm14, %v3828_v44, %v3918_v54  ;;  %v11577_v61 = vadd.f32 %v16770_v5, %v14574_v39  ;;  %v12297_v35 = vld [vmem:[%s16749_s6 + $0x400] ss:$8 sps:$4 sm:$0xff]  }
 0x3a0   :  { %5097 = vmatpush2.bf16.msra.mxu0 %v12276_v8  ;;  %v11678_v63 = vpop.f32.mrf.mxu1  ;;  %v14927_v16 = vpack.c.bf16 %v3950_v56, %v3949_v53  ;;  %v12318_v5 = vld [vmem:[%s16751_s8 + $0x60] ss:$16 sps:$4 sm:$0xff]  }
 0x3a1   :  { %5150 = vmatpush1.bf16.msra.mxu1 %v12279_v9  ;;  %v3675_v25 = vadd.f32 %v11677_v26, %v3514_v29  ;;  %5098 = vmatprep.subr.bf16.mxu0 %v12284_v37  ;;  %v3919_v1 = vmul.f32 0.2, %v3833_v28  ;;  %vm3887_vm15 = vcmp.ge.f32.partialorder %v3833_v28, 0.0  ;;  %v3530_v8 = vadd.f32 %v11577_v61, %v14584_v38  ;;  %v3851_v29 = vpop.f32.mrf.mxu0  ;;  %v16773_v26 = vld [vmem:[#allocation21_spill] sm:$0xff] }
 0x3a2   :  { %v11679_v50 = vpop.f32.mrf.mxu1  ;;  %5151 = vmatprep.subr.bf16.mxu1 %v12287_v20  ;;  %v12320_v61 = vld [vmem:[%s16751_s8 + $0x64] ss:$16 sps:$4 sm:$0xff]  }
 0x3a3   :  { %v11680_v0 = vadd.f32 %v11679_v50, %v11678_v63  ;;  %v3836_v32 = vadd.f32 %v3835_v55, %v3675_v25  ;;  %5050 = vmatmul.mubr.bf16.gmra.mxu1 %v14848_v34  ;;  %v14957_v59 = vsel %vm3887_vm15, %v3833_v28, %v3919_v1  ;;  %v16774_v28 = vld [vmem:[#allocation22_spill] sm:$0xff]  ;;  %v16775_v63 = vld [vmem:[#allocation20_spill] sm:$0xff] }
 0x3a4   :  { %5059 = vmatprep.mubr.bf16.mxu1 %v14927_v16  ;;  %5099 = vmatpush2.bf16.msra.mxu0 %v12282_v6  ;;  %v11681_v15 = vpop.f32.mrf.mxu1  ;;  %v11583_v53 = vadd.f32 %v16774_v28, %v16773_v26  ;;  %v3535_v55 = vadd.f32 %v16775_v63, %v14584_v38  ;;  %v12359_v26 = vld [vmem:[%s16751_s8 + $0x3e4] ss:$16 sps:$4 sm:$0xff]   ;;  %v12354_v28 = vld [vmem:[%s16751_s8 + $0x1a0] ss:$16 sps:$4 sm:$0xff]  }
 0x3a5   :  { %v3680_v23 = vadd.f32 %v11680_v0, %v3519_v48  ;;  %vm3888_vm0 = vcmp.ge.f32.partialorder %v3836_v32, 0.0  ;;  %v3920_v2 = vmul.f32 0.2, %v3836_v32  ;;  %5152 = vmatpush1.bf16.msra.mxu1 %v12285_v14  ;;  %5100 = vmatprep.subr.bf16.mxu0 %v12290_v62  ;;  %v12365_v63 = vld [vmem:[%s16751_s8 + $0x3c4] ss:$16 sps:$4 sm:$0xff]  }
 0x3a6   :  { %v11682_v58 = vpop.f32.mrf.mxu1  ;;  %5153 = vmatprep.subr.bf16.mxu1 %v12293_v31  ;;  %v13227_v31 = vld [vmem:[#allocation6] ss:$0 sm:$0xff] }
 0x3a7   :  { %v3841_v22 = vadd.f32 %v14876_v13, %v3680_v23  ;;  %v14960_v7 = vsel %vm3888_vm0, %v3836_v32, %v3920_v2  ;;  %v11683_v30 = vadd.f32 %v11682_v58, %v11681_v15  ;;  %v12299_v13 = vld [vmem:[%s16749_s6 + $0x404] ss:$8 sps:$4 sm:$0xff]   ;;  %v3538_v48 = vadd.f32 %v13227_v31, %v11583_v53  ;;  %v12300_v58 = vld [vmem:[%s16751_s8 + $0xe0] ss:$16 sps:$4 sm:$0xff]  }
 0x3a8   :  { %v3971_v18 = vpack.c.bf16 %v14960_v7, %v14957_v59  ;;  %5101 = vmatpush2.bf16.msra.mxu0 %v12288_v27  ;;  %v11684_v41 = vpop.f32.mrf.mxu1  ;;  %v12309_v59 = vld [vmem:[%s16751_s8 + $0x2e0] ss:$16 sps:$4 sm:$0xff]   ;;  %v12377_v31 = vld [vmem:[%s16751_s8 + $0x384] ss:$16 sps:$4 sm:$0xff]  }
 0x3a9   :  { %v3683_v24 = vadd.f32 %v11683_v30, %v3522_v49  ;;  %5154 = vmatpush1.bf16.msra.mxu1 %v12291_v51  ;;  %v3921_v10 = vmul.f32 0.2, %v3841_v22  ;;  %vm3889_vm1 = vcmp.ge.f32.partialorder %v3841_v22, 0.0  ;;  %v12303_v7 = vld [vmem:[%s16751_s8 + $0xc0] ss:$16 sps:$4 sm:$0xff]  }
 0x3aa   :  { %v11685_v57 = vpop.f32.mrf.mxu1  ;;  %5155 = vmatprep.subr.bf16.mxu1 %v12296_v43  ;;  %v12302_v43 = vld [vmem:[%s16751_s8 + $0xe4] ss:$16 sps:$4 sm:$0xff]   ;;  %v12357_v53 = vld [vmem:[%s16751_s8 + $0x3e0] ss:$16 sps:$4 sm:$0xff]  }
 0x3ab   :  { %v3844_v40 = vadd.f32 %v14915_v52, %v3683_v24  ;;  %v11686_v47 = vadd.f32 %v11685_v57, %v11684_v41  ;;  %5060 = vmatmul.mubr.bf16.gmra.mxu1 %v14891_v17  ;;  %5103 = vmatmul.mubr.bf16.vlgmr.msra.gmra.mxu0 %v14811_v46  ;;  %v3953_v11 = vsel %vm3889_vm1, %v3841_v22, %v3921_v10  ;;  %v12311_v22 = vld [vmem:[%s16751_s8 + $0x2e4] ss:$16 sps:$4 sm:$0xff]   ;;  %v12312_v41 = vld [vmem:[%s16751_s8 + $0x80] ss:$16 sps:$4 sm:$0xff]  }
 0x3ac   :  { %5112 = vmatprep.mubr.bf16.mxu0 %v14891_v17  ;;  %v11687_v39 = vpop.f32.mrf.mxu1  ;;  %5175 = vmatprep.mubr.bf16.mxu1 %v16772_v60  ;;  %v12308_v30 = vld [vmem:[%s16751_s8 + $0xa4] ss:$16 sps:$4 sm:$0xff]   ;;  %v12315_v24 = vld [vmem:[%s16751_s8 + $0x2c0] ss:$16 sps:$4 sm:$0xff]  }
 0x3ad   :  { %v3922_v44 = vmul.f32 0.2, %v3844_v40  ;;  %5156 = vmatpush1.bf16.msra.mxu1 %v12294_v12  ;;  %v3688_v36 = vadd.f32 %v11686_v47, %v3527_v45  ;;  %vm3890_vm2 = vcmp.ge.f32.partialorder %v3844_v40, 0.0  ;;  %6808 = vmatprep.subr.bf16.mxu0 %v12302_v43  ;;  %v12317_v12 = vld [vmem:[%s16751_s8 + $0x2c4] ss:$16 sps:$4 sm:$0xff]  }
 0x3ae   :  { %v11688_v9 = vpop.f32.mrf.mxu1  ;;  %5157 = vmatprep.subr.bf16.mxu1 %v12299_v13  ;;  %6809 = vmatpush1.bf16.msra.mxu0 %v12300_v58  ;;  %v12321_v57 = vld [vmem:[%s16751_s8 + $0x2a0] ss:$16 sps:$4 sm:$0xff]   ;;  %v12323_v13 = vld [vmem:[%s16751_s8 + $0x2a4] ss:$16 sps:$4 sm:$0xff]  }
 0x3af   :  { %v11689_v46 = vadd.f32 %v11688_v9, %v11687_v39  ;;  %v3849_v52 = vadd.f32 %v3848_v42, %v3688_v36  ;;  %v3954_v37 = vsel %vm3890_vm2, %v3844_v40, %v3922_v44  ;;  %v12314_v42 = vld [vmem:[%s16751_s8 + $0x84] ss:$16 sps:$4 sm:$0xff]   ;;  %v12324_v10 = vld [vmem:[%s16751_s8 + $0x40] ss:$16 sps:$4 sm:$0xff]  }
 0x3b0   :  { %v11690_v54 = vpop.f32.mrf.mxu1  ;;  %v3972_v33 = vpack.c.bf16 %v3954_v37, %v3953_v11  ;;  %v12329_v45 = vld [vmem:[%s16751_s8 + $0x284] ss:$16 sps:$4 sm:$0xff]   ;;  %v12327_v40 = vld [vmem:[%s16751_s8 + $0x280] ss:$16 sps:$4 sm:$0xff]  }
 0x3b1   :  { %5158 = vmatpush1.bf16.msra.mxu1 %v12297_v35  ;;  %v3691_v20 = vadd.f32 %v11689_v46, %v3530_v8  ;;  %v3923_v6 = vmul.f32 0.2, %v3849_v52  ;;  %vm3891_vm5 = vcmp.ge.f32.partialorder %v3849_v52, 0.0  ;;  %v12332_v47 = vld [vmem:[%s16751_s8 + $0x24] ss:$16 sps:$4 sm:$0xff]  }
 0x3b2   :  { %v11691_v56 = vpop.f32.mrf.mxu1  ;;  %6851 = vmatprep.subr.bf16.mxu1 %v12311_v22  ;;  %v12335_v39 = vld [vmem:[%s16751_s8 + $0x264] ss:$16 sps:$4 sm:$0xff]   ;;  %v12336_v35 = vld [vmem:[%s16751_s8] ss:$16 sps:$4 sm:$0xff]  }
 0x3b3   :  { %v11692_v25 = vadd.f32 %v11691_v56, %v11690_v54  ;;  %v3852_v14 = vadd.f32 %v3851_v29, %v3691_v20  ;;  %5113 = vmatmul.mubr.bf16.gmra.mxu0 %v14848_v34  ;;  %v3955_v32 = vsel %vm3891_vm5, %v3849_v52, %v3923_v6  ;;  %v12338_v44 = vld [vmem:[%s16751_s8 + $0x4] ss:$16 sps:$4 sm:$0xff]   ;;  %v12339_v8 = vld [vmem:[%s16751_s8 + $0x240] ss:$16 sps:$4 sm:$0xff]  }
 0x3b4   :  { %5176 = vmatmul.mubr.bf16.vlgmr.msra.gmra.mxu1 %v14891_v17  ;;  %5122 = vmatprep.mubr.bf16.mxu0 %v3972_v33  ;;  %v11693_v62 = vpop.f32.mrf.mxu1  ;;  %v12341_v36 = vld [vmem:[%s16751_s8 + $0x244] ss:$16 sps:$4 sm:$0xff]   ;;  %v12342_v52 = vld [vmem:[%s16751_s8 + $0x1e0] ss:$16 sps:$4 sm:$0xff]  }
 0x3b5   :  { %v3696_v19 = vadd.f32 %v11692_v25, %v3535_v55  ;;  %vm3892_vm6 = vcmp.ge.f32.partialorder %v3852_v14, 0.0  ;;  %v3924_v50 = vmul.f32 0.2, %v3852_v14  ;;  %5185 = vmatprep.mubr.bf16.mxu1 %v16772_v60  ;;  %6852 = vmatpush1.bf16.msra.mxu1 %v12309_v59  ;;  %v12344_v9 = vld [vmem:[%s16751_s8 + $0x1e4] ss:$16 sps:$4 sm:$0xff]  }
 0x3b6   :  { %v11694_v1 = vpop.f32.mrf.mxu1  ;;  %6853 = vmatprep.subr.bf16.mxu1 %v12317_v12  ;;  %v12347_v46 = vld [vmem:[%s16751_s8 + $0x224] ss:$16 sps:$4 sm:$0xff]   ;;  %v12345_v11 = vld [vmem:[%s16751_s8 + $0x220] ss:$16 sps:$4 sm:$0xff]  }
 0x3b7   :  { %v3857_v38 = vadd.f32 %v14947_v4, %v3696_v19  ;;  %v11695_v0 = vadd.f32 %v11694_v1, %v11693_v62  ;;  %v3956_v15 = vsel %vm3892_vm6, %v3852_v14, %v3924_v50  ;;  %v12350_v37 = vld [vmem:[%s16751_s8 + $0x1c4] ss:$16 sps:$4 sm:$0xff]   ;;  %v12348_v29 = vld [vmem:[%s16751_s8 + $0x1c0] ss:$16 sps:$4 sm:$0xff]  }
 0x3b8   :  { %v3973_v27 = vpack.c.bf16 %v3956_v15, %v3955_v32  ;;  %v12353_v54 = vld [vmem:[%s16751_s8 + $0x204] ss:$16 sps:$4 sm:$0xff]   ;;  %v12360_v55 = vld [vmem:[%s16751_s8 + $0x180] ss:$16 sps:$4 sm:$0xff]  }
 0x3b9   :  { %v3699_v34 = vadd.f32 %v11695_v0, %v3538_v48  ;;  %v3925_v23 = vmul.f32 0.2, %v3857_v38  ;;  %vm3893_vm7 = vcmp.ge.f32.partialorder %v3857_v38, 0.0  ;;  %6854 = vmatpush1.bf16.msra.mxu1 %v12315_v24  ;;  %v12356_v20 = vld [vmem:[%s16751_s8 + $0x1a4] ss:$16 sps:$4 sm:$0xff]  }
 0x3ba   :  { %6855 = vmatprep.subr.bf16.mxu1 %v12323_v13  ;;  %v12362_v56 = vld [vmem:[%s16751_s8 + $0x184] ss:$16 sps:$4 sm:$0xff]   ;;  %v12363_v6 = vld [vmem:[%s16751_s8 + $0x3c0] ss:$16 sps:$4 sm:$0xff]  }
 0x3bb   :  { %v3860_v2 = vadd.f32 %v11878_v21, %v3699_v34  ;;  %5123 = vmatmul.mubr.bf16.gmra.mxu0 %v3971_v18  ;;  %v3957_v4 = vsel %vm3893_vm7, %v3857_v38, %v3925_v23  ;;  %v12306_v18 = vld [vmem:[%s16751_s8 + $0xa0] ss:$16 sps:$4 sm:$0xff]   ;;  %v12368_v25 = vld [vmem:[%s16751_s8 + $0x164] ss:$16 sps:$4 sm:$0xff]  }
 0x3bc   :  { %5186 = vmatmul.mubr.bf16.gmra.mxu1 %v14927_v16  ;;  %5132 = vmatprep.mubr.bf16.mxu0 %v3973_v27  ;;  %v12305_v16 = vld [vmem:[%s16751_s8 + $0xc4] ss:$16 sps:$4 sm:$0xff]   ;;  %v12330_v21 = vld [vmem:[%s16751_s8 + $0x20] ss:$16 sps:$4 sm:$0xff]  }
 0x3bd   :  { %vm3894_vm8 = vcmp.ge.f32.partialorder %v3860_v2, 0.0  ;;  %v3926_v17 = vmul.f32 0.2, %v3860_v2  ;;  %5195 = vmatprep.mubr.bf16.mxu1 %v16772_v60  ;;  %6810 = vmatprep.subr.bf16.mxu0 %v12305_v16  ;;  %v12371_v14 = vld [vmem:[%s16751_s8 + $0x3a4] ss:$16 sps:$4 sm:$0xff]  }
 0x3be   :  { %6811 = vmatpush1.bf16.msra.mxu0 %v12303_v7  ;;  %6856 = vmatpush1.bf16.msra.mxu1 %v12321_v57  ;;  %v12366_v62 = vld [vmem:[%s16751_s8 + $0x160] ss:$16 sps:$4 sm:$0xff]   ;;  %v12374_v50 = vld [vmem:[%s16751_s8 + $0x144] ss:$16 sps:$4 sm:$0xff]  }
 0x3bf   :  { %v3958_v51 = vsel %vm3894_vm8, %v3860_v2, %v3926_v17  ;;  %6812 = vmatprep.subr.bf16.mxu0 %v12308_v30  ;;  %6857 = vmatprep.subr.bf16.mxu1 %v12329_v45  ;;  %v12369_v19 = vld [vmem:[%s16751_s8 + $0x3a0] ss:$16 sps:$4 sm:$0xff]   ;;  %v12380_v38 = vld [vmem:[%s16751_s8 + $0x124] ss:$16 sps:$4 sm:$0xff]  }
 0x3c0   :  { %v3974_v49 = vpack.c.bf16 %v3958_v51, %v3957_v4  ;;  %v12372_v48 = vld [vmem:[%s16751_s8 + $0x140] ss:$16 sps:$4 sm:$0xff]   ;;  %v12383_v0 = vld [vmem:[%s16751_s8 + $0x364] ss:$16 sps:$4 sm:$0xff]  }
 0x3c1   :  { %v12375_v1 = vld [vmem:[%s16751_s8 + $0x380] ss:$16 sps:$4 sm:$0xff]   ;;  %v12389_v34 = vld [vmem:[%s16751_s8 + $0x344] ss:$16 sps:$4 sm:$0xff]  }
 0x3c2   :  { %6813 = vmatpush1.bf16.msra.mxu0 %v12306_v18  ;;  %6858 = vmatpush1.bf16.msra.mxu1 %v12327_v40  ;;  %v12378_v32 = vld [vmem:[%s16751_s8 + $0x120] ss:$16 sps:$4 sm:$0xff]   ;;  %v12392_v17 = vld [vmem:[%s16751_s8 + $0x324] ss:$16 sps:$4 sm:$0xff]   ;;  %v4121_v18 = vlaneseq }
 0x3c3   :  { %5133 = vmatmul.mubr.bf16.gmra.mxu0 %v3972_v33  ;;  %6814 = vmatprep.subr.bf16.mxu0 %v12314_v42  ;;  %v12351_v33 = vld [vmem:[%s16751_s8 + $0x200] ss:$16 sps:$4 sm:$0xff]   ;;  %v12395_v4 = vld [vmem:[%s16751_s8 + $0x4e4] ss:$16 sps:$4 sm:$0xff]  }
 0x3c4   :  { %5196 = vmatmul.mubr.bf16.gmra.mxu1 %v3973_v27  ;;  %6859 = vmatprep.subr.bf16.mxu1 %v12335_v39  ;;  %v12381_v15 = vld [vmem:[%s16751_s8 + $0x360] ss:$16 sps:$4 sm:$0xff]   ;;  %v12386_v27 = vld [vmem:[%s16751_s8 + $0x104] ss:$16 sps:$4 sm:$0xff]   ;;  %v4122_v42 = vshrl.u32 %v4121_v18, 7 }
 0x3c5   :  { %5205 = vmatprep.mubr.bf16.mxu1 %v16772_v60  ;;  %v12333_v60 = vld [vmem:[%s16751_s8 + $0x260] ss:$16 sps:$4 sm:$0xff]   ;;  %v12407_v43 = vld [vmem:[%s16751_s8 + $0x6e4] ss:$16 sps:$4 sm:$0xff]  }
 0x3c6   :  { %6815 = vmatpush1.bf16.msra.mxu0 %v12312_v41  ;;  %6860 = vmatpush1.bf16.msra.mxu1 %v12333_v60  ;;  %v12384_v23 = vld [vmem:[%s16751_s8 + $0x100] ss:$16 sps:$4 sm:$0xff]  }
 0x3c7   :  { %6816 = vmatprep.subr.bf16.mxu0 %v12320_v61  ;;  %6861 = vmatprep.subr.bf16.mxu1 %v12341_v36  ;;  %v12387_v2 = vld [vmem:[%s16751_s8 + $0x340] ss:$16 sps:$4 sm:$0xff]  }
 0x3c8   :  { %v12390_v51 = vld [vmem:[%s16751_s8 + $0x320] ss:$16 sps:$4 sm:$0xff]  }
 0x3c9   :  { %v12396_v58 = vld [vmem:[%s16751_s8 + $0x300] ss:$16 sps:$4 sm:$0xff]  }
 0x3ca   :  { %6817 = vmatpush1.bf16.msra.mxu0 %v12318_v5  ;;  %6862 = vmatpush1.bf16.msra.mxu1 %v12339_v8  ;;  %v15211_v5 = vsub.s32 0, %v4122_v42  ;;  %v4119_v61 = vld [vmem:[%s16750_s7] sm:$0x3] }
 0x3cb   :  { %6818 = vmatprep.subr.bf16.mxu0 %v12326_v3  ;;  %6863 = vmatprep.subr.bf16.mxu1 %v12347_v46 }
 0x3cc   :  { %5206 = vmatmul.mubr.bf16.gmra.mxu1 %v3974_v49  ;;  %v12398_v49 = vld [vmem:[%s16751_s8 + $0x304] ss:$16 sps:$4 sm:$0xff]   ;;  %v15219_v3 = vrot.slane %v4119_v61, %v15211_v5 }
 0x3ce   :  { %6819 = vmatpush1.bf16.msra.mxu0 %v12324_v10  ;;  %6864 = vmatpush1.bf16.msra.mxu1 %v12345_v11 }
 0x3cf   :  { %6820 = vmatprep.subr.bf16.mxu0 %v12332_v47  ;;  %6865 = vmatprep.subr.bf16.mxu1 %v12353_v54 }
 0x3d2   :  { %6821 = vmatpush1.bf16.msra.mxu0 %v12330_v21  ;;  %6866 = vmatpush1.bf16.msra.mxu1 %v12351_v33 }
 0x3d3   :  { %6822 = vmatprep.subr.bf16.mxu0 %v12338_v44  ;;  %6867 = vmatprep.subr.bf16.mxu1 %v12359_v26 }
 0x3d6   :  { %6823 = vmatpush1.bf16.msra.mxu0 %v12336_v35  ;;  %6868 = vmatpush2.bf16.msra.mxu1 %v12357_v53 }
 0x3d7   :  { %6824 = vmatprep.subr.bf16.mxu0 %v12344_v9  ;;  %6869 = vmatprep.subr.bf16.mxu1 %v12365_v63 }
 0x3da   :  { %6825 = vmatpush2.bf16.msra.mxu0 %v12342_v52  ;;  %6870 = vmatpush2.bf16.msra.mxu1 %v12363_v6 }
 0x3db   :  { %6826 = vmatprep.subr.bf16.mxu0 %v12350_v37  ;;  %6871 = vmatprep.subr.bf16.mxu1 %v12371_v14 }
 0x3de   :  { %6827 = vmatpush2.bf16.msra.mxu0 %v12348_v29  ;;  %6872 = vmatpush2.bf16.msra.mxu1 %v12369_v19 }
 0x3df   :  { %6828 = vmatprep.subr.bf16.mxu0 %v12356_v20  ;;  %6873 = vmatprep.subr.bf16.mxu1 %v12377_v31 }
 0x3e2   :  { %6829 = vmatpush2.bf16.msra.mxu0 %v12354_v28  ;;  %6874 = vmatpush2.bf16.msra.mxu1 %v12375_v1 }
 0x3e3   :  { %6830 = vmatprep.subr.bf16.mxu0 %v12362_v56  ;;  %6875 = vmatprep.subr.bf16.mxu1 %v12383_v0 }
 0x3e6   :  { %6831 = vmatpush2.bf16.msra.mxu0 %v12360_v55  ;;  %6876 = vmatpush2.bf16.msra.mxu1 %v12381_v15 }
 0x3e7   :  { %6832 = vmatprep.subr.bf16.mxu0 %v12368_v25  ;;  %6877 = vmatprep.subr.bf16.mxu1 %v12389_v34  ;;  %v15257_v34 = vsub.s32 1, %v4122_v42 }
 0x3ea   :  { %6833 = vmatpush2.bf16.msra.mxu0 %v12366_v62  ;;  %6878 = vmatpush2.bf16.msra.mxu1 %v12387_v2 }
 0x3eb   :  { %6834 = vmatprep.subr.bf16.mxu0 %v12374_v50  ;;  %6879 = vmatprep.subr.bf16.mxu1 %v12392_v17 }
 0x3ee   :  { %6835 = vmatpush2.bf16.msra.mxu0 %v12372_v48  ;;  %6880 = vmatpush2.bf16.msra.mxu1 %v12390_v51  ;;  %v15266_v51 = vrot.slane %v4119_v61, %v15257_v34 }
 0x3ef   :  { %6836 = vmatprep.subr.bf16.mxu0 %v12380_v38  ;;  %6881 = vmatprep.subr.bf16.mxu1 %v12398_v49 }
 0x3f2   :  { %6837 = vmatpush2.bf16.msra.mxu0 %v12378_v32  ;;  %6882 = vmatpush2.bf16.msra.mxu1 %v12396_v58 }
 0x3f3   :  { %6838 = vmatprep.subr.bf16.mxu0 %v12386_v27  ;;  %6937 = vmatprep.subr.bf16.mxu1 %v12407_v43 }
 0x3f6   :  { %6839 = vmatpush2.bf16.msra.mxu0 %v12384_v23 }
 0x3f7   :  { %6894 = vmatprep.subr.bf16.mxu0 %v12395_v4 }
 0x413   :  { %v15195_v16 = vpop.f32.mrf.mxu1 }
 0x415   :  { %v15197_v59 = vpop.f32.mrf.mxu1 }
 0x416   :  { %v4888_v42 = vadd.f32 %v15197_v59, %v15266_v51 }
 0x417   :  { %v15199_v22 = vpop.f32.mrf.mxu1 }
 0x418   :  { %v4890_v61 = vadd.f32 %v15199_v22, %v15219_v3 }
 0x419   :  { %v15201_v7 = vpop.f32.mrf.mxu1 }
 0x41b   :  { %v15203_v30 = vpop.f32.mrf.mxu1 }
 0x41d   :  { %v15205_v41 = vpop.f32.mrf.mxu1 }
 0x41e   :  { %v4898_v22 = vadd.f32 %v15205_v41, %v15266_v51 }
 0x41f   :  { %v15207_v24 = vpop.f32.mrf.mxu1 }
 0x421   :  { %v15216_v57 = vpop.f32.mrf.mxu1 }
 0x42b   :  { %v15209_v12 = vpop.f32.mrf.mxu0 }
 0x42d   :  { %v4960_v13 = vpop.f32.mrf.mxu0 }
 0x42f   :  { %v4962_v40 = vpop.f32.mrf.mxu0 }
 0x430   :  { %v4963_v59 = vadd.f32 %v4962_v40, %v4890_v61 }
 0x431   :  { %v4964_v60 = vpop.f32.mrf.mxu0 }
 0x433   :  { %v4905_v45 = vpop.f32.mrf.mxu1  ;;  %v15228_v8 = vpop.f32.mrf.mxu0 }
 0x434   :  { %v4906_v10 = vadd.f32 %v4905_v45, %v15219_v3 }
 0x435   :  { %v15222_v47 = vpop.f32.mrf.mxu1  ;;  %v15233_v11 = vpop.f32.mrf.mxu0 }
 0x437   :  { %v4909_v39 = vpop.f32.mrf.mxu1  ;;  %v15235_v37 = vpop.f32.mrf.mxu0 }
 0x438   :  { %v4910_v21 = vadd.f32 %v4909_v39, %v15219_v3 }
 0x439   :  { %v15225_v44 = vpop.f32.mrf.mxu1  ;;  %v15237_v54 = vpop.f32.mrf.mxu0 }
 0x43b   :  { %v4915_v36 = vpop.f32.mrf.mxu1 }
 0x43c   :  { %v4916_v35 = vadd.f32 %v4915_v36, %v15219_v3 }
 0x43d   :  { %v15230_v9 = vpop.f32.mrf.mxu1 }
 0x43f   :  { %v4919_v46 = vpop.f32.mrf.mxu1 }
 0x440   :  { %v4920_v52 = vadd.f32 %v4919_v46, %v15219_v3 }
 0x441   :  { %v15241_v53 = vpop.f32.mrf.mxu1 }
 0x44b   :  { %v4978_v29 = vpop.f32.mrf.mxu0 }
 0x44c   :  { %v4979_v33 = vadd.f32 %v4978_v29, %v4906_v10 }
 0x44d   :  { %v15239_v20 = vpop.f32.mrf.mxu0 }
 0x44f   :  { %v4982_v26 = vpop.f32.mrf.mxu0 }
 0x450   :  { %v4983_v28 = vadd.f32 %v4982_v26, %v4910_v21  ;;  %v4886_v21 = vadd.f32 %v15195_v16, %v15219_v3 }
 0x451   :  { %v15243_v56 = vpop.f32.mrf.mxu0 }
 0x452   :  { %v4959_v29 = vadd.f32 %v15209_v12, %v4886_v21  ;;  %v4896_v12 = vadd.f32 %v15203_v30, %v15219_v3 }
 0x453   :  { %v5031_v63 = vpop.f32.mrf.mxu1  ;;  %v4988_v55 = vpop.f32.mrf.mxu0 }
 0x454   :  { %v4989_v6 = vadd.f32 %v4988_v55, %v4916_v35  ;;  %v4961_v35 = vadd.f32 %v4960_v13, %v4888_v42  ;;  %v5032_v55 = vadd.f32 %v5031_v63, %v4959_v29  ;;  %v4900_v63 = vadd.f32 %v15207_v24, %v15219_v3 }
 0x455   :  { %v5033_v25 = vpop.f32.mrf.mxu1  ;;  %v15245_v14 = vpop.f32.mrf.mxu0  ;;  %v4969_v21 = vadd.f32 %v15228_v8, %v4896_v12 }
 0x456   :  { %v5034_v26 = vadd.f32 %v5033_v25, %v4961_v35  ;;  %v4971_v25 = vadd.f32 %v15233_v11, %v4898_v22  ;;  %v4973_v30 = vadd.f32 %v15235_v37, %v4900_v63 }
 0x457   :  { %v5035_v62 = vpop.f32.mrf.mxu1  ;;  %v4992_v19 = vpop.f32.mrf.mxu0 }
 0x458   :  { %v4993_v50 = vadd.f32 %v4992_v19, %v4920_v52  ;;  %v5036_v19 = vadd.f32 %v5035_v62, %v4963_v59 }
 0x459   :  { %v5037_v31 = vpop.f32.mrf.mxu1  ;;  %v15261_v17 = vpop.f32.mrf.mxu0 }
 0x45b   :  { %v15247_v48 = vpop.f32.mrf.mxu1 }
 0x45c   :  { %v5042_v11 = vadd.f32 %v15247_v48, %v4969_v21 }
 0x45d   :  { %v5043_v1 = vpop.f32.mrf.mxu1 }
 0x45f   :  { %v15249_v38 = vpop.f32.mrf.mxu1 }
 0x460   :  { %v5046_v29 = vadd.f32 %v15249_v38, %v4973_v30 }
 0x461   :  { %v15251_v0 = vpop.f32.mrf.mxu1 }
 0x463   :  { %v5051_v32 = vpop.f32.mrf.mxu1 }
 0x464   :  { %v15253_v15 = vadd.f32 %v5051_v32, %v4979_v33  ;;  %v4892_v33 = vadd.f32 %v15201_v7, %v15266_v51 }
 0x465   :  { %v15255_v27 = vpop.f32.mrf.mxu1 }
 0x466   :  { %v4965_v16 = vadd.f32 %v4964_v60, %v4892_v33  ;;  %v4902_v60 = vadd.f32 %v15216_v57, %v15266_v51 }
 0x467   :  { %v5055_v23 = vpop.f32.mrf.mxu1 }
 0x468   :  { %v15259_v2 = vadd.f32 %v5055_v23, %v4983_v28 }
 0x469   :  { %v15263_v4 = vpop.f32.mrf.mxu1 }
 0x46b   :  { %v5061_v49 = vpop.f32.mrf.mxu1  ;;  %v5104_v58 = vpop.f32.mrf.mxu0 }
 0x46c   :  { %v15268_v43 = vadd.f32 %v5061_v49, %v4989_v6  ;;  %v5105_v13 = vadd.f32 %v5104_v58, %v5032_v55  ;;  %v5038_v49 = vadd.f32 %v5037_v31, %v4965_v16  ;;  %v4975_v31 = vadd.f32 %v15237_v54, %v4902_v60 }
 0x46d   :  { %v15270_v18 = vpop.f32.mrf.mxu1  ;;  %v5106_v45 = vpop.f32.mrf.mxu0  ;;  %v4908_v54 = vadd.f32 %v15222_v47, %v15266_v51  ;;  %v12393_v47 = vld [vmem:[%s16751_s8 + $0x4e0] ss:$16 sps:$4 sm:$0xff]  }
 0x46f   :  { %v5065_v10 = vpop.f32.mrf.mxu1  ;;  %v5108_v39 = vpop.f32.mrf.mxu0  ;;  %v4981_v22 = vadd.f32 %v15239_v20, %v4908_v54  ;;  %v4912_v20 = vadd.f32 %v15225_v44, %v15266_v51 }
 0x470   :  { %v15276_v36 = vadd.f32 %v5065_v10, %v4993_v50  ;;  %v5107_v50 = vadd.f32 %v5106_v45, %v5034_v26  ;;  %v5109_v42 = vadd.f32 %v5108_v39, %v5036_v19  ;;  %v5044_v39 = vadd.f32 %v5043_v1, %v4971_v25 }
 0x471   :  { %v15280_v46 = vpop.f32.mrf.mxu1  ;;  %v5110_v52 = vpop.f32.mrf.mxu0  ;;  %v5048_v1 = vadd.f32 %v15251_v0, %v4975_v31  ;;  %v12404_v31 = vld [vmem:[%s16751_s8 + $0x4a4] ss:$16 sps:$4 sm:$0xff]  }
 0x472   :  { %v5111_v41 = vadd.f32 %v5110_v52, %v5038_v49 }
 0x473   :  { %v5114_v28 = vpop.f32.mrf.mxu0 }
 0x474   :  { %v5177_v6 = vpop.f32.mrf.mxu1  ;;  %v5115_v26 = vadd.f32 %v5114_v28, %v5042_v11 }
 0x475   :  { %v5116_v32 = vpop.f32.mrf.mxu0  ;;  %v5178_v62 = vadd.f32 %v5177_v6, %v5105_v13 }
 0x476   :  { %v5179_v23 = vpop.f32.mrf.mxu1  ;;  %v5117_v8 = vadd.f32 %v5116_v32, %v5044_v39 }
 0x477   :  { %v5180_v7 = vadd.f32 %v5179_v23, %v5107_v50  ;;  %v5118_v40 = vpop.f32.mrf.mxu0  ;;  %v5232_v52 = vmul.f32 0.2, %v5178_v62  ;;  %vm5216_vm11 = vcmp.ge.f32.partialorder %v5178_v62, 0.0 }
 0x478   :  { %v5181_v45 = vpop.f32.mrf.mxu1  ;;  %v5119_v48 = vadd.f32 %v5118_v40, %v5046_v29  ;;  %v5054_v40 = vadd.f32 %v15255_v27, %v4981_v22 }
 0x479   :  { %v5182_v58 = vadd.f32 %v5181_v45, %v5109_v42  ;;  %v5120_v10 = vpop.f32.mrf.mxu0  ;;  %v5233_v35 = vmul.f32 0.2, %v5180_v7  ;;  %vm5217_vm10 = vcmp.ge.f32.partialorder %v5180_v7, 0.0  ;;  %v5248_v32 = vsel %vm5216_vm11, %v5178_v62, %v5232_v52 }
 0x47a   :  { %v5183_v61 = vpop.f32.mrf.mxu1  ;;  %v5121_v28 = vadd.f32 %v5120_v10, %v5048_v1  ;;  %v12410_v1 = vld [vmem:[%s16751_s8 + $0x484] ss:$16 sps:$4 sm:$0xff]   ;;  %vm7240_vm11 = vcmask 1041408  }
 0x47b   :  { %vm5218_vm9 = vcmp.ge.f32.partialorder %v5182_v58, 0.0  ;;  %v5234_v24 = vmul.f32 0.2, %v5182_v58  ;;  %v5184_v3 = vadd.f32 %v5183_v61, %v5111_v41  ;;  %v5124_v57 = vpop.f32.mrf.mxu0  ;;  %v5249_v19 = vsel %vm5217_vm10, %v5180_v7, %v5233_v35  ;;  %v12401_v7 = vld [vmem:[%s16751_s8 + $0x4c4] ss:$16 sps:$4 sm:$0xff]  }
 0x47c   :  { %v5187_v33 = vpop.f32.mrf.mxu1  ;;  %v5125_v63 = vadd.f32 %v5124_v57, %v15253_v15  ;;  %v12399_v15 = vld [vmem:[%s16751_s8 + $0x4c0] ss:$16 sps:$4 sm:$0xff]  }
 0x47d   :  { %vm5219_vm12 = vcmp.ge.f32.partialorder %v5184_v3, 0.0  ;;  %v5235_v37 = vmul.f32 0.2, %v5184_v3  ;;  %v5126_v59 = vpop.f32.mrf.mxu0  ;;  %v5250_v55 = vsel %vm5218_vm9, %v5182_v58, %v5234_v24  ;;  %v5188_v13 = vadd.f32 %v5187_v33, %v5115_v26  ;;  %v12413_v26 = vld [vmem:[%s16751_s8 + $0x6c4] ss:$16 sps:$4 sm:$0xff]  }
 0x47e   :  { %v5189_v6 = vpop.f32.mrf.mxu1  ;;  %v15310_v0 = vpack.c.bf16 %v5250_v55, %v5248_v32  ;;  %v4985_v58 = vadd.f32 %v15243_v56, %v4912_v20  ;;  %v5127_v21 = vadd.f32 %v5126_v59, %v5054_v40  ;;  %v4918_v56 = vadd.f32 %v15230_v9, %v15266_v51 }
 0x47f   :  { %v5190_v16 = vadd.f32 %v5189_v6, %v5117_v8  ;;  %v5128_v38 = vpop.f32.mrf.mxu0  ;;  %v5251_v50 = vsel %vm5219_vm12, %v5184_v3, %v5235_v37  ;;  %v5236_v10 = vmul.f32 0.2, %v5188_v13  ;;  %vm5220_vm15 = vcmp.ge.f32.partialorder %v5188_v13, 0.0 }
 0x480   :  { %v5191_v23 = vpop.f32.mrf.mxu1  ;;  %v15305_v12 = vpack.c.bf16 %v5251_v50, %v5249_v19  ;;  %v5058_v39 = vadd.f32 %v15263_v4, %v4985_v58  ;;  %v5129_v3 = vadd.f32 %v5128_v38, %v15259_v2  ;;  %v4991_v52 = vadd.f32 %v15245_v14, %v4918_v56  ;;  %v12402_v4 = vld [vmem:[%s16751_s8 + $0x4a0] ss:$16 sps:$4 sm:$0xff]  }
 0x481   :  { %v5192_v49 = vadd.f32 %v5191_v23, %v5119_v48  ;;  %v5130_v42 = vpop.f32.mrf.mxu0  ;;  %v5237_v25 = vmul.f32 0.2, %v5190_v16  ;;  %vm5221_vm14 = vcmp.ge.f32.partialorder %v5190_v16, 0.0  ;;  %v5252_v33 = vsel %vm5220_vm15, %v5188_v13, %v5236_v10  ;;  %v12405_v2 = vld [vmem:[%s16751_s8 + $0x6e0] ss:$16 sps:$4 sm:$0xff]  }
 0x482   :  { %v5193_v60 = vpop.f32.mrf.mxu1  ;;  %6840 = vmatprep.mubr.bf16.mxu0 %v15305_v12  ;;  %v5131_v54 = vadd.f32 %v5130_v42, %v5058_v39  ;;  %v4922_v55 = vadd.f32 %v15241_v53, %v15266_v51  ;;  %v5064_v6 = vadd.f32 %v15270_v18, %v4991_v52  ;;  %v12408_v19 = vld [vmem:[%s16751_s8 + $0x480] ss:$16 sps:$4 sm:$0xff]   ;;  %v12416_v23 = vld [vmem:[%s16751_s8 + $0x464] ss:$16 sps:$4 sm:$0xff]   ;;  %vm7221_vm12 = vcmask 293888  }
 0x483   :  { %vm5222_vm13 = vcmp.ge.f32.partialorder %v5192_v49, 0.0  ;;  %v5238_v62 = vmul.f32 0.2, %v5192_v49  ;;  %v5194_v45 = vadd.f32 %v5193_v60, %v5121_v28  ;;  %6841 = vmatmul.mubr.bf16.vlgmr.msra.gmra.mxu0 %v15310_v0  ;;  %v5134_v41 = vpop.f32.mrf.mxu0  ;;  %v5253_v11 = vsel %vm5221_vm14, %v5190_v16, %v5237_v25  ;;  %v12411_v13 = vld [vmem:[%s16751_s8 + $0x6c0] ss:$16 sps:$4 sm:$0xff]  }
 0x484   :  { %6895 = vmatpush1.bf16.msra.mxu0 %v12393_v47  ;;  %v5197_v44 = vpop.f32.mrf.mxu1  ;;  %v5135_v48 = vadd.f32 %v5134_v41, %v15268_v43  ;;  %v4995_v53 = vadd.f32 %v15261_v17, %v4922_v55  ;;  %v12419_v17 = vld [vmem:[%s16751_s8 + $0x6a4] ss:$16 sps:$4 sm:$0xff]   ;;  %v12414_v41 = vld [vmem:[%s16751_s8 + $0x460] ss:$16 sps:$4 sm:$0xff]  }
 0x485   :  { %vm5223_vm0 = vcmp.ge.f32.partialorder %v5194_v45, 0.0  ;;  %v5239_v27 = vmul.f32 0.2, %v5194_v45  ;;  %v5198_v30 = vadd.f32 %v5197_v44, %v5125_v63  ;;  %6896 = vmatprep.subr.bf16.mxu0 %v12401_v7  ;;  %v5254_v61 = vsel %vm5222_vm13, %v5192_v49, %v5238_v62  ;;  %v5136_v35 = vpop.f32.mrf.mxu0  ;;  %v12422_v44 = vld [vmem:[%s16751_s8 + $0x444] ss:$16 sps:$4 sm:$0xff]  }
 0x486   :  { %v5199_v24 = vpop.f32.mrf.mxu1  ;;  %v15344_v59 = vpack.c.bf16 %v5254_v61, %v5252_v33  ;;  %v5137_v18 = vadd.f32 %v5136_v35, %v5064_v6  ;;  %v5068_v42 = vadd.f32 %v15280_v46, %v4995_v53  ;;  %v12417_v46 = vld [vmem:[%s16751_s8 + $0x6a0] ss:$16 sps:$4 sm:$0xff]   ;;  %v12428_v35 = vld [vmem:[%s16751_s8 + $0x424] ss:$16 sps:$4 sm:$0xff]  }
 0x487   :  { %v5200_v57 = vadd.f32 %v5199_v24, %v5127_v21  ;;  %v5255_v29 = vsel %vm5223_vm0, %v5194_v45, %v5239_v27  ;;  %v5240_v8 = vmul.f32 0.2, %v5198_v30  ;;  %vm5224_vm1 = vcmp.ge.f32.partialorder %v5198_v30, 0.0  ;;  %v5138_v16 = vpop.f32.mrf.mxu0  ;;  %v12423_v61 = vld [vmem:[%s16751_s8 + $0x680] ss:$16 sps:$4 sm:$0xff]  }
 0x488   :  { %6897 = vmatpush1.bf16.msra.mxu0 %v12399_v15  ;;  %v5201_v37 = vpop.f32.mrf.mxu1  ;;  %v15336_v9 = vpack.c.bf16 %v5255_v29, %v5253_v11  ;;  %v5139_v63 = vadd.f32 %v5138_v16, %v15276_v36  ;;  %v12425_v15 = vld [vmem:[%s16751_s8 + $0x684] ss:$16 sps:$4 sm:$0xff]   ;;  %v12438_v6 = vld [vmem:[%s16751_s8 + $0x5e0] ss:$16 sps:$4 sm:$0xff]  }
 0x489   :  { %v5202_v14 = vadd.f32 %v5201_v37, %v5129_v3  ;;  %6898 = vmatprep.subr.bf16.mxu0 %v12404_v31  ;;  %v5241_v50 = vmul.f32 0.2, %v5200_v57  ;;  %v5256_v51 = vsel %vm5224_vm1, %v5198_v30, %v5240_v8  ;;  %vm5225_vm5 = vcmp.ge.f32.partialorder %v5200_v57, 0.0  ;;  %v5140_v20 = vpop.f32.mrf.mxu0  ;;  %v12420_v30 = vld [vmem:[%s16751_s8 + $0x440] ss:$16 sps:$4 sm:$0xff]  }
 0x48a   :  { %v5203_v38 = vpop.f32.mrf.mxu1  ;;  %6883 = vmatprep.mubr.bf16.mxu1 %v15336_v9  ;;  %v5141_v10 = vadd.f32 %v5140_v20, %v5068_v42  ;;  %v12431_v11 = vld [vmem:[%s16751_s8 + $0x664] ss:$16 sps:$4 sm:$0xff]   ;;  %v12426_v8 = vld [vmem:[%s16751_s8 + $0x420] ss:$16 sps:$4 sm:$0xff]  }
 0x48b   :  { %vm5226_vm2 = vcmp.ge.f32.partialorder %v5202_v14, 0.0  ;;  %v5242_v22 = vmul.f32 0.2, %v5202_v14  ;;  %v5204_v32 = vadd.f32 %v5203_v38, %v5131_v54  ;;  %6884 = vmatmul.mubr.bf16.vlgmr.msra.gmra.mxu1 %v15344_v59  ;;  %v5257_v25 = vsel %vm5225_vm5, %v5200_v57, %v5241_v50  ;;  %v12429_v37 = vld [vmem:[%s16751_s8 + $0x660] ss:$16 sps:$4 sm:$0xff]  }
 0x48c   :  { %6899 = vmatpush1.bf16.msra.mxu0 %v12402_v4  ;;  %6938 = vmatpush1.bf16.msra.mxu1 %v12405_v2  ;;  %v5207_v43 = vpop.f32.mrf.mxu1  ;;  %v12434_v2 = vld [vmem:[%s16751_s8 + $0x404] ss:$16 sps:$4 sm:$0xff]   ;;  %v12447_v50 = vld [vmem:[%s16751_s8 + $0x600] ss:$16 sps:$4 sm:$0xff]  }
 0x48d   :  { %v5258_v47 = vsel %vm5226_vm2, %v5202_v14, %v5242_v22  ;;  %vm5227_vm6 = vcmp.ge.f32.partialorder %v5204_v32, 0.0  ;;  %v5243_v28 = vmul.f32 0.2, %v5204_v32  ;;  %v5208_v49 = vadd.f32 %v5207_v43, %v5135_v48  ;;  %6900 = vmatprep.subr.bf16.mxu0 %v12410_v1  ;;  %6939 = vmatprep.subr.bf16.mxu1 %v12413_v26  ;;  %v12437_v54 = vld [vmem:[%s16751_s8 + $0x644] ss:$16 sps:$4 sm:$0xff]  }
 0x48e   :  { %v15373_v7 = vpack.c.bf16 %v5258_v47, %v5256_v51  ;;  %v5209_v40 = vpop.f32.mrf.mxu1  ;;  %v12432_v14 = vld [vmem:[%s16751_s8 + $0x400] ss:$16 sps:$4 sm:$0xff]   ;;  %v12440_v26 = vld [vmem:[%s16751_s8 + $0x5e4] ss:$16 sps:$4 sm:$0xff]  }
 0x48f   :  { %v5210_v60 = vadd.f32 %v5209_v40, %v5137_v18  ;;  %v5259_v62 = vsel %vm5227_vm6, %v5204_v32, %v5243_v28  ;;  %v5244_v21 = vmul.f32 0.2, %v5208_v49  ;;  %vm5228_vm7 = vcmp.ge.f32.partialorder %v5208_v49, 0.0  ;;  %v12435_v1 = vld [vmem:[%s16751_s8 + $0x640] ss:$16 sps:$4 sm:$0xff]  }
 0x490   :  { %6901 = vmatpush1.bf16.msra.mxu0 %v12408_v19  ;;  %6940 = vmatpush1.bf16.msra.mxu1 %v12411_v13  ;;  %v5211_v45 = vpop.f32.mrf.mxu1  ;;  %v15380_v58 = vpack.c.bf16 %v5259_v62, %v5257_v25  ;;  %v12443_v55 = vld [vmem:[%s16751_s8 + $0x624] ss:$16 sps:$4 sm:$0xff]   ;;  %v12441_v48 = vld [vmem:[%s16751_s8 + $0x620] ss:$16 sps:$4 sm:$0xff]  }
 0x491   :  { %v5212_v36 = vadd.f32 %v5211_v45, %v5139_v63  ;;  %6902 = vmatprep.subr.bf16.mxu0 %v12416_v23  ;;  %6941 = vmatprep.subr.bf16.mxu1 %v12419_v17  ;;  %v5245_v31 = vmul.f32 0.2, %v5210_v60  ;;  %vm5229_vm9 = vcmp.ge.f32.partialorder %v5210_v60, 0.0  ;;  %v5260_v24 = vsel %vm5228_vm7, %v5208_v49, %v5244_v21  ;;  %v12446_v16 = vld [vmem:[%s16751_s8 + $0x5c4] ss:$16 sps:$4 sm:$0xff]  }
 0x492   :  { %v5213_v27 = vpop.f32.mrf.mxu1  ;;  %6926 = vmatprep.mubr.bf16.mxu0 %v15380_v58  ;;  %v12449_v38 = vld [vmem:[%s16751_s8 + $0x604] ss:$16 sps:$4 sm:$0xff]   ;;  %v12444_v19 = vld [vmem:[%s16751_s8 + $0x5c0] ss:$16 sps:$4 sm:$0xff]  }
 0x493   :  { %vm5230_vm8 = vcmp.ge.f32.partialorder %v5212_v36, 0.0  ;;  %v5246_v56 = vmul.f32 0.2, %v5212_v36  ;;  %v5214_v39 = vadd.f32 %v5213_v27, %v5141_v10  ;;  %v5261_v52 = vsel %vm5229_vm9, %v5210_v60, %v5245_v31  ;;  %v12452_v22 = vld [vmem:[%s16751_s8 + $0x5a4] ss:$16 sps:$4 sm:$0xff]  }
 0x494   :  { %6903 = vmatpush1.bf16.msra.mxu0 %v12414_v41  ;;  %6942 = vmatpush1.bf16.msra.mxu1 %v12417_v46  ;;  %v12455_v32 = vld [vmem:[%s16751_s8 + $0x7e4] ss:$16 sps:$4 sm:$0xff]   ;;  %v12450_v53 = vld [vmem:[%s16751_s8 + $0x5a0] ss:$16 sps:$4 sm:$0xff]   ;;  %v12489_v27 = vld [vmem:[%s16751_s8 + $0xe8] ss:$16 sps:$4 sm:$0xff]  }
 0x495   :  { %v5262_v3 = vsel %vm5230_vm8, %v5212_v36, %v5246_v56  ;;  %vm5231_vm10 = vcmp.ge.f32.partialorder %v5214_v39, 0.0  ;;  %v5247_v57 = vmul.f32 0.2, %v5214_v39  ;;  %6904 = vmatprep.subr.bf16.mxu0 %v12422_v44  ;;  %6943 = vmatprep.subr.bf16.mxu1 %v12425_v15  ;;  %v12453_v51 = vld [vmem:[%s16751_s8 + $0x7e0] ss:$16 sps:$4 sm:$0xff]  }
 0x496   :  { %v15404_v29 = vpack.c.bf16 %v5262_v3, %v5260_v24  ;;  %v12458_v18 = vld [vmem:[%s16751_s8 + $0x584] ss:$16 sps:$4 sm:$0xff]   ;;  %v12456_v13 = vld [vmem:[%s16751_s8 + $0x580] ss:$16 sps:$4 sm:$0xff]   ;;  %v12491_v44 = vld [vmem:[%s16751_s8 + $0xec] ss:$16 sps:$4 sm:$0xff]  }
 0x497   :  { %v5263_v33 = vsel %vm5231_vm10, %v5214_v39, %v5247_v57  ;;  %v12461_v43 = vld [vmem:[%s16751_s8 + $0x7c4] ss:$16 sps:$4 sm:$0xff]   ;;  %v12459_v23 = vld [vmem:[%s16751_s8 + $0x7c0] ss:$16 sps:$4 sm:$0xff]   ;;  %v12497_v31 = vld [vmem:[%s16751_s8 + $0xcc] ss:$16 sps:$4 sm:$0xff]  }
 0x498   :  { %6905 = vmatpush1.bf16.msra.mxu0 %v12420_v30  ;;  %6944 = vmatpush1.bf16.msra.mxu1 %v12423_v61  ;;  %v15412_v4 = vpack.c.bf16 %v5263_v33, %v5261_v52  ;;  %v12464_v47 = vld [vmem:[%s16751_s8 + $0x564] ss:$16 sps:$4 sm:$0xff]   ;;  %v12462_v49 = vld [vmem:[%s16751_s8 + $0x560] ss:$16 sps:$4 sm:$0xff]   ;;  %v12495_v39 = vld [vmem:[%s16751_s8 + $0xc8] ss:$16 sps:$4 sm:$0xff]  }
 0x499   :  { %6906 = vmatprep.subr.bf16.mxu0 %v12428_v35  ;;  %6945 = vmatprep.subr.bf16.mxu1 %v12431_v11  ;;  %v12467_v28 = vld [vmem:[%s16751_s8 + $0x7a4] ss:$16 sps:$4 sm:$0xff]   ;;  %v12465_v17 = vld [vmem:[%s16751_s8 + $0x7a0] ss:$16 sps:$4 sm:$0xff]   ;;  %v12500_v61 = vld [vmem:[%s16751_s8 + $0xac] ss:$16 sps:$4 sm:$0xff]  }
 0x49a   :  { %6969 = vmatprep.mubr.bf16.mxu1 %v15412_v4  ;;  %v12470_v42 = vld [vmem:[%s16751_s8 + $0x544] ss:$16 sps:$4 sm:$0xff]   ;;  %v12468_v40 = vld [vmem:[%s16751_s8 + $0x540] ss:$16 sps:$4 sm:$0xff]   ;;  %v12503_v35 = vld [vmem:[%s16751_s8 + $0x2ec] ss:$16 sps:$4 sm:$0xff]  }
 0x49b   :  { %v12473_v20 = vld [vmem:[%s16751_s8 + $0x784] ss:$16 sps:$4 sm:$0xff]   ;;  %v12471_v63 = vld [vmem:[%s16751_s8 + $0x780] ss:$16 sps:$4 sm:$0xff]   ;;  %v12498_v24 = vld [vmem:[%s16751_s8 + $0xa8] ss:$16 sps:$4 sm:$0xff]  }
 0x49c   :  { %6907 = vmatpush1.bf16.msra.mxu0 %v12426_v8  ;;  %6946 = vmatpush1.bf16.msra.mxu1 %v12429_v37  ;;  %v12476_v60 = vld [vmem:[%s16751_s8 + $0x524] ss:$16 sps:$4 sm:$0xff]   ;;  %v12474_v62 = vld [vmem:[%s16751_s8 + $0x520] ss:$16 sps:$4 sm:$0xff]   ;;  %v12506_v3 = vld [vmem:[%s16751_s8 + $0x8c] ss:$16 sps:$4 sm:$0xff]  }
 0x49d   :  { %6908 = vmatprep.subr.bf16.mxu0 %v12434_v2  ;;  %6947 = vmatprep.subr.bf16.mxu1 %v12437_v54  ;;  %v12479_v25 = vld [vmem:[%s16751_s8 + $0x764] ss:$16 sps:$4 sm:$0xff]   ;;  %v12477_v45 = vld [vmem:[%s16751_s8 + $0x760] ss:$16 sps:$4 sm:$0xff]   ;;  %v12509_v57 = vld [vmem:[%s16751_s8 + $0x2cc] ss:$16 sps:$4 sm:$0xff]  }
 0x49e   :  { %v12482_v41 = vld [vmem:[%s16751_s8 + $0x504] ss:$16 sps:$4 sm:$0xff]   ;;  %v12480_v10 = vld [vmem:[%s16751_s8 + $0x500] ss:$16 sps:$4 sm:$0xff]   ;;  %v12504_v11 = vld [vmem:[%s16751_s8 + $0x88] ss:$16 sps:$4 sm:$0xff]  }
 0x49f   :  { %v12485_v46 = vld [vmem:[%s16751_s8 + $0x744] ss:$16 sps:$4 sm:$0xff]   ;;  %v12483_v21 = vld [vmem:[%s16751_s8 + $0x740] ss:$16 sps:$4 sm:$0xff]   ;;  %v12507_v52 = vld [vmem:[%s16751_s8 + $0x2c8] ss:$16 sps:$4 sm:$0xff]  }
 0x4a0   :  { %6909 = vmatpush1.bf16.msra.mxu0 %v12432_v14  ;;  %6948 = vmatpush1.bf16.msra.mxu1 %v12435_v1  ;;  %v12488_v36 = vld [vmem:[%s16751_s8 + $0x724] ss:$16 sps:$4 sm:$0xff]   ;;  %v12486_v15 = vld [vmem:[%s16751_s8 + $0x720] ss:$16 sps:$4 sm:$0xff]   ;;  %v12512_v33 = vld [vmem:[%s16751_s8 + $0x6c] ss:$16 sps:$4 sm:$0xff]  }
 0x4a1   :  { %6910 = vmatprep.subr.bf16.mxu0 %v12440_v26  ;;  %6949 = vmatprep.subr.bf16.mxu1 %v12443_v55  ;;  %v12494_v30 = vld [vmem:[%s16751_s8 + $0x704] ss:$16 sps:$4 sm:$0xff]   ;;  %v12492_v56 = vld [vmem:[%s16751_s8 + $0x700] ss:$16 sps:$4 sm:$0xff]   ;;  %v12515_v8 = vld [vmem:[%s16751_s8 + $0x2ac] ss:$16 sps:$4 sm:$0xff]  }
 0x4a2   :  { %v12510_v37 = vld [vmem:[%s16751_s8 + $0x68] ss:$16 sps:$4 sm:$0xff]   ;;  %v12518_v2 = vld [vmem:[%s16751_s8 + $0x4c] ss:$16 sps:$4 sm:$0xff]  }
 0x4a3   :  { %v12521_v54 = vld [vmem:[%s16751_s8 + $0x28c] ss:$16 sps:$4 sm:$0xff]   ;;  %v12516_v14 = vld [vmem:[%s16751_s8 + $0x48] ss:$16 sps:$4 sm:$0xff]  }
 0x4a4   :  { %6911 = vmatpush2.bf16.msra.mxu0 %v12438_v6  ;;  %6950 = vmatpush1.bf16.msra.mxu1 %v12441_v48  ;;  %v12519_v1 = vld [vmem:[%s16751_s8 + $0x288] ss:$16 sps:$4 sm:$0xff]   ;;  %v12524_v26 = vld [vmem:[%s16751_s8 + $0x2c] ss:$16 sps:$4 sm:$0xff]  }
 0x4a5   :  { %6912 = vmatprep.subr.bf16.mxu0 %v12446_v16  ;;  %6951 = vmatprep.subr.bf16.mxu1 %v12449_v38  ;;  %v12527_v55 = vld [vmem:[%s16751_s8 + $0x26c] ss:$16 sps:$4 sm:$0xff]   ;;  %v12522_v6 = vld [vmem:[%s16751_s8 + $0x28] ss:$16 sps:$4 sm:$0xff]  }
 0x4a6   :  { %v12525_v48 = vld [vmem:[%s16751_s8 + $0x268] ss:$16 sps:$4 sm:$0xff]   ;;  %v12530_v16 = vld [vmem:[%s16751_s8 + $0xc] ss:$16 sps:$4 sm:$0xff]  }
 0x4a7   :  { %v12533_v38 = vld [vmem:[%s16751_s8 + $0x24c] ss:$16 sps:$4 sm:$0xff]  }
 0x4a8   :  { %6913 = vmatpush2.bf16.msra.mxu0 %v12444_v19  ;;  %6952 = vmatpush1.bf16.msra.mxu1 %v12447_v50  ;;  %v12528_v19 = vld [vmem:[%s16751_s8 + $0x8] ss:$16 sps:$4 sm:$0xff]  }
 0x4a9   :  { %6914 = vmatprep.subr.bf16.mxu0 %v12452_v22  ;;  %6953 = vmatprep.subr.bf16.mxu1 %v12455_v32  ;;  %v12531_v50 = vld [vmem:[%s16751_s8 + $0x248] ss:$16 sps:$4 sm:$0xff]   ;;  %v12536_v22 = vld [vmem:[%s16751_s8 + $0x1ec] ss:$16 sps:$4 sm:$0xff]  }
 0x4aa   :  { %v12539_v32 = vld [vmem:[%s16751_s8 + $0x22c] ss:$16 sps:$4 sm:$0xff]  }
 0x4ac   :  { %6915 = vmatpush2.bf16.msra.mxu0 %v12450_v53  ;;  %6954 = vmatpush2.bf16.msra.mxu1 %v12453_v51  ;;  %v12534_v53 = vld [vmem:[%s16751_s8 + $0x1e8] ss:$16 sps:$4 sm:$0xff]  }
 0x4ad   :  { %6916 = vmatprep.subr.bf16.mxu0 %v12458_v18  ;;  %6955 = vmatprep.subr.bf16.mxu1 %v12461_v43  ;;  %v12537_v51 = vld [vmem:[%s16751_s8 + $0x228] ss:$16 sps:$4 sm:$0xff]   ;;  %v12542_v18 = vld [vmem:[%s16751_s8 + $0x1cc] ss:$16 sps:$4 sm:$0xff]  }
 0x4ae   :  { %v12545_v43 = vld [vmem:[%s16751_s8 + $0x20c] ss:$16 sps:$4 sm:$0xff]  }
 0x4b0   :  { %6917 = vmatpush2.bf16.msra.mxu0 %v12456_v13  ;;  %6956 = vmatpush2.bf16.msra.mxu1 %v12459_v23  ;;  %v12540_v13 = vld [vmem:[%s16751_s8 + $0x1c8] ss:$16 sps:$4 sm:$0xff]  }
 0x4b1   :  { %6918 = vmatprep.subr.bf16.mxu0 %v12464_v47  ;;  %6957 = vmatprep.subr.bf16.mxu1 %v12467_v28  ;;  %v12543_v23 = vld [vmem:[%s16751_s8 + $0x208] ss:$16 sps:$4 sm:$0xff]   ;;  %v12548_v47 = vld [vmem:[%s16751_s8 + $0x1ac] ss:$16 sps:$4 sm:$0xff]  }
 0x4b2   :  { %v12551_v28 = vld [vmem:[%s16751_s8 + $0x3ec] ss:$16 sps:$4 sm:$0xff]  }
 0x4b4   :  { %6919 = vmatpush2.bf16.msra.mxu0 %v12462_v49  ;;  %6958 = vmatpush2.bf16.msra.mxu1 %v12465_v17  ;;  %v12546_v49 = vld [vmem:[%s16751_s8 + $0x1a8] ss:$16 sps:$4 sm:$0xff]  }
 0x4b5   :  { %6920 = vmatprep.subr.bf16.mxu0 %v12470_v42  ;;  %6959 = vmatprep.subr.bf16.mxu1 %v12473_v20  ;;  %v12549_v17 = vld [vmem:[%s16751_s8 + $0x3e8] ss:$16 sps:$4 sm:$0xff]   ;;  %v12554_v42 = vld [vmem:[%s16751_s8 + $0x18c] ss:$16 sps:$4 sm:$0xff]  }
 0x4b6   :  { %v12557_v20 = vld [vmem:[%s16751_s8 + $0x3cc] ss:$16 sps:$4 sm:$0xff]  }
 0x4b8   :  { %6921 = vmatpush2.bf16.msra.mxu0 %v12468_v40  ;;  %6960 = vmatpush2.bf16.msra.mxu1 %v12471_v63  ;;  %v12552_v40 = vld [vmem:[%s16751_s8 + $0x188] ss:$16 sps:$4 sm:$0xff]  }
 0x4b9   :  { %6922 = vmatprep.subr.bf16.mxu0 %v12476_v60  ;;  %6961 = vmatprep.subr.bf16.mxu1 %v12479_v25  ;;  %v12555_v63 = vld [vmem:[%s16751_s8 + $0x3c8] ss:$16 sps:$4 sm:$0xff]   ;;  %v12560_v60 = vld [vmem:[%s16751_s8 + $0x16c] ss:$16 sps:$4 sm:$0xff]  }
 0x4ba   :  { %v12563_v25 = vld [vmem:[%s16751_s8 + $0x3ac] ss:$16 sps:$4 sm:$0xff]  }
 0x4bc   :  { %6923 = vmatpush2.bf16.msra.mxu0 %v12474_v62  ;;  %6962 = vmatpush2.bf16.msra.mxu1 %v12477_v45  ;;  %v12558_v62 = vld [vmem:[%s16751_s8 + $0x168] ss:$16 sps:$4 sm:$0xff]  }
 0x4bd   :  { %6924 = vmatprep.subr.bf16.mxu0 %v12482_v41  ;;  %6963 = vmatprep.subr.bf16.mxu1 %v12485_v46  ;;  %v12561_v45 = vld [vmem:[%s16751_s8 + $0x3a8] ss:$16 sps:$4 sm:$0xff]   ;;  %v12566_v41 = vld [vmem:[%s16751_s8 + $0x14c] ss:$16 sps:$4 sm:$0xff]  }
 0x4be   :  { %v12569_v46 = vld [vmem:[%s16751_s8 + $0x38c] ss:$16 sps:$4 sm:$0xff]  }
 0x4c0   :  { %6925 = vmatpush2.bf16.msra.mxu0 %v12480_v10  ;;  %6964 = vmatpush2.bf16.msra.mxu1 %v12483_v21  ;;  %v12564_v10 = vld [vmem:[%s16751_s8 + $0x148] ss:$16 sps:$4 sm:$0xff]  }
 0x4c1   :  { %6965 = vmatprep.subr.bf16.mxu1 %v12488_v36  ;;  %6980 = vmatprep.subr.bf16.mxu0 %v12491_v44  ;;  %v12567_v21 = vld [vmem:[%s16751_s8 + $0x388] ss:$16 sps:$4 sm:$0xff]   ;;  %v12572_v36 = vld [vmem:[%s16751_s8 + $0x12c] ss:$16 sps:$4 sm:$0xff]  }
 0x4c2   :  { %v12575_v44 = vld [vmem:[%s16751_s8 + $0x36c] ss:$16 sps:$4 sm:$0xff]  }
 0x4c3   :  { %6927 = vmatmul.mubr.bf16.vlgmr.msra.gmra.mxu0 %v15373_v7 }
 0x4c4   :  { %6966 = vmatpush2.bf16.msra.mxu1 %v12486_v15  ;;  %6981 = vmatpush1.bf16.msra.mxu0 %v12489_v27  ;;  %v12570_v15 = vld [vmem:[%s16751_s8 + $0x128] ss:$16 sps:$4 sm:$0xff]  }
 0x4c5   :  { %7012 = vmatprep.mubr.bf16.mxu0 %v15305_v12  ;;  %6967 = vmatprep.subr.bf16.mxu1 %v12494_v30  ;;  %v12501_v12 = vld [vmem:[%s16751_s8 + $0x2e8] ss:$16 sps:$4 sm:$0xff]   ;;  %v12578_v30 = vld [vmem:[%s16751_s8 + $0x10c] ss:$16 sps:$4 sm:$0xff]  }
 0x4c6   :  { %6982 = vmatprep.subr.bf16.mxu0 %v12497_v31  ;;  %v12573_v27 = vld [vmem:[%s16751_s8 + $0x368] ss:$16 sps:$4 sm:$0xff]   ;;  %v12581_v31 = vld [vmem:[%s16751_s8 + $0x34c] ss:$16 sps:$4 sm:$0xff]  }
 0x4c8   :  { %6968 = vmatpush2.bf16.msra.mxu1 %v12492_v56  ;;  %6983 = vmatpush1.bf16.msra.mxu0 %v12495_v39  ;;  %v12576_v56 = vld [vmem:[%s16751_s8 + $0x108] ss:$16 sps:$4 sm:$0xff]  }
 0x4c9   :  { %6984 = vmatprep.subr.bf16.mxu0 %v12500_v61  ;;  %7023 = vmatprep.subr.bf16.mxu1 %v12503_v35  ;;  %v12579_v39 = vld [vmem:[%s16751_s8 + $0x348] ss:$16 sps:$4 sm:$0xff]   ;;  %v12584_v61 = vld [vmem:[%s16751_s8 + $0x32c] ss:$16 sps:$4 sm:$0xff]  }
 0x4ca   :  { %v12587_v35 = vld [vmem:[%s16751_s8 + $0x4ec] ss:$16 sps:$4 sm:$0xff]  }
 0x4cb   :  { %6970 = vmatmul.mubr.bf16.vlgmr.msra.gmra.mxu1 %v15404_v29 }
 0x4cc   :  { %6985 = vmatpush1.bf16.msra.mxu0 %v12498_v24  ;;  %7024 = vmatpush1.bf16.msra.mxu1 %v12501_v12  ;;  %v12582_v24 = vld [vmem:[%s16751_s8 + $0x328] ss:$16 sps:$4 sm:$0xff]  }
 0x4cd   :  { %7055 = vmatprep.mubr.bf16.mxu1 %v15336_v9  ;;  %6986 = vmatprep.subr.bf16.mxu0 %v12506_v3  ;;  %v12513_v9 = vld [vmem:[%s16751_s8 + $0x2a8] ss:$16 sps:$4 sm:$0xff]   ;;  %v12590_v3 = vld [vmem:[%s16751_s8 + $0x30c] ss:$16 sps:$4 sm:$0xff]  }
 0x4ce   :  { %7025 = vmatprep.subr.bf16.mxu1 %v12509_v57  ;;  %v12585_v12 = vld [vmem:[%s16751_s8 + $0x4e8] ss:$16 sps:$4 sm:$0xff]   ;;  %v12593_v57 = vld [vmem:[%s16751_s8 + $0x4cc] ss:$16 sps:$4 sm:$0xff]  }
 0x4d0   :  { %6987 = vmatpush1.bf16.msra.mxu0 %v12504_v11  ;;  %7026 = vmatpush1.bf16.msra.mxu1 %v12507_v52  ;;  %v12588_v11 = vld [vmem:[%s16751_s8 + $0x308] ss:$16 sps:$4 sm:$0xff]  }
 0x4d1   :  { %6988 = vmatprep.subr.bf16.mxu0 %v12512_v33  ;;  %7027 = vmatprep.subr.bf16.mxu1 %v12515_v8  ;;  %v12591_v52 = vld [vmem:[%s16751_s8 + $0x4c8] ss:$16 sps:$4 sm:$0xff]   ;;  %v12596_v33 = vld [vmem:[%s16751_s8 + $0x4ac] ss:$16 sps:$4 sm:$0xff]  }
 0x4d2   :  { %v12594_v8 = vld [vmem:[%s16751_s8 + $0x4a8] ss:$16 sps:$4 sm:$0xff]  }
 0x4d4   :  { %6989 = vmatpush1.bf16.msra.mxu0 %v12510_v37  ;;  %7028 = vmatpush1.bf16.msra.mxu1 %v12513_v9  ;;  %v12602_v37 = vld [vmem:[%s16751_s8 + $0x48c] ss:$16 sps:$4 sm:$0xff]  }
 0x4d5   :  { %6990 = vmatprep.subr.bf16.mxu0 %v12518_v2  ;;  %7029 = vmatprep.subr.bf16.mxu1 %v12521_v54  ;;  %v12605_v9 = vld [vmem:[%s16751_s8 + $0x6cc] ss:$16 sps:$4 sm:$0xff]   ;;  %v12600_v2 = vld [vmem:[%s16751_s8 + $0x488] ss:$16 sps:$4 sm:$0xff]  }
 0x4d6   :  { %v12603_v54 = vld [vmem:[%s16751_s8 + $0x6c8] ss:$16 sps:$4 sm:$0xff]  }
 0x4d8   :  { %6991 = vmatpush1.bf16.msra.mxu0 %v12516_v14  ;;  %7030 = vmatpush1.bf16.msra.mxu1 %v12519_v1  ;;  %v12608_v14 = vld [vmem:[%s16751_s8 + $0x46c] ss:$16 sps:$4 sm:$0xff]   ;;  %v12606_v1 = vld [vmem:[%s16751_s8 + $0x468] ss:$16 sps:$4 sm:$0xff]  }
 0x4d9   :  { %6992 = vmatprep.subr.bf16.mxu0 %v12524_v26  ;;  %7031 = vmatprep.subr.bf16.mxu1 %v12527_v55  ;;  %v12614_v26 = vld [vmem:[%s16751_s8 + $0x44c] ss:$16 sps:$4 sm:$0xff]  }
 0x4da   :  { %v12617_v55 = vld [vmem:[%s16751_s8 + $0x68c] ss:$16 sps:$4 sm:$0xff]  }
 0x4dc   :  { %6993 = vmatpush1.bf16.msra.mxu0 %v12522_v6  ;;  %7032 = vmatpush1.bf16.msra.mxu1 %v12525_v48  ;;  %v12612_v6 = vld [vmem:[%s16751_s8 + $0x448] ss:$16 sps:$4 sm:$0xff]  }
 0x4dd   :  { %6994 = vmatprep.subr.bf16.mxu0 %v12530_v16  ;;  %7033 = vmatprep.subr.bf16.mxu1 %v12533_v38  ;;  %v12615_v48 = vld [vmem:[%s16751_s8 + $0x688] ss:$16 sps:$4 sm:$0xff]   ;;  %v12620_v16 = vld [vmem:[%s16751_s8 + $0x42c] ss:$16 sps:$4 sm:$0xff]  }
 0x4de   :  { %v12623_v38 = vld [vmem:[%s16751_s8 + $0x66c] ss:$16 sps:$4 sm:$0xff]  }
 0x4e0   :  { %6995 = vmatpush1.bf16.msra.mxu0 %v12528_v19  ;;  %7034 = vmatpush1.bf16.msra.mxu1 %v12531_v50  ;;  %v12618_v19 = vld [vmem:[%s16751_s8 + $0x428] ss:$16 sps:$4 sm:$0xff]  }
 0x4e1   :  { %6996 = vmatprep.subr.bf16.mxu0 %v12536_v22  ;;  %7035 = vmatprep.subr.bf16.mxu1 %v12539_v32  ;;  %v12621_v50 = vld [vmem:[%s16751_s8 + $0x668] ss:$16 sps:$4 sm:$0xff]   ;;  %v12626_v22 = vld [vmem:[%s16751_s8 + $0x40c] ss:$16 sps:$4 sm:$0xff]  }
 0x4e2   :  { %v12629_v32 = vld [vmem:[%s16751_s8 + $0x64c] ss:$16 sps:$4 sm:$0xff]  }
 0x4e4   :  { %6997 = vmatpush2.bf16.msra.mxu0 %v12534_v53  ;;  %7036 = vmatpush1.bf16.msra.mxu1 %v12537_v51  ;;  %v12624_v53 = vld [vmem:[%s16751_s8 + $0x408] ss:$16 sps:$4 sm:$0xff]  }
 0x4e5   :  { %6998 = vmatprep.subr.bf16.mxu0 %v12542_v18  ;;  %7037 = vmatprep.subr.bf16.mxu1 %v12545_v43  ;;  %v12627_v51 = vld [vmem:[%s16751_s8 + $0x648] ss:$16 sps:$4 sm:$0xff]   ;;  %v12632_v18 = vld [vmem:[%s16751_s8 + $0x5ec] ss:$16 sps:$4 sm:$0xff]  }
 0x4e6   :  { %v12635_v43 = vld [vmem:[%s16751_s8 + $0x62c] ss:$16 sps:$4 sm:$0xff]  }
 0x4e8   :  { %6999 = vmatpush2.bf16.msra.mxu0 %v12540_v13  ;;  %7038 = vmatpush1.bf16.msra.mxu1 %v12543_v23  ;;  %v12630_v13 = vld [vmem:[%s16751_s8 + $0x5e8] ss:$16 sps:$4 sm:$0xff]  }
 0x4e9   :  { %7000 = vmatprep.subr.bf16.mxu0 %v12548_v47  ;;  %7039 = vmatprep.subr.bf16.mxu1 %v12551_v28  ;;  %v12633_v23 = vld [vmem:[%s16751_s8 + $0x628] ss:$16 sps:$4 sm:$0xff]   ;;  %v12638_v47 = vld [vmem:[%s16751_s8 + $0x5cc] ss:$16 sps:$4 sm:$0xff]  }
 0x4ea   :  { %v12641_v28 = vld [vmem:[%s16751_s8 + $0x60c] ss:$16 sps:$4 sm:$0xff]  }
 0x4ec   :  { %7001 = vmatpush2.bf16.msra.mxu0 %v12546_v49  ;;  %7040 = vmatpush2.bf16.msra.mxu1 %v12549_v17  ;;  %v12636_v49 = vld [vmem:[%s16751_s8 + $0x5c8] ss:$16 sps:$4 sm:$0xff]  }
 0x4ed   :  { %7002 = vmatprep.subr.bf16.mxu0 %v12554_v42  ;;  %7041 = vmatprep.subr.bf16.mxu1 %v12557_v20  ;;  %v12639_v17 = vld [vmem:[%s16751_s8 + $0x608] ss:$16 sps:$4 sm:$0xff]   ;;  %v12644_v42 = vld [vmem:[%s16751_s8 + $0x5ac] ss:$16 sps:$4 sm:$0xff]  }
 0x4ee   :  { %v12647_v20 = vld [vmem:[%s16751_s8 + $0x7ec] ss:$16 sps:$4 sm:$0xff]  }
 0x4f0   :  { %7003 = vmatpush2.bf16.msra.mxu0 %v12552_v40  ;;  %7042 = vmatpush2.bf16.msra.mxu1 %v12555_v63  ;;  %v12642_v40 = vld [vmem:[%s16751_s8 + $0x5a8] ss:$16 sps:$4 sm:$0xff]  }
 0x4f1   :  { %7004 = vmatprep.subr.bf16.mxu0 %v12560_v60  ;;  %7043 = vmatprep.subr.bf16.mxu1 %v12563_v25  ;;  %v12645_v63 = vld [vmem:[%s16751_s8 + $0x7e8] ss:$16 sps:$4 sm:$0xff]   ;;  %v12650_v60 = vld [vmem:[%s16751_s8 + $0x58c] ss:$16 sps:$4 sm:$0xff]  }
 0x4f2   :  { %v12653_v25 = vld [vmem:[%s16751_s8 + $0x7cc] ss:$16 sps:$4 sm:$0xff]  }
 0x4f4   :  { %7005 = vmatpush2.bf16.msra.mxu0 %v12558_v62  ;;  %7044 = vmatpush2.bf16.msra.mxu1 %v12561_v45  ;;  %v12648_v62 = vld [vmem:[%s16751_s8 + $0x588] ss:$16 sps:$4 sm:$0xff]  }
 0x4f5   :  { %7006 = vmatprep.subr.bf16.mxu0 %v12566_v41  ;;  %7045 = vmatprep.subr.bf16.mxu1 %v12569_v46  ;;  %v12651_v45 = vld [vmem:[%s16751_s8 + $0x7c8] ss:$16 sps:$4 sm:$0xff]   ;;  %v12656_v41 = vld [vmem:[%s16751_s8 + $0x56c] ss:$16 sps:$4 sm:$0xff]  }
 0x4f6   :  { %v12659_v46 = vld [vmem:[%s16751_s8 + $0x7ac] ss:$16 sps:$4 sm:$0xff]  }
 0x4f8   :  { %7007 = vmatpush2.bf16.msra.mxu0 %v12564_v10  ;;  %7046 = vmatpush2.bf16.msra.mxu1 %v12567_v21  ;;  %v12654_v10 = vld [vmem:[%s16751_s8 + $0x568] ss:$16 sps:$4 sm:$0xff]  }
 0x4f9   :  { %7008 = vmatprep.subr.bf16.mxu0 %v12572_v36  ;;  %7047 = vmatprep.subr.bf16.mxu1 %v12575_v44  ;;  %v12657_v21 = vld [vmem:[%s16751_s8 + $0x7a8] ss:$16 sps:$4 sm:$0xff]   ;;  %v12662_v36 = vld [vmem:[%s16751_s8 + $0x54c] ss:$16 sps:$4 sm:$0xff]  }
 0x4fa   :  { %v12665_v44 = vld [vmem:[%s16751_s8 + $0x78c] ss:$16 sps:$4 sm:$0xff]  }
 0x4fc   :  { %7009 = vmatpush2.bf16.msra.mxu0 %v12570_v15  ;;  %7048 = vmatpush2.bf16.msra.mxu1 %v12573_v27  ;;  %v12660_v15 = vld [vmem:[%s16751_s8 + $0x548] ss:$16 sps:$4 sm:$0xff]  }
 0x4fd   :  { %7010 = vmatprep.subr.bf16.mxu0 %v12578_v30  ;;  %7049 = vmatprep.subr.bf16.mxu1 %v12581_v31  ;;  %v12663_v27 = vld [vmem:[%s16751_s8 + $0x788] ss:$16 sps:$4 sm:$0xff]   ;;  %v12668_v30 = vld [vmem:[%s16751_s8 + $0x52c] ss:$16 sps:$4 sm:$0xff]  }
 0x4fe   :  { %v12671_v31 = vld [vmem:[%s16751_s8 + $0x76c] ss:$16 sps:$4 sm:$0xff]  }
 0x500   :  { %7011 = vmatpush2.bf16.msra.mxu0 %v12576_v56  ;;  %7050 = vmatpush2.bf16.msra.mxu1 %v12579_v39  ;;  %v12666_v56 = vld [vmem:[%s16751_s8 + $0x528] ss:$16 sps:$4 sm:$0xff]  }
 0x501   :  { %7051 = vmatprep.subr.bf16.mxu1 %v12584_v61  ;;  %7066 = vmatprep.subr.bf16.mxu0 %v12587_v35  ;;  %v12669_v39 = vld [vmem:[%s16751_s8 + $0x768] ss:$16 sps:$4 sm:$0xff]   ;;  %v12674_v61 = vld [vmem:[%s16751_s8 + $0x50c] ss:$16 sps:$4 sm:$0xff]  }
 0x502   :  { %v12677_v35 = vld [vmem:[%s16751_s8 + $0x74c] ss:$16 sps:$4 sm:$0xff]  }
 0x503   :  { %7013 = vmatmul.mubr.bf16.vlgmr.msra.gmra.mxu0 %v15310_v0  ;;  %v12599_v0 = vld [vmem:[%s16751_s8 + $0x6ec] ss:$16 sps:$4 sm:$0xff]  }
 0x504   :  { %7052 = vmatpush2.bf16.msra.mxu1 %v12582_v24  ;;  %7067 = vmatpush1.bf16.msra.mxu0 %v12585_v12  ;;  %v12672_v24 = vld [vmem:[%s16751_s8 + $0x508] ss:$16 sps:$4 sm:$0xff]  }
 0x505   :  { %7098 = vmatprep.mubr.bf16.mxu0 %v15380_v58  ;;  %7053 = vmatprep.subr.bf16.mxu1 %v12590_v3  ;;  %v12597_v58 = vld [vmem:[%s16751_s8 + $0x6e8] ss:$16 sps:$4 sm:$0xff]   ;;  %v12680_v3 = vld [vmem:[%s16751_s8 + $0x72c] ss:$16 sps:$4 sm:$0xff]  }
 0x506   :  { %7068 = vmatprep.subr.bf16.mxu0 %v12593_v57  ;;  %v12675_v12 = vld [vmem:[%s16751_s8 + $0x748] ss:$16 sps:$4 sm:$0xff]  }
 0x507   :  { %v12678_v57 = vld [vmem:[%s16751_s8 + $0x728] ss:$16 sps:$4 sm:$0xff]  }
 0x508   :  { %7054 = vmatpush2.bf16.msra.mxu1 %v12588_v11  ;;  %7069 = vmatpush1.bf16.msra.mxu0 %v12591_v52  ;;  %v12683_v11 = vld [vmem:[%s16751_s8 + $0x70c] ss:$16 sps:$4 sm:$0xff]   ;;  %v12681_v52 = vld [vmem:[%s16751_s8 + $0x708] ss:$16 sps:$4 sm:$0xff]  }
 0x509   :  { %7070 = vmatprep.subr.bf16.mxu0 %v12596_v33  ;;  %7109 = vmatprep.subr.bf16.mxu1 %v12599_v0  ;;  %v12684_v0 = vld [vmem:[%s16752_s9 + $0x10] ss:$0 sps:$4 sm:$0x33]  }
 0x50b   :  { %7056 = vmatmul.mubr.bf16.vlgmr.msra.gmra.mxu1 %v15344_v59  ;;  %v12611_v59 = vld [vmem:[%s16751_s8 + $0x6ac] ss:$16 sps:$4 sm:$0xff]  }
 0x50c   :  { %7071 = vmatpush1.bf16.msra.mxu0 %v12594_v8  ;;  %7110 = vmatpush1.bf16.msra.mxu1 %v12597_v58  ;;  %v12687_v8 = vld [vmem:[%s16744_s1] sm:$0xff]  }
 0x50d   :  { %7141 = vmatprep.mubr.bf16.mxu1 %v15412_v4  ;;  %7072 = vmatprep.subr.bf16.mxu0 %v12602_v37  ;;  %v12609_v4 = vld [vmem:[%s16751_s8 + $0x6a8] ss:$16 sps:$4 sm:$0xff]  }
 0x50e   :  { %7111 = vmatprep.subr.bf16.mxu1 %v12605_v9  ;;  %v12685_v37 = vld [vmem:[%s16752_s9 + $0x8] sm:$0xff]  }
 0x510   :  { %7073 = vmatpush1.bf16.msra.mxu0 %v12600_v2  ;;  %7112 = vmatpush1.bf16.msra.mxu1 %v12603_v54 }
 0x511   :  { %7074 = vmatprep.subr.bf16.mxu0 %v12608_v14  ;;  %7113 = vmatprep.subr.bf16.mxu1 %v12611_v59  ;;  %v12686_v59 = vld [vmem:[%s16752_s9] sm:$0xff]  }
 0x514   :  { %7075 = vmatpush1.bf16.msra.mxu0 %v12606_v1  ;;  %7114 = vmatpush1.bf16.msra.mxu1 %v12609_v4 }
 0x515   :  { %7076 = vmatprep.subr.bf16.mxu0 %v12614_v26  ;;  %7115 = vmatprep.subr.bf16.mxu1 %v12617_v55 }
 0x518   :  { %7077 = vmatpush1.bf16.msra.mxu0 %v12612_v6  ;;  %7116 = vmatpush1.bf16.msra.mxu1 %v12615_v48  ;;  %v12688_v48 = vld [vmem:[%s16744_s1 + $0x8] sm:$0xff]  }
 0x519   :  { %7078 = vmatprep.subr.bf16.mxu0 %v12620_v16  ;;  %7117 = vmatprep.subr.bf16.mxu1 %v12623_v38  ;;  %v12689_v16 = vld [vmem:[%s16744_s1 + $0x10] sm:$0xff]   ;;  %v12690_v38 = vld [vmem:[%s16744_s1 + $0x18] sm:$0xff]  }
 0x51c   :  { %7079 = vmatpush1.bf16.msra.mxu0 %v12618_v19  ;;  %7118 = vmatpush1.bf16.msra.mxu1 %v12621_v50  ;;  %v12691_v19 = vld [vmem:[%s16744_s1 + $0x20] sm:$0xff]   ;;  %v12692_v50 = vld [vmem:[%s16744_s1 + $0x28] sm:$0xff]  }
 0x51d   :  { %7080 = vmatprep.subr.bf16.mxu0 %v12626_v22  ;;  %7119 = vmatprep.subr.bf16.mxu1 %v12629_v32 }
 0x520   :  { %7081 = vmatpush1.bf16.msra.mxu0 %v12624_v53  ;;  %7120 = vmatpush1.bf16.msra.mxu1 %v12627_v51 }
 0x521   :  { %7082 = vmatprep.subr.bf16.mxu0 %v12632_v18  ;;  %7121 = vmatprep.subr.bf16.mxu1 %v12635_v43 }
 0x524   :  { %7083 = vmatpush2.bf16.msra.mxu0 %v12630_v13  ;;  %7122 = vmatpush1.bf16.msra.mxu1 %v12633_v23 }
 0x525   :  { %7084 = vmatprep.subr.bf16.mxu0 %v12638_v47  ;;  %7123 = vmatprep.subr.bf16.mxu1 %v12641_v28 }
 0x528   :  { %7085 = vmatpush2.bf16.msra.mxu0 %v12636_v49  ;;  %7124 = vmatpush1.bf16.msra.mxu1 %v12639_v17 }
 0x529   :  { %7086 = vmatprep.subr.bf16.mxu0 %v12644_v42  ;;  %7125 = vmatprep.subr.bf16.mxu1 %v12647_v20 }
 0x52c   :  { %7087 = vmatpush2.bf16.msra.mxu0 %v12642_v40  ;;  %7126 = vmatpush2.bf16.msra.mxu1 %v12645_v63 }
 0x52d   :  { %7088 = vmatprep.subr.bf16.mxu0 %v12650_v60  ;;  %7127 = vmatprep.subr.bf16.mxu1 %v12653_v25 }
 0x530   :  { %7089 = vmatpush2.bf16.msra.mxu0 %v12648_v62  ;;  %7128 = vmatpush2.bf16.msra.mxu1 %v12651_v45  ;;  %v12697_v62 = vld [vmem:[%s16754_s11 + $0x70] ss:$8 sps:$4 sm:$0xff]   ;;  %v12699_v45 = vld [vmem:[%s16754_s11 + $0x74] ss:$8 sps:$4 sm:$0xff]  }
 0x531   :  { %7090 = vmatprep.subr.bf16.mxu0 %v12656_v41  ;;  %7129 = vmatprep.subr.bf16.mxu1 %v12659_v46  ;;  %v12702_v41 = vld [vmem:[%s16754_s11 + $0x64] ss:$8 sps:$4 sm:$0xff]   ;;  %v12700_v46 = vld [vmem:[%s16754_s11 + $0x60] ss:$8 sps:$4 sm:$0xff]  }
 0x534   :  { %7091 = vmatpush2.bf16.msra.mxu0 %v12654_v10  ;;  %7130 = vmatpush2.bf16.msra.mxu1 %v12657_v21  ;;  %v12705_v10 = vld [vmem:[%s16754_s11 + $0x54] ss:$8 sps:$4 sm:$0xff]  }
 0x535   :  { %7092 = vmatprep.subr.bf16.mxu0 %v12662_v36  ;;  %7131 = vmatprep.subr.bf16.mxu1 %v12665_v44  ;;  %v12703_v36 = vld [vmem:[%s16754_s11 + $0x50] ss:$8 sps:$4 sm:$0xff]   ;;  %v12708_v44 = vld [vmem:[%s16754_s11 + $0x44] ss:$8 sps:$4 sm:$0xff]  }
 0x538   :  { %7093 = vmatpush2.bf16.msra.mxu0 %v12660_v15  ;;  %7132 = vmatpush2.bf16.msra.mxu1 %v12663_v27  ;;  %v12706_v27 = vld [vmem:[%s16754_s11 + $0x40] ss:$8 sps:$4 sm:$0xff]  }
 0x539   :  { %7094 = vmatprep.subr.bf16.mxu0 %v12668_v30  ;;  %7133 = vmatprep.subr.bf16.mxu1 %v12671_v31  ;;  %v12711_v30 = vld [vmem:[%s16754_s11 + $0x34] ss:$8 sps:$4 sm:$0xff]  }
 0x53c   :  { %7095 = vmatpush2.bf16.msra.mxu0 %v12666_v56  ;;  %7134 = vmatpush2.bf16.msra.mxu1 %v12669_v39 }
 0x53d   :  { %7096 = vmatprep.subr.bf16.mxu0 %v12674_v61  ;;  %7135 = vmatprep.subr.bf16.mxu1 %v12677_v35  ;;  %v12709_v35 = vld [vmem:[%s16754_s11 + $0x30] ss:$8 sps:$4 sm:$0xff]  }
 0x540   :  { %7097 = vmatpush2.bf16.msra.mxu0 %v12672_v24  ;;  %7136 = vmatpush2.bf16.msra.mxu1 %v12675_v12  ;;  %v12714_v12 = vld [vmem:[%s16754_s11 + $0x24] ss:$8 sps:$4 sm:$0xff]  }
 0x541   :  { %7137 = vmatprep.subr.bf16.mxu1 %v12680_v3  ;;  %7657 = vmatprep.subr.bf16.mxu0 %v12699_v45 }
 0x543   :  { %7099 = vmatmul.mubr.bf16.vlgmr.msra.gmra.mxu0 %v15373_v7  ;;  %v6842_v33 = vpop.f32.mrf.mxu0  ;;  %v7242_v7 = vsel %vm7240_vm11, %v12684_v0, 0 }
 0x544   :  { %7138 = vmatpush2.bf16.msra.mxu1 %v12678_v57  ;;  %7658 = vmatpush1.bf16.msra.mxu0 %v12697_v62 }
 0x545   :  { %7139 = vmatprep.subr.bf16.mxu1 %v12683_v11  ;;  %v6844_v58 = vpop.f32.mrf.mxu0  ;;  %7659 = vmatprep.subr.bf16.mxu0 %v12702_v41 }
 0x547   :  { %v6846_v54 = vpop.f32.mrf.mxu0 }
 0x548   :  { %7140 = vmatpush2.bf16.msra.mxu1 %v12681_v52  ;;  %7660 = vmatpush1.bf16.msra.mxu0 %v12700_v46 }
 0x549   :  { %11897 = vmatprep.subr.msk.bf16.mxu1 %vm7240_vm11, %v12684_v0  ;;  %v6848_v55 = vpop.f32.mrf.mxu0  ;;  %7661 = vmatprep.subr.bf16.mxu0 %v12705_v10 }
 0x54b   :  { %7142 = vmatmul.mubr.bf16.vlgmr.msra.gmra.mxu1 %v15404_v29  ;;  %v6885_v9 = vpop.f32.mrf.mxu1 }
 0x54c   :  { %v6886_v2 = vadd.f32 %v6885_v9, %v6842_v33  ;;  %11880 = vmatpush3.bf16.msra.mxu1 %v7242_v7  ;;  %11885 = vmatprep.mubr.msk.bf16.mxu1 %vm7221_vm12, %v12687_v8  ;;  %v12712_v33 = vld [vmem:[%s16754_s11 + $0x20] ss:$8 sps:$4 sm:$0xff]   ;;  %v12717_v8 = vld [vmem:[%s16754_s11 + $0x14] ss:$8 sps:$4 sm:$0xff]   ;;  %v12720_v7 = vld [vmem:[%s16754_s11 + $0x4] ss:$8 sps:$4 sm:$0xff]  }
 0x54d   :  { %v6887_v14 = vpop.f32.mrf.mxu1  ;;  %11881 = vmatprep.subr.bf16.mxu1 %v12685_v37  ;;  %7662 = vmatpush1.bf16.msra.mxu0 %v12703_v36  ;;  %v12723_v9 = vld [vmem:[%s16754_s11 + $0xb4] ss:$8 sps:$4 sm:$0xff]  }
 0x54e   :  { %v6888_v1 = vadd.f32 %v6887_v14, %v6844_v58  ;;  %7663 = vmatprep.subr.bf16.mxu0 %v12708_v44  ;;  %v12715_v58 = vld [vmem:[%s16754_s11 + $0x10] ss:$8 sps:$4 sm:$0xff]   ;;  %v12724_v14 = vld [vmem:[%s16754_s11 + $0xa0] ss:$8 sps:$4 sm:$0xff]  }
 0x54f   :  { %v6889_v4 = vpop.f32.mrf.mxu1 }
 0x550   :  { %v6890_v26 = vadd.f32 %v6889_v4, %v6846_v54  ;;  %11882 = vmatpush3.bf16.msra.mxu1 %v12685_v37  ;;  %v12718_v37 = vld [vmem:[%s16754_s11] ss:$8 sps:$4 sm:$0xff]   ;;  %v12726_v54 = vld [vmem:[%s16754_s11 + $0xa4] ss:$8 sps:$4 sm:$0xff]  }
 0x551   :  { %v6891_v6 = vpop.f32.mrf.mxu1  ;;  %11883 = vmatprep.subr.bf16.mxu1 %v12686_v59  ;;  %7664 = vmatpush1.bf16.msra.mxu0 %v12706_v27  ;;  %v12732_v4 = vld [vmem:[%s16754_s11 + $0x84] ss:$8 sps:$4 sm:$0xff]  }
 0x552   :  { %v6892_v29 = vadd.f32 %v6891_v6, %v6848_v55  ;;  %7665 = vmatprep.subr.bf16.mxu0 %v12711_v30 }
 0x554   :  { %11884 = vmatpush3.bf16.msra.mxu1 %v12686_v59  ;;  %v12729_v59 = vld [vmem:[%s16754_s11 + $0x94] ss:$8 sps:$4 sm:$0xff]  }
 0x555   :  { %7666 = vmatpush1.bf16.msra.mxu0 %v12709_v35 }
 0x556   :  { %7667 = vmatprep.subr.bf16.mxu0 %v12714_v12 }
 0x557   :  { %11886 = vmatmul.mubr.msk.bf16.vlgmr.msra.gmra.mxu1 %vm7221_vm12, %v12688_v48 }
 0x558   :  { %11889 = vmatprep.mubr.msk.bf16.mxu1 %vm7221_vm12, %v12689_v16 }
 0x559   :  { %7668 = vmatpush1.bf16.msra.mxu0 %v12712_v33 }
 0x55a   :  { %7669 = vmatprep.subr.bf16.mxu0 %v12717_v8 }
 0x55d   :  { %7670 = vmatpush1.bf16.msra.mxu0 %v12715_v58 }
 0x55e   :  { %7671 = vmatprep.subr.bf16.mxu0 %v12720_v7 }
 0x55f   :  { %11890 = vmatmul.mubr.msk.bf16.gmra.mxu1 %vm7221_vm12, %v12690_v38 }
 0x560   :  { %11893 = vmatprep.mubr.msk.bf16.mxu1 %vm7221_vm12, %v12691_v19 }
 0x561   :  { %7672 = vmatpush1.bf16.msra.mxu0 %v12718_v37 }
 0x562   :  { %7681 = vmatprep.subr.bf16.mxu0 %v12723_v9 }
 0x567   :  { %11894 = vmatmul.mubr.msk.bf16.gmra.mxu1 %vm7221_vm12, %v12692_v50 }
 0x583   :  { %v6928_v22 = vpop.f32.mrf.mxu0 }
 0x584   :  { %v6929_v32 = vadd.f32 %v6928_v22, %v6886_v2  ;;  %v12721_v2 = vld [vmem:[%s16754_s11 + $0xb0] ss:$8 sps:$4 sm:$0xff]  }
 0x585   :  { %v6930_v53 = vpop.f32.mrf.mxu0  ;;  %7682 = vmatpush2.bf16.msra.mxu0 %v12721_v2 }
 0x586   :  { %v6931_v51 = vadd.f32 %v6930_v53, %v6888_v1  ;;  %7683 = vmatprep.subr.bf16.mxu0 %v12726_v54  ;;  %v12727_v1 = vld [vmem:[%s16754_s11 + $0x90] ss:$8 sps:$4 sm:$0xff]  }
 0x587   :  { %v6932_v18 = vpop.f32.mrf.mxu0 }
 0x588   :  { %v6933_v43 = vadd.f32 %v6932_v18, %v6890_v26  ;;  %v12730_v26 = vld [vmem:[%s16754_s11 + $0x80] ss:$8 sps:$4 sm:$0xff]  }
 0x589   :  { %v6934_v13 = vpop.f32.mrf.mxu0  ;;  %7684 = vmatpush2.bf16.msra.mxu0 %v12724_v14 }
 0x58a   :  { %v6935_v23 = vadd.f32 %v6934_v13, %v6892_v29  ;;  %7685 = vmatprep.subr.bf16.mxu0 %v12729_v59 }
 0x58b   :  { %v6971_v47 = vpop.f32.mrf.mxu1 }
 0x58c   :  { %v15962_v28 = vadd.f32 %v6971_v47, %v6929_v32 }
 0x58d   :  { %v6973_v49 = vpop.f32.mrf.mxu1  ;;  %7686 = vmatpush2.bf16.msra.mxu0 %v12727_v1 }
 0x58e   :  { %v15964_v17 = vadd.f32 %v6973_v49, %v6931_v51  ;;  %7687 = vmatprep.subr.bf16.mxu0 %v12732_v4 }
 0x58f   :  { %v6975_v42 = vpop.f32.mrf.mxu1 }
 0x590   :  { %v15966_v20 = vadd.f32 %v6975_v42, %v6933_v43  ;;  %v16058_v42 = vld [vmem:[#allocation8] ss:$0 sm:$0xff] }
 0x591   :  { %v6977_v40 = vpop.f32.mrf.mxu1  ;;  %7688 = vmatpush2.bf16.msra.mxu0 %v12730_v26 }
 0x592   :  { %v9172_v63 = vpack.c.bf16 %v15966_v20, %v15962_v28  ;;  %v15970_v60 = vadd.f32 %v6977_v40, %v6935_v23  ;;  %v13171_v28 = vld [vmem:[#allocation11 + $0x160] ss:$8 sps:$4 sm:$0xff]   ;;  %v13176_v20 = vld [vmem:[#allocation11 + $0x154] ss:$8 sps:$4 sm:$0xff]  }
 0x594   :  { %v9173_v25 = vpack.c.bf16 %v15970_v60, %v15964_v17  ;;  %v13107_v17 = vld [vmem:[#allocation11 + $0x14] ss:$8 sps:$4 sm:$0xff]   ;;  %v13105_v60 = vld [vmem:[#allocation11 + $0x10] ss:$8 sps:$4 sm:$0xff]  }
 0x5c3   :  { %v7014_v21 = vpop.f32.mrf.mxu0 }
 0x5c5   :  { %v7016_v15 = vpop.f32.mrf.mxu0 }
 0x5c7   :  { %v7018_v39 = vpop.f32.mrf.mxu0 }
 0x5c9   :  { %v7020_v11 = vpop.f32.mrf.mxu0 }
 0x5cb   :  { %v7057_v31 = vpop.f32.mrf.mxu1 }
 0x5cc   :  { %v7058_v56 = vadd.f32 %v7057_v31, %v7014_v21 }
 0x5cd   :  { %v7059_v61 = vpop.f32.mrf.mxu1 }
 0x5ce   :  { %v7060_v24 = vadd.f32 %v7059_v61, %v7016_v15 }
 0x5cf   :  { %v7061_v3 = vpop.f32.mrf.mxu1 }
 0x5d0   :  { %v7062_v57 = vadd.f32 %v7061_v3, %v7018_v39 }
 0x5d1   :  { %v7063_v52 = vpop.f32.mrf.mxu1 }
 0x5d2   :  { %v7064_v0 = vadd.f32 %v7063_v52, %v7020_v11 }
 0x603   :  { %v7100_v55 = vpop.f32.mrf.mxu0 }
 0x604   :  { %v7101_v6 = vadd.f32 %v7100_v55, %v7058_v56 }
 0x605   :  { %v7102_v29 = vpop.f32.mrf.mxu0 }
 0x606   :  { %v7103_v48 = vadd.f32 %v7102_v29, %v7060_v24 }
 0x607   :  { %v7104_v16 = vpop.f32.mrf.mxu0 }
 0x608   :  { %v7105_v38 = vadd.f32 %v7104_v16, %v7062_v57 }
 0x609   :  { %v7106_v22 = vpop.f32.mrf.mxu0 }
 0x60a   :  { %v7107_v18 = vadd.f32 %v7106_v22, %v7064_v0 }
 0x60b   :  { %v7143_v19 = vpop.f32.mrf.mxu1 }
 0x60c   :  { %v16046_v50 = vadd.f32 %v7143_v19, %v7101_v6 }
 0x60d   :  { %v7145_v32 = vpop.f32.mrf.mxu1 }
 0x60e   :  { %v16048_v53 = vadd.f32 %v7145_v32, %v7103_v48 }
 0x60f   :  { %v7147_v51 = vpop.f32.mrf.mxu1 }
 0x610   :  { %v16050_v43 = vadd.f32 %v7147_v51, %v7105_v38 }
 0x611   :  { %v7149_v13 = vpop.f32.mrf.mxu1 }
 0x612   :  { %v9174_v23 = vpack.c.bf16 %v16050_v43, %v16046_v50  ;;  %v16054_v47 = vadd.f32 %v7149_v13, %v7107_v18 }
 0x614   :  { %v9175_v49 = vpack.c.bf16 %v16054_v47, %v16048_v53  ;;  %v13188_v53 = vld [vmem:[#allocation11 + $0x114] ss:$8 sps:$4 sm:$0xff]   ;;  %v13186_v47 = vld [vmem:[#allocation11 + $0x110] ss:$8 sps:$4 sm:$0xff]  }
 0x617   :  { %v11887_v40 = vpop.f32.mrf.mxu1 }
 0x618   :  { %v7287_v62 = vadd.f32 %v11887_v40, %v16058_v42 }
 0x619   :  { %v7278_v45 = vpop.f32.mrf.mxu1 }
 0x61a   :  { %vm7327_vm13 = vcmp.ge.f32.partialorder %v7287_v62, 0.0  ;;  %v7339_v41 = vmul.f32 0.2, %v7287_v62  ;;  %v7279_v46 = vadd.f32 %v16058_v42, %v7278_v45 }
 0x61b   :  { %v11888_v10 = vpop.f32.mrf.mxu1 }
 0x61c   :  { %v7351_v21 = vsel %vm7327_vm13, %v7287_v62, %v7339_v41  ;;  %vm7325_vm14 = vcmp.ge.f32.partialorder %v7279_v46, 0.0  ;;  %v7337_v36 = vmul.f32 0.2, %v7279_v46  ;;  %v7290_v44 = vadd.f32 %v11888_v10, %v16058_v42 }
 0x61d   :  { %v11405_v15 = vpack.c.bf16 %v7351_v21, %v7351_v21  ;;  %v7281_v27 = vpop.f32.mrf.mxu1 }
 0x61e   :  { %v7349_v30 = vsel %vm7325_vm14, %v7279_v46, %v7337_v36  ;;  %vm7328_vm15 = vcmp.ge.f32.partialorder %v7290_v44, 0.0  ;;  %v7340_v31 = vmul.f32 0.2, %v7290_v44  ;;  %v7282_v56 = vadd.f32 %v16058_v42, %v7281_v27 }
 0x61f   :  { %7412 = vst.msk [vmem:[#allocation3 + $0x10] sm:$0xf] %vm128_vm3, %v11405_v15  ;;  %v11403_v39 = vpack.c.bf16 %v7349_v30, %v7349_v30  ;;  %v11891_v61 = vpop.f32.mrf.mxu1 }
 0x620   :  { %v7352_v35 = vsel %vm7328_vm15, %v7290_v44, %v7340_v31  ;;  %vm7326_vm0 = vcmp.ge.f32.partialorder %v7282_v56, 0.0  ;;  %v7338_v24 = vmul.f32 0.2, %v7282_v56  ;;  %v7303_v12 = vadd.f32 %v11891_v61, %v16058_v42  ;;  %v12736_v31 = vld [vmem:[%s16756_s13 + $0xe0] ss:$16 sps:$4 sm:$0xff]  }
 0x621   :  { %7410 = vst.msk [vmem:[#allocation3 + $0x8] sm:$0xf] %vm128_vm3, %v11403_v39  ;;  %v11406_v3 = vpack.c.bf16 %v7352_v35, %v7352_v35  ;;  %v7294_v57 = vpop.f32.mrf.mxu1  ;;  %v12741_v39 = vld [vmem:[%s16756_s13 + $0xc4] ss:$16 sps:$4 sm:$0xff]  }
 0x622   :  { %v7350_v11 = vsel %vm7326_vm0, %v7282_v56, %v7338_v24  ;;  %vm7331_vm1 = vcmp.ge.f32.partialorder %v7303_v12, 0.0  ;;  %v7343_v52 = vmul.f32 0.2, %v7303_v12  ;;  %v7295_v33 = vadd.f32 %v16058_v42, %v7294_v57  ;;  %v12747_v35 = vld [vmem:[%s16756_s13 + $0x2e4] ss:$16 sps:$4 sm:$0xff]  }
 0x623   :  { %7413 = vst.msk [vmem:[#allocation3 + $0x14] sm:$0xf] %vm128_vm3, %v11406_v3  ;;  %v11404_v0 = vpack.c.bf16 %v7350_v11, %v7350_v11  ;;  %v11892_v8 = vpop.f32.mrf.mxu1  ;;  %v12739_v24 = vld [vmem:[%s16756_s13 + $0xc0] ss:$16 sps:$4 sm:$0xff]   ;;  %8957 = vmatprep.subr.bf16.mxu0 %v12747_v35  ;;  %v12750_v57 = vld [vmem:[%s16756_s13 + $0x84] ss:$16 sps:$4 sm:$0xff]  }
 0x624   :  { %v7355_v58 = vsel %vm7331_vm1, %v7303_v12, %v7343_v52  ;;  %vm7329_vm2 = vcmp.ge.f32.partialorder %v7295_v33, 0.0  ;;  %v7341_v7 = vmul.f32 0.2, %v7295_v33  ;;  %v7306_v37 = vadd.f32 %v11892_v8, %v16058_v42  ;;  %v12744_v12 = vld [vmem:[%s16756_s13 + $0xa4] ss:$16 sps:$4 sm:$0xff]  }
 0x625   :  { %7411 = vst.msk [vmem:[#allocation3 + $0xc] sm:$0xf] %vm128_vm3, %v11404_v0  ;;  %v11409_v9 = vpack.c.bf16 %v7355_v58, %v7355_v58  ;;  %v7297_v2 = vpop.f32.mrf.mxu1  ;;  %v12742_v3 = vld [vmem:[%s16756_s13 + $0xa0] ss:$16 sps:$4 sm:$0xff]   ;;  %v12762_v8 = vld [vmem:[%s16756_s13 + $0x44] ss:$16 sps:$4 sm:$0xff]  }
 0x626   :  { %v7353_v54 = vsel %vm7329_vm2, %v7295_v33, %v7341_v7  ;;  %vm7332_vm5 = vcmp.ge.f32.partialorder %v7306_v37, 0.0  ;;  %v7344_v14 = vmul.f32 0.2, %v7306_v37  ;;  %v7298_v59 = vadd.f32 %v16058_v42, %v7297_v2  ;;  %v12748_v52 = vld [vmem:[%s16756_s13 + $0x80] ss:$16 sps:$4 sm:$0xff]  }
 0x627   :  { %7416 = vst.msk [vmem:[#allocation3 + $0x20] sm:$0xf] %vm128_vm3, %v11409_v9  ;;  %v11407_v1 = vpack.c.bf16 %v7353_v54, %v7353_v54  ;;  %v11895_v4 = vpop.f32.mrf.mxu1  ;;  %v12756_v33 = vld [vmem:[%s16756_s13 + $0x64] ss:$16 sps:$4 sm:$0xff]   ;;  %v12754_v0 = vld [vmem:[%s16756_s13 + $0x60] ss:$16 sps:$4 sm:$0xff]  }
 0x628   :  { %v7356_v26 = vsel %vm7332_vm5, %v7306_v37, %v7344_v14  ;;  %vm7330_vm6 = vcmp.ge.f32.partialorder %v7298_v59, 0.0  ;;  %v7342_v55 = vmul.f32 0.2, %v7298_v59  ;;  %v7319_v6 = vadd.f32 %v11895_v4, %v16058_v42  ;;  %v12760_v58 = vld [vmem:[%s16756_s13 + $0x40] ss:$16 sps:$4 sm:$0xff]  }
 0x629   :  { %7414 = vst.msk [vmem:[#allocation3 + $0x18] sm:$0xf] %vm128_vm3, %v11407_v1  ;;  %v11410_v29 = vpack.c.bf16 %v7356_v26, %v7356_v26  ;;  %v7310_v48 = vpop.f32.mrf.mxu1  ;;  %v12768_v7 = vld [vmem:[%s16756_s13 + $0x24] ss:$16 sps:$4 sm:$0xff]   ;;  %v12766_v37 = vld [vmem:[%s16756_s13 + $0x20] ss:$16 sps:$4 sm:$0xff]  }
 0x62a   :  { %v7354_v16 = vsel %vm7330_vm6, %v7298_v59, %v7342_v55  ;;  %vm7335_vm7 = vcmp.ge.f32.partialorder %v7319_v6, 0.0  ;;  %v7347_v38 = vmul.f32 0.2, %v7319_v6  ;;  %v7311_v19 = vadd.f32 %v16058_v42, %v7310_v48  ;;  %v16076_v22 = vld [vmem:[#allocation3 + $0x10] sm:$0xff]   ;;  %v12774_v9 = vld [vmem:[%s16756_s13 + $0x4] ss:$16 sps:$4 sm:$0xff]  }
 0x62b   :  { %7417 = vst.msk [vmem:[#allocation3 + $0x24] sm:$0xf] %vm128_vm3, %v11410_v29  ;;  %v11408_v32 = vpack.c.bf16 %v7354_v16, %v7354_v16  ;;  %v11896_v51 = vpop.f32.mrf.mxu1  ;;  %10968 = vmatprep.mubr.msk.bf16.mxu0 %vm2230_vm4, %v16076_v22  ;;  %v12772_v2 = vld [vmem:[%s16756_s13] ss:$16 sps:$4 sm:$0xff]   ;;  %v12780_v54 = vld [vmem:[%s16756_s13 + $0x1e4] ss:$16 sps:$4 sm:$0xff]  }
 0x62c   :  { %v7359_v18 = vsel %vm7335_vm7, %v7319_v6, %v7347_v38  ;;  %vm7333_vm8 = vcmp.ge.f32.partialorder %v7311_v19, 0.0  ;;  %v7345_v13 = vmul.f32 0.2, %v7311_v19  ;;  %v7322_v40 = vadd.f32 %v11896_v51, %v16058_v42  ;;  %v12694_v62 = vld [vmem:[#allocation3 + $0x8] sm:$0xff]   ;;  %v12733_v16 = vld [vmem:[#allocation3] sm:$0xff]  }
 0x62d   :  { %7415 = vst.msk [vmem:[#allocation3 + $0x1c] sm:$0xf] %vm128_vm3, %v11408_v32  ;;  %v11413_v45 = vpack.c.bf16 %v7359_v18, %v7359_v18  ;;  %v7313_v41 = vpop.f32.mrf.mxu1  ;;  %7439 = vrot.lane.b32.xlu0 %v12694_v62, %s13359_s5  ;;  %v12778_v14 = vld [vmem:[%s16756_s13 + $0x1e0] ss:$16 sps:$4 sm:$0xff]   ;;  %v12786_v59 = vld [vmem:[%s16756_s13 + $0x1c4] ss:$16 sps:$4 sm:$0xff]  }
 0x62e   :  { %v7357_v46 = vsel %vm7333_vm8, %v7311_v19, %v7345_v13  ;;  %vm7336_vm9 = vcmp.ge.f32.partialorder %v7322_v40, 0.0  ;;  %v7348_v10 = vmul.f32 0.2, %v7322_v40  ;;  %v7314_v21 = vadd.f32 %v16058_v42, %v7313_v41  ;;  %v12738_v42 = vld [vmem:[%s16756_s13 + $0xe4] ss:$16 sps:$4 sm:$0xff]  }
 0x62f   :  { %7420 = vst.msk [vmem:[#allocation3 + $0x30] sm:$0xf] %vm128_vm3, %v11413_v45  ;;  %v11411_v36 = vpack.c.bf16 %v7357_v46, %v7357_v46  ;;  %8914 = vmatprep.subr.bf16.mxu1 %v12738_v42  ;;  %v12784_v1 = vld [vmem:[%s16756_s13 + $0x1c0] ss:$16 sps:$4 sm:$0xff]   ;;  %v12792_v4 = vld [vmem:[%s16756_s13 + $0x1a4] ss:$16 sps:$4 sm:$0xff]  }
 0x630   :  { %v7360_v44 = vsel %vm7336_vm9, %v7322_v40, %v7348_v10  ;;  %vm7334_vm10 = vcmp.ge.f32.partialorder %v7314_v21, 0.0  ;;  %v7346_v15 = vmul.f32 0.2, %v7314_v21  ;;  %8915 = vmatpush1.bf16.msra.mxu1 %v12736_v31  ;;  %v12790_v26 = vld [vmem:[%s16756_s13 + $0x1a0] ss:$16 sps:$4 sm:$0xff]  }
 0x631   :  { %7418 = vst.msk [vmem:[#allocation3 + $0x28] sm:$0xf] %vm128_vm3, %v11411_v36  ;;  %v11414_v27 = vpack.c.bf16 %v7360_v44, %v7360_v44  ;;  %8916 = vmatprep.subr.bf16.mxu1 %v12741_v39  ;;  %v12798_v55 = vld [vmem:[%s16756_s13 + $0x184] ss:$16 sps:$4 sm:$0xff]   ;;  %v12796_v6 = vld [vmem:[%s16756_s13 + $0x180] ss:$16 sps:$4 sm:$0xff]  }
 0x632   :  { %v7358_v30 = vsel %vm7334_vm10, %v7314_v21, %v7346_v15  ;;  %v12804_v29 = vld [vmem:[%s16756_s13 + $0x164] ss:$16 sps:$4 sm:$0xff]   ;;  %v12802_v48 = vld [vmem:[%s16756_s13 + $0x160] ss:$16 sps:$4 sm:$0xff]   ;;  %v12734_v18 = vld [vmem:[#allocation3 + $0x20] sm:$0xff]  }
 0x633   :  { %7421 = vst.msk [vmem:[#allocation3 + $0x34] sm:$0xf] %vm128_vm3, %v11414_v27  ;;  %v11412_v56 = vpack.c.bf16 %v7358_v30, %v7358_v30  ;;  %v12745_v38 = vld [vmem:[%s16756_s13 + $0x2e0] ss:$16 sps:$4 sm:$0xff]   ;;  %v12753_v32 = vld [vmem:[%s16756_s13 + $0x2c4] ss:$16 sps:$4 sm:$0xff]  }
 0x634   :  { %v12695_v61 = vld [vmem:[#allocation3 + $0x18] sm:$0xff]   ;;  %8917 = vmatpush1.bf16.msra.mxu1 %v12739_v24 }
 0x635   :  { %7419 = vst.msk [vmem:[#allocation3 + $0x2c] sm:$0xf] %vm128_vm3, %v11412_v56  ;;  %7461 = vrot.lane.b32.xlu1 %v12695_v61, %s13359_s5  ;;  %8918 = vmatprep.subr.bf16.mxu1 %v12744_v12  ;;  %v12751_v13 = vld [vmem:[%s16756_s13 + $0x2c0] ss:$16 sps:$4 sm:$0xff]   ;;  %v12759_v40 = vld [vmem:[%s16756_s13 + $0x2a4] ss:$16 sps:$4 sm:$0xff]  }
 0x636   :  { %v12757_v62 = vld [vmem:[%s16756_s13 + $0x2a0] ss:$16 sps:$4 sm:$0xff]   ;;  %v12765_v41 = vld [vmem:[%s16756_s13 + $0x284] ss:$16 sps:$4 sm:$0xff]  }
 0x637   :  { %v12763_v21 = vld [vmem:[%s16756_s13 + $0x280] ss:$16 sps:$4 sm:$0xff]   ;;  %v12771_v36 = vld [vmem:[%s16756_s13 + $0x264] ss:$16 sps:$4 sm:$0xff]  }
 0x638   :  { %8919 = vmatpush1.bf16.msra.mxu1 %v12742_v3  ;;  %v12769_v44 = vld [vmem:[%s16756_s13 + $0x260] ss:$16 sps:$4 sm:$0xff]   ;;  %v12777_v15 = vld [vmem:[%s16756_s13 + $0x244] ss:$16 sps:$4 sm:$0xff]  }
 0x639   :  { %8920 = vmatprep.subr.bf16.mxu1 %v12750_v57  ;;  %v12775_v30 = vld [vmem:[%s16756_s13 + $0x240] ss:$16 sps:$4 sm:$0xff]   ;;  %v12783_v31 = vld [vmem:[%s16756_s13 + $0x224] ss:$16 sps:$4 sm:$0xff]  }
 0x63a   :  { %v12735_v10 = vld [vmem:[#allocation3 + $0x30] sm:$0xff]   ;;  %v12781_v56 = vld [vmem:[%s16756_s13 + $0x220] ss:$16 sps:$4 sm:$0xff]   ;;  %v12789_v42 = vld [vmem:[%s16756_s13 + $0x204] ss:$16 sps:$4 sm:$0xff]  }
 0x63b   :  { %v12787_v39 = vld [vmem:[%s16756_s13 + $0x200] ss:$16 sps:$4 sm:$0xff]   ;;  %v12795_v61 = vld [vmem:[%s16756_s13 + $0x3e4] ss:$16 sps:$4 sm:$0xff]  }
 0x63c   :  { %v12696_v11 = vld [vmem:[#allocation3 + $0x28] sm:$0xff]   ;;  %8921 = vmatpush1.bf16.msra.mxu1 %v12748_v52 }
 0x63d   :  { %7483 = vrot.lane.b32.xlu0 %v12696_v11, %s13359_s5  ;;  %8922 = vmatprep.subr.bf16.mxu1 %v12756_v33  ;;  %v12793_v35 = vld [vmem:[%s16756_s13 + $0x3e0] ss:$16 sps:$4 sm:$0xff]   ;;  %v12801_v24 = vld [vmem:[%s16756_s13 + $0x3c4] ss:$16 sps:$4 sm:$0xff]  }
 0x63e   :  { %v12799_v12 = vld [vmem:[%s16756_s13 + $0x3c0] ss:$16 sps:$4 sm:$0xff]   ;;  %v12807_v3 = vld [vmem:[%s16756_s13 + $0x3a4] ss:$16 sps:$4 sm:$0xff]  }
 0x63f   :  { %v12805_v57 = vld [vmem:[%s16756_s13 + $0x3a0] ss:$16 sps:$4 sm:$0xff]   ;;  %v12810_v11 = vld [vmem:[%s16756_s13 + $0x144] ss:$16 sps:$4 sm:$0xff]  }
 0x640   :  { %8923 = vmatpush1.bf16.msra.mxu1 %v12754_v0  ;;  %v12813_v52 = vld [vmem:[%s16756_s13 + $0x384] ss:$16 sps:$4 sm:$0xff]   ;;  %v12808_v33 = vld [vmem:[%s16756_s13 + $0x140] ss:$16 sps:$4 sm:$0xff]  }
 0x641   :  { %8924 = vmatprep.subr.bf16.mxu1 %v12762_v8  ;;  %v12811_v0 = vld [vmem:[%s16756_s13 + $0x380] ss:$16 sps:$4 sm:$0xff]   ;;  %v12816_v8 = vld [vmem:[%s16756_s13 + $0x124] ss:$16 sps:$4 sm:$0xff]  }
 0x644   :  { %8925 = vmatpush1.bf16.msra.mxu1 %v12760_v58  ;;  %v12819_v58 = vld [vmem:[%s16756_s13 + $0x364] ss:$16 sps:$4 sm:$0xff]  }
 0x645   :  { %8926 = vmatprep.subr.bf16.mxu1 %v12768_v7  ;;  %v12814_v7 = vld [vmem:[%s16756_s13 + $0x120] ss:$16 sps:$4 sm:$0xff]  }
 0x648   :  { %8927 = vmatpush1.bf16.msra.mxu1 %v12766_v37  ;;  %v12817_v37 = vld [vmem:[%s16756_s13 + $0x360] ss:$16 sps:$4 sm:$0xff]  }
 0x649   :  { %8928 = vmatprep.subr.bf16.mxu1 %v12774_v9  ;;  %v12822_v9 = vld [vmem:[%s16756_s13 + $0x104] ss:$16 sps:$4 sm:$0xff]  }
 0x64c   :  { %8929 = vmatpush1.bf16.msra.mxu1 %v12772_v2  ;;  %v12825_v2 = vld [vmem:[%s16756_s13 + $0x344] ss:$16 sps:$4 sm:$0xff]  }
 0x64d   :  { %8930 = vmatprep.subr.bf16.mxu1 %v12780_v54  ;;  %v12820_v54 = vld [vmem:[%s16756_s13 + $0x100] ss:$16 sps:$4 sm:$0xff]  }
 0x650   :  { %8931 = vmatpush2.bf16.msra.mxu1 %v12778_v14  ;;  %v12823_v14 = vld [vmem:[%s16756_s13 + $0x340] ss:$16 sps:$4 sm:$0xff]  }
 0x651   :  { %8932 = vmatprep.subr.bf16.mxu1 %v12786_v59  ;;  %v12828_v59 = vld [vmem:[%s16756_s13 + $0x324] ss:$16 sps:$4 sm:$0xff]  }
 0x654   :  { %8933 = vmatpush2.bf16.msra.mxu1 %v12784_v1  ;;  %v12831_v1 = vld [vmem:[%s16756_s13 + $0x4e4] ss:$16 sps:$4 sm:$0xff]  }
 0x655   :  { %8934 = vmatprep.subr.bf16.mxu1 %v12792_v4  ;;  %v12826_v4 = vld [vmem:[%s16756_s13 + $0x320] ss:$16 sps:$4 sm:$0xff]  }
 0x658   :  { %8935 = vmatpush2.bf16.msra.mxu1 %v12790_v26  ;;  %v12834_v26 = vld [vmem:[%s16756_s13 + $0x304] ss:$16 sps:$4 sm:$0xff]  }
 0x659   :  { %8936 = vmatprep.subr.bf16.mxu1 %v12798_v55  ;;  %v12832_v55 = vld [vmem:[%s16756_s13 + $0x300] ss:$16 sps:$4 sm:$0xff]  }
 0x65c   :  { %8937 = vmatpush2.bf16.msra.mxu1 %v12796_v6  ;;  %v12843_v6 = vld [vmem:[%s16756_s13 + $0xec] ss:$16 sps:$4 sm:$0xff]  }
 0x65d   :  { %8938 = vmatprep.subr.bf16.mxu1 %v12804_v29  ;;  %v7518_v29 = vld [vmem:[#allocation9] sm:$0x3] }
 0x660   :  { %8939 = vmatpush2.bf16.msra.mxu1 %v12802_v48  ;;  %v16296_v48 = vrot.slane %v7518_v29, %v15257_v34 }
 0x661   :  { %8940 = vmatprep.subr.bf16.mxu1 %v12810_v11 }
 0x664   :  { %8941 = vmatpush2.bf16.msra.mxu1 %v12808_v33 }
 0x665   :  { %8942 = vmatprep.subr.bf16.mxu1 %v12816_v8 }
 0x668   :  { %8943 = vmatpush2.bf16.msra.mxu1 %v12814_v7 }
 0x669   :  { %8944 = vmatprep.subr.bf16.mxu1 %v12822_v9 }
 0x66c   :  { %8945 = vmatpush2.bf16.msra.mxu1 %v12820_v54 }
 0x66d   :  { %9000 = vmatprep.subr.bf16.mxu1 %v12831_v1 }
 0x69f   :  { %v7440_v19 = vpop.permute.xlu0 %7439 }
 0x6a0   :  { %v7448_v51 = vsel %vm2230_vm4, %v12733_v16, %v7440_v19  ;;  %v16299_v16 = vrot.slane %v7518_v29, %v15211_v5 }
 0x6a1   :  { %7690 = vmatmul.mubr.bf16.vlgmr.msra.gmra.mxu0 %v7448_v51 }
 0x6a2   :  { %10969 = vmatprep.mubr.msk.bf16.mxu0 %vm2230_vm4, %v12734_v18  ;;  %8958 = vmatpush1.bf16.msra.mxu0 %v12745_v38 }
 0x6a3   :  { %8959 = vmatprep.subr.bf16.mxu0 %v12753_v32 }
 0x6a6   :  { %8960 = vmatpush1.bf16.msra.mxu0 %v12751_v13 }
 0x6a7   :  { %v7462_v45 = vpop.permute.xlu1 %7461  ;;  %8961 = vmatprep.subr.bf16.mxu0 %v12759_v40 }
 0x6a8   :  { %v7470_v46 = vsel %vm2230_vm4, %v16076_v22, %v7462_v45 }
 0x6a9   :  { %7700 = vmatmul.mubr.bf16.gmra.mxu0 %v7470_v46 }
 0x6aa   :  { %10970 = vmatprep.mubr.msk.bf16.mxu0 %vm2230_vm4, %v12735_v10  ;;  %8962 = vmatpush1.bf16.msra.mxu0 %v12757_v62 }
 0x6ab   :  { %8963 = vmatprep.subr.bf16.mxu0 %v12765_v41 }
 0x6ae   :  { %8964 = vmatpush1.bf16.msra.mxu0 %v12763_v21 }
 0x6af   :  { %v7484_v22 = vpop.permute.xlu0 %7483  ;;  %8965 = vmatprep.subr.bf16.mxu0 %v12771_v36 }
 0x6b0   :  { %v7492_v27 = vsel %vm2230_vm4, %v12734_v18, %v7484_v22 }
 0x6b1   :  { %7710 = vmatmul.mubr.bf16.gmra.mxu0 %v7492_v27 }
 0x6b2   :  { %8966 = vmatpush1.bf16.msra.mxu0 %v12769_v44 }
 0x6b3   :  { %8967 = vmatprep.subr.bf16.mxu0 %v12777_v15 }
 0x6b6   :  { %8968 = vmatpush1.bf16.msra.mxu0 %v12775_v30 }
 0x6b7   :  { %8969 = vmatprep.subr.bf16.mxu0 %v12783_v31 }
 0x6ba   :  { %8970 = vmatpush1.bf16.msra.mxu0 %v12781_v56 }
 0x6bb   :  { %8971 = vmatprep.subr.bf16.mxu0 %v12789_v42 }
 0x6be   :  { %8972 = vmatpush1.bf16.msra.mxu0 %v12787_v39  ;;  %v12829_v39 = vld [vmem:[%s16756_s13 + $0x4e0] ss:$16 sps:$4 sm:$0xff]  }
 0x6bf   :  { %8973 = vmatprep.subr.bf16.mxu0 %v12795_v61 }
 0x6c2   :  { %8974 = vmatpush2.bf16.msra.mxu0 %v12793_v35 }
 0x6c3   :  { %8975 = vmatprep.subr.bf16.mxu0 %v12801_v24  ;;  %v12837_v24 = vld [vmem:[%s16756_s13 + $0x4c4] ss:$16 sps:$4 sm:$0xff]  }
 0x6c6   :  { %8976 = vmatpush2.bf16.msra.mxu0 %v12799_v12 }
 0x6c7   :  { %8977 = vmatprep.subr.bf16.mxu0 %v12807_v3 }
 0x6ca   :  { %8978 = vmatpush2.bf16.msra.mxu0 %v12805_v57 }
 0x6cb   :  { %8979 = vmatprep.subr.bf16.mxu0 %v12813_v52 }
 0x6ce   :  { %8980 = vmatpush2.bf16.msra.mxu0 %v12811_v0  ;;  %v12835_v0 = vld [vmem:[%s16756_s13 + $0x4c0] ss:$16 sps:$4 sm:$0xff]  }
 0x6cf   :  { %8981 = vmatprep.subr.bf16.mxu0 %v12819_v58  ;;  %v12840_v58 = vld [vmem:[%s16756_s13 + $0x4a4] ss:$16 sps:$4 sm:$0xff]  }
 0x6d2   :  { %8982 = vmatpush2.bf16.msra.mxu0 %v12817_v37 }
 0x6d3   :  { %8983 = vmatprep.subr.bf16.mxu0 %v12825_v2 }
 0x6d6   :  { %8984 = vmatpush2.bf16.msra.mxu0 %v12823_v14 }
 0x6d7   :  { %8985 = vmatprep.subr.bf16.mxu0 %v12828_v59 }
 0x6da   :  { %8986 = vmatpush2.bf16.msra.mxu0 %v12826_v4  ;;  %v12838_v4 = vld [vmem:[%s16756_s13 + $0x4a0] ss:$16 sps:$4 sm:$0xff]  }
 0x6db   :  { %8987 = vmatprep.subr.bf16.mxu0 %v12834_v26  ;;  %v12841_v26 = vld [vmem:[%s16756_s13 + $0xe8] ss:$16 sps:$4 sm:$0xff]  }
 0x6de   :  { %8988 = vmatpush2.bf16.msra.mxu0 %v12832_v55 }
 0x6df   :  { %9043 = vmatprep.subr.bf16.mxu0 %v12843_v6  ;;  %v12846_v6 = vld [vmem:[%s16756_s13 + $0x484] ss:$16 sps:$4 sm:$0xff]  }
 0x761   :  { %v7691_v38 = vpop.f32.mrf.mxu0 }
 0x762   :  { %v7692_v51 = vadd.f32 %v7691_v38, %v16299_v16  ;;  %v12849_v38 = vld [vmem:[%s16756_s13 + $0xcc] ss:$16 sps:$4 sm:$0xff]  }
 0x763   :  { %v7693_v19 = vpop.f32.mrf.mxu0 }
 0x764   :  { %v7694_v32 = vadd.f32 %v7693_v19, %v16296_v48  ;;  %v7732_v46 = vmul.f32 0.2, %v7692_v51  ;;  %vm7720_vm11 = vcmp.ge.f32.partialorder %v7692_v51, 0.0 }
 0x765   :  { %v7695_v18 = vpop.f32.mrf.mxu0 }
 0x766   :  { %v7696_v13 = vadd.f32 %v7695_v18, %v16299_v16  ;;  %v7733_v62 = vmul.f32 0.2, %v7694_v32  ;;  %vm7721_vm4 = vcmp.ge.f32.partialorder %v7694_v32, 0.0  ;;  %v7744_v30 = vsel %vm7720_vm11, %v7692_v51, %v7732_v46  ;;  %v12844_v51 = vld [vmem:[%s16756_s13 + $0x480] ss:$16 sps:$4 sm:$0xff]  }
 0x767   :  { %v7697_v40 = vpop.f32.mrf.mxu0  ;;  %v12847_v18 = vld [vmem:[%s16756_s13 + $0xc8] ss:$16 sps:$4 sm:$0xff]  }
 0x768   :  { %vm7722_vm3 = vcmp.ge.f32.partialorder %v7696_v13, 0.0  ;;  %v7734_v45 = vmul.f32 0.2, %v7696_v13  ;;  %v7698_v41 = vadd.f32 %v7697_v40, %v16296_v48  ;;  %v7745_v15 = vsel %vm7721_vm4, %v7694_v32, %v7733_v62 }
 0x769   :  { %v7701_v10 = vpop.f32.mrf.mxu0 }
 0x76a   :  { %vm7723_vm12 = vcmp.ge.f32.partialorder %v7698_v41, 0.0  ;;  %v7735_v21 = vmul.f32 0.2, %v7698_v41  ;;  %v7746_v36 = vsel %vm7722_vm3, %v7696_v13, %v7734_v45  ;;  %v7702_v31 = vadd.f32 %v7701_v10, %v16299_v16  ;;  %v12852_v13 = vld [vmem:[%s16756_s13 + $0x464] ss:$16 sps:$4 sm:$0xff]  }
 0x76b   :  { %v7703_v44 = vpop.f32.mrf.mxu0  ;;  %v16310_v61 = vpack.c.bf16 %v7746_v36, %v7744_v30  ;;  %v12853_v10 = vld [vmem:[%s16756_s13 + $0xa8] ss:$16 sps:$4 sm:$0xff]   ;;  %v12861_v36 = vld [vmem:[%s16756_s13 + $0x8c] ss:$16 sps:$4 sm:$0xff]   ;;  %v12862_v30 = vld [vmem:[%s16756_s13 + $0x420] ss:$16 sps:$4 sm:$0xff]  }
 0x76c   :  { %v7704_v22 = vadd.f32 %v7703_v44, %v16296_v48  ;;  %v7747_v27 = vsel %vm7723_vm12, %v7698_v41, %v7735_v21  ;;  %v7736_v52 = vmul.f32 0.2, %v7702_v31  ;;  %vm7724_vm15 = vcmp.ge.f32.partialorder %v7702_v31, 0.0  ;;  %v12850_v41 = vld [vmem:[%s16756_s13 + $0x460] ss:$16 sps:$4 sm:$0xff]  }
 0x76d   :  { %v7705_v56 = vpop.f32.mrf.mxu0  ;;  %v7757_v42 = vpack.c.bf16 %v7747_v27, %v7745_v15  ;;  %v12858_v21 = vld [vmem:[%s16756_s13 + $0x444] ss:$16 sps:$4 sm:$0xff]   ;;  %v12856_v44 = vld [vmem:[%s16756_s13 + $0x440] ss:$16 sps:$4 sm:$0xff]   ;;  %v12867_v27 = vld [vmem:[%s16756_s13 + $0x6c] ss:$16 sps:$4 sm:$0xff]  }
 0x76e   :  { %v7706_v35 = vadd.f32 %v7705_v56, %v16299_v16  ;;  %v7737_v3 = vmul.f32 0.2, %v7704_v22  ;;  %vm7725_vm14 = vcmp.ge.f32.partialorder %v7704_v22, 0.0  ;;  %v7748_v14 = vsel %vm7724_vm15, %v7702_v31, %v7736_v52  ;;  %v12864_v15 = vld [vmem:[%s16756_s13 + $0x424] ss:$16 sps:$4 sm:$0xff]  }
 0x76f   :  { %v7707_v12 = vpop.f32.mrf.mxu0  ;;  %8946 = vmatprep.mubr.bf16.mxu1 %v7757_v42  ;;  %v12865_v31 = vld [vmem:[%s16756_s13 + $0x68] ss:$16 sps:$4 sm:$0xff]   ;;  %v12870_v56 = vld [vmem:[%s16756_s13 + $0x404] ss:$16 sps:$4 sm:$0xff]   ;;  %v12885_v52 = vld [vmem:[%s16756_s13 + $0xc] ss:$16 sps:$4 sm:$0xff]  }
 0x770   :  { %vm7726_vm13 = vcmp.ge.f32.partialorder %v7706_v35, 0.0  ;;  %v7738_v57 = vmul.f32 0.2, %v7706_v35  ;;  %v7708_v11 = vadd.f32 %v7707_v12, %v16296_v48  ;;  %8947 = vmatmul.mubr.bf16.vlgmr.msra.gmra.mxu1 %v16310_v61  ;;  %v7749_v2 = vsel %vm7725_vm14, %v7704_v22, %v7737_v3  ;;  %v12859_v22 = vld [vmem:[%s16756_s13 + $0x88] ss:$16 sps:$4 sm:$0xff]  }
 0x771   :  { %9001 = vmatpush1.bf16.msra.mxu1 %v12829_v39  ;;  %v16318_v33 = vpop.f32.mrf.mxu0  ;;  %v12868_v39 = vld [vmem:[%s16756_s13 + $0x400] ss:$16 sps:$4 sm:$0xff]   ;;  %v12879_v12 = vld [vmem:[%s16756_s13 + $0x2c] ss:$16 sps:$4 sm:$0xff]  }
 0x772   :  { %vm7727_vm0 = vcmp.ge.f32.partialorder %v7708_v11, 0.0  ;;  %v7739_v8 = vmul.f32 0.2, %v7708_v11  ;;  %9002 = vmatprep.subr.bf16.mxu1 %v12837_v24  ;;  %v7750_v7 = vsel %vm7726_vm13, %v7706_v35, %v7738_v57  ;;  %v12871_v35 = vld [vmem:[%s16756_s13 + $0x48] ss:$16 sps:$4 sm:$0xff]  }
 0x773   :  { %v7713_v37 = vpop.f32.mrf.mxu0  ;;  %v16337_v55 = vpack.c.bf16 %v7750_v7, %v7748_v14  ;;  %v12876_v24 = vld [vmem:[%s16756_s13 + $0x5e4] ss:$16 sps:$4 sm:$0xff]   ;;  %v12874_v3 = vld [vmem:[%s16756_s13 + $0x5e0] ss:$16 sps:$4 sm:$0xff]   ;;  %v12877_v57 = vld [vmem:[%s16756_s13 + $0x28] ss:$16 sps:$4 sm:$0xff]  }
 0x774   :  { %v7714_v9 = vadd.f32 %v7713_v37, %v16296_v48  ;;  %v7751_v54 = vsel %vm7727_vm0, %v7708_v11, %v7739_v8  ;;  %v12882_v11 = vld [vmem:[%s16756_s13 + $0x5c4] ss:$16 sps:$4 sm:$0xff]   ;;  %v12883_v8 = vld [vmem:[%s16756_s13 + $0x8] ss:$16 sps:$4 sm:$0xff]   ;;  %v12891_v7 = vld [vmem:[%s16756_s13 + $0x1ec] ss:$16 sps:$4 sm:$0xff]  }
 0x775   :  { %9003 = vmatpush1.bf16.msra.mxu1 %v12835_v0  ;;  %v16327_v59 = vpop.f32.mrf.mxu0  ;;  %v16329_v1 = vpack.c.bf16 %v7751_v54, %v7749_v2  ;;  %v12880_v0 = vld [vmem:[%s16756_s13 + $0x5c0] ss:$16 sps:$4 sm:$0xff]   ;;  %v12894_v2 = vld [vmem:[%s16756_s13 + $0x584] ss:$16 sps:$4 sm:$0xff]   ;;  %v12897_v54 = vld [vmem:[%s16756_s13 + $0x1cc] ss:$16 sps:$4 sm:$0xff]  }
 0x776   :  { %9004 = vmatprep.subr.bf16.mxu1 %v12840_v58  ;;  %v7741_v19 = vmul.f32 0.2, %v7714_v9  ;;  %vm7729_vm1 = vcmp.ge.f32.partialorder %v7714_v9, 0.0  ;;  %v12888_v58 = vld [vmem:[%s16756_s13 + $0x5a4] ss:$16 sps:$4 sm:$0xff]  }
 0x777   :  { %v7717_v29 = vpop.f32.mrf.mxu0  ;;  %8989 = vmatprep.mubr.bf16.mxu0 %v16329_v1  ;;  %v12886_v37 = vld [vmem:[%s16756_s13 + $0x5a0] ss:$16 sps:$4 sm:$0xff]  }
 0x778   :  { %v7718_v32 = vadd.f32 %v7717_v29, %v16296_v48  ;;  %8990 = vmatmul.mubr.bf16.vlgmr.msra.gmra.mxu0 %v16337_v55  ;;  %v12855_v48 = vld [vmem:[%s16756_s13 + $0xac] ss:$16 sps:$4 sm:$0xff]   ;;  %v7753_v62 = vsel %vm7729_vm1, %v7714_v9, %v7741_v19  ;;  %v12889_v9 = vld [vmem:[%s16756_s13 + $0x1e8] ss:$16 sps:$4 sm:$0xff]   ;;  %v12892_v14 = vld [vmem:[%s16756_s13 + $0x580] ss:$16 sps:$4 sm:$0xff]  }
 0x779   :  { %9005 = vmatpush1.bf16.msra.mxu1 %v12838_v4  ;;  %9044 = vmatpush1.bf16.msra.mxu0 %v12841_v26  ;;  %v12895_v4 = vld [vmem:[%s16756_s13 + $0x1c8] ss:$16 sps:$4 sm:$0xff]   ;;  %v12900_v26 = vld [vmem:[%s16756_s13 + $0x564] ss:$16 sps:$4 sm:$0xff]   ;;  %v12898_v29 = vld [vmem:[%s16756_s13 + $0x560] ss:$16 sps:$4 sm:$0xff]  }
 0x77a   :  { %vm7731_vm2 = vcmp.ge.f32.partialorder %v7718_v32, 0.0  ;;  %v7743_v40 = vmul.f32 0.2, %v7718_v32  ;;  %9075 = vmatprep.mubr.bf16.mxu0 %v7757_v42  ;;  %9006 = vmatprep.subr.bf16.mxu1 %v12846_v6  ;;  %v12873_v42 = vld [vmem:[%s16756_s13 + $0x4c] ss:$16 sps:$4 sm:$0xff]  }
 0x77b   :  { %9045 = vmatprep.subr.bf16.mxu0 %v12849_v38  ;;  %v12903_v6 = vld [vmem:[%s16756_s13 + $0x1ac] ss:$16 sps:$4 sm:$0xff]   ;;  %v12901_v38 = vld [vmem:[%s16756_s13 + $0x1a8] ss:$16 sps:$4 sm:$0xff]   ;;  %v12906_v19 = vld [vmem:[%s16756_s13 + $0x544] ss:$16 sps:$4 sm:$0xff]  }
 0x77c   :  { %v7755_v45 = vsel %vm7731_vm2, %v7718_v32, %v7743_v40  ;;  %v12909_v32 = vld [vmem:[%s16756_s13 + $0x18c] ss:$16 sps:$4 sm:$0xff]  }
 0x77d   :  { %9007 = vmatpush1.bf16.msra.mxu1 %v12844_v51  ;;  %9046 = vmatpush1.bf16.msra.mxu0 %v12847_v18  ;;  %v16363_v46 = vpack.c.bf16 %v7755_v45, %v7753_v62  ;;  %v12904_v51 = vld [vmem:[%s16756_s13 + $0x540] ss:$16 sps:$4 sm:$0xff]   ;;  %v12907_v18 = vld [vmem:[%s16756_s13 + $0x188] ss:$16 sps:$4 sm:$0xff]   ;;  %v12915_v40 = vld [vmem:[%s16756_s13 + $0x16c] ss:$16 sps:$4 sm:$0xff]   ;;  %v7712_v62 = vadd.f32 %v16318_v33, %v16299_v16 }
 0x77e   :  { %9008 = vmatprep.subr.bf16.mxu1 %v12852_v13  ;;  %9047 = vmatprep.subr.bf16.mxu0 %v12855_v48  ;;  %v12912_v13 = vld [vmem:[%s16756_s13 + $0x524] ss:$16 sps:$4 sm:$0xff]   ;;  %v7716_v48 = vadd.f32 %v16327_v59, %v16299_v16  ;;  %v12910_v45 = vld [vmem:[%s16756_s13 + $0x520] ss:$16 sps:$4 sm:$0xff]   ;;  %v12921_v16 = vld [vmem:[%s16756_s13 + $0x14c] ss:$16 sps:$4 sm:$0xff]  }
 0x77f   :  { %9032 = vmatprep.mubr.bf16.mxu1 %v16363_v46  ;;  %v7740_v59 = vmul.f32 0.2, %v7712_v62  ;;  %vm7728_vm6 = vcmp.ge.f32.partialorder %v7712_v62, 0.0 }
 0x780   :  { %v7742_v33 = vmul.f32 0.2, %v7716_v48  ;;  %vm7730_vm5 = vcmp.ge.f32.partialorder %v7716_v48, 0.0 }
 0x781   :  { %9009 = vmatpush1.bf16.msra.mxu1 %v12850_v41  ;;  %9048 = vmatpush1.bf16.msra.mxu0 %v12853_v10  ;;  %v12913_v41 = vld [vmem:[%s16756_s13 + $0x168] ss:$16 sps:$4 sm:$0xff]   ;;  %v12918_v10 = vld [vmem:[%s16756_s13 + $0x504] ss:$16 sps:$4 sm:$0xff]  }
 0x782   :  { %9010 = vmatprep.subr.bf16.mxu1 %v12858_v21  ;;  %9049 = vmatprep.subr.bf16.mxu0 %v12861_v36  ;;  %v12916_v21 = vld [vmem:[%s16756_s13 + $0x500] ss:$16 sps:$4 sm:$0xff]   ;;  %v12919_v36 = vld [vmem:[%s16756_s13 + $0x148] ss:$16 sps:$4 sm:$0xff]  }
 0x785   :  { %9011 = vmatpush1.bf16.msra.mxu1 %v12856_v44  ;;  %9050 = vmatpush1.bf16.msra.mxu0 %v12859_v22  ;;  %v12924_v44 = vld [vmem:[%s16756_s13 + $0x12c] ss:$16 sps:$4 sm:$0xff]  }
 0x786   :  { %9012 = vmatprep.subr.bf16.mxu1 %v12864_v15  ;;  %9051 = vmatprep.subr.bf16.mxu0 %v12867_v27  ;;  %v12927_v22 = vld [vmem:[%s16756_s13 + $0x2ec] ss:$16 sps:$4 sm:$0xff]   ;;  %v7754_v15 = vsel %vm7730_vm5, %v7716_v48, %v7742_v33  ;;  %v7752_v27 = vsel %vm7728_vm6, %v7712_v62, %v7740_v59  ;;  %v12982_v33 = vld [vmem:[%s16756_s13 + $0x3a8] ss:$16 sps:$4 sm:$0xff]  }
 0x787   :  { %v12978_v48 = vld [vmem:[%s16756_s13 + $0x3cc] ss:$16 sps:$4 sm:$0xff]   ;;  %v12985_v59 = vld [vmem:[%s16756_s13 + $0x5e8] ss:$16 sps:$4 sm:$0xff]  }
 0x788   :  { %v12981_v62 = vld [vmem:[%s16756_s13 + $0x40c] ss:$16 sps:$4 sm:$0xff]  }
 0x789   :  { %9013 = vmatpush1.bf16.msra.mxu1 %v12862_v30  ;;  %9052 = vmatpush1.bf16.msra.mxu0 %v12865_v31  ;;  %v12922_v30 = vld [vmem:[%s16756_s13 + $0x128] ss:$16 sps:$4 sm:$0xff]  }
 0x78a   :  { %9014 = vmatprep.subr.bf16.mxu1 %v12870_v56  ;;  %9053 = vmatprep.subr.bf16.mxu0 %v12873_v42  ;;  %v12925_v31 = vld [vmem:[%s16756_s13 + $0x2e8] ss:$16 sps:$4 sm:$0xff]   ;;  %v16517_v56 = vpack.c.bf16 %v7754_v15, %v7752_v27  ;;  %v12930_v42 = vld [vmem:[%s16756_s13 + $0x10c] ss:$16 sps:$4 sm:$0xff]  }
 0x78b   :  { %v12996_v15 = vld [vmem:[%s16756_s13 + $0x36c] ss:$16 sps:$4 sm:$0xff]  }
 0x78c   :  { %v12999_v27 = vld [vmem:[%s16756_s13 + $0x5ac] ss:$16 sps:$4 sm:$0xff]  }
 0x78d   :  { %9015 = vmatpush1.bf16.msra.mxu1 %v12868_v39  ;;  %9054 = vmatpush1.bf16.msra.mxu0 %v12871_v35  ;;  %v12933_v39 = vld [vmem:[%s16756_s13 + $0x2cc] ss:$16 sps:$4 sm:$0xff]   ;;  %v12928_v35 = vld [vmem:[%s16756_s13 + $0x108] ss:$16 sps:$4 sm:$0xff]  }
 0x78e   :  { %9016 = vmatprep.subr.bf16.mxu1 %v12876_v24  ;;  %9055 = vmatprep.subr.bf16.mxu0 %v12879_v12  ;;  %v12931_v24 = vld [vmem:[%s16756_s13 + $0x2c8] ss:$16 sps:$4 sm:$0xff]   ;;  %v12936_v12 = vld [vmem:[%s16756_s13 + $0x2ac] ss:$16 sps:$4 sm:$0xff]  }
 0x791   :  { %9017 = vmatpush2.bf16.msra.mxu1 %v12874_v3  ;;  %9056 = vmatpush1.bf16.msra.mxu0 %v12877_v57  ;;  %v12939_v3 = vld [vmem:[%s16756_s13 + $0x4ec] ss:$16 sps:$4 sm:$0xff]   ;;  %v12934_v57 = vld [vmem:[%s16756_s13 + $0x2a8] ss:$16 sps:$4 sm:$0xff]  }
 0x792   :  { %9018 = vmatprep.subr.bf16.mxu1 %v12882_v11  ;;  %9057 = vmatprep.subr.bf16.mxu0 %v12885_v52  ;;  %v12942_v11 = vld [vmem:[%s16756_s13 + $0x28c] ss:$16 sps:$4 sm:$0xff]  }
 0x793   :  { %v12945_v52 = vld [vmem:[%s16756_s13 + $0x4cc] ss:$16 sps:$4 sm:$0xff]  }
 0x795   :  { %9019 = vmatpush2.bf16.msra.mxu1 %v12880_v0  ;;  %9058 = vmatpush1.bf16.msra.mxu0 %v12883_v8  ;;  %v12940_v0 = vld [vmem:[%s16756_s13 + $0x288] ss:$16 sps:$4 sm:$0xff]  }
 0x796   :  { %9020 = vmatprep.subr.bf16.mxu1 %v12888_v58  ;;  %9059 = vmatprep.subr.bf16.mxu0 %v12891_v7  ;;  %v12943_v8 = vld [vmem:[%s16756_s13 + $0x4c8] ss:$16 sps:$4 sm:$0xff]   ;;  %v12948_v58 = vld [vmem:[%s16756_s13 + $0x26c] ss:$16 sps:$4 sm:$0xff]  }
 0x797   :  { %v12946_v7 = vld [vmem:[%s16756_s13 + $0x268] ss:$16 sps:$4 sm:$0xff]  }
 0x799   :  { %9021 = vmatpush2.bf16.msra.mxu1 %v12886_v37  ;;  %9060 = vmatpush2.bf16.msra.mxu0 %v12889_v9  ;;  %v12954_v37 = vld [vmem:[%s16756_s13 + $0x24c] ss:$16 sps:$4 sm:$0xff]  }
 0x79a   :  { %9022 = vmatprep.subr.bf16.mxu1 %v12894_v2  ;;  %9061 = vmatprep.subr.bf16.mxu0 %v12897_v54  ;;  %v12957_v9 = vld [vmem:[%s16756_s13 + $0x48c] ss:$16 sps:$4 sm:$0xff]   ;;  %v12952_v2 = vld [vmem:[%s16756_s13 + $0x248] ss:$16 sps:$4 sm:$0xff]  }
 0x79b   :  { %v12955_v54 = vld [vmem:[%s16756_s13 + $0x488] ss:$16 sps:$4 sm:$0xff]  }
 0x79d   :  { %9023 = vmatpush2.bf16.msra.mxu1 %v12892_v14  ;;  %9062 = vmatpush2.bf16.msra.mxu0 %v12895_v4  ;;  %v12960_v14 = vld [vmem:[%s16756_s13 + $0x22c] ss:$16 sps:$4 sm:$0xff]  }
 0x79e   :  { %9024 = vmatprep.subr.bf16.mxu1 %v12900_v26  ;;  %9063 = vmatprep.subr.bf16.mxu0 %v12903_v6  ;;  %v12963_v4 = vld [vmem:[%s16756_s13 + $0x46c] ss:$16 sps:$4 sm:$0xff]   ;;  %v12958_v26 = vld [vmem:[%s16756_s13 + $0x228] ss:$16 sps:$4 sm:$0xff]  }
 0x79f   :  { %v12961_v6 = vld [vmem:[%s16756_s13 + $0x468] ss:$16 sps:$4 sm:$0xff]  }
 0x7a1   :  { %9025 = vmatpush2.bf16.msra.mxu1 %v12898_v29  ;;  %9064 = vmatpush2.bf16.msra.mxu0 %v12901_v38  ;;  %v12966_v29 = vld [vmem:[%s16756_s13 + $0x20c] ss:$16 sps:$4 sm:$0xff]  }
 0x7a2   :  { %9026 = vmatprep.subr.bf16.mxu1 %v12906_v19  ;;  %9065 = vmatprep.subr.bf16.mxu0 %v12909_v32  ;;  %v12969_v38 = vld [vmem:[%s16756_s13 + $0x44c] ss:$16 sps:$4 sm:$0xff]   ;;  %v12964_v19 = vld [vmem:[%s16756_s13 + $0x208] ss:$16 sps:$4 sm:$0xff]  }
 0x7a3   :  { %v12967_v32 = vld [vmem:[%s16756_s13 + $0x448] ss:$16 sps:$4 sm:$0xff]  }
 0x7a5   :  { %9027 = vmatpush2.bf16.msra.mxu1 %v12904_v51  ;;  %9066 = vmatpush2.bf16.msra.mxu0 %v12907_v18  ;;  %v12972_v51 = vld [vmem:[%s16756_s13 + $0x3ec] ss:$16 sps:$4 sm:$0xff]  }
 0x7a6   :  { %9028 = vmatprep.subr.bf16.mxu1 %v12912_v13  ;;  %9067 = vmatprep.subr.bf16.mxu0 %v12915_v40  ;;  %v12975_v18 = vld [vmem:[%s16756_s13 + $0x42c] ss:$16 sps:$4 sm:$0xff]   ;;  %v12970_v13 = vld [vmem:[%s16756_s13 + $0x3e8] ss:$16 sps:$4 sm:$0xff]  }
 0x7a7   :  { %v12973_v40 = vld [vmem:[%s16756_s13 + $0x428] ss:$16 sps:$4 sm:$0xff]  }
 0x7a9   :  { %9029 = vmatpush2.bf16.msra.mxu1 %v12910_v45  ;;  %9068 = vmatpush2.bf16.msra.mxu0 %v12913_v41  ;;  %v12976_v45 = vld [vmem:[%s16756_s13 + $0x3c8] ss:$16 sps:$4 sm:$0xff]  }
 0x7aa   :  { %9030 = vmatprep.subr.bf16.mxu1 %v12918_v10  ;;  %9069 = vmatprep.subr.bf16.mxu0 %v12921_v16  ;;  %v12979_v41 = vld [vmem:[%s16756_s13 + $0x408] ss:$16 sps:$4 sm:$0xff]   ;;  %v12984_v10 = vld [vmem:[%s16756_s13 + $0x3ac] ss:$16 sps:$4 sm:$0xff]  }
 0x7ab   :  { %v12987_v16 = vld [vmem:[%s16756_s13 + $0x5ec] ss:$16 sps:$4 sm:$0xff]  }
 0x7ad   :  { %9031 = vmatpush2.bf16.msra.mxu1 %v12916_v21  ;;  %9070 = vmatpush2.bf16.msra.mxu0 %v12919_v36  ;;  %v12990_v21 = vld [vmem:[%s16756_s13 + $0x38c] ss:$16 sps:$4 sm:$0xff]  }
 0x7ae   :  { %9071 = vmatprep.subr.bf16.mxu0 %v12924_v44  ;;  %9086 = vmatprep.subr.bf16.mxu1 %v12927_v22  ;;  %v12993_v36 = vld [vmem:[%s16756_s13 + $0x5cc] ss:$16 sps:$4 sm:$0xff]   ;;  %v12988_v44 = vld [vmem:[%s16756_s13 + $0x388] ss:$16 sps:$4 sm:$0xff]  }
 0x7af   :  { %v12991_v22 = vld [vmem:[%s16756_s13 + $0x5c8] ss:$16 sps:$4 sm:$0xff]  }
 0x7b0   :  { %9033 = vmatmul.mubr.bf16.vlgmr.msra.gmra.mxu1 %v16517_v56 }
 0x7b1   :  { %9072 = vmatpush2.bf16.msra.mxu0 %v12922_v30  ;;  %9087 = vmatpush1.bf16.msra.mxu1 %v12925_v31  ;;  %v12994_v30 = vld [vmem:[%s16756_s13 + $0x368] ss:$16 sps:$4 sm:$0xff]  }
 0x7b2   :  { %9118 = vmatprep.mubr.bf16.mxu1 %v16329_v1  ;;  %9073 = vmatprep.subr.bf16.mxu0 %v12930_v42  ;;  %v12937_v1 = vld [vmem:[%s16756_s13 + $0x4e8] ss:$16 sps:$4 sm:$0xff]   ;;  %v13002_v42 = vld [vmem:[%s16756_s13 + $0x34c] ss:$16 sps:$4 sm:$0xff]  }
 0x7b3   :  { %9088 = vmatprep.subr.bf16.mxu1 %v12933_v39  ;;  %v12997_v31 = vld [vmem:[%s16756_s13 + $0x5a8] ss:$16 sps:$4 sm:$0xff]   ;;  %v13005_v39 = vld [vmem:[%s16756_s13 + $0x58c] ss:$16 sps:$4 sm:$0xff]  }
 0x7b5   :  { %9074 = vmatpush2.bf16.msra.mxu0 %v12928_v35  ;;  %9089 = vmatpush1.bf16.msra.mxu1 %v12931_v24  ;;  %v13000_v35 = vld [vmem:[%s16756_s13 + $0x348] ss:$16 sps:$4 sm:$0xff]  }
 0x7b6   :  { %9090 = vmatprep.subr.bf16.mxu1 %v12936_v12  ;;  %9129 = vmatprep.subr.bf16.mxu0 %v12939_v3  ;;  %v13003_v24 = vld [vmem:[%s16756_s13 + $0x588] ss:$16 sps:$4 sm:$0xff]   ;;  %v13008_v12 = vld [vmem:[%s16756_s13 + $0x32c] ss:$16 sps:$4 sm:$0xff]  }
 0x7b7   :  { %v13011_v3 = vld [vmem:[%s16756_s13 + $0x56c] ss:$16 sps:$4 sm:$0xff]  }
 0x7b8   :  { %9076 = vmatmul.mubr.bf16.vlgmr.msra.gmra.mxu0 %v16310_v61  ;;  %v12951_v61 = vld [vmem:[%s16756_s13 + $0x4ac] ss:$16 sps:$4 sm:$0xff]  }
 0x7b9   :  { %9091 = vmatpush1.bf16.msra.mxu1 %v12934_v57  ;;  %9130 = vmatpush1.bf16.msra.mxu0 %v12937_v1  ;;  %v13006_v57 = vld [vmem:[%s16756_s13 + $0x328] ss:$16 sps:$4 sm:$0xff]  }
 0x7ba   :  { %9161 = vmatprep.mubr.bf16.mxu0 %v16363_v46  ;;  %9092 = vmatprep.subr.bf16.mxu1 %v12942_v11  ;;  %v12949_v46 = vld [vmem:[%s16756_s13 + $0x4a8] ss:$16 sps:$4 sm:$0xff]   ;;  %v13014_v11 = vld [vmem:[%s16756_s13 + $0x30c] ss:$16 sps:$4 sm:$0xff]  }
 0x7bb   :  { %9131 = vmatprep.subr.bf16.mxu0 %v12945_v52  ;;  %v13009_v1 = vld [vmem:[%s16756_s13 + $0x568] ss:$16 sps:$4 sm:$0xff]   ;;  %v13017_v52 = vld [vmem:[%s16756_s13 + $0x54c] ss:$16 sps:$4 sm:$0xff]  }
 0x7bd   :  { %9093 = vmatpush1.bf16.msra.mxu1 %v12940_v0  ;;  %9132 = vmatpush1.bf16.msra.mxu0 %v12943_v8  ;;  %v13012_v0 = vld [vmem:[%s16756_s13 + $0x308] ss:$16 sps:$4 sm:$0xff]  }
 0x7be   :  { %9094 = vmatprep.subr.bf16.mxu1 %v12948_v58  ;;  %9133 = vmatprep.subr.bf16.mxu0 %v12951_v61  ;;  %v13015_v8 = vld [vmem:[%s16756_s13 + $0x548] ss:$16 sps:$4 sm:$0xff]   ;;  %v13020_v58 = vld [vmem:[%s16756_s13 + $0x52c] ss:$16 sps:$4 sm:$0xff]  }
 0x7bf   :  { %v13026_v61 = vld [vmem:[#allocation11 + $0x274] ss:$8 sps:$4 sm:$0xff]  }
 0x7c1   :  { %9095 = vmatpush1.bf16.msra.mxu1 %v12946_v7  ;;  %9134 = vmatpush1.bf16.msra.mxu0 %v12949_v46  ;;  %v13018_v7 = vld [vmem:[%s16756_s13 + $0x528] ss:$16 sps:$4 sm:$0xff]  }
 0x7c2   :  { %9096 = vmatprep.subr.bf16.mxu1 %v12954_v37  ;;  %9135 = vmatprep.subr.bf16.mxu0 %v12957_v9  ;;  %v13024_v46 = vld [vmem:[#allocation11 + $0x270] ss:$8 sps:$4 sm:$0xff]   ;;  %v13029_v9 = vld [vmem:[#allocation11 + $0x264] ss:$8 sps:$4 sm:$0xff]  }
 0x7c3   :  { %v13023_v37 = vld [vmem:[%s16756_s13 + $0x50c] ss:$16 sps:$4 sm:$0xff]  }
 0x7c5   :  { %9097 = vmatpush1.bf16.msra.mxu1 %v12952_v2  ;;  %9136 = vmatpush1.bf16.msra.mxu0 %v12955_v54  ;;  %v13021_v2 = vld [vmem:[%s16756_s13 + $0x508] ss:$16 sps:$4 sm:$0xff]  }
 0x7c6   :  { %9098 = vmatprep.subr.bf16.mxu1 %v12960_v14  ;;  %9137 = vmatprep.subr.bf16.mxu0 %v12963_v4  ;;  %v13027_v54 = vld [vmem:[#allocation11 + $0x260] ss:$8 sps:$4 sm:$0xff]   ;;  %v13032_v14 = vld [vmem:[#allocation11 + $0x254] ss:$8 sps:$4 sm:$0xff]   ;;  %v13030_v4 = vld [vmem:[#allocation11 + $0x250] ss:$8 sps:$4 sm:$0xff]  }
 0x7c9   :  { %9099 = vmatpush1.bf16.msra.mxu1 %v12958_v26  ;;  %9138 = vmatpush1.bf16.msra.mxu0 %v12961_v6  ;;  %v13035_v26 = vld [vmem:[#allocation11 + $0x244] ss:$8 sps:$4 sm:$0xff]   ;;  %v13033_v6 = vld [vmem:[#allocation11 + $0x240] ss:$8 sps:$4 sm:$0xff]  }
 0x7ca   :  { %9100 = vmatprep.subr.bf16.mxu1 %v12966_v29  ;;  %9139 = vmatprep.subr.bf16.mxu0 %v12969_v38  ;;  %v13036_v29 = vld [vmem:[#allocation11 + $0x230] ss:$8 sps:$4 sm:$0xff]   ;;  %v13041_v38 = vld [vmem:[#allocation11 + $0x224] ss:$8 sps:$4 sm:$0xff]  }
 0x7cd   :  { %9101 = vmatpush1.bf16.msra.mxu1 %v12964_v19  ;;  %9140 = vmatpush1.bf16.msra.mxu0 %v12967_v32  ;;  %v13039_v19 = vld [vmem:[#allocation11 + $0x220] ss:$8 sps:$4 sm:$0xff]   ;;  %v13078_v32 = vld [vmem:[#allocation11 + $0x370] ss:$8 sps:$4 sm:$0xff]  }
 0x7ce   :  { %9102 = vmatprep.subr.bf16.mxu1 %v12972_v51  ;;  %9141 = vmatprep.subr.bf16.mxu0 %v12975_v18  ;;  %v13080_v51 = vld [vmem:[#allocation11 + $0x374] ss:$8 sps:$4 sm:$0xff]  }
 0x7cf   :  { %v13044_v18 = vld [vmem:[#allocation11 + $0x214] ss:$8 sps:$4 sm:$0xff]  }
 0x7d1   :  { %9103 = vmatpush2.bf16.msra.mxu1 %v12970_v13  ;;  %9142 = vmatpush1.bf16.msra.mxu0 %v12973_v40  ;;  %v13042_v13 = vld [vmem:[#allocation11 + $0x210] ss:$8 sps:$4 sm:$0xff]   ;;  %v13084_v40 = vld [vmem:[#allocation11 + $0x360] ss:$8 sps:$4 sm:$0xff]  }
 0x7d2   :  { %9104 = vmatprep.subr.bf16.mxu1 %v12978_v48  ;;  %9143 = vmatprep.subr.bf16.mxu0 %v12981_v62  ;;  %v13047_v48 = vld [vmem:[#allocation11 + $0x204] ss:$8 sps:$4 sm:$0xff]   ;;  %v13045_v62 = vld [vmem:[#allocation11 + $0x200] ss:$8 sps:$4 sm:$0xff]  }
 0x7d5   :  { %9105 = vmatpush2.bf16.msra.mxu1 %v12976_v45  ;;  %9144 = vmatpush1.bf16.msra.mxu0 %v12979_v41  ;;  %v13090_v45 = vld [vmem:[#allocation11 + $0x350] ss:$8 sps:$4 sm:$0xff]   ;;  %v13092_v41 = vld [vmem:[#allocation11 + $0x354] ss:$8 sps:$4 sm:$0xff]  }
 0x7d6   :  { %9106 = vmatprep.subr.bf16.mxu1 %v12984_v10  ;;  %9145 = vmatprep.subr.bf16.mxu0 %v12987_v16  ;;  %v13050_v10 = vld [vmem:[#allocation11 + $0x2f4] ss:$8 sps:$4 sm:$0xff]   ;;  %v13048_v16 = vld [vmem:[#allocation11 + $0x2f0] ss:$8 sps:$4 sm:$0xff]  }
 0x7d9   :  { %9107 = vmatpush2.bf16.msra.mxu1 %v12982_v33  ;;  %9146 = vmatpush2.bf16.msra.mxu0 %v12985_v59  ;;  %v13096_v33 = vld [vmem:[#allocation11 + $0x340] ss:$8 sps:$4 sm:$0xff]   ;;  %v13098_v59 = vld [vmem:[#allocation11 + $0x344] ss:$8 sps:$4 sm:$0xff]  }
 0x7da   :  { %9108 = vmatprep.subr.bf16.mxu1 %v12990_v21  ;;  %9147 = vmatprep.subr.bf16.mxu0 %v12993_v36  ;;  %v13053_v21 = vld [vmem:[#allocation11 + $0x2e4] ss:$8 sps:$4 sm:$0xff]   ;;  %v13051_v36 = vld [vmem:[#allocation11 + $0x2e0] ss:$8 sps:$4 sm:$0xff]  }
 0x7dd   :  { %9109 = vmatpush2.bf16.msra.mxu1 %v12988_v44  ;;  %9148 = vmatpush2.bf16.msra.mxu0 %v12991_v22  ;;  %v13102_v44 = vld [vmem:[#allocation11 + $0x330] ss:$8 sps:$4 sm:$0xff]   ;;  %v13104_v22 = vld [vmem:[#allocation11 + $0x334] ss:$8 sps:$4 sm:$0xff]  }
 0x7de   :  { %9110 = vmatprep.subr.bf16.mxu1 %v12996_v15  ;;  %9149 = vmatprep.subr.bf16.mxu0 %v12999_v27  ;;  %v13056_v15 = vld [vmem:[#allocation11 + $0x2d4] ss:$8 sps:$4 sm:$0xff]   ;;  %v13054_v27 = vld [vmem:[#allocation11 + $0x2d0] ss:$8 sps:$4 sm:$0xff]  }
 0x7e1   :  { %9111 = vmatpush2.bf16.msra.mxu1 %v12994_v30  ;;  %9150 = vmatpush2.bf16.msra.mxu0 %v12997_v31  ;;  %v13108_v30 = vld [vmem:[#allocation11 + $0x320] ss:$8 sps:$4 sm:$0xff]   ;;  %v13110_v31 = vld [vmem:[#allocation11 + $0x324] ss:$8 sps:$4 sm:$0xff]  }
 0x7e2   :  { %9112 = vmatprep.subr.bf16.mxu1 %v13002_v42  ;;  %9151 = vmatprep.subr.bf16.mxu0 %v13005_v39  ;;  %v13059_v42 = vld [vmem:[#allocation11 + $0x2c4] ss:$8 sps:$4 sm:$0xff]   ;;  %v13057_v39 = vld [vmem:[#allocation11 + $0x2c0] ss:$8 sps:$4 sm:$0xff]  }
 0x7e5   :  { %9113 = vmatpush2.bf16.msra.mxu1 %v13000_v35  ;;  %9152 = vmatpush2.bf16.msra.mxu0 %v13003_v24  ;;  %v13114_v35 = vld [vmem:[#allocation11 + $0x310] ss:$8 sps:$4 sm:$0xff]   ;;  %v13116_v24 = vld [vmem:[#allocation11 + $0x314] ss:$8 sps:$4 sm:$0xff]  }
 0x7e6   :  { %9114 = vmatprep.subr.bf16.mxu1 %v13008_v12  ;;  %9153 = vmatprep.subr.bf16.mxu0 %v13011_v3  ;;  %v13062_v12 = vld [vmem:[#allocation11 + $0x2b4] ss:$8 sps:$4 sm:$0xff]   ;;  %v13060_v3 = vld [vmem:[#allocation11 + $0x2b0] ss:$8 sps:$4 sm:$0xff]  }
 0x7e9   :  { %9115 = vmatpush2.bf16.msra.mxu1 %v13006_v57  ;;  %9154 = vmatpush2.bf16.msra.mxu0 %v13009_v1  ;;  %v13120_v57 = vld [vmem:[#allocation11 + $0x300] ss:$8 sps:$4 sm:$0xff]   ;;  %v13122_v1 = vld [vmem:[#allocation11 + $0x304] ss:$8 sps:$4 sm:$0xff]  }
 0x7ea   :  { %9116 = vmatprep.subr.bf16.mxu1 %v13014_v11  ;;  %9155 = vmatprep.subr.bf16.mxu0 %v13017_v52  ;;  %v13065_v11 = vld [vmem:[#allocation11 + $0x2a4] ss:$8 sps:$4 sm:$0xff]   ;;  %v13063_v52 = vld [vmem:[#allocation11 + $0x2a0] ss:$8 sps:$4 sm:$0xff]  }
 0x7ed   :  { %9117 = vmatpush2.bf16.msra.mxu1 %v13012_v0  ;;  %9156 = vmatpush2.bf16.msra.mxu0 %v13015_v8  ;;  %v13126_v0 = vld [vmem:[#allocation11 + $0x3f0] ss:$8 sps:$4 sm:$0xff]   ;;  %v13128_v8 = vld [vmem:[#allocation11 + $0x3f4] ss:$8 sps:$4 sm:$0xff]  }
 0x7ee   :  { %9157 = vmatprep.subr.bf16.mxu0 %v13020_v58  ;;  %9629 = vmatprep.subr.bf16.mxu1 %v13026_v61  ;;  %v13068_v58 = vld [vmem:[#allocation11 + $0x294] ss:$8 sps:$4 sm:$0xff]   ;;  %v13066_v61 = vld [vmem:[#allocation11 + $0x290] ss:$8 sps:$4 sm:$0xff]  }
 0x7f0   :  { %9119 = vmatmul.mubr.bf16.vlgmr.msra.gmra.mxu1 %v16337_v55  ;;  %v13038_v55 = vld [vmem:[#allocation11 + $0x234] ss:$8 sps:$4 sm:$0xff]  }
 0x7f1   :  { %9158 = vmatpush2.bf16.msra.mxu0 %v13018_v7  ;;  %9630 = vmatpush1.bf16.msra.mxu1 %v13024_v46  ;;  %v13132_v7 = vld [vmem:[#allocation11 + $0x3e0] ss:$8 sps:$4 sm:$0xff]   ;;  %v13134_v46 = vld [vmem:[#allocation11 + $0x3e4] ss:$8 sps:$4 sm:$0xff]  }
 0x7f2   :  { %9159 = vmatprep.subr.bf16.mxu0 %v13023_v37  ;;  %9631 = vmatprep.subr.bf16.mxu1 %v13029_v9  ;;  %v13071_v37 = vld [vmem:[#allocation11 + $0x284] ss:$8 sps:$4 sm:$0xff]   ;;  %v13069_v9 = vld [vmem:[#allocation11 + $0x280] ss:$8 sps:$4 sm:$0xff]  }
 0x7f5   :  { %9160 = vmatpush2.bf16.msra.mxu0 %v13021_v2  ;;  %9632 = vmatpush1.bf16.msra.mxu1 %v13027_v54  ;;  %v13138_v2 = vld [vmem:[#allocation11 + $0x3d0] ss:$8 sps:$4 sm:$0xff]   ;;  %v13140_v54 = vld [vmem:[#allocation11 + $0x3d4] ss:$8 sps:$4 sm:$0xff]  }
 0x7f6   :  { %9633 = vmatprep.subr.bf16.mxu1 %v13032_v14  ;;  %9672 = vmatprep.subr.bf16.mxu0 %v13080_v51  ;;  %v13074_v14 = vld [vmem:[#allocation11 + $0x74] ss:$8 sps:$4 sm:$0xff]   ;;  %v13167_v51 = vld [vmem:[#allocation11 + $0x384] ss:$8 sps:$4 sm:$0xff]  }
 0x7f8   :  { %9162 = vmatmul.mubr.bf16.vlgmr.msra.gmra.mxu0 %v16517_v56  ;;  %v13086_v56 = vld [vmem:[#allocation11 + $0x364] ss:$8 sps:$4 sm:$0xff]  }
 0x7f9   :  { %9634 = vmatpush1.bf16.msra.mxu1 %v13030_v4  ;;  %9673 = vmatpush1.bf16.msra.mxu0 %v13078_v32  ;;  %v13144_v4 = vld [vmem:[#allocation11 + $0x3c0] ss:$8 sps:$4 sm:$0xff]   ;;  %v13162_v32 = vld [vmem:[#allocation11 + $0x390] ss:$8 sps:$4 sm:$0xff]  }
 0x7fa   :  { %9635 = vmatprep.subr.bf16.mxu1 %v13035_v26  ;;  %9674 = vmatprep.subr.bf16.mxu0 %v13086_v56  ;;  %v13146_v26 = vld [vmem:[#allocation11 + $0x3c4] ss:$8 sps:$4 sm:$0xff]  }
 0x7fd   :  { %9636 = vmatpush1.bf16.msra.mxu1 %v13033_v6  ;;  %9675 = vmatpush1.bf16.msra.mxu0 %v13084_v40  ;;  %v13152_v6 = vld [vmem:[#allocation11 + $0x3b4] ss:$8 sps:$4 sm:$0xff]  }
 0x7fe   :  { %9637 = vmatprep.subr.bf16.mxu1 %v13038_v55  ;;  %9676 = vmatprep.subr.bf16.mxu0 %v13092_v41  ;;  %v13150_v55 = vld [vmem:[#allocation11 + $0x3b0] ss:$8 sps:$4 sm:$0xff]  }
 0x801   :  { %9638 = vmatpush1.bf16.msra.mxu1 %v13036_v29  ;;  %9677 = vmatpush1.bf16.msra.mxu0 %v13090_v45  ;;  %v13158_v29 = vld [vmem:[#allocation11 + $0x3a4] ss:$8 sps:$4 sm:$0xff]  }
 0x802   :  { %9639 = vmatprep.subr.bf16.mxu1 %v13041_v38  ;;  %9678 = vmatprep.subr.bf16.mxu0 %v13098_v59  ;;  %v13156_v38 = vld [vmem:[#allocation11 + $0x3a0] ss:$8 sps:$4 sm:$0xff]  }
 0x805   :  { %9640 = vmatpush1.bf16.msra.mxu1 %v13039_v19  ;;  %9679 = vmatpush1.bf16.msra.mxu0 %v13096_v33  ;;  %v13164_v19 = vld [vmem:[#allocation11 + $0x394] ss:$8 sps:$4 sm:$0xff]  }
 0x806   :  { %9641 = vmatprep.subr.bf16.mxu1 %v13044_v18  ;;  %9680 = vmatprep.subr.bf16.mxu0 %v13104_v22  ;;  %v13165_v18 = vld [vmem:[#allocation11 + $0x380] ss:$8 sps:$4 sm:$0xff]  }
 0x809   :  { %9642 = vmatpush1.bf16.msra.mxu1 %v13042_v13  ;;  %9681 = vmatpush1.bf16.msra.mxu0 %v13102_v44  ;;  %v13170_v13 = vld [vmem:[#allocation11 + $0x174] ss:$8 sps:$4 sm:$0xff]  }
 0x80a   :  { %9643 = vmatprep.subr.bf16.mxu1 %v13047_v48  ;;  %9682 = vmatprep.subr.bf16.mxu0 %v13110_v31 }
 0x80d   :  { %9644 = vmatpush1.bf16.msra.mxu1 %v13045_v62  ;;  %9683 = vmatpush1.bf16.msra.mxu0 %v13108_v30 }
 0x80e   :  { %9645 = vmatprep.subr.bf16.mxu1 %v13050_v10  ;;  %9684 = vmatprep.subr.bf16.mxu0 %v13116_v24  ;;  %v13072_v24 = vld [vmem:[#allocation11 + $0x70] ss:$8 sps:$4 sm:$0xff]  }
 0x811   :  { %9646 = vmatpush2.bf16.msra.mxu1 %v13048_v16  ;;  %9685 = vmatpush1.bf16.msra.mxu0 %v13114_v35 }
 0x812   :  { %9647 = vmatprep.subr.bf16.mxu1 %v13053_v21  ;;  %9686 = vmatprep.subr.bf16.mxu0 %v13122_v1  ;;  %v13083_v1 = vld [vmem:[#allocation11 + $0x54] ss:$8 sps:$4 sm:$0xff]  }
 0x815   :  { %9648 = vmatpush2.bf16.msra.mxu1 %v13051_v36  ;;  %9687 = vmatpush1.bf16.msra.mxu0 %v13120_v57  ;;  %v13075_v57 = vld [vmem:[#allocation11 + $0x60] ss:$8 sps:$4 sm:$0xff]  }
 0x816   :  { %9649 = vmatprep.subr.bf16.mxu1 %v13056_v15  ;;  %9688 = vmatprep.subr.bf16.mxu0 %v13128_v8  ;;  %v13095_v8 = vld [vmem:[#allocation11 + $0x34] ss:$8 sps:$4 sm:$0xff]  }
 0x819   :  { %9650 = vmatpush2.bf16.msra.mxu1 %v13054_v27  ;;  %9689 = vmatpush2.bf16.msra.mxu0 %v13126_v0  ;;  %v13087_v0 = vld [vmem:[#allocation11 + $0x40] ss:$8 sps:$4 sm:$0xff]  }
 0x81a   :  { %9651 = vmatprep.subr.bf16.mxu1 %v13059_v42  ;;  %9690 = vmatprep.subr.bf16.mxu0 %v13134_v46  ;;  %v13111_v46 = vld [vmem:[#allocation11] ss:$8 sps:$4 sm:$0xff]  }
 0x81d   :  { %9652 = vmatpush2.bf16.msra.mxu1 %v13057_v39  ;;  %9691 = vmatpush2.bf16.msra.mxu0 %v13132_v7  ;;  %v13099_v7 = vld [vmem:[#allocation11 + $0x20] ss:$8 sps:$4 sm:$0xff]  }
 0x81e   :  { %9653 = vmatprep.subr.bf16.mxu1 %v13062_v12  ;;  %9692 = vmatprep.subr.bf16.mxu0 %v13140_v54  ;;  %v13123_v54 = vld [vmem:[#allocation11 + $0xe0] ss:$8 sps:$4 sm:$0xff]  }
 0x821   :  { %9654 = vmatpush2.bf16.msra.mxu1 %v13060_v3  ;;  %9693 = vmatpush2.bf16.msra.mxu0 %v13138_v2  ;;  %v13077_v3 = vld [vmem:[#allocation11 + $0x64] ss:$8 sps:$4 sm:$0xff]  }
 0x822   :  { %9655 = vmatprep.subr.bf16.mxu1 %v13065_v11  ;;  %9694 = vmatprep.subr.bf16.mxu0 %v13146_v26  ;;  %v13081_v11 = vld [vmem:[#allocation11 + $0x50] ss:$8 sps:$4 sm:$0xff]   ;;  %v13125_v2 = vld [vmem:[#allocation11 + $0xe4] ss:$8 sps:$4 sm:$0xff]  }
 0x823   :  { %v13137_v26 = vld [vmem:[#allocation11 + $0xc4] ss:$8 sps:$4 sm:$0xff]  }
 0x825   :  { %9656 = vmatpush2.bf16.msra.mxu1 %v13063_v52  ;;  %9695 = vmatpush2.bf16.msra.mxu0 %v13144_v4  ;;  %v13089_v52 = vld [vmem:[#allocation11 + $0x44] ss:$8 sps:$4 sm:$0xff]   ;;  %v13129_v4 = vld [vmem:[#allocation11 + $0xd0] ss:$8 sps:$4 sm:$0xff]  }
 0x826   :  { %9657 = vmatprep.subr.bf16.mxu1 %v13068_v58  ;;  %9696 = vmatprep.subr.bf16.mxu0 %v13152_v6  ;;  %v13093_v58 = vld [vmem:[#allocation11 + $0x30] ss:$8 sps:$4 sm:$0xff]   ;;  %v13135_v6 = vld [vmem:[#allocation11 + $0xc0] ss:$8 sps:$4 sm:$0xff]  }
 0x829   :  { %9658 = vmatpush2.bf16.msra.mxu1 %v13066_v61  ;;  %9697 = vmatpush2.bf16.msra.mxu0 %v13150_v55  ;;  %v13101_v61 = vld [vmem:[#allocation11 + $0x24] ss:$8 sps:$4 sm:$0xff]   ;;  %v13143_v55 = vld [vmem:[#allocation11 + $0xb4] ss:$8 sps:$4 sm:$0xff]  }
 0x82a   :  { %9659 = vmatprep.subr.bf16.mxu1 %v13071_v37  ;;  %9698 = vmatprep.subr.bf16.mxu0 %v13158_v29  ;;  %v13119_v37 = vld [vmem:[#allocation11 + $0xf4] ss:$8 sps:$4 sm:$0xff]   ;;  %v13141_v29 = vld [vmem:[#allocation11 + $0xb0] ss:$8 sps:$4 sm:$0xff]  }
 0x82d   :  { %9660 = vmatpush2.bf16.msra.mxu1 %v13069_v9  ;;  %9699 = vmatpush2.bf16.msra.mxu0 %v13156_v38  ;;  %v13117_v9 = vld [vmem:[#allocation11 + $0xf0] ss:$8 sps:$4 sm:$0xff]  }
 0x82e   :  { %10035 = vmatprep.subr.bf16.mxu1 %v13074_v14  ;;  %9700 = vmatprep.subr.bf16.mxu0 %v13164_v19  ;;  %v13131_v14 = vld [vmem:[#allocation11 + $0xd4] ss:$8 sps:$4 sm:$0xff]   ;;  %v13149_v19 = vld [vmem:[#allocation11 + $0xa4] ss:$8 sps:$4 sm:$0xff]  }
 0x830   :  { %v8948_v40 = vpop.f32.mrf.mxu1 }
 0x831   :  { %9701 = vmatpush2.bf16.msra.mxu0 %v13162_v32  ;;  %v13147_v32 = vld [vmem:[#allocation11 + $0xa0] ss:$8 sps:$4 sm:$0xff]  }
 0x832   :  { %9702 = vmatprep.subr.bf16.mxu0 %v13167_v51  ;;  %v8950_v56 = vpop.f32.mrf.mxu1 }
 0x834   :  { %v8952_v62 = vpop.f32.mrf.mxu1 }
 0x835   :  { %9703 = vmatpush2.bf16.msra.mxu0 %v13165_v18  ;;  %v13155_v18 = vld [vmem:[#allocation11 + $0x94] ss:$8 sps:$4 sm:$0xff]  }
 0x836   :  { %10078 = vmatprep.subr.bf16.mxu0 %v13170_v13  ;;  %v8954_v41 = vpop.f32.mrf.mxu1 }
 0x838   :  { %v8991_v48 = vpop.f32.mrf.mxu0 }
 0x839   :  { %v8992_v15 = vadd.f32 %v8991_v48, %v8948_v40  ;;  %v13153_v40 = vld [vmem:[#allocation11 + $0x90] ss:$8 sps:$4 sm:$0xff]  }
 0x83a   :  { %v8993_v45 = vpop.f32.mrf.mxu0 }
 0x83b   :  { %v8994_v44 = vadd.f32 %v8993_v45, %v8950_v56  ;;  %v13159_v45 = vld [vmem:[#allocation11 + $0x80] ss:$8 sps:$4 sm:$0xff]  }
 0x83c   :  { %v8995_v10 = vpop.f32.mrf.mxu0 }
 0x83d   :  { %v8996_v21 = vadd.f32 %v8995_v10, %v8952_v62  ;;  %v13161_v62 = vld [vmem:[#allocation11 + $0x84] ss:$8 sps:$4 sm:$0xff]  }
 0x83e   :  { %v8997_v33 = vpop.f32.mrf.mxu0 }
 0x83f   :  { %v8998_v22 = vadd.f32 %v8997_v33, %v8954_v41 }
 0x870   :  { %v9034_v16 = vpop.f32.mrf.mxu1 }
 0x871   :  { %v9035_v39 = vadd.f32 %v9034_v16, %v8992_v15 }
 0x872   :  { %v9036_v59 = vpop.f32.mrf.mxu1 }
 0x873   :  { %v9037_v31 = vadd.f32 %v9036_v59, %v8994_v44 }
 0x874   :  { %v9038_v36 = vpop.f32.mrf.mxu1 }
 0x875   :  { %v9039_v27 = vadd.f32 %v9038_v36, %v8996_v21 }
 0x876   :  { %v9040_v30 = vpop.f32.mrf.mxu1 }
 0x877   :  { %v9041_v42 = vadd.f32 %v9040_v30, %v8998_v22  ;;  %v9240_v12 = vpack.c.bf16 %v9039_v27, %v9035_v39 }
 0x878   :  { %v9077_v38 = vpop.f32.mrf.mxu0 }
 0x879   :  { %v9241_v35 = vpack.c.bf16 %v9041_v42, %v9037_v31 }
 0x87a   :  { %v9079_v51 = vpop.f32.mrf.mxu0 }
 0x87b   :  { %9661 = vmatprep.mubr.bf16.mxu1 %v9241_v35 }
 0x87c   :  { %9662 = vmatmul.mubr.bf16.vlgmr.msra.gmra.mxu1 %v9240_v12  ;;  %v9081_v56 = vpop.f32.mrf.mxu0 }
 0x87d   :  { %10036 = vmatpush1.bf16.msra.mxu1 %v13072_v24  ;;  %10067 = vmatprep.mubr.bf16.mxu1 %v9173_v25  ;;  %v13113_v25 = vld [vmem:[#allocation11 + $0x4] ss:$8 sps:$4 sm:$0xff]   ;;  %v13168_v24 = vld [vmem:[#allocation11 + $0x170] ss:$8 sps:$4 sm:$0xff]  }
 0x87e   :  { %10037 = vmatprep.subr.bf16.mxu1 %v13077_v3  ;;  %v9083_v41 = vpop.f32.mrf.mxu0  ;;  %v13173_v3 = vld [vmem:[#allocation11 + $0x164] ss:$8 sps:$4 sm:$0xff]  }
 0x881   :  { %10038 = vmatpush1.bf16.msra.mxu1 %v13075_v57  ;;  %v13179_v57 = vld [vmem:[#allocation11 + $0x144] ss:$8 sps:$4 sm:$0xff]  }
 0x882   :  { %10039 = vmatprep.subr.bf16.mxu1 %v13083_v1  ;;  %v13177_v1 = vld [vmem:[#allocation11 + $0x140] ss:$8 sps:$4 sm:$0xff]  }
 0x885   :  { %10040 = vmatpush1.bf16.msra.mxu1 %v13081_v11  ;;  %v13182_v11 = vld [vmem:[#allocation11 + $0x134] ss:$8 sps:$4 sm:$0xff]  }
 0x886   :  { %10041 = vmatprep.subr.bf16.mxu1 %v13089_v52  ;;  %v13180_v52 = vld [vmem:[#allocation11 + $0x130] ss:$8 sps:$4 sm:$0xff]  }
 0x889   :  { %10042 = vmatpush1.bf16.msra.mxu1 %v13087_v0  ;;  %v13185_v0 = vld [vmem:[#allocation11 + $0x124] ss:$8 sps:$4 sm:$0xff]  }
 0x88a   :  { %10043 = vmatprep.subr.bf16.mxu1 %v13095_v8  ;;  %v13183_v8 = vld [vmem:[#allocation11 + $0x120] ss:$8 sps:$4 sm:$0xff]  }
 0x88d   :  { %10044 = vmatpush1.bf16.msra.mxu1 %v13093_v58  ;;  %v13189_v58 = vld [vmem:[#allocation11 + $0x100] ss:$8 sps:$4 sm:$0xff]  }
 0x88e   :  { %10045 = vmatprep.subr.bf16.mxu1 %v13101_v61  ;;  %v13194_v61 = vld [vmem:[#allocation11 + $0x1f4] ss:$8 sps:$4 sm:$0xff]  }
 0x891   :  { %10046 = vmatpush1.bf16.msra.mxu1 %v13099_v7  ;;  %v13192_v7 = vld [vmem:[#allocation11 + $0x1f0] ss:$8 sps:$4 sm:$0xff]  }
 0x892   :  { %10047 = vmatprep.subr.bf16.mxu1 %v13107_v17  ;;  %v13197_v17 = vld [vmem:[#allocation11 + $0x1e4] ss:$8 sps:$4 sm:$0xff]  }
 0x895   :  { %10048 = vmatpush1.bf16.msra.mxu1 %v13105_v60  ;;  %v13195_v60 = vld [vmem:[#allocation11 + $0x1e0] ss:$8 sps:$4 sm:$0xff]  }
 0x896   :  { %10049 = vmatprep.subr.bf16.mxu1 %v13113_v25  ;;  %v13200_v25 = vld [vmem:[#allocation11 + $0x1d4] ss:$8 sps:$4 sm:$0xff]  }
 0x899   :  { %10050 = vmatpush1.bf16.msra.mxu1 %v13111_v46  ;;  %v13198_v46 = vld [vmem:[#allocation11 + $0x1d0] ss:$8 sps:$4 sm:$0xff]  }
 0x89a   :  { %10051 = vmatprep.subr.bf16.mxu1 %v13119_v37  ;;  %v13203_v37 = vld [vmem:[#allocation11 + $0x1c4] ss:$8 sps:$4 sm:$0xff]  }
 0x89d   :  { %10052 = vmatpush2.bf16.msra.mxu1 %v13117_v9  ;;  %v13201_v9 = vld [vmem:[#allocation11 + $0x1c0] ss:$8 sps:$4 sm:$0xff]  }
 0x89e   :  { %10053 = vmatprep.subr.bf16.mxu1 %v13125_v2  ;;  %v13206_v2 = vld [vmem:[#allocation11 + $0x1b4] ss:$8 sps:$4 sm:$0xff]  }
 0x8a1   :  { %10054 = vmatpush2.bf16.msra.mxu1 %v13123_v54  ;;  %v13204_v54 = vld [vmem:[#allocation11 + $0x1b0] ss:$8 sps:$4 sm:$0xff]  }
 0x8a2   :  { %10055 = vmatprep.subr.bf16.mxu1 %v13131_v14  ;;  %v13209_v14 = vld [vmem:[#allocation11 + $0x1a4] ss:$8 sps:$4 sm:$0xff]  }
 0x8a5   :  { %10056 = vmatpush2.bf16.msra.mxu1 %v13129_v4  ;;  %v13207_v4 = vld [vmem:[#allocation11 + $0x1a0] ss:$8 sps:$4 sm:$0xff]  }
 0x8a6   :  { %10057 = vmatprep.subr.bf16.mxu1 %v13137_v26  ;;  %v13212_v26 = vld [vmem:[#allocation11 + $0x194] ss:$8 sps:$4 sm:$0xff]  }
 0x8a9   :  { %10058 = vmatpush2.bf16.msra.mxu1 %v13135_v6  ;;  %v13210_v6 = vld [vmem:[#allocation11 + $0x190] ss:$8 sps:$4 sm:$0xff]  }
 0x8aa   :  { %10059 = vmatprep.subr.bf16.mxu1 %v13143_v55  ;;  %v13215_v55 = vld [vmem:[#allocation11 + $0x184] ss:$8 sps:$4 sm:$0xff]  }
 0x8ad   :  { %10060 = vmatpush2.bf16.msra.mxu1 %v13141_v29  ;;  %v13213_v29 = vld [vmem:[#allocation11 + $0x180] ss:$8 sps:$4 sm:$0xff]  }
 0x8ae   :  { %10061 = vmatprep.subr.bf16.mxu1 %v13149_v19 }
 0x8b0   :  { %v9120_v13 = vpop.f32.mrf.mxu1 }
 0x8b1   :  { %10062 = vmatpush2.bf16.msra.mxu1 %v13147_v32  ;;  %v9121_v15 = vadd.f32 %v9120_v13, %v9077_v38 }
 0x8b2   :  { %v9122_v48 = vpop.f32.mrf.mxu1  ;;  %10063 = vmatprep.subr.bf16.mxu1 %v13155_v18 }
 0x8b3   :  { %v9123_v44 = vadd.f32 %v9122_v48, %v9079_v51 }
 0x8b4   :  { %v9124_v10 = vpop.f32.mrf.mxu1 }
 0x8b5   :  { %10064 = vmatpush2.bf16.msra.mxu1 %v13153_v40  ;;  %v9125_v21 = vadd.f32 %v9124_v10, %v9081_v56 }
 0x8b6   :  { %10065 = vmatprep.subr.bf16.mxu1 %v13161_v62  ;;  %v9126_v33 = vpop.f32.mrf.mxu1 }
 0x8b7   :  { %v9127_v22 = vadd.f32 %v9126_v33, %v9083_v41 }
 0x8b8   :  { %v9163_v16 = vpop.f32.mrf.mxu0 }
 0x8b9   :  { %10066 = vmatpush2.bf16.msra.mxu1 %v13159_v45  ;;  %v9164_v39 = vadd.f32 %v9163_v16, %v9121_v15  ;;  %v10121_v45 = vld [vmem:[#allocation12] sm:$0x3] }
 0x8ba   :  { %v9165_v59 = vpop.f32.mrf.mxu0 }
 0x8bb   :  { %v9166_v31 = vadd.f32 %v9165_v59, %v9123_v44  ;;  %v10126_v59 = vrot.slane %v10121_v45, %v15211_v5  ;;  %v10130_v44 = vrot.slane %v10121_v45, %v15257_v34 }
 0x8bc   :  { %10068 = vmatmul.mubr.bf16.vlgmr.msra.gmra.mxu1 %v9172_v63  ;;  %v9167_v36 = vpop.f32.mrf.mxu0  ;;  %v13174_v63 = vld [vmem:[#allocation11 + $0x150] ss:$8 sps:$4 sm:$0xff]  }
 0x8bd   :  { %v9168_v27 = vadd.f32 %v9167_v36, %v9125_v21 }
 0x8be   :  { %v9169_v30 = vpop.f32.mrf.mxu0 }
 0x8bf   :  { %v9170_v42 = vadd.f32 %v9169_v30, %v9127_v22  ;;  %v9242_v12 = vpack.c.bf16 %v9168_v27, %v9164_v39 }
 0x8c1   :  { %v9243_v35 = vpack.c.bf16 %v9170_v42, %v9166_v31 }
 0x8c3   :  { %9704 = vmatprep.mubr.bf16.mxu0 %v9243_v35 }
 0x8c4   :  { %9705 = vmatmul.mubr.bf16.vlgmr.msra.gmra.mxu0 %v9242_v12 }
 0x8c5   :  { %10079 = vmatpush1.bf16.msra.mxu0 %v13168_v24  ;;  %10110 = vmatprep.mubr.bf16.mxu0 %v9175_v49  ;;  %v13191_v49 = vld [vmem:[#allocation11 + $0x104] ss:$8 sps:$4 sm:$0xff]  }
 0x8c6   :  { %10080 = vmatprep.subr.bf16.mxu0 %v13173_v3 }
 0x8c9   :  { %10081 = vmatpush1.bf16.msra.mxu0 %v13171_v28 }
 0x8ca   :  { %10082 = vmatprep.subr.bf16.mxu0 %v13176_v20 }
 0x8cd   :  { %10083 = vmatpush1.bf16.msra.mxu0 %v13174_v63 }
 0x8ce   :  { %10084 = vmatprep.subr.bf16.mxu0 %v13179_v57 }
 0x8d1   :  { %10085 = vmatpush1.bf16.msra.mxu0 %v13177_v1 }
 0x8d2   :  { %10086 = vmatprep.subr.bf16.mxu0 %v13182_v11 }
 0x8d5   :  { %10087 = vmatpush1.bf16.msra.mxu0 %v13180_v52 }
 0x8d6   :  { %10088 = vmatprep.subr.bf16.mxu0 %v13185_v0 }
 0x8d9   :  { %10089 = vmatpush1.bf16.msra.mxu0 %v13183_v8 }
 0x8da   :  { %10090 = vmatprep.subr.bf16.mxu0 %v13188_v53 }
 0x8dd   :  { %10091 = vmatpush1.bf16.msra.mxu0 %v13186_v47 }
 0x8de   :  { %10092 = vmatprep.subr.bf16.mxu0 %v13191_v49 }
 0x8e1   :  { %10093 = vmatpush1.bf16.msra.mxu0 %v13189_v58 }
 0x8e2   :  { %10094 = vmatprep.subr.bf16.mxu0 %v13194_v61 }
 0x8e5   :  { %10095 = vmatpush2.bf16.msra.mxu0 %v13192_v7 }
 0x8e6   :  { %10096 = vmatprep.subr.bf16.mxu0 %v13197_v17 }
 0x8e9   :  { %10097 = vmatpush2.bf16.msra.mxu0 %v13195_v60 }
 0x8ea   :  { %10098 = vmatprep.subr.bf16.mxu0 %v13200_v25 }
 0x8ed   :  { %10099 = vmatpush2.bf16.msra.mxu0 %v13198_v46 }
 0x8ee   :  { %10100 = vmatprep.subr.bf16.mxu0 %v13203_v37 }
 0x8f1   :  { %10101 = vmatpush2.bf16.msra.mxu0 %v13201_v9 }
 0x8f2   :  { %10102 = vmatprep.subr.bf16.mxu0 %v13206_v2 }
 0x8f5   :  { %10103 = vmatpush2.bf16.msra.mxu0 %v13204_v54 }
 0x8f6   :  { %10104 = vmatprep.subr.bf16.mxu0 %v13209_v14 }
 0x8f9   :  { %10105 = vmatpush2.bf16.msra.mxu0 %v13207_v4 }
 0x8fa   :  { %10106 = vmatprep.subr.bf16.mxu0 %v13212_v26 }
 0x8fd   :  { %10107 = vmatpush2.bf16.msra.mxu0 %v13210_v6 }
 0x8fe   :  { %10108 = vmatprep.subr.bf16.mxu0 %v13215_v55 }
 0x901   :  { %10109 = vmatpush2.bf16.msra.mxu0 %v13213_v29 }
 0x904   :  { %10111 = vmatmul.mubr.bf16.vlgmr.msra.gmra.mxu0 %v9174_v23 }
 0x93c   :  { %v9663_v38 = vpop.f32.mrf.mxu1 }
 0x93e   :  { %v9665_v19 = vpop.f32.mrf.mxu1 }
 0x940   :  { %v9667_v32 = vpop.f32.mrf.mxu1 }
 0x942   :  { %v9669_v18 = vpop.f32.mrf.mxu1 }
 0x97c   :  { %v10069_v40 = vpop.f32.mrf.mxu1 }
 0x97e   :  { %v10071_v62 = vpop.f32.mrf.mxu1 }
 0x980   :  { %v10073_v21 = vpop.f32.mrf.mxu1 }
 0x982   :  { %v10075_v31 = vpop.f32.mrf.mxu1 }
 0x984   :  { %v9706_v51 = vpop.f32.mrf.mxu0 }
 0x985   :  { %v9707_v48 = vadd.f32 %v9706_v51, %v9663_v38 }
 0x986   :  { %v9708_v13 = vpop.f32.mrf.mxu0 }
 0x987   :  { %v9709_v41 = vadd.f32 %v9708_v13, %v9665_v19  ;;  %v10070_v33 = vadd.f32 %v10069_v40, %v9707_v48 }
 0x988   :  { %v9710_v56 = vpop.f32.mrf.mxu0 }
 0x989   :  { %v9711_v16 = vadd.f32 %v9710_v56, %v9667_v32  ;;  %v10072_v36 = vadd.f32 %v10071_v62, %v9709_v41 }
 0x98a   :  { %v9712_v10 = vpop.f32.mrf.mxu0 }
 0x98b   :  { %v9713_v43 = vadd.f32 %v9712_v10, %v9669_v18  ;;  %v10074_v30 = vadd.f32 %v10073_v21, %v9711_v16 }
 0x98d   :  { %v10076_v5 = vadd.f32 %v10075_v31, %v9713_v43 }
 0x9c4   :  { %v10112_v50 = vpop.f32.mrf.mxu0 }
 0x9c5   :  { %v10113_v23 = vadd.f32 %v10112_v50, %v10070_v33 }
 0x9c6   :  { %v10114_v22 = vpop.f32.mrf.mxu0 }
 0x9c7   :  { %v10133_v15 = vadd.f32 %v10126_v59, %v10113_v23  ;;  %v10115_v27 = vadd.f32 %v10114_v22, %v10072_v36 }
 0x9c8   :  { %v10116_v42 = vpop.f32.mrf.mxu0 }
 0x9c9   :  { %10137 = vst [vmem:[%s16759_s16] sm:$0xff] %v10133_v15  ;;  %v10134_v39 = vadd.f32 %v10130_v44, %v10115_v27  ;;  %v10117_v35 = vadd.f32 %v10116_v42, %v10074_v30 }
 0x9ca   :  { %v10118_v24 = vpop.f32.mrf.mxu0 }
 0x9cb   :  { %10138 = vst [vmem:[%s16759_s16 + $0x8] sm:$0xff] %v10134_v39  ;;  %v10135_v12 = vadd.f32 %v10126_v59, %v10117_v35  ;;  %v10119_v34 = vadd.f32 %v10118_v24, %v10076_v5 }
 0x9cd   :  { %10139 = vst [vmem:[%s16759_s16 + $0x10] sm:$0xff] %v10135_v12  ;;  %v10136_v3 = vadd.f32 %v10130_v44, %v10119_v34 }
 0x9cf   :  { %10140 = vst [vmem:[%s16759_s16 + $0x18] sm:$0xff] %v10136_v3 }
 0x9d0   :  { %10145 = vsyncpa [#allocation5], 1 }
 0x9d1   :  { %10146 = vsyncpa [#allocation7], 1 }
 0x9d2   :  { %10147 = vsyncpa [#allocation10], 1 }
 0x9d3   :  { %10148 = vsyncpa [#allocation13], 1 }

</bundles_post_ra>
